<compile_context>
chip_gen: v5e
topology: v5e:2x2
jax: 0.10.0
libtpu: 0.0.40
codegen_flags: <defaults>
</compile_context>

<pallas_src>
import jax
import jax.numpy as jnp
from jax.experimental import pallas as pl
from jax.experimental.pallas import tpu as pltpu

D_IN = 784
D_IN_PAD = 1024     # 784 padded to a multiple of 256 (MXU-friendly, exact)
H1 = 512
H2 = 256
D_OUT = 1
D_OUT_PAD = 128     # final layer padded to a full lane width (lane-dense store)


def _leaky_relu(x, slope=0.2):
    return jnp.where(x > 0, x, slope * x)


def discriminator_kernel(x_ref, w1_ref, b1_ref, w2_ref, b2_ref, w3_ref, b3_ref,
                         o_ref):
    # x tile: (tile_B, 1024) bf16; weights bf16; biases f32.
    x = x_ref[...]

    h1 = jnp.dot(x, w1_ref[...], preferred_element_type=jnp.float32)
    h1 = _leaky_relu(h1 + b1_ref[...])

    h2 = jnp.dot(h1.astype(jnp.bfloat16), w2_ref[...],
                 preferred_element_type=jnp.float32)
    h2 = _leaky_relu(h2 + b2_ref[...])

    h3 = jnp.dot(h2.astype(jnp.bfloat16), w3_ref[...],
                 preferred_element_type=jnp.float32)
    h3 = h3 + b3_ref[...]

    # (tile_B, 128) lane-dense store; column 0 holds the real logit.
    o_ref[...] = jax.nn.sigmoid(h3).astype(o_ref.dtype)


def discriminator_forward(img, params, tile_b=128):
    """img: (B, 784) float32 -> (B, 1) float32 probability."""
    w1, b1, w2, b2, w3, b3 = params
    B = img.shape[0]

    # --- wrapper-side layout prep (exact zero padding + bf16 weights) ---
    x = jnp.pad(img, ((0, 0), (0, D_IN_PAD - D_IN))).astype(jnp.bfloat16)
    w1p = jnp.pad(w1, ((0, D_IN_PAD - D_IN), (0, 0))).astype(jnp.bfloat16)
    w2p = w2.astype(jnp.bfloat16)
    w3p = jnp.pad(w3, ((0, 0), (0, D_OUT_PAD - D_OUT))).astype(jnp.bfloat16)
    b3p = jnp.pad(b3, ((0, 0), (0, D_OUT_PAD - D_OUT)))

    # Pad batch up to a multiple of the tile size.
    n_tiles = -(-B // tile_b)
    B_pad = n_tiles * tile_b
    if B_pad != B:
        x = jnp.pad(x, ((0, B_pad - B), (0, 0)))

    const = lambda shape: pl.BlockSpec(shape, lambda i: (0, 0))

    out = pl.pallas_call(
        discriminator_kernel,
        out_shape=jax.ShapeDtypeStruct((B_pad, D_OUT_PAD), jnp.float32),
        grid=(n_tiles,),
        in_specs=[
            pl.BlockSpec((tile_b, D_IN_PAD), lambda i: (i, 0)),  # x tile
            const((D_IN_PAD, H1)),  const((1, H1)),              # W1, b1
            const((H1, H2)),        const((1, H2)),              # W2, b2
            const((H2, D_OUT_PAD)), const((1, D_OUT_PAD)),       # W3, b3
        ],
        out_specs=pl.BlockSpec((tile_b, D_OUT_PAD), lambda i: (i, 0)),
        compiler_params=pltpu.CompilerParams(
            dimension_semantics=("parallel",),
            vmem_limit_bytes=32 << 20,
        ),
    )(x, w1p, b1, w2p, b2, w3p, b3p)

    return out[:B, :D_OUT]


def init_params(key):
    """Deterministic init mimicking nn.Linear default (U[-1/sqrt(fan_in), +])."""
    dims = [(D_IN, H1), (H1, H2), (H2, D_OUT)]
    params = []
    for i, (fan_in, fan_out) in enumerate(dims):
        kw, kb = jax.random.split(jax.random.fold_in(key, i))
        bound = 1.0 / (fan_in ** 0.5)
        w = jax.random.uniform(kw, (fan_in, fan_out), jnp.float32, -bound, bound)
        b = jax.random.uniform(kb, (1, fan_out), jnp.float32, -bound, bound)
        params.extend([w, b])
    return tuple(params)


def reference_forward(img, params):
    """Plain-JAX reference replicating the kernel's bf16-input / f32-accum math."""
    w1, b1, w2, b2, w3, b3 = params
    bf = lambda v: v.astype(jnp.bfloat16)
    h1 = jnp.dot(bf(img), bf(w1), preferred_element_type=jnp.float32) + b1
    h1 = jnp.where(h1 > 0, h1, 0.2 * h1)
    h2 = jnp.dot(bf(h1), bf(w2), preferred_element_type=jnp.float32) + b2
    h2 = jnp.where(h2 > 0, h2, 0.2 * h2)
    h3 = jnp.dot(bf(h2), bf(w3), preferred_element_type=jnp.float32) + b3
    return jax.nn.sigmoid(h3)


if __name__ == "__main__":
    key = jax.random.PRNGKey(0)
    k_img, k_par = jax.random.split(key)

    B = 256  # two 128-row tiles -> exercises the pipelined batch grid
    img = jax.random.normal(k_img, (B, D_IN), dtype=jnp.float32)
    params = init_params(k_par)

    out = discriminator_forward(img, params, tile_b=128)
    out = jax.block_until_ready(out)

    ref = reference_forward(img, params)
    assert out.shape == (B, D_OUT)
    assert jnp.allclose(out, ref, atol=2e-3, rtol=2e-3), (
        float(jnp.max(jnp.abs(out - ref))))

    print("KERNEL_OK")
</pallas_src>

<mosaic_0001>
module attributes {stable_mosaic.version = 11 : i64} {
  func.func @discriminator_kernel(%arg0: i32, %arg1: memref<128x1024xbf16, #tpu.memory_space<vmem>>, %arg2: memref<1024x512xbf16, #tpu.memory_space<vmem>>, %arg3: memref<1x512xf32, #tpu.memory_space<vmem>>, %arg4: memref<512x256xbf16, #tpu.memory_space<vmem>>, %arg5: memref<1x256xf32, #tpu.memory_space<vmem>>, %arg6: memref<256x128xbf16, #tpu.memory_space<vmem>>, %arg7: memref<1x128xf32, #tpu.memory_space<vmem>>, %arg8: memref<128x128xf32, #tpu.memory_space<vmem>>) attributes {dimension_semantics = [#tpu.dimension_semantics<parallel>], iteration_bounds = array<i64: 2>, scalar_prefetch = 0 : i64, scratch_operands = 0 : i64, tpu.core_type = #tpu.core_type<tc>, window_params = [{transform_indices = @transform_0, window_bounds = array<i64: 128, 1024>}, {pipeline_mode = #tpu.pipeline_mode<synchronous>, transform_indices = @transform_1, window_bounds = array<i64: 1024, 512>}, {pipeline_mode = #tpu.pipeline_mode<synchronous>, transform_indices = @transform_2, window_bounds = array<i64: 1, 512>}, {pipeline_mode = #tpu.pipeline_mode<synchronous>, transform_indices = @transform_3, window_bounds = array<i64: 512, 256>}, {pipeline_mode = #tpu.pipeline_mode<synchronous>, transform_indices = @transform_4, window_bounds = array<i64: 1, 256>}, {pipeline_mode = #tpu.pipeline_mode<synchronous>, transform_indices = @transform_5, window_bounds = array<i64: 256, 128>}, {pipeline_mode = #tpu.pipeline_mode<synchronous>, transform_indices = @transform_6, window_bounds = array<i64: 1, 128>}, {transform_indices = @transform_7, window_bounds = array<i64: 128, 128>}]} {
    %c0 = arith.constant 0 : index
    %c0_0 = arith.constant 0 : index
    %0 = vector.load %arg1[%c0, %c0_0] : memref<128x1024xbf16, #tpu.memory_space<vmem>>, vector<128x1024xbf16>
    %c0_1 = arith.constant 0 : index
    %c0_2 = arith.constant 0 : index
    %1 = vector.load %arg2[%c0_1, %c0_2] : memref<1024x512xbf16, #tpu.memory_space<vmem>>, vector<1024x512xbf16>
    %cst = arith.constant dense<0.000000e+00> : vector<128x512xf32>
    %2 = tpu.matmul %0, %1, %cst {dimension_numbers = #tpu.dot_dimension_numbers<[1], [0], [0], [1], [0, 0, 1, 1], [], []>} : vector<128x1024xbf16>, vector<1024x512xbf16>, vector<128x512xf32> -> vector<128x512xf32>
    %c0_3 = arith.constant 0 : index
    %c0_4 = arith.constant 0 : index
    %3 = vector.load %arg3[%c0_3, %c0_4] : memref<1x512xf32, #tpu.memory_space<vmem>>, vector<1x512xf32>
    %4 = vector.broadcast %3 : vector<1x512xf32> to vector<128x512xf32>
    %5 = arith.addf %2, %4 : vector<128x512xf32>
    %cst_5 = arith.constant 0.000000e+00 : f32
    %6 = vector.broadcast %cst_5 : f32 to vector<128x512xf32>
    %7 = arith.cmpf ogt, %5, %6 : vector<128x512xf32>
    %cst_6 = arith.constant 2.000000e-01 : f32
    %8 = vector.broadcast %cst_6 : f32 to vector<128x512xf32>
    %9 = arith.mulf %8, %5 : vector<128x512xf32>
    %10 = arith.select %7, %5, %9 : vector<128x512xi1>, vector<128x512xf32>
    %11 = arith.truncf %10 : vector<128x512xf32> to vector<128x512xbf16>
    %c0_7 = arith.constant 0 : index
    %c0_8 = arith.constant 0 : index
    %12 = vector.load %arg4[%c0_7, %c0_8] : memref<512x256xbf16, #tpu.memory_space<vmem>>, vector<512x256xbf16>
    %cst_9 = arith.constant dense<0.000000e+00> : vector<128x256xf32>
    %13 = tpu.matmul %11, %12, %cst_9 {dimension_numbers = #tpu.dot_dimension_numbers<[1], [0], [0], [1], [0, 0, 1, 1], [], []>} : vector<128x512xbf16>, vector<512x256xbf16>, vector<128x256xf32> -> vector<128x256xf32>
    %c0_10 = arith.constant 0 : index
    %c0_11 = arith.constant 0 : index
    %14 = vector.load %arg5[%c0_10, %c0_11] : memref<1x256xf32, #tpu.memory_space<vmem>>, vector<1x256xf32>
    %15 = vector.broadcast %14 : vector<1x256xf32> to vector<128x256xf32>
    %16 = arith.addf %13, %15 : vector<128x256xf32>
    %cst_12 = arith.constant 0.000000e+00 : f32
    %17 = vector.broadcast %cst_12 : f32 to vector<128x256xf32>
    %18 = arith.cmpf ogt, %16, %17 : vector<128x256xf32>
    %cst_13 = arith.constant 2.000000e-01 : f32
    %19 = vector.broadcast %cst_13 : f32 to vector<128x256xf32>
    %20 = arith.mulf %19, %16 : vector<128x256xf32>
    %21 = arith.select %18, %16, %20 : vector<128x256xi1>, vector<128x256xf32>
    %22 = arith.truncf %21 : vector<128x256xf32> to vector<128x256xbf16>
    %c0_14 = arith.constant 0 : index
    %c0_15 = arith.constant 0 : index
    %23 = vector.load %arg6[%c0_14, %c0_15] : memref<256x128xbf16, #tpu.memory_space<vmem>>, vector<256x128xbf16>
    %cst_16 = arith.constant dense<0.000000e+00> : vector<128x128xf32>
    %24 = tpu.matmul %22, %23, %cst_16 {dimension_numbers = #tpu.dot_dimension_numbers<[1], [0], [0], [1], [0, 0, 1, 1], [], []>} : vector<128x256xbf16>, vector<256x128xbf16>, vector<128x128xf32> -> vector<128x128xf32>
    %c0_17 = arith.constant 0 : index
    %c0_18 = arith.constant 0 : index
    %25 = vector.load %arg7[%c0_17, %c0_18] : memref<1x128xf32, #tpu.memory_space<vmem>>, vector<1x128xf32>
    %26 = vector.broadcast %25 : vector<1x128xf32> to vector<128x128xf32>
    %27 = arith.addf %24, %26 : vector<128x128xf32>
    %28 = arith.negf %27 : vector<128x128xf32>
    %29 = math.exp %28 : vector<128x128xf32>
    %cst_19 = arith.constant 1.000000e+00 : f32
    %30 = vector.broadcast %cst_19 : f32 to vector<128x128xf32>
    %31 = arith.addf %30, %29 : vector<128x128xf32>
    %32 = arith.divf %30, %31 : vector<128x128xf32>
    %c0_20 = arith.constant 0 : index
    %c0_21 = arith.constant 0 : index
    %33 = vector.load %arg8[%c0_20, %c0_21] : memref<128x128xf32, #tpu.memory_space<vmem>>, vector<128x128xf32>
    tpu.vector_store %arg8[%c0_20, %c0_21], %32 {strides = array<i32>} : memref<128x128xf32, #tpu.memory_space<vmem>>, vector<128x128xf32>,
    return
  }
  func.func @transform_0(%arg0: i32) -> (i32, i32) {
    %c0_i32 = arith.constant 0 : i32
    %c0_i32_0 = arith.constant 0 : i32
    return %arg0, %c0_i32 : i32, i32
  }
  func.func @transform_1(%arg0: i32) -> (i32, i32) {
    %c0_i32 = arith.constant 0 : i32
    %c0_i32_0 = arith.constant 0 : i32
    %c0_i32_1 = arith.constant 0 : i32
    return %c0_i32, %c0_i32_0 : i32, i32
  }
  func.func @transform_2(%arg0: i32) -> (i32, i32) {
    %c0_i32 = arith.constant 0 : i32
    %c0_i32_0 = arith.constant 0 : i32
    %c0_i32_1 = arith.constant 0 : i32
    return %c0_i32, %c0_i32_0 : i32, i32
  }
  func.func @transform_3(%arg0: i32) -> (i32, i32) {
    %c0_i32 = arith.constant 0 : i32
    %c0_i32_0 = arith.constant 0 : i32
    %c0_i32_1 = arith.constant 0 : i32
    return %c0_i32, %c0_i32_0 : i32, i32
  }
  func.func @transform_4(%arg0: i32) -> (i32, i32) {
    %c0_i32 = arith.constant 0 : i32
    %c0_i32_0 = arith.constant 0 : i32
    %c0_i32_1 = arith.constant 0 : i32
    return %c0_i32, %c0_i32_0 : i32, i32
  }
  func.func @transform_5(%arg0: i32) -> (i32, i32) {
    %c0_i32 = arith.constant 0 : i32
    %c0_i32_0 = arith.constant 0 : i32
    %c0_i32_1 = arith.constant 0 : i32
    return %c0_i32, %c0_i32_0 : i32, i32
  }
  func.func @transform_6(%arg0: i32) -> (i32, i32) {
    %c0_i32 = arith.constant 0 : i32
    %c0_i32_0 = arith.constant 0 : i32
    %c0_i32_1 = arith.constant 0 : i32
    return %c0_i32, %c0_i32_0 : i32, i32
  }
  func.func @transform_7(%arg0: i32) -> (i32, i32) {
    %c0_i32 = arith.constant 0 : i32
    %c0_i32_0 = arith.constant 0 : i32
    return %arg0, %c0_i32 : i32, i32
  }
}

</mosaic_0001>

<bundles_post_ra>
// kernel: tpu_custom_call.1
= control target key start
LH: loop header
LB: loop body
LE: loop exit
PB: predicated region body
PF: predicated region fallthrough
CT: control target
= control target key end

     0   :  { %s9612_s0 = inlined_call_operand.hbm [shape: bf16[256,1024], index: 0, kind: input, shape index: {}]   ;;  %s9613_s1 = inlined_call_operand.hbm [shape: bf16[1024,512], index: 1, kind: input, shape index: {}]   ;;  %s9614_s2 = inlined_call_operand.hbm [shape: f32[1,512], index: 2, kind: input, shape index: {}]   ;;  %s9615_s3 = inlined_call_operand.hbm [shape: bf16[512,256], index: 3, kind: input, shape index: {}]   ;;  %s9616_s4 = inlined_call_operand.vmem [shape: f32[1,256], index: 4, kind: input, shape index: {}]   ;;  %s9617_s5 = inlined_call_operand.hbm [shape: bf16[256,128], index: 5, kind: input, shape index: {}]   ;;  %s9618_s6 = inlined_call_operand.vmem [shape: f32[1,128], index: 6, kind: input, shape index: {}]   ;;  %s9619_s7 = inlined_call_operand.hbm [shape: f32[256,128], index: 7, kind: output, shape index: {}]  }
   0x1   :  { %9726 = sst [smem:[#allocation71_spill]] %s9613_s1 }
   0x2   :  { %12 = vsyncpa [#allocation3], 0 }
   0x3   :  { %14 = vsyncpa [#allocation3 + $0x1], 0 }
   0x4   :  { %15 = vsyncpa [#allocation6], 0 }
   0x5   :  { %16 = vsyncpa [#allocation9], 0 }
   0x6   :  { %17 = vsyncpa [#allocation4], 0 }
   0x7   :  { %19 = vsyncpa [#allocation4 + $0x1], 0  ;;  %s8162_s24 = smov 0   ;;  %s8164_s25 = smov 0  }
   0x8   :  { %s8166_s26 = smov 0   ;;  %s8168_s27 = smov 0  }
   0x9 LB: > { %s8183_s28 = sadd.s32 4294967295, %s8106_s27   ;;  %s5659_s29 = sadd.s32 4294967294, %s8106_s27   ;;  %s8106_s27 = sphi %s8168_s27, %s9920_s27   ;;  %s8102_s26 = sphi %s8166_s26, %s9919_s26   ;;  %s8098_s25 = sphi %s8164_s25, %s9918_s25   ;;  %s8094_s24 = sphi %s8162_s24, %s9917_s24  }
   0xa   : > { %p45_p0 = scmp.ne.s32.totalorder %s8098_s25, %s8094_s24  ;;  %p46_p1 = scmp.eq.s32.totalorder %s8183_s28, 0 }
   0xb   : > { %p195_p2 = scmp.eq.s32.totalorder %s8183_s28, 1  ;;  %p201_p3 = scmp.eq.s32.totalorder %s5659_s29, 1 }
   0xc   : > { %p8192_p4 = por %p46_p1, %p45_p0  ;;  %p5660_p5 = scmp.ge.s32.totalorder %s8106_s27, 1 }
   0xd   : > { %p8197_p6 = por %p201_p3, %p45_p0  ;;  %p208_p7 = scmp.lt.s32.totalorder %s8106_s27, 3 }
   0xe   : > { %s9729_s1 = sld [smem:[#allocation71_spill]]  ;;  %s8108_s13 = smov [#allocation5]  }
   0xf   : > { %p8205_p8 = pnand %p5660_p5, %p208_p7  ;;  %s221_s14 = sshll.u32 %s8108_s13, 4  ;;  %s222_s14 = int_to_ptr.vmem [resolvable:$true] %s221_s14 }
  0x10   : > { %s245_s18 = sshll.u32 %s9615_s3, 4  ;;  %s8109_s19 = smov 256   ;;  %s246_s18 = int_to_ptr.hbm [resolvable:$true] %s245_s18 }
  0x11   : > { %p7737_p9 = pneg %p8205_p8  ;;  %s8110_s20 = smov 16  }
  0x12   : > { %s8111_s21 = smov [#allocation8]   ;;  %s8112_s23 = smov 128  }
  0x13   : > { %p8213_p10 = pnand %p7737_p9, %p46_p1  ;;  %s247_s22 = sshll.u32 %s8111_s21, 4  ;;  %s248_s22 = int_to_ptr.vmem [resolvable:$true] %s247_s22 }
  0x14   : > { %s219_s11 = sshll.u32 %s9729_s1, 4  ;;  %s8113_s29 = smov 8   ;;  %s220_s11 = int_to_ptr.hbm [resolvable:$true] %s219_s11 }
  0x15   : > { %7740 = dma.hbm_to_vmem [thread:$0]  (!%p8213_p10), %s220_s11, 32768, %s222_s14, [#allocation6], %s8109_s19, %s8109_s19, %s8110_s20  }
  0x16   : > { %7746 = dma.hbm_to_vmem [thread:$0]  (!%p8213_p10), %s246_s18, 8192, %s248_s22, [#allocation9], %s8112_s23, %s8112_s23, %s8113_s29  }
  0x17   : > { %s234_s13 = sshll.u32 %s9614_s2, 4  ;;  %s8114_s16 = smov [#allocation7]   ;;  %s235_s13 = int_to_ptr.hbm [resolvable:$true] %s234_s13 }
  0x18   : > { %s236_s11 = sshll.u32 %s8114_s16, 4  ;;  %s262_s19 = sshll.u32 %s9617_s5, 4  ;;  %s237_s11 = int_to_ptr.vmem [resolvable:$true] %s236_s11  ;;  %s263_s19 = int_to_ptr.hbm [resolvable:$true] %s262_s19 }
  0x19   : > { %7743 = dma.hbm_to_vmem [thread:$0]  (!%p8213_p10), %s235_s13, 64, %s237_s11, [#allocation6]  }
  0x1a   : > { %s8115_s18 = smov [#allocation10]   ;;  %s8116_s21 = smov 64  }
  0x1b   : > { %s264_s20 = sshll.u32 %s8115_s18, 4  ;;  %s8117_s22 = smov 4   ;;  %s265_s20 = int_to_ptr.vmem [resolvable:$true] %s264_s20 }
  0x1c   : > { %7749 = dma.hbm_to_vmem [thread:$0]  (!%p8213_p10), %s263_s19, 2048, %s265_s20, [#allocation9], %s8116_s21, %s8116_s21, %s8117_s22  }
  0x1d   : > { %s8236_s23 = sadd.s32 1, %s8106_s27   ;;  %s32_s9 = sadd.s32 1, %s8102_s26 }
  0x1e   : > { %s29_s29 = ssub.s32 %s8106_s27, %s8236_s23  ;;  %p39_p13 = scmp.ne.s32.totalorder %s8102_s26, %s8098_s25 }
  0x1f   : > { %p30_p12 = scmp.eq.s32.totalorder %s29_s29, 0  ;;  %p40_p0 = scmp.eq.s32.totalorder %s8106_s27, 0 }
  0x20   : > { %p8249_p5 = por %p195_p2, %p39_p13  ;;  %p7762_p7 = scmp.lt.s32.totalorder %s8106_s27, 2 }
  0x21   : > { %s8245_s10 = scalar_select %p30_p12, %s8102_s26, %s32_s9  }
  0x22   : > { %p41_p3 = por %p40_p0, %p39_p13  ;;  %s281_s16 = sand.u32 1, %s8102_s26  }
  0x23   : > { %s5666_s15 = sshll.u32 %s281_s16, 9  ;;  %s7299_s11 = sshll.u32 %s8106_s27, 9 }
  0x24   : > { %s291_s19 = scalar_lea.hbm %s9612_s0, %s7299_s11  ;;  %s285_s18 = scalar_lea.vmem [#allocation2], %s5666_s15 }
  0x25   : > { %s294_s20 = sshll.u32 %s285_s18, 4  ;;  %s292_s21 = sshll.u32 %s291_s19, 4  ;;  %s295_s20 = int_to_ptr.vmem [resolvable:$true] %s294_s20  ;;  %s293_s21 = int_to_ptr.hbm [resolvable:$true] %s292_s21 }
  0x26   : > { %p8259_p9 = pnand %p7762_p7, %p41_p3  ;;  %s282_s29 = scalar_lea.sflag [#allocation3], %s281_s16 }
  0x27   : > { %s8002_s9 = sshra.s32 %s293_s21, 4  ;;  %s8009_s14 = scalar_lea.hbm %s9612_s0, 1024  ;;  %s8003_s9 = int_to_ptr.hbm [resolvable:$true] %s8002_s9 }
  0x28   : > { %s8004_s1 = scalar_lea.hbm %s8003_s9, 512  ;;  %p8006_p10 = pneg %p8259_p9 }
  0x29   : > { %p8005_p2 = scmp.ne.s32.totalorder %s8003_s9, %s8004_s1  ;;  %p8010_p0 = scmp.lt.s32.totalorder %s8003_s9, %s9612_s0 }
  0x2a   : > { %p8011_p3 = scmp.lt.s32.totalorder %s8009_s14, %s8004_s1 }
  0x2b   : > { %p8007_p12 = pnand %p8006_p10, %p8005_p2 }
  0x2c   : > { %p8012_p7 = por %p8011_p3, %p8010_p0 }
  0x2d   : > { %p8008_p13 = pneg %p8007_p12 }
  0x2f   : > { %p8013_p11 = pnand %p8012_p7, %p8008_p13 }
  0x31   : > { %8016 = shalt.err (!%p8013_p11)
}
  0x32   : > { %s8118_s16 = smov 512   ;;  %s8119_s18 = smov 32  }
  0x33   : > { %7753 = dma.hbm_to_vmem [thread:$0]  (!%p8259_p9), %s293_s21, 8192, %s295_s20, %s282_s29, %s8118_s16, %s8118_s16, %s8119_s18  }
  0x34   : > { %306 = sbr.rel (%p8205_p8) target bundleno = 1764 (0x6e4), region = 48 }
  0x39   : > { %s8276_s11 = sand.u32 1, %s8098_s25  }
  0x3a   : > { %s5671_s15 = sshll.u32 %s8276_s11, 9  ;;  %s309_s9 = scalar_lea.sflag [#allocation3], %s8276_s11 }
  0x3b   : > { %s8280_s1 = scalar_lea.vmem [#allocation2], %s5671_s15 }
  0x3c   : > { %8077 = dma.done.wait (%p8192_p4), %s309_s9, 8192  }
  0x3d   : > { %8079 = vsyncadd (%p8192_p4), %s309_s9, 4294959104 }
  0x3e   : > { %8081 = dma.done.wait (%p46_p1), [#allocation6], 32832  }
  0x3f   : > { %8083 = vsyncadd (%p46_p1), [#allocation6], 4294934464 }
  0x40   : > { %8085 = dma.done.wait (%p46_p1), [#allocation9], 10240  }
  0x41   : > { %8087 = vsyncadd (%p46_p1), [#allocation9], 4294957056  ;;  %v6047_v0 = vld [vmem:[#allocation5 + $0xe0] sm:$0xf]  ;;  %v7394_v1 = vld [vmem:[#allocation5 + $0xec] sm:$0xf0] }
  0x42   : > { %v6175_v2 = vld [vmem:[#allocation5 + $0x1e0] sm:$0xf]  ;;  %v6048_v3 = vor.u32 %v7394_v1, %v6047_v0  ;;  %v7426_v4 = vld [vmem:[#allocation5 + $0x1ec] sm:$0xf0]  ;;  %v7300_v55 = vld [vmem:[%s8280_s1 + $0x4] sm:$0xf] }
  0x43   : > { %v6031_v5 = vld [vmem:[#allocation5 + $0xc0] sm:$0xf]  ;;  %v7390_v6 = vld [vmem:[#allocation5 + $0xcc] sm:$0xf0]  ;;  %v6176_v7 = vor.u32 %v7426_v4, %v6175_v2  ;;  %v5681_v57 = vld [vmem:[%s8280_s1 + $0x20] sm:$0xf0] }
  0x44   : > { %v6159_v8 = vld [vmem:[#allocation5 + $0x1c0] sm:$0xf]  ;;  %v7422_v9 = vld [vmem:[#allocation5 + $0x1cc] sm:$0xf0]  ;;  %2296 = vmatpush.bf16.msra.mxu0 %v6048_v3  ;;  %7701 = vmatpush.bf16.msra.mxu2 %v6048_v3  ;;  %v6032_v10 = vor.u32 %v7390_v6, %v6031_v5  ;;  %v7332_v58 = vld [vmem:[%s8280_s1 + $0x104] sm:$0xf]  ;;  %v8306_v4 = vor.u32 %v7300_v55, %v5681_v57 }
  0x45   : > { %2345 = vmatpush.bf16.msra.mxu1 %v6176_v7  ;;  %7709 = vmatpush.bf16.msra.mxu3 %v6176_v7  ;;  %v6160_v11 = vor.u32 %v7422_v9, %v6159_v8  ;;  %v6015_v12 = vld [vmem:[#allocation5 + $0xa0] sm:$0xf]  ;;  %v7386_v13 = vld [vmem:[#allocation5 + $0xac] sm:$0xf0]  ;;  %v5809_v59 = vld [vmem:[%s8280_s1 + $0x120] sm:$0xf0] }
  0x46   : > { %v6143_v14 = vld [vmem:[#allocation5 + $0x1a0] sm:$0xf]  ;;  %v7418_v15 = vld [vmem:[#allocation5 + $0x1ac] sm:$0xf0]  ;;  %v6016_v16 = vor.u32 %v7386_v13, %v6015_v12  ;;  %9736 = vst [vmem:[#allocation18_spill] sm:$0xff] %v8306_v4  ;;  %v8308_v5 = vor.u32 %v7332_v58, %v5809_v59  ;;  %s5676_s22 = sshll.u32 %s8276_s11, 7 }
  0x47   : > { %v6144_v17 = vor.u32 %v7418_v15, %v6143_v14  ;;  %v5999_v18 = vld [vmem:[#allocation5 + $0x80] sm:$0xf]  ;;  %v7382_v19 = vld [vmem:[#allocation5 + $0x8c] sm:$0xf0]  ;;  %s9548_s29 = scalar_lea.vmem [#allocation11], %s5676_s22  ;;  %s7700_s14 = sshll.u32 %s8183_s28, 7 }
  0x48   : > { %2297 = vmatpush.bf16.msra.mxu0 %v6032_v10  ;;  %7702 = vmatpush.bf16.msra.mxu2 %v6032_v10  ;;  %v6127_v20 = vld [vmem:[#allocation5 + $0x180] sm:$0xf]  ;;  %v7414_v21 = vld [vmem:[#allocation5 + $0x18c] sm:$0xf0]  ;;  %v6000_v22 = vor.u32 %v7382_v19, %v5999_v18  ;;  %9737 = vst [vmem:[#allocation19_spill] sm:$0xff] %v8308_v5  ;;  %s5544_s16 = scalar_lea.hbm %s9619_s7, %s7700_s14  ;;  %s5545_s28 = sshll.u32 %s9548_s29, 4  ;;  %s5546_s28 = int_to_ptr.vmem [resolvable:$true] %s5545_s28 }
  0x49   : > { %2346 = vmatpush.bf16.msra.mxu1 %v6160_v11  ;;  %7710 = vmatpush.bf16.msra.mxu3 %v6160_v11  ;;  %v6128_v23 = vor.u32 %v7414_v21, %v6127_v20  ;;  %v5983_v24 = vld [vmem:[#allocation5 + $0x60] sm:$0xf]  ;;  %v7378_v25 = vld [vmem:[#allocation5 + $0x6c] sm:$0xf0]  ;;  %s5547_s18 = sshll.u32 %s5544_s16, 4  ;;  %s5533_s15 = scalar_lea.sflag [#allocation4], %s8276_s11  ;;  %s5548_s18 = int_to_ptr.hbm [resolvable:$true] %s5547_s18 }
  0x4a   : > { %v6111_v26 = vld [vmem:[#allocation5 + $0x160] sm:$0xf]  ;;  %v7410_v27 = vld [vmem:[#allocation5 + $0x16c] sm:$0xf0]  ;;  %v5984_v28 = vor.u32 %v7378_v25, %v5983_v24  ;;  %s8046_s9 = sshra.s32 %s5548_s18, 4  ;;  %s8052_s20 = scalar_lea.hbm %s9619_s7, 256  ;;  %s8047_s9 = int_to_ptr.hbm [resolvable:$true] %s8046_s9 }
  0x4b   : > { %v6112_v29 = vor.u32 %v7410_v27, %v6111_v26  ;;  %v5967_v30 = vld [vmem:[#allocation5 + $0x40] sm:$0xf]  ;;  %v7374_v31 = vld [vmem:[#allocation5 + $0x4c] sm:$0xf0]  ;;  %p8053_p11 = scmp.lt.s32.totalorder %s8047_s9, %s9619_s7 }
  0x4c   : > { %2298 = vmatpush.bf16.msra.mxu0 %v6016_v16  ;;  %7703 = vmatpush.bf16.msra.mxu2 %v6016_v16  ;;  %v6095_v32 = vld [vmem:[#allocation5 + $0x140] sm:$0xf]  ;;  %v7406_v33 = vld [vmem:[#allocation5 + $0x14c] sm:$0xf0]  ;;  %v5968_v34 = vor.u32 %v7374_v31, %v5967_v30 }
  0x4d   : > { %2347 = vmatpush.bf16.msra.mxu1 %v6144_v17  ;;  %7711 = vmatpush.bf16.msra.mxu3 %v6144_v17  ;;  %v6096_v35 = vor.u32 %v7406_v33, %v6095_v32  ;;  %v5951_v36 = vld [vmem:[#allocation5 + $0x20] sm:$0xf]  ;;  %v7370_v37 = vld [vmem:[#allocation5 + $0x2c] sm:$0xf0] }
  0x4e   : > { %v6079_v38 = vld [vmem:[#allocation5 + $0x120] sm:$0xf]  ;;  %v7402_v39 = vld [vmem:[#allocation5 + $0x12c] sm:$0xf0]  ;;  %v5952_v40 = vor.u32 %v7370_v37, %v5951_v36 }
  0x4f   : > { %v5935_v41 = vld [vmem:[#allocation5] sm:$0xf]  ;;  %v6080_v42 = vor.u32 %v7402_v39, %v6079_v38  ;;  %v7366_v43 = vld [vmem:[#allocation5 + $0xc] sm:$0xf0] }
  0x50   : > { %2299 = vmatpush.bf16.msra.mxu0 %v6000_v22  ;;  %7704 = vmatpush.bf16.msra.mxu2 %v6000_v22  ;;  %v6063_v44 = vld [vmem:[#allocation5 + $0x100] sm:$0xf]  ;;  %v7398_v45 = vld [vmem:[#allocation5 + $0x10c] sm:$0xf0]  ;;  %v5936_v52 = vor.u32 %v7366_v43, %v5935_v41 }
  0x51   : > { %2348 = vmatpush.bf16.msra.mxu1 %v6128_v23  ;;  %7712 = vmatpush.bf16.msra.mxu3 %v6128_v23  ;;  %v5679_v46 = vld [vmem:[%s8280_s1] sm:$0xf]  ;;  %v7458_v49 = vld [vmem:[#allocation5 + $0x2ec] sm:$0xf0]  ;;  %v6064_v56 = vor.u32 %v7398_v45, %v6063_v44 }
  0x52   : > { %v7304_v47 = vld [vmem:[%s8280_s1 + $0x1c] sm:$0xf0]  ;;  %v7490_v51 = vld [vmem:[#allocation5 + $0x3ec] sm:$0xf0] }
  0x53   : > { %v6303_v48 = vld [vmem:[#allocation5 + $0x2e0] sm:$0xf]  ;;  %v8302_v63 = vor.u32 %v7304_v47, %v5679_v46  ;;  %v7454_v1 = vld [vmem:[#allocation5 + $0x2cc] sm:$0xf0]  ;;  %v7308_v46 = vld [vmem:[%s8280_s1 + $0x44] sm:$0xf] }
  0x54   : > { %2300 = vmatpush.bf16.msra.mxu0 %v5984_v28  ;;  %7705 = vmatpush.bf16.msra.mxu2 %v5984_v28  ;;  %v6431_v50 = vld [vmem:[#allocation5 + $0x3e0] sm:$0xf]  ;;  %v6304_v60 = vor.u32 %v7458_v49, %v6303_v48  ;;  %v7486_v3 = vld [vmem:[#allocation5 + $0x3cc] sm:$0xf0]  ;;  %v5713_v47 = vld [vmem:[%s8280_s1 + $0x60] sm:$0xf0] }
  0x55   : > { %2349 = vmatpush.bf16.msra.mxu1 %v6112_v29  ;;  %7713 = vmatpush.bf16.msra.mxu3 %v6112_v29  ;;  %v5807_v53 = vld [vmem:[%s8280_s1 + $0x100] sm:$0xf]  ;;  %v6432_v61 = vor.u32 %v7490_v51, %v6431_v50  ;;  %9734 = vst [vmem:[#allocation16_spill] sm:$0xff] %v8302_v63  ;;  %v7450_v9 = vld [vmem:[#allocation5 + $0x2ac] sm:$0xf0] }
  0x56   : > { %v7336_v54 = vld [vmem:[%s8280_s1 + $0x11c] sm:$0xf0]  ;;  %v7482_v11 = vld [vmem:[#allocation5 + $0x3ac] sm:$0xf0]  ;;  %v7340_v48 = vld [vmem:[%s8280_s1 + $0x144] sm:$0xf] }
  0x57   : > { %v6287_v62 = vld [vmem:[#allocation5 + $0x2c0] sm:$0xf]  ;;  %v8304_v0 = vor.u32 %v7336_v54, %v5807_v53  ;;  %v7522_v13 = vld [vmem:[#allocation5 + $0x4ec] sm:$0xf0]  ;;  %v5841_v49 = vld [vmem:[%s8280_s1 + $0x160] sm:$0xf0] }
  0x58   : > { %2301 = vmatpush.bf16.msra.mxu0 %v5968_v34  ;;  %7706 = vmatpush.bf16.msra.mxu2 %v5968_v34  ;;  %v6415_v2 = vld [vmem:[#allocation5 + $0x3c0] sm:$0xf]  ;;  %v6288_v7 = vor.u32 %v7454_v1, %v6287_v62  ;;  %v7554_v16 = vld [vmem:[#allocation5 + $0x5ec] sm:$0xf0]  ;;  %v8326_v62 = vor.u32 %v7308_v46, %v5713_v47  ;;  %v8328_v1 = vor.u32 %v7340_v48, %v5841_v49 }
  0x59   : > { %2350 = vmatpush.bf16.msra.mxu1 %v6096_v35  ;;  %7714 = vmatpush.bf16.msra.mxu3 %v6096_v35  ;;  %9735 = vst [vmem:[#allocation17_spill] sm:$0xff] %v8304_v0  ;;  %v6271_v6 = vld [vmem:[#allocation5 + $0x2a0] sm:$0xf]  ;;  %v6416_v8 = vor.u32 %v7486_v3, %v6415_v2  ;;  %v7446_v18 = vld [vmem:[#allocation5 + $0x28c] sm:$0xf0] }
  0x5a   : > { %v6399_v10 = vld [vmem:[#allocation5 + $0x3a0] sm:$0xf]  ;;  %v6272_v21 = vor.u32 %v7450_v9, %v6271_v6  ;;  %v7518_v23 = vld [vmem:[#allocation5 + $0x4cc] sm:$0xf0]  ;;  %9738 = vst [vmem:[#allocation20_spill] sm:$0xff] %v8326_v62 }
  0x5b   : > { %v6559_v12 = vld [vmem:[#allocation5 + $0x4e0] sm:$0xf]  ;;  %v6400_v22 = vor.u32 %v7482_v11, %v6399_v10  ;;  %v7550_v25 = vld [vmem:[#allocation5 + $0x5cc] sm:$0xf0]  ;;  %9739 = vst [vmem:[#allocation21_spill] sm:$0xff] %v8328_v1 }
  0x5c   : > { %2302 = vmatpush.bf16.msra.mxu0 %v5952_v40  ;;  %7707 = vmatpush.bf16.msra.mxu2 %v5952_v40  ;;  %v6687_v14 = vld [vmem:[#allocation5 + $0x5e0] sm:$0xf]  ;;  %v6560_v15 = vor.u32 %v7522_v13, %v6559_v12  ;;  %v7478_v27 = vld [vmem:[#allocation5 + $0x38c] sm:$0xf0] }
  0x5d   : > { %2351 = vmatpush.bf16.msra.mxu1 %v6080_v42  ;;  %7715 = vmatpush.bf16.msra.mxu3 %v6080_v42  ;;  %v6255_v17 = vld [vmem:[#allocation5 + $0x280] sm:$0xf]  ;;  %v6688_v19 = vor.u32 %v7554_v16, %v6687_v14  ;;  %v7514_v31 = vld [vmem:[#allocation5 + $0x4ac] sm:$0xf0] }
  0x5e   : > { %v6543_v20 = vld [vmem:[#allocation5 + $0x4c0] sm:$0xf]  ;;  %v7546_v33 = vld [vmem:[#allocation5 + $0x5ac] sm:$0xf0]  ;;  %v6256_v38 = vor.u32 %v7446_v18, %v6255_v17 }
  0x5f   : > { %v6671_v24 = vld [vmem:[#allocation5 + $0x5c0] sm:$0xf]  ;;  %v6544_v28 = vor.u32 %v7518_v23, %v6543_v20  ;;  %v7442_v41 = vld [vmem:[#allocation5 + $0x26c] sm:$0xf0] }
  0x60   : > { %2303 = vmatpush.bf16.msra.mxu0 %v5936_v52  ;;  %7708 = vmatpush.bf16.msra.mxu2 %v5936_v52  ;;  %v6383_v26 = vld [vmem:[#allocation5 + $0x380] sm:$0xf]  ;;  %v6672_v29 = vor.u32 %v7550_v25, %v6671_v24  ;;  %v7474_v43 = vld [vmem:[#allocation5 + $0x36c] sm:$0xf0] }
  0x61   : > { %2352 = vmatpush.bf16.msra.mxu1 %v6064_v56  ;;  %7716 = vmatpush.bf16.msra.mxu3 %v6064_v56  ;;  %v6527_v30 = vld [vmem:[#allocation5 + $0x4a0] sm:$0xf]  ;;  %v6384_v39 = vor.u32 %v7478_v27, %v6383_v26  ;;  %v7510_v54 = vld [vmem:[#allocation5 + $0x48c] sm:$0xf0] }
  0x62   : > { %v6655_v32 = vld [vmem:[#allocation5 + $0x5a0] sm:$0xf]  ;;  %v6528_v44 = vor.u32 %v7514_v31, %v6527_v30  ;;  %v7542_v56 = vld [vmem:[#allocation5 + $0x58c] sm:$0xf0] }
  0x63   : > { %2304 = vmatmul.bf16.vlgmr.msra.gmra.mxu0 %v8302_v63  ;;  %2324 = vmatmul.bf16.vlgmr.msra.gmra.mxu2 %v8304_v0  ;;  %v5711_v34 = vld [vmem:[%s8280_s1 + $0x40] sm:$0xf]  ;;  %v6656_v45 = vor.u32 %v7546_v33, %v6655_v32  ;;  %v7438_v59 = vld [vmem:[#allocation5 + $0x24c] sm:$0xf0] }
  0x64   : > { %2394 = vmatpush.bf16.msrb.mxu2 %v6304_v60  ;;  %2353 = vmatmul.bf16.vlgmr.msra.gmra.mxu1 %v8306_v4  ;;  %v7312_v35 = vld [vmem:[%s8280_s1 + $0x5c] sm:$0xf0]  ;;  %v7506_v9 = vld [vmem:[#allocation5 + $0x46c] sm:$0xf0] }
  0x65   : > { %2443 = vmatpush.bf16.msrb.mxu3 %v6432_v61  ;;  %2492 = vmatpush.bf16.msrb.mxu0 %v6560_v15  ;;  %v5839_v36 = vld [vmem:[%s8280_s1 + $0x140] sm:$0xf]  ;;  %v8322_v57 = vor.u32 %v7312_v35, %v5711_v34  ;;  %v7470_v61 = vld [vmem:[#allocation5 + $0x34c] sm:$0xf0] }
  0x66   : > { %2373 = vmatmul.bf16.vlgmr.msra.gmra.mxu3 %v8308_v5  ;;  %2541 = vmatpush.bf16.msrb.mxu1 %v6688_v19  ;;  %v7344_v37 = vld [vmem:[%s8280_s1 + $0x15c] sm:$0xf0]  ;;  %v7434_v12 = vld [vmem:[#allocation5 + $0x22c] sm:$0xf0] }
  0x67   : > { %v6239_v40 = vld [vmem:[#allocation5 + $0x260] sm:$0xf]  ;;  %v8324_v58 = vor.u32 %v7344_v37, %v5839_v36  ;;  %v7538_v13 = vld [vmem:[#allocation5 + $0x56c] sm:$0xf0] }
  0x68   : > { %2395 = vmatpush.bf16.msrb.mxu2 %v6288_v7  ;;  %v6367_v42 = vld [vmem:[#allocation5 + $0x360] sm:$0xf]  ;;  %v6240_v52 = vor.u32 %v7442_v41, %v6239_v40  ;;  %v7466_v17 = vld [vmem:[#allocation5 + $0x32c] sm:$0xf0]  ;;  %v7316_v40 = vld [vmem:[%s8280_s1 + $0x84] sm:$0xf] }
  0x69   : > { %2444 = vmatpush.bf16.msrb.mxu3 %v6416_v8  ;;  %2493 = vmatpush.bf16.msrb.mxu0 %v6544_v28  ;;  %v6223_v50 = vld [vmem:[#allocation5 + $0x240] sm:$0xf]  ;;  %v6368_v53 = vor.u32 %v7474_v43, %v6367_v42  ;;  %v7534_v23 = vld [vmem:[#allocation5 + $0x54c] sm:$0xf0]  ;;  %v5745_v41 = vld [vmem:[%s8280_s1 + $0xa0] sm:$0xf0] }
  0x6a   : > { %2542 = vmatpush.bf16.msrb.mxu1 %v6672_v29  ;;  %v6511_v51 = vld [vmem:[#allocation5 + $0x480] sm:$0xf]  ;;  %v6224_v6 = vor.u32 %v7438_v59, %v6223_v50  ;;  %v7430_v25 = vld [vmem:[#allocation5 + $0x20c] sm:$0xf0]  ;;  %v7348_v42 = vld [vmem:[%s8280_s1 + $0x184] sm:$0xf] }
  0x6b   : > { %v6639_v55 = vld [vmem:[#allocation5 + $0x580] sm:$0xf]  ;;  %v6512_v2 = vor.u32 %v7510_v54, %v6511_v51  ;;  %v7462_v30 = vld [vmem:[#allocation5 + $0x30c] sm:$0xf0]  ;;  %v5873_v43 = vld [vmem:[%s8280_s1 + $0x1a0] sm:$0xf0] }
  0x6c   : > { %2396 = vmatpush.bf16.msrb.mxu2 %v6272_v21  ;;  %v6351_v60 = vld [vmem:[#allocation5 + $0x340] sm:$0xf]  ;;  %v6640_v3 = vor.u32 %v7542_v56, %v6639_v55  ;;  %v7502_v21 = vld [vmem:[#allocation5 + $0x44c] sm:$0xf0] }
  0x6d   : > { %2445 = vmatpush.bf16.msrb.mxu3 %v6400_v22  ;;  %2494 = vmatpush.bf16.msrb.mxu0 %v6528_v44  ;;  %v6352_v7 = vor.u32 %v7470_v61, %v6351_v60  ;;  %v6495_v8 = vld [vmem:[#allocation5 + $0x460] sm:$0xf]  ;;  %v7498_v32 = vld [vmem:[#allocation5 + $0x42c] sm:$0xf0] }
  0x6e   : > { %2543 = vmatpush.bf16.msrb.mxu1 %v6656_v45  ;;  %v6623_v10 = vld [vmem:[#allocation5 + $0x560] sm:$0xf]  ;;  %v6496_v14 = vor.u32 %v7506_v9, %v6495_v8  ;;  %v7530_v34 = vld [vmem:[#allocation5 + $0x52c] sm:$0xf0] }
  0x6f   : > { %v6207_v11 = vld [vmem:[#allocation5 + $0x220] sm:$0xf]  ;;  %v6624_v15 = vor.u32 %v7538_v13, %v6623_v10  ;;  %v7494_v47 = vld [vmem:[#allocation5 + $0x40c] sm:$0xf0]  ;;  %v7324_v10 = vld [vmem:[%s8280_s1 + $0xc4] sm:$0xf] }
  0x70   : > { %2397 = vmatpush.bf16.msrb.mxu2 %v6256_v38  ;;  %v6335_v16 = vld [vmem:[#allocation5 + $0x320] sm:$0xf]  ;;  %v6208_v19 = vor.u32 %v7434_v12, %v6207_v11  ;;  %v7526_v49 = vld [vmem:[#allocation5 + $0x50c] sm:$0xf0]  ;;  %v5777_v11 = vld [vmem:[%s8280_s1 + $0xe0] sm:$0xf0] }
  0x71   : > { %2446 = vmatpush.bf16.msrb.mxu3 %v6384_v39  ;;  %2495 = vmatpush.bf16.msrb.mxu0 %v6512_v2  ;;  %v6479_v18 = vld [vmem:[#allocation5 + $0x440] sm:$0xf]  ;;  %v6336_v20 = vor.u32 %v7466_v17, %v6335_v16  ;;  %v7586_v59 = vld [vmem:[#allocation5 + $0x6ec] sm:$0xf0]  ;;  %v7356_v12 = vld [vmem:[%s8280_s1 + $0x1c4] sm:$0xf]  ;;  %v8366_v16 = vor.u32 %v7324_v10, %v5777_v11 }
  0x72   : > { %2544 = vmatpush.bf16.msrb.mxu1 %v6640_v3  ;;  %v6607_v22 = vld [vmem:[#allocation5 + $0x540] sm:$0xf]  ;;  %v6480_v26 = vor.u32 %v7502_v21, %v6479_v18  ;;  %v7618_v2 = vld [vmem:[#allocation5 + $0x7ec] sm:$0xf0]  ;;  %v5905_v13 = vld [vmem:[%s8280_s1 + $0x1e0] sm:$0xf0] }
  0x73   : > { %2309 = vmatmul.bf16.gmra.mxu0 %v8322_v57  ;;  %2329 = vmatmul.bf16.gmra.mxu2 %v8324_v58  ;;  %v6191_v24 = vld [vmem:[#allocation5 + $0x200] sm:$0xf]  ;;  %v6608_v27 = vor.u32 %v7534_v23, %v6607_v22  ;;  %9742 = vst [vmem:[#allocation24_spill] sm:$0xff] %v8366_v16  ;;  %v8368_v17 = vor.u32 %v7356_v12, %v5905_v13  ;;  %v7614_v22 = vld [vmem:[#allocation5 + $0x7cc] sm:$0xf0] }
  0x74   : > { %2398 = vmatpush.bf16.msrb.mxu2 %v6240_v52  ;;  %2358 = vmatmul.bf16.gmra.mxu1 %v8326_v62  ;;  %v6463_v28 = vld [vmem:[#allocation5 + $0x420] sm:$0xf]  ;;  %v6192_v31 = vor.u32 %v7430_v25, %v6191_v24  ;;  %v8346_v52 = vor.u32 %v7316_v40, %v5745_v41  ;;  %v5687_v24 = vld [vmem:[%s8280_s1 + $0x8] sm:$0xf]  ;;  %v7610_v40 = vld [vmem:[#allocation5 + $0x7ac] sm:$0xf0] }
  0x75   : > { %2447 = vmatpush.bf16.msrb.mxu3 %v6368_v53  ;;  %2496 = vmatpush.bf16.msrb.mxu0 %v6496_v14  ;;  %v6319_v29 = vld [vmem:[#allocation5 + $0x300] sm:$0xf]  ;;  %v6464_v44 = vor.u32 %v7498_v32, %v6463_v28  ;;  %v8348_v53 = vor.u32 %v7348_v42, %v5873_v43  ;;  %9743 = vst [vmem:[#allocation25_spill] sm:$0xff] %v8368_v17  ;;  %v7305_v25 = vld [vmem:[%s8280_s1 + $0x24] sm:$0xf0] }
  0x76   : > { %2378 = vmatmul.bf16.gmra.mxu3 %v8328_v1  ;;  %2545 = vmatpush.bf16.msrb.mxu1 %v6624_v15  ;;  %v6591_v33 = vld [vmem:[#allocation5 + $0x520] sm:$0xf]  ;;  %v6320_v35 = vor.u32 %v7462_v30, %v6319_v29  ;;  %9740 = vst [vmem:[#allocation22_spill] sm:$0xff] %v8346_v52  ;;  %v7306_v28 = vld [vmem:[%s8280_s1 + $0x2c] sm:$0xf0]  ;;  %v8382_v32 = vor.u32 %v7305_v25, %v5687_v24 }
  0x77   : > { %v5743_v36 = vld [vmem:[%s8280_s1 + $0x80] sm:$0xf]  ;;  %v6592_v45 = vor.u32 %v7530_v34, %v6591_v33  ;;  %v5689_v29 = vld [vmem:[%s8280_s1 + $0x28] sm:$0xf0]  ;;  %v7302_v30 = vld [vmem:[%s8280_s1 + $0x14] sm:$0xf] }
  0x78   : > { %2399 = vmatpush.bf16.msrb.mxu2 %v6224_v6  ;;  %v7320_v37 = vld [vmem:[%s8280_s1 + $0x9c] sm:$0xf0]  ;;  %v5719_v42 = vld [vmem:[%s8280_s1 + $0x48] sm:$0xf]  ;;  %v7317_v10 = vld [vmem:[%s8280_s1 + $0x8c] sm:$0xf] }
  0x79   : > { %2448 = vmatpush.bf16.msrb.mxu3 %v6352_v7  ;;  %v5871_v38 = vld [vmem:[%s8280_s1 + $0x180] sm:$0xf]  ;;  %2497 = vmatpush.bf16.msrb.mxu0 %v6480_v26  ;;  %v8342_v50 = vor.u32 %v7320_v37, %v5743_v36  ;;  %v7301_v26 = vld [vmem:[%s8280_s1 + $0xc] sm:$0xf]  ;;  %v7578_v37 = vld [vmem:[#allocation5 + $0x6ac] sm:$0xf0] }
  0x7a   : > { %v7352_v39 = vld [vmem:[%s8280_s1 + $0x19c] sm:$0xf0]  ;;  %2546 = vmatpush.bf16.msrb.mxu1 %v6608_v27  ;;  %v5695_v27 = vld [vmem:[%s8280_s1 + $0x10] sm:$0xf]  ;;  %v8386_v34 = vor.u32 %v7301_v26, %v5689_v29  ;;  %v7313_v43 = vld [vmem:[%s8280_s1 + $0x64] sm:$0xf0] }
  0x7b   : > { %v6447_v46 = vld [vmem:[#allocation5 + $0x400] sm:$0xf]  ;;  %v8344_v51 = vor.u32 %v7352_v39, %v5871_v38  ;;  %v8384_v33 = vor.u32 %v7306_v28, %v5695_v27  ;;  %v5759_v11 = vld [vmem:[%s8280_s1 + $0x90] sm:$0xf]  ;;  %v5753_v13 = vld [vmem:[%s8280_s1 + $0xa8] sm:$0xf0] }
  0x7c   : > { %2400 = vmatpush.bf16.msrb.mxu2 %v6208_v19  ;;  %v6575_v48 = vld [vmem:[#allocation5 + $0x500] sm:$0xf]  ;;  %v6448_v54 = vor.u32 %v7494_v47, %v6447_v46  ;;  %v7582_v19 = vld [vmem:[#allocation5 + $0x6cc] sm:$0xf0]  ;;  %v5721_v47 = vld [vmem:[%s8280_s1 + $0x68] sm:$0xf0] }
  0x7d   : > { %2449 = vmatpush.bf16.msrb.mxu3 %v6336_v20  ;;  %2498 = vmatpush.bf16.msrb.mxu0 %v6464_v44  ;;  %v6576_v55 = vor.u32 %v7526_v49, %v6575_v48  ;;  %v6815_v56 = vld [vmem:[#allocation5 + $0x6e0] sm:$0xf]  ;;  %v7309_v44 = vld [vmem:[%s8280_s1 + $0x4c] sm:$0xf]  ;;  %v7314_v46 = vld [vmem:[%s8280_s1 + $0x6c] sm:$0xf0] }
  0x7e   : > { %2547 = vmatpush.bf16.msrb.mxu1 %v6592_v45  ;;  %v6943_v60 = vld [vmem:[#allocation5 + $0x7e0] sm:$0xf]  ;;  %v6816_v61 = vor.u32 %v7586_v59, %v6815_v56  ;;  %v5727_v45 = vld [vmem:[%s8280_s1 + $0x50] sm:$0xf]  ;;  %v7310_v48 = vld [vmem:[%s8280_s1 + $0x54] sm:$0xf]  ;;  %v8406_v56 = vor.u32 %v7309_v44, %v5721_v47 }
  0x7f   : > { %v6944_v3 = vor.u32 %v7618_v2, %v6943_v60  ;;  %v5775_v6 = vld [vmem:[%s8280_s1 + $0xc0] sm:$0xf]  ;;  %v5729_v49 = vld [vmem:[%s8280_s1 + $0x70] sm:$0xf0]  ;;  %v7322_v12 = vld [vmem:[%s8280_s1 + $0xac] sm:$0xf0] }
  0x80   : > { %2401 = vmatpush.bf16.msrb.mxu2 %v6192_v31  ;;  %v7328_v7 = vld [vmem:[%s8280_s1 + $0xdc] sm:$0xf0]  ;;  %v5697_v31 = vld [vmem:[%s8280_s1 + $0x30] sm:$0xf0]  ;;  %9746 = vst [vmem:[#allocation28_spill] sm:$0xff] %v8406_v56  ;;  %v8408_v59 = vor.u32 %v7310_v48, %v5729_v49 }
  0x81   : > { %2450 = vmatpush.bf16.msrb.mxu3 %v6320_v35  ;;  %2499 = vmatpush.bf16.msrb.mxu0 %v6448_v54  ;;  %v5903_v8 = vld [vmem:[%s8280_s1 + $0x1c0] sm:$0xf]  ;;  %v8362_v14 = vor.u32 %v7328_v7, %v5775_v6  ;;  %v8388_v35 = vor.u32 %v7302_v30, %v5697_v31  ;;  %v8402_v54 = vor.u32 %v7313_v43, %v5719_v42  ;;  %v7606_v6 = vld [vmem:[#allocation5 + $0x78c] sm:$0xf0]  ;;  %v5783_v30 = vld [vmem:[%s8280_s1 + $0xc8] sm:$0xf] }
  0x82   : > { %2548 = vmatpush.bf16.msrb.mxu1 %v6576_v55  ;;  %v7360_v9 = vld [vmem:[%s8280_s1 + $0x1dc] sm:$0xf0]  ;;  %v8404_v55 = vor.u32 %v7314_v46, %v5727_v45  ;;  %9747 = vst [vmem:[#allocation29_spill] sm:$0xff] %v8408_v59  ;;  %v7570_v25 = vld [vmem:[#allocation5 + $0x66c] sm:$0xf0] }
  0x83   : > { %2314 = vmatmul.bf16.gmra.mxu0 %v8342_v50  ;;  %2334 = vmatmul.bf16.gmra.mxu2 %v8344_v51  ;;  %9741 = vst [vmem:[#allocation23_spill] sm:$0xff] %v8362_v14  ;;  %v8364_v15 = vor.u32 %v7360_v9, %v5903_v8  ;;  %v6799_v18 = vld [vmem:[#allocation5 + $0x6c0] sm:$0xf]  ;;  %v5751_v8 = vld [vmem:[%s8280_s1 + $0x88] sm:$0xf] }
  0x84   : > { %2363 = vmatmul.bf16.gmra.mxu1 %v8346_v52  ;;  %2590 = vmatpush.bf16.msra.mxu2 %v6816_v61  ;;  %v6927_v20 = vld [vmem:[#allocation5 + $0x7c0] sm:$0xf]  ;;  %v6800_v21 = vor.u32 %v7582_v19, %v6799_v18  ;;  %9744 = vst [vmem:[#allocation26_spill] sm:$0xff] %v8402_v54  ;;  %v7574_v61 = vld [vmem:[#allocation5 + $0x68c] sm:$0xf0] }
  0x85   : > { %2639 = vmatpush.bf16.msra.mxu3 %v6944_v3  ;;  %v6928_v23 = vor.u32 %v7614_v22, %v6927_v20  ;;  %v6783_v36 = vld [vmem:[#allocation5 + $0x6a0] sm:$0xf]  ;;  %9745 = vst [vmem:[#allocation27_spill] sm:$0xff] %v8404_v55  ;;  %v7321_v9 = vld [vmem:[%s8280_s1 + $0xa4] sm:$0xf0]  ;;  %v8426_v22 = vor.u32 %v7317_v10, %v5753_v13 }
  0x86   : > { %2383 = vmatmul.bf16.gmra.mxu3 %v8348_v53  ;;  %v6911_v38 = vld [vmem:[#allocation5 + $0x7a0] sm:$0xf]  ;;  %v6784_v39 = vor.u32 %v7578_v37, %v6783_v36  ;;  %v7318_v18 = vld [vmem:[%s8280_s1 + $0x94] sm:$0xf]  ;;  %v8422_v20 = vor.u32 %v7321_v9, %v5751_v8  ;;  %v7602_v28 = vld [vmem:[#allocation5 + $0x76c] sm:$0xf0] }
  0x87   : > { %v6912_v41 = vor.u32 %v7610_v40, %v6911_v38  ;;  %v6767_v60 = vld [vmem:[#allocation5 + $0x680] sm:$0xf]  ;;  %v5761_v19 = vld [vmem:[%s8280_s1 + $0xb0] sm:$0xf0]  ;;  %9750 = vst [vmem:[#allocation32_spill] sm:$0xff] %v8426_v22 }
  0x88   : > { %2591 = vmatpush.bf16.msra.mxu2 %v6800_v21  ;;  %v6895_v2 = vld [vmem:[#allocation5 + $0x780] sm:$0xf]  ;;  %v6768_v3 = vor.u32 %v7574_v61, %v6767_v60  ;;  %9748 = vst [vmem:[#allocation30_spill] sm:$0xff] %v8422_v20  ;;  %v8424_v21 = vor.u32 %v7322_v12, %v5759_v11  ;;  %v7329_v31 = vld [vmem:[%s8280_s1 + $0xe4] sm:$0xf0] }
  0x89   : > { %2640 = vmatpush.bf16.msra.mxu3 %v6928_v23  ;;  %v6896_v7 = vor.u32 %v7606_v6, %v6895_v2  ;;  %v8428_v23 = vor.u32 %v7318_v18, %v5761_v19  ;;  %v6751_v24 = vld [vmem:[#allocation5 + $0x660] sm:$0xf]  ;;  %v7325_v36 = vld [vmem:[%s8280_s1 + $0xcc] sm:$0xf]  ;;  %v5791_v37 = vld [vmem:[%s8280_s1 + $0xd0] sm:$0xf]  ;;  %v8442_v42 = vor.u32 %v7329_v31, %v5783_v30 }
  0x8a   : > { %9749 = vst [vmem:[#allocation31_spill] sm:$0xff] %v8424_v21  ;;  %v6879_v26 = vld [vmem:[#allocation5 + $0x760] sm:$0xf]  ;;  %v6752_v27 = vor.u32 %v7570_v25, %v6751_v24  ;;  %v7330_v38 = vld [vmem:[%s8280_s1 + $0xec] sm:$0xf0] }
  0x8b   : > { %9751 = vst [vmem:[#allocation33_spill] sm:$0xff] %v8428_v23  ;;  %v6880_v29 = vor.u32 %v7602_v28, %v6879_v26  ;;  %v7326_v40 = vld [vmem:[%s8280_s1 + $0xd4] sm:$0xf]  ;;  %v8444_v43 = vor.u32 %v7330_v38, %v5791_v37  ;;  %v6735_v46 = vld [vmem:[#allocation5 + $0x640] sm:$0xf] }
  0x8c   : > { %2592 = vmatpush.bf16.msra.mxu2 %v6784_v39  ;;  %v5785_v39 = vld [vmem:[%s8280_s1 + $0xe8] sm:$0xf0]  ;;  %9752 = vst [vmem:[#allocation34_spill] sm:$0xff] %v8442_v42  ;;  %v7566_v47 = vld [vmem:[#allocation5 + $0x64c] sm:$0xf0] }
  0x8d   : > { %2641 = vmatpush.bf16.msra.mxu3 %v6912_v41  ;;  %v5793_v41 = vld [vmem:[%s8280_s1 + $0xf0] sm:$0xf0]  ;;  %9753 = vst [vmem:[#allocation35_spill] sm:$0xff] %v8444_v43  ;;  %v8446_v44 = vor.u32 %v7325_v36, %v5785_v39  ;;  %v6863_v48 = vld [vmem:[#allocation5 + $0x740] sm:$0xf]  ;;  %v6736_v49 = vor.u32 %v7566_v47, %v6735_v46 }
  0x8e   : > { %v8448_v45 = vor.u32 %v7326_v40, %v5793_v41  ;;  %v7598_v60 = vld [vmem:[#allocation5 + $0x74c] sm:$0xf0]  ;;  %v686_v2 = vld [vmem:[#allocation7] sm:$0xf]  ;;  %v7337_v6 = vld [vmem:[%s8280_s1 + $0x124] sm:$0xf0] }
  0x8f   : > { %9754 = vst [vmem:[#allocation36_spill] sm:$0xff] %v8446_v44  ;;  %v6864_v61 = vor.u32 %v7598_v60, %v6863_v48  ;;  %v5823_v8 = vld [vmem:[%s8280_s1 + $0x110] sm:$0xf]  ;;  %v5817_v10 = vld [vmem:[%s8280_s1 + $0x128] sm:$0xf0]  ;;  %v8462_v13 = vperm.slane %v686_v2, 0 }
  0x90   : > { %2593 = vmatpush.bf16.msra.mxu2 %v6768_v3  ;;  %9755 = vst [vmem:[#allocation37_spill] sm:$0xff] %v8448_v45  ;;  %v5815_v3 = vld [vmem:[%s8280_s1 + $0x108] sm:$0xf]  ;;  %v7338_v9 = vld [vmem:[%s8280_s1 + $0x12c] sm:$0xf0] }
  0x91   : > { %2642 = vmatpush.bf16.msra.mxu3 %v6896_v7  ;;  %v7333_v7 = vld [vmem:[%s8280_s1 + $0x10c] sm:$0xf]  ;;  %v7334_v11 = vld [vmem:[%s8280_s1 + $0x114] sm:$0xf]  ;;  %v8464_v18 = vor.u32 %v7337_v6, %v5815_v3  ;;  %v8466_v19 = vor.u32 %v7338_v9, %v5823_v8  ;;  %v7392_v30 = vld [vmem:[#allocation5 + $0xe4] sm:$0xf] }
  0x92   : > { %v5825_v12 = vld [vmem:[%s8280_s1 + $0x130] sm:$0xf0]  ;;  %v8468_v25 = vor.u32 %v7333_v7, %v5817_v10  ;;  %v6719_v31 = vld [vmem:[#allocation5 + $0x620] sm:$0xf]  ;;  %v7562_v36 = vld [vmem:[#allocation5 + $0x62c] sm:$0xf0] }
  0x93   : > { %2319 = vmatmul.bf16.gmra.mxu0 %v8362_v14  ;;  %2339 = vmatmul.bf16.gmra.mxu2 %v8364_v15  ;;  %9756 = vst [vmem:[#allocation38_spill] sm:$0xff] %v8464_v18  ;;  %v8470_v26 = vor.u32 %v7334_v11, %v5825_v12  ;;  %v6049_v37 = vld [vmem:[#allocation5 + $0xf0] sm:$0xf0]  ;;  %v6720_v38 = vor.u32 %v7562_v36, %v6719_v31  ;;  %v7424_v40 = vld [vmem:[#allocation5 + $0x1e4] sm:$0xf] }
  0x94   : > { %2368 = vmatmul.bf16.gmra.mxu1 %v8366_v16  ;;  %2594 = vmatpush.bf16.msra.mxu2 %v6752_v27  ;;  %9757 = vst [vmem:[#allocation39_spill] sm:$0xff] %v8466_v19  ;;  %v6052_v39 = vor.u32 %v7392_v30, %v6049_v37  ;;  %v6177_v41 = vld [vmem:[#allocation5 + $0x1f0] sm:$0xf0]  ;;  %v6847_v46 = vld [vmem:[#allocation5 + $0x720] sm:$0xf] }
  0x95   : > { %2643 = vmatpush.bf16.msra.mxu3 %v6880_v29  ;;  %9758 = vst [vmem:[#allocation40_spill] sm:$0xff] %v8468_v25  ;;  %v6180_v48 = vor.u32 %v7424_v40, %v6177_v41  ;;  %v7388_v60 = vld [vmem:[#allocation5 + $0xc4] sm:$0xf]  ;;  %v6161_v9 = vld [vmem:[#allocation5 + $0x1d0] sm:$0xf0] }
  0x96   : > { %2388 = vmatmul.bf16.gmra.mxu3 %v8368_v17  ;;  %9759 = vst [vmem:[#allocation41_spill] sm:$0xff] %v8470_v26  ;;  %2688 = vmatpush.bf16.msra.mxu0 %v6052_v39  ;;  %v7420_v8 = vld [vmem:[#allocation5 + $0x1c4] sm:$0xf]  ;;  %v6017_v30 = vld [vmem:[#allocation5 + $0xb0] sm:$0xf0] }
  0x97   : > { %2737 = vmatpush.bf16.msra.mxu1 %v6180_v48  ;;  %v6164_v11 = vor.u32 %v7420_v8, %v6161_v9  ;;  %v7416_v31 = vld [vmem:[#allocation5 + $0x1a4] sm:$0xf]  ;;  %v5847_v37 = vld [vmem:[%s8280_s1 + $0x148] sm:$0xf]  ;;  %v6145_v40 = vld [vmem:[#allocation5 + $0x1b0] sm:$0xf0] }
  0x98   : > { %2595 = vmatpush.bf16.msra.mxu2 %v6736_v49  ;;  %v7594_v49 = vld [vmem:[#allocation5 + $0x72c] sm:$0xf0]  ;;  %v7341_v41 = vld [vmem:[%s8280_s1 + $0x14c] sm:$0xf]  ;;  %v6148_v48 = vor.u32 %v7416_v31, %v6145_v40  ;;  %v7412_v8 = vld [vmem:[#allocation5 + $0x184] sm:$0xf] }
  0x99   : > { %2644 = vmatpush.bf16.msra.mxu3 %v6864_v61  ;;  %v6033_v61 = vld [vmem:[#allocation5 + $0xd0] sm:$0xf0]  ;;  %v6848_v6 = vor.u32 %v7594_v49, %v6847_v46  ;;  %v5855_v46 = vld [vmem:[%s8280_s1 + $0x150] sm:$0xf]  ;;  %v5849_v49 = vld [vmem:[%s8280_s1 + $0x168] sm:$0xf0] }
  0x9a   : > { %v6036_v7 = vor.u32 %v7388_v60, %v6033_v61  ;;  %v7342_v60 = vld [vmem:[%s8280_s1 + $0x154] sm:$0xf] }
  0x9b   : > { %2738 = vmatpush.bf16.msra.mxu1 %v6164_v11  ;;  %v5857_v61 = vld [vmem:[%s8280_s1 + $0x170] sm:$0xf0] }
  0x9c   : > { %2596 = vmatpush.bf16.msra.mxu2 %v6720_v38  ;;  %v7345_v38 = vld [vmem:[%s8280_s1 + $0x164] sm:$0xf0]  ;;  %2689 = vmatpush.bf16.msra.mxu0 %v6036_v7  ;;  %v8500_v11 = vor.u32 %v7342_v60, %v5857_v61 }
  0x9d   : > { %2645 = vmatpush.bf16.msra.mxu3 %v6848_v6  ;;  %v6001_v6 = vld [vmem:[#allocation5 + $0x90] sm:$0xf0] }
  0x9e   : > { %9763 = vst [vmem:[#allocation45_spill] sm:$0xff] %v8500_v11 }
  0x9f   : > { %2739 = vmatpush.bf16.msra.mxu1 %v6148_v48  ;;  %v7408_v48 = vld [vmem:[#allocation5 + $0x164] sm:$0xf] }
  0xa3   : > { %2402 = vmatmul.bf16.vlgmr.msrb.gmra.mxu2 %v8382_v32  ;;  %2500 = vmatmul.bf16.vlgmr.msrb.gmra.mxu0 %v8384_v33 }
  0xa4   : > { %2549 = vmatmul.bf16.vlgmr.msrb.gmra.mxu1 %v8388_v35 }
  0xa6   : > { %2451 = vmatmul.bf16.vlgmr.msrb.gmra.mxu3 %v8386_v34 }
  0xb3   : > { %2407 = vmatmul.bf16.gmra.mxu2 %v8402_v54  ;;  %2505 = vmatmul.bf16.gmra.mxu0 %v8404_v55 }
  0xb4   : > { %2554 = vmatmul.bf16.gmra.mxu1 %v8408_v59 }
  0xb6   : > { %2456 = vmatmul.bf16.gmra.mxu3 %v8406_v56 }
  0xc3   : > { %2412 = vmatmul.bf16.gmra.mxu2 %v8422_v20  ;;  %2510 = vmatmul.bf16.gmra.mxu0 %v8424_v21 }
  0xc4   : > { %2559 = vmatmul.bf16.gmra.mxu1 %v8428_v23 }
  0xc6   : > { %2461 = vmatmul.bf16.gmra.mxu3 %v8426_v22 }
  0xd3   : > { %2417 = vmatmul.bf16.gmra.mxu2 %v8442_v42  ;;  %2515 = vmatmul.bf16.gmra.mxu0 %v8444_v43 }
  0xd4   : > { %2564 = vmatmul.bf16.gmra.mxu1 %v8448_v45  ;;  %v6065_v45 = vld [vmem:[#allocation5 + $0x110] sm:$0xf0] }
  0xd6   : > { %2466 = vmatmul.bf16.gmra.mxu3 %v8446_v44 }
  0xe0   : > { %v2305_v24 = vpop.f32.mrf.mxu0 }
  0xe1   : > { %v2306_v27 = vadd.f32 %v2305_v24, %v8462_v13  ;;  %v2354_v28 = vpop.f32.mrf.mxu1 }
  0xe3   : > { %v8473_v29 = vadd.f32 %v2354_v28, %v2306_v27  ;;  %2422 = vmatmul.bf16.gmra.mxu2 %v8464_v18  ;;  %2520 = vmatmul.bf16.gmra.mxu0 %v8466_v19  ;;  %v7384_v28 = vld [vmem:[#allocation5 + $0xa4] sm:$0xf] }
  0xe4   : > { %2569 = vmatmul.bf16.gmra.mxu1 %v8470_v26  ;;  %v6020_v39 = vor.u32 %v7384_v28, %v6017_v30  ;;  %v8498_v30 = vor.u32 %v7341_v41, %v5849_v49  ;;  %v5985_v41 = vld [vmem:[#allocation5 + $0x70] sm:$0xf0] }
  0xe5   : > { %v6113_v49 = vld [vmem:[#allocation5 + $0x170] sm:$0xf0] }
  0xe6   : > { %2471 = vmatmul.bf16.gmra.mxu3 %v8468_v25  ;;  %v2325_v47 = vpop.f32.mrf.mxu2  ;;  %2690 = vmatpush.bf16.msra.mxu0 %v6020_v39  ;;  %9762 = vst [vmem:[#allocation44_spill] sm:$0xff] %v8498_v30  ;;  %v7558_v39 = vld [vmem:[#allocation5 + $0x60c] sm:$0xf0]  ;;  %v6116_v61 = vor.u32 %v7408_v48, %v6113_v49  ;;  %v5953_v48 = vld [vmem:[#allocation5 + $0x30] sm:$0xf0] }
  0xe7   : > { %v2326_v2 = vadd.f32 %v2325_v47, %v8462_v13  ;;  %v7346_v47 = vld [vmem:[%s8280_s1 + $0x16c] sm:$0xf0]  ;;  %v7400_v49 = vld [vmem:[#allocation5 + $0x124] sm:$0xf] }
  0xe8   : > { %v2307_v10 = vpop.f32.mrf.mxu0  ;;  %v8496_v7 = vor.u32 %v7346_v47, %v5855_v46 }
  0xe9   : > { %v2374_v3 = vpop.f32.mrf.mxu3  ;;  %v2308_v24 = vadd.f32 %v2307_v10, %v8462_v13  ;;  %v2356_v27 = vpop.f32.mrf.mxu1 }
  0xea   : > { %v8480_v12 = vadd.f32 %v2374_v3, %v2326_v2  ;;  %v7380_v3 = vld [vmem:[#allocation5 + $0x84] sm:$0xf]  ;;  %9761 = vst [vmem:[#allocation43_spill] sm:$0xff] %v8496_v7 }
  0xeb   : > { %v8483_v36 = vadd.f32 %v2356_v27, %v2308_v24  ;;  %v8494_v24 = vor.u32 %v7345_v38, %v5847_v37  ;;  %v6129_v27 = vld [vmem:[#allocation5 + $0x190] sm:$0xf0]  ;;  %v6004_v25 = vor.u32 %v7380_v3, %v6001_v6  ;;  %v7376_v37 = vld [vmem:[#allocation5 + $0x64] sm:$0xf]  ;;  %v6703_v38 = vld [vmem:[#allocation5 + $0x600] sm:$0xf] }
  0xec   : > { %v6704_v46 = vor.u32 %v7558_v39, %v6703_v38  ;;  %v5988_v47 = vor.u32 %v7376_v37, %v5985_v41  ;;  %v7590_v3 = vld [vmem:[#allocation5 + $0x70c] sm:$0xf0]  ;;  %v7372_v6 = vld [vmem:[#allocation5 + $0x44] sm:$0xf] }
  0xed   : > { %9760 = vst [vmem:[#allocation42_spill] sm:$0xff] %v8494_v24  ;;  %2691 = vmatpush.bf16.msra.mxu0 %v6004_v25  ;;  %v6097_v25 = vld [vmem:[#allocation5 + $0x150] sm:$0xf0] }
  0xee   : > { %v2327_v2 = vpop.f32.mrf.mxu2  ;;  %2597 = vmatpush.bf16.msra.mxu2 %v6704_v46  ;;  %v7368_v46 = vld [vmem:[#allocation5 + $0x24] sm:$0xf] }
  0xef   : > { %v2328_v9 = vadd.f32 %v2327_v2, %v8462_v13  ;;  %v6132_v2 = vor.u32 %v7412_v8, %v6129_v27  ;;  %v5969_v8 = vld [vmem:[#allocation5 + $0x50] sm:$0xf0] }
  0xf0   : > { %v2310_v28 = vpop.f32.mrf.mxu0 }
  0xf1   : > { %v2376_v10 = vpop.f32.mrf.mxu3  ;;  %v2311_v40 = vadd.f32 %v2310_v28, %v8462_v13  ;;  %v2359_v26 = vpop.f32.mrf.mxu1  ;;  %2740 = vmatpush.bf16.msra.mxu1 %v6132_v2  ;;  %v7404_v28 = vld [vmem:[#allocation5 + $0x144] sm:$0xf]  ;;  %v5972_v2 = vor.u32 %v7372_v6, %v5969_v8  ;;  %2692 = vmatpush.bf16.msra.mxu0 %v5988_v47  ;;  %v6081_v6 = vld [vmem:[#allocation5 + $0x130] sm:$0xf0]  ;;  %v7349_v8 = vld [vmem:[%s8280_s1 + $0x18c] sm:$0xf]  ;;  %v5956_v47 = vor.u32 %v7368_v46, %v5953_v48 }
  0xf2   : > { %v8502_v31 = vadd.f32 %v2376_v10, %v2328_v9  ;;  %v6100_v41 = vor.u32 %v7404_v28, %v6097_v25  ;;  %v5937_v25 = vld [vmem:[#allocation5 + $0x10] sm:$0xf0] }
  0xf3   : > { %v8505_v19 = vadd.f32 %v2359_v26, %v2311_v40  ;;  %2427 = vmatmul.bf16.gmra.mxu2 %v8494_v24  ;;  %2525 = vmatmul.bf16.gmra.mxu0 %v8496_v7  ;;  %v6831_v26 = vld [vmem:[#allocation5 + $0x700] sm:$0xf]  ;;  %v7396_v7 = vld [vmem:[#allocation5 + $0x104] sm:$0xf] }
  0xf4   : > { %2574 = vmatmul.bf16.gmra.mxu1 %v8500_v11  ;;  %v6832_v27 = vor.u32 %v7590_v3, %v6831_v26  ;;  %v7353_v3 = vld [vmem:[%s8280_s1 + $0x1a4] sm:$0xf0]  ;;  %v7350_v11 = vld [vmem:[%s8280_s1 + $0x194] sm:$0xf] }
  0xf5   : > { %2741 = vmatpush.bf16.msra.mxu1 %v6116_v61  ;;  %2693 = vmatpush.bf16.msra.mxu0 %v5972_v2  ;;  %v6084_v61 = vor.u32 %v7400_v49, %v6081_v6  ;;  %v6068_v49 = vor.u32 %v7396_v7, %v6065_v45  ;;  %v6433_v45 = vld [vmem:[#allocation5 + $0x3f0] sm:$0xf0] }
  0xf6   : > { %2476 = vmatmul.bf16.gmra.mxu3 %v8498_v30  ;;  %v2330_v60 = vpop.f32.mrf.mxu2  ;;  %v5889_v30 = vld [vmem:[%s8280_s1 + $0x1b0] sm:$0xf0] }
  0xf7   : > { %v2331_v9 = vadd.f32 %v2330_v60, %v8462_v13  ;;  %2646 = vmatpush.bf16.msra.mxu3 %v6832_v27  ;;  %v5879_v60 = vld [vmem:[%s8280_s1 + $0x188] sm:$0xf]  ;;  %v7364_v27 = vld [vmem:[#allocation5 + $0x4] sm:$0xf]  ;;  %v8532_v42 = vor.u32 %v7350_v11, %v5889_v30  ;;  %v6305_v11 = vld [vmem:[#allocation5 + $0x2f0] sm:$0xf0] }
  0xf8   : > { %v2312_v40 = vpop.f32.mrf.mxu0  ;;  %v8526_v24 = vor.u32 %v7353_v3, %v5879_v60  ;;  %v5940_v2 = vor.u32 %v7364_v27, %v5937_v25  ;;  %v7456_v30 = vld [vmem:[#allocation5 + $0x2e4] sm:$0xf]  ;;  %v5911_v27 = vld [vmem:[%s8280_s1 + $0x1c8] sm:$0xf] }
  0xf9   : > { %v2379_v10 = vpop.f32.mrf.mxu3  ;;  %v2313_v38 = vadd.f32 %v2312_v40, %v8462_v13  ;;  %v2361_v39 = vpop.f32.mrf.mxu1  ;;  %v5881_v40 = vld [vmem:[%s8280_s1 + $0x1a8] sm:$0xf0]  ;;  %2742 = vmatpush.bf16.msra.mxu1 %v6100_v41  ;;  %9766 = vst [vmem:[#allocation48_spill] sm:$0xff] %v8532_v42  ;;  %2694 = vmatpush.bf16.msra.mxu0 %v5956_v47  ;;  %v7488_v60 = vld [vmem:[#allocation5 + $0x3e4] sm:$0xf] }
  0xfa   : > { %v8512_v37 = vadd.f32 %v2379_v10, %v2331_v9  ;;  %v5887_v9 = vld [vmem:[%s8280_s1 + $0x190] sm:$0xf]  ;;  %v8530_v43 = vor.u32 %v7349_v8, %v5881_v40  ;;  %v6436_v3 = vor.u32 %v7488_v60, %v6433_v45  ;;  %v7361_v25 = vld [vmem:[%s8280_s1 + $0x1e4] sm:$0xf0] }
  0xfb   : > { %v8515_v26 = vadd.f32 %v2361_v39, %v2313_v38  ;;  %v7354_v10 = vld [vmem:[%s8280_s1 + $0x1ac] sm:$0xf0] }
  0xfc   : > { %v8528_v18 = vor.u32 %v7354_v10, %v5887_v9  ;;  %9765 = vst [vmem:[#allocation47_spill] sm:$0xff] %v8530_v43  ;;  %2835 = vmatpush.bf16.msrb.mxu3 %v6436_v3 }
  0xfd   : > { %2743 = vmatpush.bf16.msra.mxu1 %v6084_v61  ;;  %2695 = vmatpush.bf16.msra.mxu0 %v5940_v2  ;;  %v7362_v2 = vld [vmem:[%s8280_s1 + $0x1ec] sm:$0xf0] }
  0xfe   : > { %v2332_v28 = vpop.f32.mrf.mxu2  ;;  %9764 = vst [vmem:[#allocation46_spill] sm:$0xff] %v8528_v18 }
  0xff   : > { %v2333_v38 = vadd.f32 %v2332_v28, %v8462_v13 }
 0x100   : > { %v2315_v44 = vpop.f32.mrf.mxu0 }
 0x101   : > { %v2381_v39 = vpop.f32.mrf.mxu3  ;;  %v2316_v46 = vadd.f32 %v2315_v44, %v8462_v13  ;;  %v2364_v48 = vpop.f32.mrf.mxu1  ;;  %2744 = vmatpush.bf16.msra.mxu1 %v6068_v49  ;;  %v6308_v44 = vor.u32 %v7456_v30, %v6305_v11  ;;  %v5921_v49 = vld [vmem:[%s8280_s1 + $0x1f0] sm:$0xf0] }
 0x102   : > { %v8534_v41 = vadd.f32 %v2381_v39, %v2333_v38  ;;  %v7357_v38 = vld [vmem:[%s8280_s1 + $0x1cc] sm:$0xf]  ;;  %v5919_v39 = vld [vmem:[%s8280_s1 + $0x1d0] sm:$0xf] }
 0x103   : > { %v8537_v6 = vadd.f32 %v2364_v48, %v2316_v46  ;;  %2432 = vmatmul.bf16.gmra.mxu2 %v8526_v24  ;;  %2530 = vmatmul.bf16.gmra.mxu0 %v8528_v18  ;;  %v5913_v46 = vld [vmem:[%s8280_s1 + $0x1e8] sm:$0xf0]  ;;  %v7358_v48 = vld [vmem:[%s8280_s1 + $0x1d4] sm:$0xf]  ;;  %v8560_v45 = vor.u32 %v7362_v2, %v5919_v39 }
 0x104   : > { %2579 = vmatmul.bf16.gmra.mxu1 %v8532_v42  ;;  %2786 = vmatpush.bf16.msrb.mxu2 %v6308_v44  ;;  %v8558_v44 = vor.u32 %v7361_v25, %v5911_v27  ;;  %v8562_v3 = vor.u32 %v7357_v38, %v5913_v46  ;;  %v7452_v27 = vld [vmem:[#allocation5 + $0x2c4] sm:$0xf]  ;;  %v6289_v25 = vld [vmem:[#allocation5 + $0x2d0] sm:$0xf0]  ;;  %v5737_v42 = vld [vmem:[%s8280_s1 + $0x78] sm:$0xf0] }
 0x105   : > { %9768 = vst [vmem:[#allocation50_spill] sm:$0xff] %v8560_v45  ;;  %v7484_v38 = vld [vmem:[#allocation5 + $0x3c4] sm:$0xf]  ;;  %v6292_v39 = vor.u32 %v7452_v27, %v6289_v25  ;;  %v6417_v2 = vld [vmem:[#allocation5 + $0x3d0] sm:$0xf0] }
 0x106   : > { %2481 = vmatmul.bf16.gmra.mxu3 %v8530_v43  ;;  %v2335_v7 = vpop.f32.mrf.mxu2  ;;  %9767 = vst [vmem:[#allocation49_spill] sm:$0xff] %v8558_v44  ;;  %v7303_v27 = vld [vmem:[%s8280_s1 + $0x1c] sm:$0xf] }
 0x107   : > { %v2336_v8 = vadd.f32 %v2335_v7, %v8462_v13  ;;  %9769 = vst [vmem:[#allocation51_spill] sm:$0xff] %v8562_v3  ;;  %v5705_v25 = vld [vmem:[%s8280_s1 + $0x38] sm:$0xf0] }
 0x108   : > { %v2317_v10 = vpop.f32.mrf.mxu0  ;;  %2787 = vmatpush.bf16.msrb.mxu2 %v6292_v39 }
 0x109   : > { %v2384_v9 = vpop.f32.mrf.mxu3  ;;  %v2318_v47 = vadd.f32 %v2317_v10, %v8462_v13  ;;  %v2366_v61 = vpop.f32.mrf.mxu1 }
 0x10a   : > { %v8544_v40 = vadd.f32 %v2384_v9, %v2336_v8  ;;  %v8564_v8 = vor.u32 %v7358_v48, %v5921_v49  ;;  %v6420_v48 = vor.u32 %v7484_v38, %v6417_v2 }
 0x10b   : > { %v8547_v28 = vadd.f32 %v2366_v61, %v2318_v47 }
 0x10c   : > { %9770 = vst [vmem:[#allocation52_spill] sm:$0xff] %v8564_v8  ;;  %2836 = vmatpush.bf16.msrb.mxu3 %v6420_v48 }
 0x10e   : > { %v2337_v30 = vpop.f32.mrf.mxu2 }
 0x10f   : > { %v2338_v11 = vadd.f32 %v2337_v30, %v8462_v13 }
 0x110   : > { %v2320_v7 = vpop.f32.mrf.mxu0 }
 0x111   : > { %v2386_v60 = vpop.f32.mrf.mxu3  ;;  %v2321_v10 = vadd.f32 %v2320_v7, %v8462_v13  ;;  %v2369_v47 = vpop.f32.mrf.mxu1 }
 0x112   : > { %v8566_v9 = vadd.f32 %v2386_v60, %v2338_v11 }
 0x113   : > { %v8569_v61 = vadd.f32 %v2369_v47, %v2321_v10  ;;  %2437 = vmatmul.bf16.gmra.mxu2 %v8558_v44  ;;  %2535 = vmatmul.bf16.gmra.mxu0 %v8560_v45  ;;  %v8588_v44 = vor.u32 %v7303_v27, %v5705_v25 }
 0x114   : > { %2584 = vmatmul.bf16.gmra.mxu1 %v8564_v8  ;;  %v5703_v8 = vld [vmem:[%s8280_s1 + $0x18] sm:$0xf] }
 0x115   : > { %9772 = vst [vmem:[#allocation54_spill] sm:$0xff] %v8588_v44 }
 0x116   : > { %2486 = vmatmul.bf16.gmra.mxu3 %v8562_v3  ;;  %v2340_v46 = vpop.f32.mrf.mxu2  ;;  %v7307_v3 = vld [vmem:[%s8280_s1 + $0x34] sm:$0xf0] }
 0x117   : > { %v2341_v49 = vadd.f32 %v2340_v46, %v8462_v13  ;;  %v8586_v46 = vor.u32 %v7307_v3, %v5703_v8  ;;  %v6401_v8 = vld [vmem:[#allocation5 + $0x3b0] sm:$0xf0] }
 0x118   : > { %v2322_v11 = vpop.f32.mrf.mxu0 }
 0x119   : > { %v2389_v30 = vpop.f32.mrf.mxu3  ;;  %v2323_v7 = vadd.f32 %v2322_v11, %v8462_v13  ;;  %v2371_v10 = vpop.f32.mrf.mxu1  ;;  %9771 = vst [vmem:[#allocation53_spill] sm:$0xff] %v8586_v46 }
 0x11a   : > { %v8576_v60 = vadd.f32 %v2389_v30, %v2341_v49  ;;  %v7448_v30 = vld [vmem:[#allocation5 + $0x2a4] sm:$0xf] }
 0x11b   : > { %v8579_v47 = vadd.f32 %v2371_v10, %v2323_v7 }
 0x11e   : > { %v2342_v45 = vpop.f32.mrf.mxu2 }
 0x11f   : > { %v2343_v38 = vadd.f32 %v2342_v45, %v8462_v13  ;;  %v6273_v13 = vld [vmem:[#allocation5 + $0x2b0] sm:$0xf0]  ;;  %v7480_v45 = vld [vmem:[#allocation5 + $0x3a4] sm:$0xf] }
 0x120   : > { %v2501_v39 = vpop.f32.mrf.mxu0  ;;  %v6276_v3 = vor.u32 %v7448_v30, %v6273_v13  ;;  %v6404_v7 = vor.u32 %v7480_v45, %v6401_v8 }
 0x121   : > { %v2391_v2 = vpop.f32.mrf.mxu3  ;;  %v2550_v49 = vpop.f32.mrf.mxu1 }
 0x122   : > { %v8590_v48 = vadd.f32 %v2391_v2, %v2343_v38  ;;  %2788 = vmatpush.bf16.msrb.mxu2 %v6276_v3  ;;  %2837 = vmatpush.bf16.msrb.mxu3 %v6404_v7 }
 0x123   : > { %2598 = vmatmul.bf16.vlgmr.msra.gmra.mxu2 %v8586_v46  ;;  %2696 = vmatmul.bf16.vlgmr.msra.gmra.mxu0 %v8302_v63  ;;  %v7315_v63 = vld [vmem:[%s8280_s1 + $0x74] sm:$0xf0]  ;;  %v7311_v46 = vld [vmem:[%s8280_s1 + $0x5c] sm:$0xf] }
 0x124   : > { %2745 = vmatmul.bf16.vlgmr.msra.gmra.mxu1 %v8306_v4  ;;  %v8606_v8 = vor.u32 %v7311_v46, %v5737_v42  ;;  %v6385_v42 = vld [vmem:[#allocation5 + $0x390] sm:$0xf0] }
 0x126   : > { %2647 = vmatmul.bf16.vlgmr.msra.gmra.mxu3 %v8588_v44  ;;  %v2403_v11 = vpop.f32.mrf.mxu2  ;;  %v5735_v44 = vld [vmem:[%s8280_s1 + $0x58] sm:$0xf]  ;;  %9773 = vst [vmem:[#allocation55_spill] sm:$0xff] %v8606_v8 }
 0x127   : > { %v2404_v10 = vadd.f32 %v2403_v11, %v8473_v29  ;;  %v8604_v45 = vor.u32 %v7315_v63, %v5735_v44  ;;  %v7476_v63 = vld [vmem:[#allocation5 + $0x384] sm:$0xf] }
 0x128   : > { %v2503_v25 = vpop.f32.mrf.mxu0 }
 0x129   : > { %v2452_v27 = vpop.f32.mrf.mxu3  ;;  %v2552_v2 = vpop.f32.mrf.mxu1 }
 0x12a   : > { %v2453_v38 = vadd.f32 %v2452_v27, %v2404_v10 }
 0x12c   : > { %v2502_v4 = vadd.f32 %v2501_v39, %v2453_v38  ;;  %v6388_v39 = vor.u32 %v7476_v63, %v6385_v42 }
 0x12e   : > { %v8601_v43 = vadd.f32 %v2550_v49, %v2502_v4  ;;  %v2405_v18 = vpop.f32.mrf.mxu2  ;;  %v7444_v4 = vld [vmem:[#allocation5 + $0x284] sm:$0xf]  ;;  %2838 = vmatpush.bf16.msrb.mxu3 %v6388_v39 }
 0x12f   : > { %v2406_v30 = vadd.f32 %v2405_v18, %v8483_v36  ;;  %v6257_v18 = vld [vmem:[#allocation5 + $0x290] sm:$0xf0] }
 0x130   : > { %v2506_v29 = vpop.f32.mrf.mxu0  ;;  %v6260_v36 = vor.u32 %v7444_v4, %v6257_v18 }
 0x131   : > { %v2454_v13 = vpop.f32.mrf.mxu3  ;;  %v2555_v11 = vpop.f32.mrf.mxu1 }
 0x132   : > { %v2455_v3 = vadd.f32 %v2454_v13, %v2406_v30  ;;  %2789 = vmatpush.bf16.msrb.mxu2 %v6260_v36  ;;  %v5767_v13 = vld [vmem:[%s8280_s1 + $0x98] sm:$0xf] }
 0x133   : > { %2603 = vmatmul.bf16.gmra.mxu2 %v8604_v45  ;;  %2701 = vmatmul.bf16.gmra.mxu0 %v8322_v57 }
 0x134   : > { %v2504_v7 = vadd.f32 %v2503_v25, %v2455_v3  ;;  %2750 = vmatmul.bf16.gmra.mxu1 %v8326_v62  ;;  %v7323_v3 = vld [vmem:[%s8280_s1 + $0xb4] sm:$0xf0]  ;;  %v7319_v62 = vld [vmem:[%s8280_s1 + $0x9c] sm:$0xf] }
 0x135   : > { %v8622_v63 = vor.u32 %v7323_v3, %v5767_v13 }
 0x136   : > { %2652 = vmatmul.bf16.gmra.mxu3 %v8606_v8  ;;  %v8612_v44 = vadd.f32 %v2552_v2, %v2504_v7  ;;  %v2408_v46 = vpop.f32.mrf.mxu2  ;;  %v5769_v8 = vld [vmem:[%s8280_s1 + $0xb8] sm:$0xf0] }
 0x137   : > { %v2409_v49 = vadd.f32 %v2408_v46, %v8505_v19  ;;  %v8624_v42 = vor.u32 %v7319_v62, %v5769_v8  ;;  %v6369_v62 = vld [vmem:[#allocation5 + $0x370] sm:$0xf0] }
 0x138   : > { %v2508_v27 = vpop.f32.mrf.mxu0 }
 0x139   : > { %v2457_v10 = vpop.f32.mrf.mxu3  ;;  %v2557_v38 = vpop.f32.mrf.mxu1  ;;  %9774 = vst [vmem:[#allocation56_spill] sm:$0xff] %v8624_v42 }
 0x13a   : > { %v2458_v25 = vadd.f32 %v2457_v10, %v2409_v49 }
 0x13c   : > { %v2507_v30 = vadd.f32 %v2506_v29, %v2458_v25  ;;  %v7440_v29 = vld [vmem:[#allocation5 + $0x264] sm:$0xf] }
 0x13e   : > { %v8619_v4 = vadd.f32 %v2555_v11, %v2507_v30  ;;  %v2410_v18 = vpop.f32.mrf.mxu2  ;;  %v7472_v11 = vld [vmem:[#allocation5 + $0x364] sm:$0xf] }
 0x13f   : > { %v2411_v2 = vadd.f32 %v2410_v18, %v8515_v26  ;;  %v6241_v26 = vld [vmem:[#allocation5 + $0x270] sm:$0xf0] }
 0x140   : > { %v2511_v19 = vpop.f32.mrf.mxu0  ;;  %v6244_v49 = vor.u32 %v7440_v29, %v6241_v26 }
 0x141   : > { %v2459_v7 = vpop.f32.mrf.mxu3  ;;  %v2560_v46 = vpop.f32.mrf.mxu1 }
 0x142   : > { %v2460_v36 = vadd.f32 %v2459_v7, %v2411_v2  ;;  %2790 = vmatpush.bf16.msrb.mxu2 %v6244_v49  ;;  %v5799_v7 = vld [vmem:[%s8280_s1 + $0xd8] sm:$0xf] }
 0x143   : > { %2608 = vmatmul.bf16.gmra.mxu2 %v8622_v63  ;;  %2706 = vmatmul.bf16.gmra.mxu0 %v8342_v50 }
 0x144   : > { %v2509_v39 = vadd.f32 %v2508_v27, %v2460_v36  ;;  %2755 = vmatmul.bf16.gmra.mxu1 %v8346_v52  ;;  %v6372_v27 = vor.u32 %v7472_v11, %v6369_v62  ;;  %v7331_v36 = vld [vmem:[%s8280_s1 + $0xf4] sm:$0xf0]  ;;  %v7327_v52 = vld [vmem:[%s8280_s1 + $0xdc] sm:$0xf] }
 0x145   : > { %v8640_v11 = vor.u32 %v7331_v36, %v5799_v7 }
 0x146   : > { %2657 = vmatmul.bf16.gmra.mxu3 %v8624_v42  ;;  %v8630_v8 = vadd.f32 %v2557_v38, %v2509_v39  ;;  %v2413_v10 = vpop.f32.mrf.mxu2  ;;  %v5801_v42 = vld [vmem:[%s8280_s1 + $0xf8] sm:$0xf0] }
 0x147   : > { %v2414_v25 = vadd.f32 %v2413_v10, %v8537_v6  ;;  %2839 = vmatpush.bf16.msrb.mxu3 %v6372_v27  ;;  %9775 = vst [vmem:[#allocation57_spill] sm:$0xff] %v8640_v11  ;;  %v8642_v62 = vor.u32 %v7327_v52, %v5801_v42  ;;  %v6353_v52 = vld [vmem:[#allocation5 + $0x350] sm:$0xf0] }
 0x148   : > { %v2513_v13 = vpop.f32.mrf.mxu0 }
 0x149   : > { %v2462_v30 = vpop.f32.mrf.mxu3  ;;  %v2562_v18 = vpop.f32.mrf.mxu1  ;;  %9776 = vst [vmem:[#allocation58_spill] sm:$0xff] %v8642_v62 }
 0x14a   : > { %v2463_v3 = vadd.f32 %v2462_v30, %v2414_v25 }
 0x14c   : > { %v2512_v2 = vadd.f32 %v2511_v19, %v2463_v3  ;;  %v7436_v19 = vld [vmem:[#allocation5 + $0x244] sm:$0xf] }
 0x14e   : > { %v8637_v29 = vadd.f32 %v2560_v46, %v2512_v2  ;;  %v2415_v26 = vpop.f32.mrf.mxu2  ;;  %v7468_v46 = vld [vmem:[#allocation5 + $0x344] sm:$0xf] }
 0x14f   : > { %v2416_v38 = vadd.f32 %v2415_v26, %v8547_v28  ;;  %v6225_v28 = vld [vmem:[#allocation5 + $0x250] sm:$0xf0] }
 0x150   : > { %v2516_v6 = vpop.f32.mrf.mxu0  ;;  %v6228_v25 = vor.u32 %v7436_v19, %v6225_v28 }
 0x151   : > { %v2464_v39 = vpop.f32.mrf.mxu3  ;;  %v2565_v10 = vpop.f32.mrf.mxu1 }
 0x152   : > { %v2465_v49 = vadd.f32 %v2464_v39, %v2416_v38  ;;  %2791 = vmatpush.bf16.msrb.mxu2 %v6228_v25  ;;  %v5831_v39 = vld [vmem:[%s8280_s1 + $0x118] sm:$0xf] }
 0x153   : > { %2613 = vmatmul.bf16.gmra.mxu2 %v8640_v11  ;;  %2711 = vmatmul.bf16.gmra.mxu0 %v8362_v14 }
 0x154   : > { %v2514_v27 = vadd.f32 %v2513_v13, %v2465_v49  ;;  %2760 = vmatmul.bf16.gmra.mxu1 %v8366_v16  ;;  %v6356_v13 = vor.u32 %v7468_v46, %v6353_v52  ;;  %v7339_v49 = vld [vmem:[%s8280_s1 + $0x134] sm:$0xf0]  ;;  %v7335_v16 = vld [vmem:[%s8280_s1 + $0x11c] sm:$0xf] }
 0x155   : > { %v8658_v46 = vor.u32 %v7339_v49, %v5831_v39  ;;  %v6337_v49 = vld [vmem:[#allocation5 + $0x330] sm:$0xf0] }
 0x156   : > { %2662 = vmatmul.bf16.gmra.mxu3 %v8642_v62  ;;  %v8648_v42 = vadd.f32 %v2562_v18, %v2514_v27  ;;  %v2418_v30 = vpop.f32.mrf.mxu2  ;;  %v5833_v62 = vld [vmem:[%s8280_s1 + $0x138] sm:$0xf0] }
 0x157   : > { %v2419_v3 = vadd.f32 %v2418_v30, %v8569_v61  ;;  %2840 = vmatpush.bf16.msrb.mxu3 %v6356_v13  ;;  %9777 = vst [vmem:[#allocation59_spill] sm:$0xff] %v8658_v46  ;;  %v8660_v52 = vor.u32 %v7335_v16, %v5833_v62  ;;  %v7520_v13 = vld [vmem:[#allocation5 + $0x4e4] sm:$0xf] }
 0x158   : > { %v2518_v7 = vpop.f32.mrf.mxu0  ;;  %v7464_v62 = vld [vmem:[#allocation5 + $0x324] sm:$0xf] }
 0x159   : > { %v2467_v2 = vpop.f32.mrf.mxu3  ;;  %v2567_v26 = vpop.f32.mrf.mxu1  ;;  %9778 = vst [vmem:[#allocation60_spill] sm:$0xff] %v8660_v52 }
 0x15a   : > { %v2468_v36 = vadd.f32 %v2467_v2, %v2419_v3  ;;  %v6561_v3 = vld [vmem:[#allocation5 + $0x4f0] sm:$0xf0]  ;;  %v7552_v2 = vld [vmem:[#allocation5 + $0x5e4] sm:$0xf] }
 0x15c   : > { %v2517_v38 = vadd.f32 %v2516_v6, %v2468_v36  ;;  %v6689_v36 = vld [vmem:[#allocation5 + $0x5f0] sm:$0xf0] }
 0x15d   : > { %v6692_v16 = vor.u32 %v7552_v2, %v6689_v36  ;;  %v6673_v2 = vld [vmem:[#allocation5 + $0x5d0] sm:$0xf0] }
 0x15e   : > { %v8655_v19 = vadd.f32 %v2565_v10, %v2517_v38  ;;  %v2420_v28 = vpop.f32.mrf.mxu2  ;;  %v6564_v10 = vor.u32 %v7520_v13, %v6561_v3  ;;  %v6209_v38 = vld [vmem:[#allocation5 + $0x230] sm:$0xf0]  ;;  %v7548_v13 = vld [vmem:[#allocation5 + $0x5c4] sm:$0xf] }
 0x15f   : > { %v2421_v18 = vadd.f32 %v2420_v28, %v8579_v47  ;;  %v7432_v47 = vld [vmem:[#allocation5 + $0x224] sm:$0xf]  ;;  %2933 = vmatpush.bf16.msrb.mxu1 %v6692_v16 }
 0x160   : > { %v2521_v61 = vpop.f32.mrf.mxu0  ;;  %v6212_v39 = vor.u32 %v7432_v47, %v6209_v38  ;;  %2884 = vmatpush.bf16.msrb.mxu0 %v6564_v10  ;;  %v7512_v47 = vld [vmem:[#allocation5 + $0x4a4] sm:$0xf]  ;;  %v6529_v38 = vld [vmem:[#allocation5 + $0x4b0] sm:$0xf0] }
 0x161   : > { %v2469_v27 = vpop.f32.mrf.mxu3  ;;  %v2570_v30 = vpop.f32.mrf.mxu1  ;;  %v7544_v16 = vld [vmem:[#allocation5 + $0x5a4] sm:$0xf] }
 0x162   : > { %v2470_v25 = vadd.f32 %v2469_v27, %v2421_v18  ;;  %v6340_v18 = vor.u32 %v7464_v62, %v6337_v49  ;;  %v7516_v27 = vld [vmem:[#allocation5 + $0x4c4] sm:$0xf]  ;;  %2792 = vmatpush.bf16.msrb.mxu2 %v6212_v39  ;;  %v6657_v49 = vld [vmem:[#allocation5 + $0x5b0] sm:$0xf0]  ;;  %v5863_v39 = vld [vmem:[%s8280_s1 + $0x158] sm:$0xf] }
 0x163   : > { %2618 = vmatmul.bf16.gmra.mxu2 %v8658_v46  ;;  %2716 = vmatmul.bf16.gmra.mxu0 %v8304_v0  ;;  %v5865_v0 = vld [vmem:[%s8280_s1 + $0x178] sm:$0xf0] }
 0x164   : > { %v2519_v6 = vadd.f32 %v2518_v7, %v2470_v25  ;;  %2765 = vmatmul.bf16.gmra.mxu1 %v8308_v5  ;;  %v6545_v25 = vld [vmem:[#allocation5 + $0x4d0] sm:$0xf0]  ;;  %2841 = vmatpush.bf16.msrb.mxu3 %v6340_v18 }
 0x165   : > { %v6548_v5 = vor.u32 %v7516_v27, %v6545_v25  ;;  %v6660_v27 = vor.u32 %v7544_v16, %v6657_v49  ;;  %v7343_v25 = vld [vmem:[%s8280_s1 + $0x15c] sm:$0xf] }
 0x166   : > { %2667 = vmatmul.bf16.gmra.mxu3 %v8660_v52  ;;  %v8666_v28 = vadd.f32 %v2567_v26, %v2519_v6  ;;  %v2423_v7 = vpop.f32.mrf.mxu2  ;;  %v6676_v26 = vor.u32 %v7548_v13, %v6673_v2  ;;  %v6513_v13 = vld [vmem:[#allocation5 + $0x490] sm:$0xf0] }
 0x167   : > { %v2424_v3 = vadd.f32 %v2423_v7, %v8480_v12  ;;  %2885 = vmatpush.bf16.msrb.mxu0 %v6548_v5  ;;  %v6532_v12 = vor.u32 %v7512_v47, %v6529_v38  ;;  %v7347_v7 = vld [vmem:[%s8280_s1 + $0x174] sm:$0xf0]  ;;  %v7540_v5 = vld [vmem:[#allocation5 + $0x584] sm:$0xf]  ;;  %v8678_v38 = vor.u32 %v7343_v25, %v5865_v0  ;;  %v6193_v25 = vld [vmem:[#allocation5 + $0x210] sm:$0xf0] }
 0x168   : > { %v2523_v36 = vpop.f32.mrf.mxu0  ;;  %2934 = vmatpush.bf16.msrb.mxu1 %v6676_v26  ;;  %v8676_v26 = vor.u32 %v7347_v7, %v5863_v39  ;;  %v7536_v39 = vld [vmem:[#allocation5 + $0x564] sm:$0xf]  ;;  %v6625_v7 = vld [vmem:[#allocation5 + $0x570] sm:$0xf0] }
 0x169   : > { %v2472_v52 = vpop.f32.mrf.mxu3  ;;  %v2572_v10 = vpop.f32.mrf.mxu1  ;;  %9779 = vst [vmem:[#allocation61_spill] sm:$0xff] %v8678_v38  ;;  %v7428_v0 = vld [vmem:[#allocation5 + $0x204] sm:$0xf] }
 0x16a   : > { %v2473_v6 = vadd.f32 %v2472_v52, %v2424_v3  ;;  %v7508_v52 = vld [vmem:[#allocation5 + $0x484] sm:$0xf] }
 0x16b   : > { %2886 = vmatpush.bf16.msrb.mxu0 %v6532_v12 }
 0x16c   : > { %v2522_v62 = vadd.f32 %v2521_v61, %v2473_v6  ;;  %2935 = vmatpush.bf16.msrb.mxu1 %v6660_v27  ;;  %v6516_v61 = vor.u32 %v7508_v52, %v6513_v13  ;;  %v6641_v6 = vld [vmem:[#allocation5 + $0x590] sm:$0xf0]  ;;  %v7460_v52 = vld [vmem:[#allocation5 + $0x304] sm:$0xf]  ;;  %v6196_v13 = vor.u32 %v7428_v0, %v6193_v25 }
 0x16d   : > { %v6644_v16 = vor.u32 %v7540_v5, %v6641_v6  ;;  %v6321_v5 = vld [vmem:[#allocation5 + $0x310] sm:$0xf0]  ;;  %v7496_v0 = vld [vmem:[#allocation5 + $0x424] sm:$0xf] }
 0x16e   : > { %v8673_v46 = vadd.f32 %v2570_v30, %v2522_v62  ;;  %v2425_v18 = vpop.f32.mrf.mxu2  ;;  %v7504_v30 = vld [vmem:[#allocation5 + $0x464] sm:$0xf]  ;;  %v6497_v62 = vld [vmem:[#allocation5 + $0x470] sm:$0xf0]  ;;  %2793 = vmatpush.bf16.msrb.mxu2 %v6196_v13  ;;  %v5895_v13 = vld [vmem:[%s8280_s1 + $0x198] sm:$0xf] }
 0x16f   : > { %v2426_v3 = vadd.f32 %v2425_v18, %v8502_v31  ;;  %2887 = vmatpush.bf16.msrb.mxu0 %v6516_v61  ;;  %v6500_v31 = vor.u32 %v7504_v30, %v6497_v62  ;;  %v6628_v18 = vor.u32 %v7536_v39, %v6625_v7  ;;  %v7500_v61 = vld [vmem:[#allocation5 + $0x444] sm:$0xf]  ;;  %v6481_v6 = vld [vmem:[#allocation5 + $0x450] sm:$0xf0] }
 0x170   : > { %v2526_v47 = vpop.f32.mrf.mxu0  ;;  %2936 = vmatpush.bf16.msrb.mxu1 %v6644_v16  ;;  %v7532_v16 = vld [vmem:[#allocation5 + $0x544] sm:$0xf]  ;;  %v6484_v62 = vor.u32 %v7500_v61, %v6481_v6  ;;  %v6609_v39 = vld [vmem:[#allocation5 + $0x550] sm:$0xf0]  ;;  %v7351_v6 = vld [vmem:[%s8280_s1 + $0x19c] sm:$0xf] }
 0x171   : > { %v2474_v2 = vpop.f32.mrf.mxu3  ;;  %v2575_v12 = vpop.f32.mrf.mxu1  ;;  %v6465_v25 = vld [vmem:[#allocation5 + $0x430] sm:$0xf0] }
 0x172   : > { %v2475_v49 = vadd.f32 %v2474_v2, %v2426_v3  ;;  %v6324_v2 = vor.u32 %v7460_v52, %v6321_v5  ;;  %v6593_v5 = vld [vmem:[#allocation5 + $0x530] sm:$0xf0] }
 0x173   : > { %2623 = vmatmul.bf16.gmra.mxu2 %v8676_v26  ;;  %2721 = vmatmul.bf16.gmra.mxu0 %v8324_v58 }
 0x174   : > { %v2524_v27 = vadd.f32 %v2523_v36, %v2475_v49  ;;  %2770 = vmatmul.bf16.gmra.mxu1 %v8328_v1  ;;  %2888 = vmatpush.bf16.msrb.mxu0 %v6500_v31  ;;  %v5897_v1 = vld [vmem:[%s8280_s1 + $0x1b8] sm:$0xf0] }
 0x175   : > { %2937 = vmatpush.bf16.msrb.mxu1 %v6628_v18  ;;  %2842 = vmatpush.bf16.msrb.mxu3 %v6324_v2  ;;  %v7528_v18 = vld [vmem:[#allocation5 + $0x524] sm:$0xf] }
 0x176   : > { %2672 = vmatmul.bf16.gmra.mxu3 %v8678_v38  ;;  %v8684_v3 = vadd.f32 %v2572_v10, %v2524_v27  ;;  %v2428_v36 = vpop.f32.mrf.mxu2  ;;  %v6612_v10 = vor.u32 %v7532_v16, %v6609_v39  ;;  %v6596_v61 = vor.u32 %v7528_v18, %v6593_v5  ;;  %v7492_v16 = vld [vmem:[#allocation5 + $0x404] sm:$0xf] }
 0x177   : > { %v2429_v49 = vadd.f32 %v2428_v36, %v8512_v37  ;;  %v6468_v37 = vor.u32 %v7496_v0, %v6465_v25  ;;  %v7355_v36 = vld [vmem:[%s8280_s1 + $0x1b4] sm:$0xf0]  ;;  %v8696_v25 = vor.u32 %v7351_v6, %v5897_v1  ;;  %v7616_v1 = vld [vmem:[#allocation5 + $0x7e4] sm:$0xf] }
 0x178   : > { %v2528_v7 = vpop.f32.mrf.mxu0  ;;  %2889 = vmatpush.bf16.msrb.mxu0 %v6484_v62 }
 0x179   : > { %v2477_v30 = vpop.f32.mrf.mxu3  ;;  %v2577_v31 = vpop.f32.mrf.mxu1  ;;  %2938 = vmatpush.bf16.msrb.mxu1 %v6612_v10  ;;  %v8694_v10 = vor.u32 %v7355_v36, %v5895_v13  ;;  %v6945_v36 = vld [vmem:[#allocation5 + $0x7f0] sm:$0xf0] }
 0x17a   : > { %v2478_v27 = vadd.f32 %v2477_v30, %v2429_v49  ;;  %v6449_v49 = vld [vmem:[#allocation5 + $0x410] sm:$0xf0]  ;;  %v7524_v30 = vld [vmem:[#allocation5 + $0x504] sm:$0xf]  ;;  %v6948_v6 = vor.u32 %v7616_v1, %v6945_v36 }
 0x17c   : > { %v2527_v52 = vadd.f32 %v2526_v47, %v2478_v27  ;;  %2890 = vmatpush.bf16.msrb.mxu0 %v6468_v37  ;;  %v6452_v47 = vor.u32 %v7492_v16, %v6449_v49  ;;  %v6577_v27 = vld [vmem:[#allocation5 + $0x510] sm:$0xf0]  ;;  %3031 = vmatpush.bf16.msra.mxu3 %v6948_v6 }
 0x17d   : > { %2939 = vmatpush.bf16.msrb.mxu1 %v6596_v61  ;;  %v6580_v18 = vor.u32 %v7524_v30, %v6577_v27  ;;  %v7363_v27 = vld [vmem:[%s8280_s1 + $0x1f4] sm:$0xf0] }
 0x17e   : > { %v8691_v38 = vadd.f32 %v2575_v12, %v2527_v52  ;;  %v2430_v2 = vpop.f32.mrf.mxu2  ;;  %v6817_v52 = vld [vmem:[#allocation5 + $0x6f0] sm:$0xf0] }
 0x17f   : > { %v2431_v62 = vadd.f32 %v2430_v2, %v8534_v41  ;;  %v7584_v41 = vld [vmem:[#allocation5 + $0x6e4] sm:$0xf] }
 0x180   : > { %v2531_v0 = vpop.f32.mrf.mxu0  ;;  %2891 = vmatpush.bf16.msrb.mxu0 %v6452_v47  ;;  %v6820_v13 = vor.u32 %v7584_v41, %v6817_v52  ;;  %v5927_v47 = vld [vmem:[%s8280_s1 + $0x1d8] sm:$0xf] }
 0x181   : > { %v2479_v39 = vpop.f32.mrf.mxu3  ;;  %v2580_v37 = vpop.f32.mrf.mxu1  ;;  %2940 = vmatpush.bf16.msrb.mxu1 %v6580_v18  ;;  %v7359_v18 = vld [vmem:[%s8280_s1 + $0x1dc] sm:$0xf]  ;;  %v8712_v1 = vor.u32 %v7363_v27, %v5927_v47  ;;  %v6929_v27 = vld [vmem:[#allocation5 + $0x7d0] sm:$0xf0] }
 0x182   : > { %v2480_v5 = vadd.f32 %v2479_v39, %v2431_v62  ;;  %2982 = vmatpush.bf16.msra.mxu2 %v6820_v13 }
 0x183   : > { %2628 = vmatmul.bf16.gmra.mxu2 %v8694_v10  ;;  %2726 = vmatmul.bf16.gmra.mxu0 %v8344_v51 }
 0x184   : > { %v2529_v12 = vadd.f32 %v2528_v7, %v2480_v5  ;;  %2775 = vmatmul.bf16.gmra.mxu1 %v8348_v53  ;;  %v5929_v5 = vld [vmem:[%s8280_s1 + $0x1f8] sm:$0xf0]  ;;  %s8048_s1 = scalar_lea.hbm %s8047_s9, 128 }
 0x185   : > { %v8714_v36 = vor.u32 %v7359_v18, %v5929_v5  ;;  %p8049_p1 = scmp.ne.s32.totalorder %s8047_s9, %s8048_s1  ;;  %p8054_p9 = scmp.lt.s32.totalorder %s8052_s20, %s8048_s1 }
 0x186   : > { %2677 = vmatmul.bf16.gmra.mxu3 %v8696_v25  ;;  %v8702_v61 = vadd.f32 %v2577_v31, %v2529_v12  ;;  %v2433_v7 = vpop.f32.mrf.mxu2 }
 0x187   : > { %v2434_v2 = vadd.f32 %v2433_v7, %v8544_v40  ;;  %9780 = vst [vmem:[#allocation62_spill] sm:$0xff] %v8714_v36  ;;  %p8050_p4 = pnand %p8049_p1, %p8249_p5  ;;  %p8055_p2 = por %p8054_p9, %p8053_p11 }
 0x188   : > { %v2533_v49 = vpop.f32.mrf.mxu0 }
 0x189   : > { %v2482_v16 = vpop.f32.mrf.mxu3  ;;  %v2582_v62 = vpop.f32.mrf.mxu1  ;;  %p8051_p8 = pneg %p8050_p4 }
 0x18a   : > { %v2483_v30 = vadd.f32 %v2482_v16, %v2434_v2  ;;  %v6801_v2 = vld [vmem:[#allocation5 + $0x6d0] sm:$0xf0]  ;;  %v7612_v16 = vld [vmem:[#allocation5 + $0x7c4] sm:$0xf] }
 0x18b   : > { %v6932_v18 = vor.u32 %v7612_v16, %v6929_v27  ;;  %p8056_p10 = pnand %p8055_p2, %p8051_p8 }
 0x18c   : > { %v2532_v39 = vadd.f32 %v2531_v0, %v2483_v30 }
 0x18d   : > { %3032 = vmatpush.bf16.msra.mxu3 %v6932_v18 }
 0x18e   : > { %v8709_v41 = vadd.f32 %v2580_v37, %v2532_v39  ;;  %v2435_v52 = vpop.f32.mrf.mxu2  ;;  %v7580_v37 = vld [vmem:[#allocation5 + $0x6c4] sm:$0xf] }
 0x18f   : > { %v2436_v31 = vadd.f32 %v2435_v52, %v8566_v9  ;;  %v6804_v47 = vor.u32 %v7580_v37, %v6801_v2 }
 0x190   : > { %v2536_v40 = vpop.f32.mrf.mxu0 }
 0x191   : > { %v2484_v12 = vpop.f32.mrf.mxu3  ;;  %v2585_v7 = vpop.f32.mrf.mxu1  ;;  %2983 = vmatpush.bf16.msra.mxu2 %v6804_v47  ;;  %v6913_v47 = vld [vmem:[#allocation5 + $0x7b0] sm:$0xf0] }
 0x192   : > { %v2485_v13 = vadd.f32 %v2484_v12, %v2436_v31  ;;  %v7879_v12 = vld [vmem:[#allocation7] sm:$0xf] }
 0x193   : > { %2633 = vmatmul.bf16.gmra.mxu2 %v8712_v1  ;;  %2731 = vmatmul.bf16.gmra.mxu0 %v8364_v15 }
 0x194   : > { %v2534_v6 = vadd.f32 %v2533_v49, %v2485_v13  ;;  %2780 = vmatmul.bf16.gmra.mxu1 %v8368_v17  ;;  %v8723_v13 = vperm.slane %v7879_v12, 1 }
 0x196   : > { %2682 = vmatmul.bf16.gmra.mxu3 %v8714_v36  ;;  %v8720_v0 = vadd.f32 %v2582_v62, %v2534_v6  ;;  %v2438_v9 = vpop.f32.mrf.mxu2 }
 0x197   : > { %v2439_v30 = vadd.f32 %v2438_v9, %v8576_v60 }
 0x198   : > { %v2538_v49 = vpop.f32.mrf.mxu0 }
 0x199   : > { %v2487_v39 = vpop.f32.mrf.mxu3  ;;  %v2587_v52 = vpop.f32.mrf.mxu1 }
 0x19a   : > { %v2488_v5 = vadd.f32 %v2487_v39, %v2439_v30 }
 0x19c   : > { %v2537_v31 = vadd.f32 %v2536_v40, %v2488_v5  ;;  %v7576_v40 = vld [vmem:[#allocation5 + $0x6a4] sm:$0xf] }
 0x19e   : > { %v8725_v62 = vadd.f32 %v2585_v7, %v2537_v31  ;;  %v2440_v6 = vpop.f32.mrf.mxu2  ;;  %v6785_v7 = vld [vmem:[#allocation5 + $0x6b0] sm:$0xf0] }
 0x19f   : > { %v2441_v17 = vadd.f32 %v2440_v6, %v8590_v48  ;;  %v7608_v48 = vld [vmem:[#allocation5 + $0x7a4] sm:$0xf]  ;;  %v6788_v39 = vor.u32 %v7576_v40, %v6785_v7 }
 0x1a0   : > { %v2697_v60 = vpop.f32.mrf.mxu0  ;;  %v6916_v27 = vor.u32 %v7608_v48, %v6913_v47  ;;  %v6769_v47 = vld [vmem:[#allocation5 + $0x690] sm:$0xf0] }
 0x1a1   : > { %v2489_v36 = vpop.f32.mrf.mxu3  ;;  %v2698_v37 = vadd.f32 %v2697_v60, %v8723_v13  ;;  %v2746_v2 = vpop.f32.mrf.mxu1  ;;  %2984 = vmatpush.bf16.msra.mxu2 %v6788_v39 }
 0x1a2   : > { %v2490_v9 = vadd.f32 %v2489_v36, %v2441_v17  ;;  %3033 = vmatpush.bf16.msra.mxu3 %v6916_v27 }
 0x1a3   : > { %v8729_v30 = vadd.f32 %v2746_v2, %v2698_v37  ;;  %2794 = vmatmul.bf16.vlgmr.msrb.gmra.mxu2 %v8382_v32  ;;  %2892 = vmatmul.bf16.vlgmr.msrb.gmra.mxu0 %v8384_v33 }
 0x1a4   : > { %v2539_v16 = vadd.f32 %v2538_v49, %v2490_v9  ;;  %2941 = vmatmul.bf16.vlgmr.msrb.gmra.mxu1 %v8388_v35 }
 0x1a6   : > { %2843 = vmatmul.bf16.vlgmr.msrb.gmra.mxu3 %v8386_v34  ;;  %v8735_v17 = vadd.f32 %v2587_v52, %v2539_v16  ;;  %v2599_v36 = vpop.f32.mrf.mxu2 }
 0x1a7   : > { %v2600_v49 = vadd.f32 %v2599_v36, %v8601_v43  ;;  %v7604_v36 = vld [vmem:[#allocation5 + $0x784] sm:$0xf] }
 0x1a8   : > { %v2699_v5 = vpop.f32.mrf.mxu0 }
 0x1a9   : > { %v2648_v18 = vpop.f32.mrf.mxu3  ;;  %v2700_v12 = vadd.f32 %v2699_v5, %v8723_v13  ;;  %v2748_v6 = vpop.f32.mrf.mxu1  ;;  %v6897_v5 = vld [vmem:[#allocation5 + $0x790] sm:$0xf0] }
 0x1aa   : > { %v2649_v31 = vadd.f32 %v2648_v18, %v2600_v49 }
 0x1ab   : > { %v8739_v60 = vadd.f32 %v2748_v6, %v2700_v12 }
 0x1ac   : > { %v3928_v16 = vmul.f32 0.2, %v2649_v31  ;;  %vm3864_vm0 = vcmp.gt.f32.partialorder %v2649_v31, 0.0 }
 0x1ae   : > { %v2601_v9 = vpop.f32.mrf.mxu2  ;;  %v3992_v27 = vsel %vm3864_vm0, %v2649_v31, %v3928_v16 }
 0x1af   : > { %v2602_v37 = vadd.f32 %v2601_v9, %v8612_v44  ;;  %v7572_v44 = vld [vmem:[#allocation5 + $0x684] sm:$0xf]  ;;  %v6900_v9 = vor.u32 %v7604_v36, %v6897_v5 }
 0x1b0   : > { %v2702_v52 = vpop.f32.mrf.mxu0  ;;  %v6772_v18 = vor.u32 %v7572_v44, %v6769_v47 }
 0x1b1   : > { %v2650_v2 = vpop.f32.mrf.mxu3  ;;  %v2703_v7 = vadd.f32 %v2702_v52, %v8723_v13  ;;  %v2751_v43 = vpop.f32.mrf.mxu1  ;;  %3034 = vmatpush.bf16.msra.mxu3 %v6900_v9 }
 0x1b2   : > { %v2651_v40 = vadd.f32 %v2650_v2, %v2602_v37  ;;  %2985 = vmatpush.bf16.msra.mxu2 %v6772_v18  ;;  %v7600_v18 = vld [vmem:[#allocation5 + $0x764] sm:$0xf] }
 0x1b3   : > { %v8743_v39 = vadd.f32 %v2751_v43, %v2703_v7  ;;  %2799 = vmatmul.bf16.gmra.mxu2 %v8402_v54  ;;  %2897 = vmatmul.bf16.gmra.mxu0 %v8404_v55 }
 0x1b4   : > { %vm3868_vm1 = vcmp.gt.f32.partialorder %v2651_v40, 0.0  ;;  %v3932_v48 = vmul.f32 0.2, %v2651_v40  ;;  %2946 = vmatmul.bf16.gmra.mxu1 %v8408_v59 }
 0x1b6   : > { %2848 = vmatmul.bf16.gmra.mxu3 %v8406_v56  ;;  %v3996_v49 = vsel %vm3868_vm1, %v2651_v40, %v3932_v48  ;;  %v2604_v6 = vpop.f32.mrf.mxu2 }
 0x1b7   : > { %v8749_v12 = vpack.c.bf16 %v3996_v49, %v3992_v27  ;;  %v2605_v37 = vadd.f32 %v2604_v6, %v8619_v4  ;;  %v6881_v6 = vld [vmem:[#allocation5 + $0x770] sm:$0xf0] }
 0x1b8   : > { %v2704_v52 = vpop.f32.mrf.mxu0 }
 0x1b9   : > { %9781 = vst [vmem:[#allocation63_spill] sm:$0xff] %v8749_v12  ;;  %v2653_v2 = vpop.f32.mrf.mxu3  ;;  %v2705_v43 = vadd.f32 %v2704_v52, %v8723_v13  ;;  %v2753_v59 = vpop.f32.mrf.mxu1  ;;  %v6884_v52 = vor.u32 %v7600_v18, %v6881_v6 }
 0x1ba   : > { %v2654_v7 = vadd.f32 %v2653_v2, %v2605_v37 }
 0x1bb   : > { %v8753_v56 = vadd.f32 %v2753_v59, %v2705_v43  ;;  %v7568_v59 = vld [vmem:[#allocation5 + $0x664] sm:$0xf]  ;;  %3035 = vmatpush.bf16.msra.mxu3 %v6884_v52  ;;  %v9786_v52 = vld [vmem:[#allocation37_spill] sm:$0xff] }
 0x1bc   : > { %v3936_v44 = vmul.f32 0.2, %v2654_v7  ;;  %vm3872_vm2 = vcmp.gt.f32.partialorder %v2654_v7, 0.0 }
 0x1be   : > { %v2606_v31 = vpop.f32.mrf.mxu2  ;;  %v4000_v9 = vsel %vm3872_vm2, %v2654_v7, %v3936_v44 }
 0x1bf   : > { %v2607_v16 = vadd.f32 %v2606_v31, %v8630_v8  ;;  %v6753_v8 = vld [vmem:[#allocation5 + $0x670] sm:$0xf0] }
 0x1c0   : > { %v2707_v48 = vpop.f32.mrf.mxu0  ;;  %v6756_v5 = vor.u32 %v7568_v59, %v6753_v8 }
 0x1c1   : > { %v2655_v40 = vpop.f32.mrf.mxu3  ;;  %v2708_v36 = vadd.f32 %v2707_v48, %v8723_v13  ;;  %v2756_v4 = vpop.f32.mrf.mxu1 }
 0x1c2   : > { %v2656_v47 = vadd.f32 %v2655_v40, %v2607_v16  ;;  %2986 = vmatpush.bf16.msra.mxu2 %v6756_v5 }
 0x1c3   : > { %v8757_v49 = vadd.f32 %v2756_v4, %v2708_v36  ;;  %2804 = vmatmul.bf16.gmra.mxu2 %v8422_v20  ;;  %2902 = vmatmul.bf16.gmra.mxu0 %v8424_v21 }
 0x1c4   : > { %vm3876_vm3 = vcmp.gt.f32.partialorder %v2656_v47, 0.0  ;;  %v3940_v27 = vmul.f32 0.2, %v2656_v47  ;;  %2951 = vmatmul.bf16.gmra.mxu1 %v8428_v23  ;;  %v6167_v23 = vld [vmem:[#allocation5 + $0x1c8] sm:$0xf] }
 0x1c6   : > { %2853 = vmatmul.bf16.gmra.mxu3 %v8426_v22  ;;  %v4004_v37 = vsel %vm3876_vm3, %v2656_v47, %v3940_v27  ;;  %v2609_v2 = vpop.f32.mrf.mxu2 }
 0x1c7   : > { %v8763_v43 = vpack.c.bf16 %v4004_v37, %v4000_v9  ;;  %v2610_v31 = vadd.f32 %v2609_v2, %v8637_v29  ;;  %v9783_v9 = vld [vmem:[#allocation34_spill] sm:$0xff]  ;;  %v9784_v37 = vld [vmem:[#allocation35_spill] sm:$0xff]  ;;  %v9785_v2 = vld [vmem:[#allocation36_spill] sm:$0xff] }
 0x1c8   : > { %v2709_v40 = vpop.f32.mrf.mxu0 }
 0x1c9   : > { %9782 = vst [vmem:[#allocation64_spill] sm:$0xff] %v8763_v43  ;;  %v2658_v16 = vpop.f32.mrf.mxu3  ;;  %v2710_v36 = vadd.f32 %v2709_v40, %v8723_v13  ;;  %v2758_v4 = vpop.f32.mrf.mxu1 }
 0x1ca   : > { %v2659_v48 = vadd.f32 %v2658_v16, %v2610_v31  ;;  %v6737_v31 = vld [vmem:[#allocation5 + $0x650] sm:$0xf0]  ;;  %v7596_v16 = vld [vmem:[#allocation5 + $0x744] sm:$0xf] }
 0x1cb   : > { %v8767_v12 = vadd.f32 %v2758_v4, %v2710_v36  ;;  %v6865_v36 = vld [vmem:[#allocation5 + $0x750] sm:$0xf0] }
 0x1cc   : > { %v3944_v27 = vmul.f32 0.2, %v2659_v48  ;;  %vm3880_vm4 = vcmp.gt.f32.partialorder %v2659_v48, 0.0 }
 0x1ce   : > { %v2611_v59 = vpop.f32.mrf.mxu2  ;;  %v4008_v4 = vsel %vm3880_vm4, %v2659_v48, %v3944_v27 }
 0x1cf   : > { %v2612_v7 = vadd.f32 %v2611_v59, %v8648_v42  ;;  %v7564_v42 = vld [vmem:[#allocation5 + $0x644] sm:$0xf] }
 0x1d0   : > { %v2712_v47 = vpop.f32.mrf.mxu0  ;;  %v6740_v40 = vor.u32 %v7564_v42, %v6737_v31 }
 0x1d1   : > { %v2660_v44 = vpop.f32.mrf.mxu3  ;;  %v2713_v18 = vadd.f32 %v2712_v47, %v8723_v13  ;;  %v2761_v29 = vpop.f32.mrf.mxu1 }
 0x1d2   : > { %v2661_v8 = vadd.f32 %v2660_v44, %v2612_v7  ;;  %v6868_v44 = vor.u32 %v7596_v16, %v6865_v36  ;;  %2987 = vmatpush.bf16.msra.mxu2 %v6740_v40  ;;  %v6055_v40 = vld [vmem:[#allocation5 + $0xe8] sm:$0xf]  ;;  %v7395_v36 = vld [vmem:[#allocation5 + $0xf4] sm:$0xf0] }
 0x1d3   : > { %v8771_v6 = vadd.f32 %v2761_v29, %v2713_v18  ;;  %2809 = vmatmul.bf16.gmra.mxu2 %v9783_v9  ;;  %2907 = vmatmul.bf16.gmra.mxu0 %v9784_v37 }
 0x1d4   : > { %vm3884_vm5 = vcmp.gt.f32.partialorder %v2661_v8, 0.0  ;;  %v3948_v5 = vmul.f32 0.2, %v2661_v8  ;;  %2956 = vmatmul.bf16.gmra.mxu1 %v9786_v52  ;;  %3036 = vmatpush.bf16.msra.mxu3 %v6868_v44  ;;  %v9790_v44 = vld [vmem:[#allocation40_spill] sm:$0xff] }
 0x1d6   : > { %2858 = vmatmul.bf16.gmra.mxu3 %v9785_v2  ;;  %v4012_v59 = vsel %vm3884_vm5, %v2661_v8, %v3948_v5  ;;  %v2614_v7 = vpop.f32.mrf.mxu2 }
 0x1d7   : > { %v8777_v47 = vpack.c.bf16 %v4012_v59, %v4008_v4  ;;  %v2615_v18 = vadd.f32 %v2614_v7, %v8655_v19  ;;  %v6183_v4 = vld [vmem:[#allocation5 + $0x1e8] sm:$0xf]  ;;  %v7427_v7 = vld [vmem:[#allocation5 + $0x1f4] sm:$0xf0] }
 0x1d8   : > { %v2714_v43 = vpop.f32.mrf.mxu0 }
 0x1d9   : > { %9787 = vst [vmem:[#allocation65_spill] sm:$0xff] %v8777_v47  ;;  %v2663_v29 = vpop.f32.mrf.mxu3  ;;  %v2715_v52 = vadd.f32 %v2714_v43, %v8723_v13  ;;  %v2763_v37 = vpop.f32.mrf.mxu1  ;;  %v6849_v47 = vld [vmem:[#allocation5 + $0x730] sm:$0xf0] }
 0x1da   : > { %v2664_v2 = vadd.f32 %v2663_v29, %v2615_v18  ;;  %v9791_v18 = vld [vmem:[#allocation41_spill] sm:$0xff]  ;;  %v7560_v29 = vld [vmem:[#allocation5 + $0x624] sm:$0xf] }
 0x1db   : > { %v8781_v9 = vadd.f32 %v2763_v37, %v2715_v52  ;;  %v9788_v37 = vld [vmem:[#allocation38_spill] sm:$0xff]  ;;  %v9789_v52 = vld [vmem:[#allocation39_spill] sm:$0xff] }
 0x1dc   : > { %vm3888_vm6 = vcmp.gt.f32.partialorder %v2664_v2, 0.0  ;;  %v3952_v5 = vmul.f32 0.2, %v2664_v2 }
 0x1de   : > { %v2616_v42 = vpop.f32.mrf.mxu2 }
 0x1df   : > { %v2617_v48 = vadd.f32 %v2616_v42, %v8666_v28  ;;  %v6056_v28 = vor.u32 %v7395_v36, %v6055_v40  ;;  %v6721_v42 = vld [vmem:[#allocation5 + $0x630] sm:$0xf0]  ;;  %v6039_v40 = vld [vmem:[#allocation5 + $0xc8] sm:$0xf]  ;;  %v7391_v36 = vld [vmem:[#allocation5 + $0xd4] sm:$0xf0] }
 0x1e0   : > { %v2717_v8 = vpop.f32.mrf.mxu0 }
 0x1e1   : > { %v2665_v27 = vpop.f32.mrf.mxu3  ;;  %v2718_v19 = vadd.f32 %v2717_v8, %v8723_v13  ;;  %v2766_v16 = vpop.f32.mrf.mxu1  ;;  %v6724_v8 = vor.u32 %v7560_v29, %v6721_v42  ;;  %3080 = vmatpush.bf16.msra.mxu0 %v6056_v28  ;;  %v6151_v42 = vld [vmem:[#allocation5 + $0x1a8] sm:$0xf] }
 0x1e2   : > { %v2666_v31 = vadd.f32 %v2665_v27, %v2617_v48  ;;  %v6184_v48 = vor.u32 %v7427_v7, %v6183_v4  ;;  %v7592_v27 = vld [vmem:[#allocation5 + $0x724] sm:$0xf]  ;;  %v6040_v4 = vor.u32 %v7391_v36, %v6039_v40  ;;  %v7423_v7 = vld [vmem:[#allocation5 + $0x1d4] sm:$0xf0] }
 0x1e3   : > { %v8785_v43 = vadd.f32 %v2766_v16, %v2718_v19  ;;  %2814 = vmatmul.bf16.gmra.mxu2 %v9788_v37  ;;  %2912 = vmatmul.bf16.gmra.mxu0 %v9789_v52  ;;  %v4016_v19 = vsel %vm3888_vm6, %v2664_v2, %v3952_v5  ;;  %v6852_v52 = vor.u32 %v7592_v27, %v6849_v47  ;;  %v6023_v47 = vld [vmem:[#allocation5 + $0xa8] sm:$0xf]  ;;  %v7415_v40 = vld [vmem:[#allocation5 + $0x194] sm:$0xf0] }
 0x1e4   : > { %vm3892_vm7 = vcmp.gt.f32.partialorder %v2666_v31, 0.0  ;;  %v3956_v59 = vmul.f32 0.2, %v2666_v31  ;;  %2961 = vmatmul.bf16.gmra.mxu1 %v9791_v18  ;;  %2988 = vmatpush.bf16.msra.mxu2 %v6724_v8  ;;  %v6168_v29 = vor.u32 %v7423_v7, %v6167_v23  ;;  %v6135_v23 = vld [vmem:[#allocation5 + $0x188] sm:$0xf] }
 0x1e5   : > { %3129 = vmatpush.bf16.msra.mxu1 %v6184_v48  ;;  %3037 = vmatpush.bf16.msra.mxu3 %v6852_v52  ;;  %v7383_v52 = vld [vmem:[#allocation5 + $0x94] sm:$0xf0] }
 0x1e6   : > { %2863 = vmatmul.bf16.gmra.mxu3 %v9790_v44  ;;  %v4020_v16 = vsel %vm3892_vm7, %v2666_v31, %v3956_v59  ;;  %v2619_v37 = vpop.f32.mrf.mxu2  ;;  %3081 = vmatpush.bf16.msra.mxu0 %v6040_v4  ;;  %v7387_v59 = vld [vmem:[#allocation5 + $0xb4] sm:$0xf0]  ;;  %v6136_v4 = vor.u32 %v7415_v40, %v6135_v23  ;;  %v7556_v23 = vld [vmem:[#allocation5 + $0x604] sm:$0xf] }
 0x1e7   : > { %v8793_v44 = vpack.c.bf16 %v4020_v16, %v4016_v19  ;;  %v2620_v18 = vadd.f32 %v2619_v37, %v8673_v46  ;;  %v6024_v27 = vor.u32 %v7387_v59, %v6023_v47  ;;  %v7419_v46 = vld [vmem:[#allocation5 + $0x1b4] sm:$0xf0]  ;;  %v6007_v19 = vld [vmem:[#allocation5 + $0x88] sm:$0xf] }
 0x1e8   : > { %v2719_v28 = vpop.f32.mrf.mxu0  ;;  %v6152_v37 = vor.u32 %v7419_v46, %v6151_v42  ;;  %v6008_v16 = vor.u32 %v7383_v52, %v6007_v19  ;;  %v7379_v47 = vld [vmem:[#allocation5 + $0x74] sm:$0xf0]  ;;  %v6119_v59 = vld [vmem:[#allocation5 + $0x168] sm:$0xf]  ;;  %v9794_v46 = vld [vmem:[#allocation43_spill] sm:$0xff] }
 0x1e9   : > { %9792 = vst [vmem:[#allocation66_spill] sm:$0xff] %v8793_v44  ;;  %v2668_v22 = vpop.f32.mrf.mxu3  ;;  %v2720_v5 = vadd.f32 %v2719_v28, %v8723_v13  ;;  %v2768_v31 = vpop.f32.mrf.mxu1  ;;  %3130 = vmatpush.bf16.msra.mxu1 %v6168_v29  ;;  %v9795_v19 = vld [vmem:[#allocation44_spill] sm:$0xff]  ;;  %v9796_v52 = vld [vmem:[#allocation45_spill] sm:$0xff] }
 0x1ea   : > { %v2669_v2 = vadd.f32 %v2668_v22, %v2620_v18  ;;  %3082 = vmatpush.bf16.msra.mxu0 %v6024_v27 }
 0x1eb   : > { %v8797_v48 = vadd.f32 %v2768_v31, %v2720_v5  ;;  %v5991_v31 = vld [vmem:[#allocation5 + $0x68] sm:$0xf] }
 0x1ec   : > { %vm3896_vm8 = vcmp.gt.f32.partialorder %v2669_v2, 0.0  ;;  %v3960_v7 = vmul.f32 0.2, %v2669_v2 }
 0x1ed   : > { %3131 = vmatpush.bf16.msra.mxu1 %v6152_v37  ;;  %v5992_v37 = vor.u32 %v7379_v47, %v5991_v31  ;;  %v5975_v31 = vld [vmem:[#allocation5 + $0x48] sm:$0xf]  ;;  %v7375_v47 = vld [vmem:[#allocation5 + $0x54] sm:$0xf0] }
 0x1ee   : > { %v2621_v8 = vpop.f32.mrf.mxu2  ;;  %3083 = vmatpush.bf16.msra.mxu0 %v6008_v16  ;;  %v7588_v16 = vld [vmem:[#allocation5 + $0x704] sm:$0xf] }
 0x1ef   : > { %v2622_v22 = vadd.f32 %v2621_v8, %v8684_v3  ;;  %v9793_v3 = vld [vmem:[#allocation42_spill] sm:$0xff] }
 0x1f0   : > { %v2722_v36 = vpop.f32.mrf.mxu0  ;;  %v7411_v8 = vld [vmem:[#allocation5 + $0x174] sm:$0xf0] }
 0x1f1   : > { %v2670_v18 = vpop.f32.mrf.mxu3  ;;  %v2723_v29 = vadd.f32 %v2722_v36, %v8723_v13  ;;  %v2771_v5 = vpop.f32.mrf.mxu1  ;;  %3132 = vmatpush.bf16.msra.mxu1 %v6136_v4  ;;  %v6833_v36 = vld [vmem:[#allocation5 + $0x710] sm:$0xf0]  ;;  %v4024_v4 = vsel %vm3896_vm8, %v2669_v2, %v3960_v7 }
 0x1f2   : > { %v2671_v28 = vadd.f32 %v2670_v18, %v2622_v22  ;;  %v6705_v22 = vld [vmem:[#allocation5 + $0x610] sm:$0xf0]  ;;  %v6120_v18 = vor.u32 %v7411_v8, %v6119_v59  ;;  %3084 = vmatpush.bf16.msra.mxu0 %v5992_v37  ;;  %v6836_v44 = vor.u32 %v7588_v16, %v6833_v36  ;;  %v5976_v59 = vor.u32 %v7375_v47, %v5975_v31  ;;  %v7407_v8 = vld [vmem:[#allocation5 + $0x154] sm:$0xf0] }
 0x1f3   : > { %v8801_v27 = vadd.f32 %v2771_v5, %v2723_v29  ;;  %2819 = vmatmul.bf16.gmra.mxu2 %v9793_v3  ;;  %2917 = vmatmul.bf16.gmra.mxu0 %v9794_v46  ;;  %v6708_v40 = vor.u32 %v7556_v23, %v6705_v22  ;;  %v6103_v46 = vld [vmem:[#allocation5 + $0x148] sm:$0xf]  ;;  %v7371_v22 = vld [vmem:[#allocation5 + $0x34] sm:$0xf0] }
 0x1f4   : > { %vm3900_vm9 = vcmp.gt.f32.partialorder %v2671_v28, 0.0  ;;  %v3964_v42 = vmul.f32 0.2, %v2671_v28  ;;  %2966 = vmatmul.bf16.gmra.mxu1 %v9796_v52  ;;  %3038 = vmatpush.bf16.msra.mxu3 %v6836_v44  ;;  %v6104_v23 = vor.u32 %v7407_v8, %v6103_v46  ;;  %v7367_v44 = vld [vmem:[#allocation5 + $0x14] sm:$0xf0] }
 0x1f5   : > { %3133 = vmatpush.bf16.msra.mxu1 %v6120_v18  ;;  %2989 = vmatpush.bf16.msra.mxu2 %v6708_v40  ;;  %v6087_v18 = vld [vmem:[#allocation5 + $0x128] sm:$0xf]  ;;  %v7399_v31 = vld [vmem:[#allocation5 + $0x114] sm:$0xf0] }
 0x1f6   : > { %2868 = vmatmul.bf16.gmra.mxu3 %v9795_v19  ;;  %v4028_v29 = vsel %vm3900_vm9, %v2671_v28, %v3964_v42  ;;  %v2624_v5 = vpop.f32.mrf.mxu2  ;;  %3085 = vmatpush.bf16.msra.mxu0 %v5976_v59  ;;  %v5959_v42 = vld [vmem:[#allocation5 + $0x28] sm:$0xf] }
 0x1f7   : > { %v8809_v19 = vpack.c.bf16 %v4028_v29, %v4024_v4  ;;  %v2625_v52 = vadd.f32 %v2624_v5, %v8691_v38  ;;  %v5960_v36 = vor.u32 %v7371_v22, %v5959_v42  ;;  %v7403_v38 = vld [vmem:[#allocation5 + $0x134] sm:$0xf0]  ;;  %v5943_v29 = vld [vmem:[#allocation5 + $0x8] sm:$0xf]  ;;  %v9799_v22 = vld [vmem:[#allocation47_spill] sm:$0xff] }
 0x1f8   : > { %v2724_v37 = vpop.f32.mrf.mxu0  ;;  %v6088_v4 = vor.u32 %v7403_v38, %v6087_v18  ;;  %v6071_v46 = vld [vmem:[#allocation5 + $0x108] sm:$0xf]  ;;  %v5944_v5 = vor.u32 %v7367_v44, %v5943_v29  ;;  %v7459_v38 = vld [vmem:[#allocation5 + $0x2f4] sm:$0xf0] }
 0x1f9   : > { %9797 = vst [vmem:[#allocation67_spill] sm:$0xff] %v8809_v19  ;;  %v2673_v3 = vpop.f32.mrf.mxu3  ;;  %v2725_v7 = vadd.f32 %v2724_v37, %v8723_v13  ;;  %v2773_v28 = vpop.f32.mrf.mxu1  ;;  %3134 = vmatpush.bf16.msra.mxu1 %v6104_v23  ;;  %v6072_v59 = vor.u32 %v7399_v31, %v6071_v46  ;;  %v9800_v18 = vld [vmem:[#allocation48_spill] sm:$0xff]  ;;  %v7491_v29 = vld [vmem:[#allocation5 + $0x3f4] sm:$0xf0] }
 0x1fa   : > { %v2674_v2 = vadd.f32 %v2673_v3, %v2625_v52  ;;  %3086 = vmatpush.bf16.msra.mxu0 %v5960_v36  ;;  %v6311_v36 = vld [vmem:[#allocation5 + $0x2e8] sm:$0xf] }
 0x1fb   : > { %v8813_v16 = vadd.f32 %v2773_v28, %v2725_v7 }
 0x1fc   : > { %v3968_v8 = vmul.f32 0.2, %v2674_v2  ;;  %vm3904_vm10 = vcmp.gt.f32.partialorder %v2674_v2, 0.0 }
 0x1fd   : > { %3135 = vmatpush.bf16.msra.mxu1 %v6088_v4  ;;  %v6439_v4 = vld [vmem:[#allocation5 + $0x3e8] sm:$0xf] }
 0x1fe   : > { %v2626_v40 = vpop.f32.mrf.mxu2  ;;  %3087 = vmatpush.bf16.msra.mxu0 %v5944_v5  ;;  %v4032_v44 = vsel %vm3904_vm10, %v2674_v2, %v3968_v8 }
 0x1ff   : > { %v2627_v3 = vadd.f32 %v2626_v40, %v8702_v61  ;;  %v9798_v61 = vld [vmem:[#allocation46_spill] sm:$0xff]  ;;  %v6312_v40 = vor.u32 %v7459_v38, %v6311_v36 }
 0x200   : > { %v2727_v47 = vpop.f32.mrf.mxu0 }
 0x201   : > { %v2675_v52 = vpop.f32.mrf.mxu3  ;;  %v2728_v23 = vadd.f32 %v2727_v47, %v8723_v13  ;;  %v2776_v7 = vpop.f32.mrf.mxu1  ;;  %3136 = vmatpush.bf16.msra.mxu1 %v6072_v59  ;;  %3178 = vmatpush.bf16.msrb.mxu2 %v6312_v40 }
 0x202   : > { %v2676_v37 = vadd.f32 %v2675_v52, %v2627_v3  ;;  %v6440_v52 = vor.u32 %v7491_v29, %v6439_v4 }
 0x203   : > { %v8817_v42 = vadd.f32 %v2776_v7, %v2728_v23  ;;  %2824 = vmatmul.bf16.gmra.mxu2 %v8526_v24  ;;  %2922 = vmatmul.bf16.gmra.mxu0 %v9798_v61 }
 0x204   : > { %vm3908_vm11 = vcmp.gt.f32.partialorder %v2676_v37, 0.0  ;;  %v3972_v28 = vmul.f32 0.2, %v2676_v37  ;;  %2971 = vmatmul.bf16.gmra.mxu1 %v9800_v18  ;;  %3227 = vmatpush.bf16.msrb.mxu3 %v6440_v52  ;;  %v7455_v52 = vld [vmem:[#allocation5 + $0x2d4] sm:$0xf0] }
 0x206   : > { %2873 = vmatmul.bf16.gmra.mxu3 %v9799_v22  ;;  %v4036_v46 = vsel %vm3908_vm11, %v2676_v37, %v3972_v28  ;;  %v2629_v3 = vpop.f32.mrf.mxu2 }
 0x207   : > { %v8823_v5 = vpack.c.bf16 %v4036_v46, %v4032_v44  ;;  %v2630_v31 = vadd.f32 %v2629_v3, %v8709_v41  ;;  %v9802_v44 = vld [vmem:[#allocation49_spill] sm:$0xff]  ;;  %v9803_v46 = vld [vmem:[#allocation50_spill] sm:$0xff]  ;;  %v9805_v3 = vld [vmem:[#allocation52_spill] sm:$0xff] }
 0x208   : > { %v2729_v59 = vpop.f32.mrf.mxu0 }
 0x209   : > { %9801 = vst [vmem:[#allocation46_spill] sm:$0xff] %v8823_v5  ;;  %v2678_v47 = vpop.f32.mrf.mxu3  ;;  %v2730_v7 = vadd.f32 %v2729_v59, %v8723_v13  ;;  %v2778_v19 = vpop.f32.mrf.mxu1  ;;  %v7487_v59 = vld [vmem:[#allocation5 + $0x3d4] sm:$0xf0] }
 0x20a   : > { %v2679_v23 = vadd.f32 %v2678_v47, %v2630_v31  ;;  %v6423_v31 = vld [vmem:[#allocation5 + $0x3c8] sm:$0xf] }
 0x20b   : > { %v8827_v18 = vadd.f32 %v2778_v19, %v2730_v7  ;;  %v9804_v19 = vld [vmem:[#allocation51_spill] sm:$0xff] }
 0x20c   : > { %v3976_v28 = vmul.f32 0.2, %v2679_v23  ;;  %vm3912_vm12 = vcmp.gt.f32.partialorder %v2679_v23, 0.0 }
 0x20e   : > { %v2631_v36 = vpop.f32.mrf.mxu2  ;;  %v4040_v7 = vsel %vm3912_vm12, %v2679_v23, %v3976_v28 }
 0x20f   : > { %v2632_v2 = vadd.f32 %v2631_v36, %v8720_v0  ;;  %v6295_v0 = vld [vmem:[#allocation5 + $0x2c8] sm:$0xf] }
 0x210   : > { %v2732_v37 = vpop.f32.mrf.mxu0  ;;  %v6296_v47 = vor.u32 %v7455_v52, %v6295_v0 }
 0x211   : > { %v2680_v8 = vpop.f32.mrf.mxu3  ;;  %v2733_v4 = vadd.f32 %v2732_v37, %v8723_v13  ;;  %v2781_v41 = vpop.f32.mrf.mxu1 }
 0x212   : > { %v2681_v38 = vadd.f32 %v2680_v8, %v2632_v2  ;;  %v6424_v8 = vor.u32 %v7487_v59, %v6423_v31  ;;  %3179 = vmatpush.bf16.msrb.mxu2 %v6296_v47  ;;  %v9807_v47 = vld [vmem:[#allocation53_spill] sm:$0xff]  ;;  %v9808_v59 = vld [vmem:[#allocation16_spill] sm:$0xff] }
 0x213   : > { %v8831_v29 = vadd.f32 %v2781_v41, %v2733_v4  ;;  %2829 = vmatmul.bf16.gmra.mxu2 %v9802_v44  ;;  %2927 = vmatmul.bf16.gmra.mxu0 %v9803_v46 }
 0x214   : > { %vm3916_vm13 = vcmp.gt.f32.partialorder %v2681_v38, 0.0  ;;  %v3980_v40 = vmul.f32 0.2, %v2681_v38  ;;  %2976 = vmatmul.bf16.gmra.mxu1 %v9805_v3  ;;  %3228 = vmatpush.bf16.msrb.mxu3 %v6424_v8 }
 0x216   : > { %2878 = vmatmul.bf16.gmra.mxu3 %v9804_v19  ;;  %v4044_v36 = vsel %vm3916_vm13, %v2681_v38, %v3980_v40  ;;  %v2634_v2 = vpop.f32.mrf.mxu2 }
 0x217   : > { %v8837_v37 = vpack.c.bf16 %v4044_v36, %v4040_v7  ;;  %v2635_v4 = vadd.f32 %v2634_v2, %v8725_v62  ;;  %v9809_v7 = vld [vmem:[#allocation54_spill] sm:$0xff] }
 0x218   : > { %v2734_v5 = vpop.f32.mrf.mxu0  ;;  %v7483_v36 = vld [vmem:[#allocation5 + $0x3b4] sm:$0xf0] }
 0x219   : > { %9806 = vst [vmem:[#allocation68_spill] sm:$0xff] %v8837_v37  ;;  %v2683_v41 = vpop.f32.mrf.mxu3  ;;  %v2735_v3 = vadd.f32 %v2734_v5, %v8723_v13  ;;  %v2783_v46 = vpop.f32.mrf.mxu1  ;;  %v9810_v13 = vld [vmem:[#allocation18_spill] sm:$0xff]  ;;  %v6279_v5 = vld [vmem:[#allocation5 + $0x2a8] sm:$0xf] }
 0x21a   : > { %v2684_v19 = vadd.f32 %v2683_v41, %v2635_v4 }
 0x21b   : > { %v8841_v44 = vadd.f32 %v2783_v46, %v2735_v3  ;;  %v7451_v46 = vld [vmem:[#allocation5 + $0x2b4] sm:$0xf0]  ;;  %v6407_v3 = vld [vmem:[#allocation5 + $0x3a8] sm:$0xf] }
 0x21c   : > { %v3984_v40 = vmul.f32 0.2, %v2684_v19  ;;  %vm3920_vm14 = vcmp.gt.f32.partialorder %v2684_v19, 0.0  ;;  %v6408_v41 = vor.u32 %v7483_v36, %v6407_v3  ;;  %v9813_v3 = vld [vmem:[#allocation20_spill] sm:$0xff] }
 0x21e   : > { %v2636_v0 = vpop.f32.mrf.mxu2  ;;  %v4048_v2 = vsel %vm3920_vm14, %v2684_v19, %v3984_v40  ;;  %3229 = vmatpush.bf16.msrb.mxu3 %v6408_v41 }
 0x21f   : > { %v2637_v23 = vadd.f32 %v2636_v0, %v8735_v17  ;;  %v6280_v17 = vor.u32 %v7451_v46, %v6279_v5 }
 0x220   : > { %v2893_v38 = vpop.f32.mrf.mxu0 }
 0x221   : > { %v2685_v28 = vpop.f32.mrf.mxu3  ;;  %v2942_v31 = vpop.f32.mrf.mxu1  ;;  %3180 = vmatpush.bf16.msrb.mxu2 %v6280_v17  ;;  %v6263_v17 = vld [vmem:[#allocation5 + $0x288] sm:$0xf] }
 0x222   : > { %v2686_v52 = vadd.f32 %v2685_v28, %v2637_v23 }
 0x223   : > { %2990 = vmatmul.bf16.vlgmr.msra.gmra.mxu2 %v9807_v47  ;;  %3088 = vmatmul.bf16.vlgmr.msra.gmra.mxu0 %v9808_v59 }
 0x224   : > { %vm3924_vm15 = vcmp.gt.f32.partialorder %v2686_v52, 0.0  ;;  %v3988_v62 = vmul.f32 0.2, %v2686_v52  ;;  %3137 = vmatmul.bf16.vlgmr.msra.gmra.mxu1 %v9810_v13 }
 0x226   : > { %3039 = vmatmul.bf16.vlgmr.msra.gmra.mxu3 %v9809_v7  ;;  %v4052_v8 = vsel %vm3924_vm15, %v2686_v52, %v3988_v62  ;;  %v2795_v4 = vpop.f32.mrf.mxu2 }
 0x227   : > { %v8848_v0 = vpack.c.bf16 %v4052_v8, %v4048_v2  ;;  %v2796_v23 = vadd.f32 %v2795_v4, %v8729_v30  ;;  %v9812_v30 = vld [vmem:[#allocation55_spill] sm:$0xff] }
 0x228   : > { %v2895_v37 = vpop.f32.mrf.mxu0 }
 0x229   : > { %9811 = vst [vmem:[#allocation69_spill] sm:$0xff] %v8848_v0  ;;  %v2844_v28 = vpop.f32.mrf.mxu3  ;;  %v2944_v59 = vpop.f32.mrf.mxu1 }
 0x22a   : > { %v2845_v7 = vadd.f32 %v2844_v28, %v2796_v23 }
 0x22c   : > { %v2894_v13 = vadd.f32 %v2893_v38, %v2845_v7  ;;  %v7447_v38 = vld [vmem:[#allocation5 + $0x294] sm:$0xf0] }
 0x22d   : > { %v6264_v7 = vor.u32 %v7447_v38, %v6263_v17 }
 0x22e   : > { %v8851_v47 = vadd.f32 %v2942_v31, %v2894_v13  ;;  %v2797_v22 = vpop.f32.mrf.mxu2  ;;  %v6391_v31 = vld [vmem:[#allocation5 + $0x388] sm:$0xf]  ;;  %v7479_v13 = vld [vmem:[#allocation5 + $0x394] sm:$0xf0] }
 0x22f   : > { %v2798_v5 = vadd.f32 %v2797_v22, %v8739_v60  ;;  %v6392_v22 = vor.u32 %v7479_v13, %v6391_v31  ;;  %3181 = vmatpush.bf16.msrb.mxu2 %v6264_v7  ;;  %v9815_v31 = vld [vmem:[#allocation22_spill] sm:$0xff]  ;;  %v6247_v7 = vld [vmem:[#allocation5 + $0x268] sm:$0xf] }
 0x230   : > { %v2898_v40 = vpop.f32.mrf.mxu0 }
 0x231   : > { %v2846_v19 = vpop.f32.mrf.mxu3  ;;  %v2947_v62 = vpop.f32.mrf.mxu1  ;;  %3230 = vmatpush.bf16.msrb.mxu3 %v6392_v22 }
 0x232   : > { %v2847_v52 = vadd.f32 %v2846_v19, %v2798_v5 }
 0x233   : > { %2995 = vmatmul.bf16.gmra.mxu2 %v8604_v45  ;;  %3093 = vmatmul.bf16.gmra.mxu0 %v8322_v57 }
 0x234   : > { %v2896_v46 = vadd.f32 %v2895_v37, %v2847_v52  ;;  %3142 = vmatmul.bf16.gmra.mxu1 %v9813_v3 }
 0x236   : > { %3044 = vmatmul.bf16.gmra.mxu3 %v9812_v30  ;;  %v8858_v36 = vadd.f32 %v2944_v59, %v2896_v46  ;;  %v2800_v60 = vpop.f32.mrf.mxu2 }
 0x237   : > { %v2801_v2 = vadd.f32 %v2800_v60, %v8743_v39  ;;  %v9814_v39 = vld [vmem:[#allocation56_spill] sm:$0xff]  ;;  %v7475_v60 = vld [vmem:[#allocation5 + $0x374] sm:$0xf0] }
 0x238   : > { %v2900_v8 = vpop.f32.mrf.mxu0 }
 0x239   : > { %v2849_v37 = vpop.f32.mrf.mxu3  ;;  %v2949_v41 = vpop.f32.mrf.mxu1 }
 0x23a   : > { %v2850_v4 = vadd.f32 %v2849_v37, %v2801_v2 }
 0x23c   : > { %v2899_v23 = vadd.f32 %v2898_v40, %v2850_v4  ;;  %v7443_v40 = vld [vmem:[#allocation5 + $0x274] sm:$0xf0] }
 0x23d   : > { %v6248_v13 = vor.u32 %v7443_v40, %v6247_v7 }
 0x23e   : > { %v8861_v28 = vadd.f32 %v2947_v62, %v2899_v23  ;;  %v2802_v5 = vpop.f32.mrf.mxu2  ;;  %v6375_v62 = vld [vmem:[#allocation5 + $0x368] sm:$0xf] }
 0x23f   : > { %v2803_v19 = vadd.f32 %v2802_v5, %v8753_v56  ;;  %v6376_v2 = vor.u32 %v7475_v60, %v6375_v62  ;;  %3182 = vmatpush.bf16.msrb.mxu2 %v6248_v13  ;;  %v9817_v62 = vld [vmem:[#allocation24_spill] sm:$0xff] }
 0x240   : > { %v2903_v17 = vpop.f32.mrf.mxu0  ;;  %v6231_v13 = vld [vmem:[#allocation5 + $0x248] sm:$0xf] }
 0x241   : > { %v2851_v52 = vpop.f32.mrf.mxu3  ;;  %v2952_v46 = vpop.f32.mrf.mxu1  ;;  %3231 = vmatpush.bf16.msrb.mxu3 %v6376_v2 }
 0x242   : > { %v2852_v59 = vadd.f32 %v2851_v52, %v2803_v19 }
 0x243   : > { %3000 = vmatmul.bf16.gmra.mxu2 %v8622_v63  ;;  %3098 = vmatmul.bf16.gmra.mxu0 %v8342_v50 }
 0x244   : > { %v2901_v38 = vadd.f32 %v2900_v8, %v2852_v59  ;;  %3147 = vmatmul.bf16.gmra.mxu1 %v9815_v31 }
 0x246   : > { %3049 = vmatmul.bf16.gmra.mxu3 %v9814_v39  ;;  %v8868_v22 = vadd.f32 %v2949_v41, %v2901_v38  ;;  %v2805_v56 = vpop.f32.mrf.mxu2 }
 0x247   : > { %v2806_v37 = vadd.f32 %v2805_v56, %v8757_v49  ;;  %v9816_v49 = vld [vmem:[#allocation58_spill] sm:$0xff] }
 0x248   : > { %v2905_v4 = vpop.f32.mrf.mxu0  ;;  %v7471_v56 = vld [vmem:[#allocation5 + $0x354] sm:$0xf0] }
 0x249   : > { %v2854_v8 = vpop.f32.mrf.mxu3  ;;  %v2954_v5 = vpop.f32.mrf.mxu1 }
 0x24a   : > { %v2855_v23 = vadd.f32 %v2854_v8, %v2806_v37 }
 0x24c   : > { %v2904_v19 = vadd.f32 %v2903_v17, %v2855_v23  ;;  %v7439_v17 = vld [vmem:[#allocation5 + $0x254] sm:$0xf0] }
 0x24d   : > { %v6232_v60 = vor.u32 %v7439_v17, %v6231_v13 }
 0x24e   : > { %v8871_v52 = vadd.f32 %v2952_v46, %v2904_v19  ;;  %v2807_v59 = vpop.f32.mrf.mxu2  ;;  %v6359_v46 = vld [vmem:[#allocation5 + $0x348] sm:$0xf] }
 0x24f   : > { %v2808_v0 = vadd.f32 %v2807_v59, %v8767_v12  ;;  %v6360_v37 = vor.u32 %v7471_v56, %v6359_v46  ;;  %3183 = vmatpush.bf16.msrb.mxu2 %v6232_v60  ;;  %v7523_v46 = vld [vmem:[#allocation5 + $0x4f4] sm:$0xf0]  ;;  %v6695_v56 = vld [vmem:[#allocation5 + $0x5e8] sm:$0xf]  ;;  %v9819_v60 = vld [vmem:[#allocation17_spill] sm:$0xff] }
 0x250   : > { %v2908_v40 = vpop.f32.mrf.mxu0 }
 0x251   : > { %v2856_v7 = vpop.f32.mrf.mxu3  ;;  %v2957_v38 = vpop.f32.mrf.mxu1  ;;  %3232 = vmatpush.bf16.msrb.mxu3 %v6360_v37 }
 0x252   : > { %v2857_v41 = vadd.f32 %v2856_v7, %v2808_v0 }
 0x253   : > { %3005 = vmatmul.bf16.gmra.mxu2 %v8640_v11  ;;  %3103 = vmatmul.bf16.gmra.mxu0 %v8362_v14  ;;  %v7551_v14 = vld [vmem:[#allocation5 + $0x5d4] sm:$0xf0] }
 0x254   : > { %v2906_v31 = vadd.f32 %v2905_v4, %v2857_v41  ;;  %3152 = vmatmul.bf16.gmra.mxu1 %v9817_v62 }
 0x256   : > { %3054 = vmatmul.bf16.gmra.mxu3 %v9816_v49  ;;  %v8878_v2 = vadd.f32 %v2954_v5, %v2906_v31  ;;  %v2810_v12 = vpop.f32.mrf.mxu2  ;;  %v6567_v49 = vld [vmem:[#allocation5 + $0x4e8] sm:$0xf] }
 0x257   : > { %v2811_v0 = vadd.f32 %v2810_v12, %v8771_v6  ;;  %v9818_v12 = vld [vmem:[#allocation59_spill] sm:$0xff]  ;;  %v6568_v37 = vor.u32 %v7523_v46, %v6567_v49  ;;  %v6679_v49 = vld [vmem:[#allocation5 + $0x5c8] sm:$0xf] }
 0x258   : > { %v2910_v4 = vpop.f32.mrf.mxu0 }
 0x259   : > { %v2859_v8 = vpop.f32.mrf.mxu3  ;;  %v2959_v19 = vpop.f32.mrf.mxu1  ;;  %3276 = vmatpush.bf16.msrb.mxu0 %v6568_v37 }
 0x25a   : > { %v2860_v23 = vadd.f32 %v2859_v8, %v2811_v0  ;;  %v7555_v0 = vld [vmem:[#allocation5 + $0x5f4] sm:$0xf0]  ;;  %v6215_v8 = vld [vmem:[#allocation5 + $0x228] sm:$0xf] }
 0x25c   : > { %v2909_v59 = vadd.f32 %v2908_v40, %v2860_v23  ;;  %v9820_v40 = vld [vmem:[#allocation60_spill] sm:$0xff]  ;;  %v6696_v23 = vor.u32 %v7555_v0, %v6695_v56  ;;  %v6680_v56 = vor.u32 %v7551_v14, %v6679_v49 }
 0x25e   : > { %v8881_v7 = vadd.f32 %v2957_v38, %v2909_v59  ;;  %v2812_v41 = vpop.f32.mrf.mxu2  ;;  %v9821_v38 = vld [vmem:[#allocation19_spill] sm:$0xff]  ;;  %v6343_v59 = vld [vmem:[#allocation5 + $0x328] sm:$0xf]  ;;  %3325 = vmatpush.bf16.msrb.mxu1 %v6696_v23 }
 0x25f   : > { %v2813_v62 = vadd.f32 %v2812_v41, %v8781_v9  ;;  %v7435_v9 = vld [vmem:[#allocation5 + $0x234] sm:$0xf0] }
 0x260   : > { %v2913_v17 = vpop.f32.mrf.mxu0  ;;  %v7467_v41 = vld [vmem:[#allocation5 + $0x334] sm:$0xf0] }
 0x261   : > { %v2861_v13 = vpop.f32.mrf.mxu3  ;;  %v2962_v5 = vpop.f32.mrf.mxu1 }
 0x262   : > { %v2862_v31 = vadd.f32 %v2861_v13, %v2813_v62  ;;  %v6216_v62 = vor.u32 %v7435_v9, %v6215_v8  ;;  %3326 = vmatpush.bf16.msrb.mxu1 %v6680_v56  ;;  %v6663_v8 = vld [vmem:[#allocation5 + $0x5a8] sm:$0xf] }
 0x263   : > { %3010 = vmatmul.bf16.gmra.mxu2 %v9818_v12  ;;  %3108 = vmatmul.bf16.gmra.mxu0 %v9819_v60  ;;  %v6551_v12 = vld [vmem:[#allocation5 + $0x4c8] sm:$0xf]  ;;  %v7519_v60 = vld [vmem:[#allocation5 + $0x4d4] sm:$0xf0] }
 0x264   : > { %v2911_v6 = vadd.f32 %v2910_v4, %v2862_v31  ;;  %3157 = vmatmul.bf16.gmra.mxu1 %v9821_v38  ;;  %v6344_v31 = vor.u32 %v7467_v41, %v6343_v59  ;;  %3184 = vmatpush.bf16.msrb.mxu2 %v6216_v62  ;;  %v6552_v38 = vor.u32 %v7519_v60, %v6551_v12  ;;  %v7547_v59 = vld [vmem:[#allocation5 + $0x5b4] sm:$0xf0]  ;;  %v6519_v12 = vld [vmem:[#allocation5 + $0x488] sm:$0xf] }
 0x265   : > { %v6664_v41 = vor.u32 %v7547_v59, %v6663_v8  ;;  %v7511_v60 = vld [vmem:[#allocation5 + $0x494] sm:$0xf0]  ;;  %v6199_v59 = vld [vmem:[#allocation5 + $0x208] sm:$0xf] }
 0x266   : > { %3059 = vmatmul.bf16.gmra.mxu3 %v9820_v40  ;;  %v8888_v13 = vadd.f32 %v2959_v19, %v2911_v6  ;;  %v2815_v4 = vpop.f32.mrf.mxu2  ;;  %3277 = vmatpush.bf16.msrb.mxu0 %v6552_v38  ;;  %v6535_v19 = vld [vmem:[#allocation5 + $0x4a8] sm:$0xf]  ;;  %v7515_v6 = vld [vmem:[#allocation5 + $0x4b4] sm:$0xf0]  ;;  %v6520_v38 = vor.u32 %v7511_v60, %v6519_v12 }
 0x267   : > { %v2816_v46 = vadd.f32 %v2815_v4, %v8785_v43  ;;  %3233 = vmatpush.bf16.msrb.mxu3 %v6344_v31  ;;  %v6536_v23 = vor.u32 %v7515_v6, %v6535_v19  ;;  %3327 = vmatpush.bf16.msrb.mxu1 %v6664_v41  ;;  %v6647_v4 = vld [vmem:[#allocation5 + $0x588] sm:$0xf]  ;;  %v7543_v31 = vld [vmem:[#allocation5 + $0x594] sm:$0xf0] }
 0x268   : > { %v2915_v11 = vpop.f32.mrf.mxu0  ;;  %v7507_v19 = vld [vmem:[#allocation5 + $0x474] sm:$0xf0]  ;;  %v6327_v12 = vld [vmem:[#allocation5 + $0x308] sm:$0xf] }
 0x269   : > { %v2864_v40 = vpop.f32.mrf.mxu3  ;;  %v2964_v37 = vpop.f32.mrf.mxu1  ;;  %v7431_v41 = vld [vmem:[#allocation5 + $0x214] sm:$0xf0] }
 0x26a   : > { %v2865_v0 = vadd.f32 %v2864_v40, %v2816_v46  ;;  %3278 = vmatpush.bf16.msrb.mxu0 %v6536_v23  ;;  %v6648_v46 = vor.u32 %v7543_v31, %v6647_v4  ;;  %v9823_v23 = vld [vmem:[#allocation21_spill] sm:$0xff]  ;;  %v6200_v60 = vor.u32 %v7431_v41, %v6199_v59  ;;  %v7463_v4 = vld [vmem:[#allocation5 + $0x314] sm:$0xf0]  ;;  %v6599_v59 = vld [vmem:[#allocation5 + $0x528] sm:$0xf] }
 0x26b   : > { %v7503_v31 = vld [vmem:[#allocation5 + $0x454] sm:$0xf0] }
 0x26c   : > { %v2914_v9 = vadd.f32 %v2913_v17, %v2865_v0  ;;  %3328 = vmatpush.bf16.msrb.mxu1 %v6648_v46  ;;  %v6503_v0 = vld [vmem:[#allocation5 + $0x468] sm:$0xf]  ;;  %3185 = vmatpush.bf16.msrb.mxu2 %v6200_v60 }
 0x26d   : > { %v6504_v8 = vor.u32 %v7507_v19, %v6503_v0  ;;  %v6615_v46 = vld [vmem:[#allocation5 + $0x548] sm:$0xf] }
 0x26e   : > { %v8891_v43 = vadd.f32 %v2962_v5, %v2914_v9  ;;  %v2817_v62 = vpop.f32.mrf.mxu2  ;;  %3279 = vmatpush.bf16.msrb.mxu0 %v6520_v38  ;;  %v6631_v5 = vld [vmem:[#allocation5 + $0x568] sm:$0xf]  ;;  %v7539_v9 = vld [vmem:[#allocation5 + $0x574] sm:$0xf0] }
 0x26f   : > { %v2818_v14 = vadd.f32 %v2817_v62, %v8797_v48  ;;  %v9822_v48 = vld [vmem:[#allocation61_spill] sm:$0xff]  ;;  %v6632_v62 = vor.u32 %v7539_v9, %v6631_v5  ;;  %v6487_v38 = vld [vmem:[#allocation5 + $0x448] sm:$0xf] }
 0x270   : > { %v2918_v49 = vpop.f32.mrf.mxu0  ;;  %v6488_v19 = vor.u32 %v7503_v31, %v6487_v38  ;;  %v7495_v38 = vld [vmem:[#allocation5 + $0x414] sm:$0xf0] }
 0x271   : > { %v2866_v40 = vpop.f32.mrf.mxu3  ;;  %v2967_v17 = vpop.f32.mrf.mxu1  ;;  %3329 = vmatpush.bf16.msrb.mxu1 %v6632_v62 }
 0x272   : > { %v2867_v56 = vadd.f32 %v2866_v40, %v2818_v14  ;;  %3280 = vmatpush.bf16.msrb.mxu0 %v6504_v8  ;;  %v6328_v40 = vor.u32 %v7463_v4, %v6327_v12  ;;  %v7531_v12 = vld [vmem:[#allocation5 + $0x534] sm:$0xf0] }
 0x273   : > { %3015 = vmatmul.bf16.gmra.mxu2 %v8676_v26  ;;  %3113 = vmatmul.bf16.gmra.mxu0 %v8324_v58  ;;  %v6600_v4 = vor.u32 %v7531_v12, %v6599_v59  ;;  %v7619_v59 = vld [vmem:[#allocation5 + $0x7f4] sm:$0xf0] }
 0x274   : > { %v2916_v6 = vadd.f32 %v2915_v11, %v2867_v56  ;;  %3162 = vmatmul.bf16.gmra.mxu1 %v9823_v23  ;;  %v7535_v23 = vld [vmem:[#allocation5 + $0x554] sm:$0xf0]  ;;  %3234 = vmatpush.bf16.msrb.mxu3 %v6328_v40  ;;  %v6583_v40 = vld [vmem:[#allocation5 + $0x508] sm:$0xf] }
 0x275   : > { %v6616_v5 = vor.u32 %v7535_v23, %v6615_v46 }
 0x276   : > { %3064 = vmatmul.bf16.gmra.mxu3 %v9822_v48  ;;  %v8898_v14 = vadd.f32 %v2964_v37, %v2916_v6  ;;  %v2820_v11 = vpop.f32.mrf.mxu2  ;;  %3281 = vmatpush.bf16.msrb.mxu0 %v6488_v19  ;;  %v6471_v37 = vld [vmem:[#allocation5 + $0x428] sm:$0xf]  ;;  %v7499_v6 = vld [vmem:[#allocation5 + $0x434] sm:$0xf0] }
 0x277   : > { %v2821_v56 = vadd.f32 %v2820_v11, %v8801_v27  ;;  %3330 = vmatpush.bf16.msrb.mxu1 %v6616_v5  ;;  %v6472_v62 = vor.u32 %v7499_v6, %v6471_v37  ;;  %v6455_v11 = vld [vmem:[#allocation5 + $0x408] sm:$0xf] }
 0x278   : > { %v2920_v48 = vpop.f32.mrf.mxu0  ;;  %v6456_v46 = vor.u32 %v7495_v38, %v6455_v11  ;;  %v6951_v37 = vld [vmem:[#allocation5 + $0x7e8] sm:$0xf] }
 0x279   : > { %v2869_v0 = vpop.f32.mrf.mxu3  ;;  %v2969_v8 = vpop.f32.mrf.mxu1  ;;  %v6952_v12 = vor.u32 %v7619_v59, %v6951_v37  ;;  %v7583_v37 = vld [vmem:[#allocation5 + $0x6d4] sm:$0xf0] }
 0x27a   : > { %v2870_v9 = vadd.f32 %v2869_v0, %v2821_v56  ;;  %3282 = vmatpush.bf16.msrb.mxu0 %v6472_v62  ;;  %v7527_v56 = vld [vmem:[#allocation5 + $0x514] sm:$0xf0] }
 0x27b   : > { %3331 = vmatpush.bf16.msrb.mxu1 %v6600_v4  ;;  %v6584_v19 = vor.u32 %v7527_v56, %v6583_v40  ;;  %3423 = vmatpush.bf16.msra.mxu3 %v6952_v12  ;;  %v7615_v12 = vld [vmem:[#allocation5 + $0x7d4] sm:$0xf0] }
 0x27c   : > { %v2919_v41 = vadd.f32 %v2918_v49, %v2870_v9 }
 0x27e   : > { %v8901_v27 = vadd.f32 %v2967_v17, %v2919_v41  ;;  %v2822_v60 = vpop.f32.mrf.mxu2  ;;  %3283 = vmatpush.bf16.msrb.mxu0 %v6456_v46  ;;  %v6823_v17 = vld [vmem:[#allocation5 + $0x6e8] sm:$0xf] }
 0x27f   : > { %v2823_v23 = vadd.f32 %v2822_v60, %v8813_v16  ;;  %3332 = vmatpush.bf16.msrb.mxu1 %v6584_v19  ;;  %v7587_v16 = vld [vmem:[#allocation5 + $0x6f4] sm:$0xf0] }
 0x280   : > { %v2923_v0 = vpop.f32.mrf.mxu0  ;;  %v6824_v6 = vor.u32 %v7587_v16, %v6823_v17  ;;  %v9825_v17 = vld [vmem:[#allocation25_spill] sm:$0xff] }
 0x281   : > { %v2871_v31 = vpop.f32.mrf.mxu3  ;;  %v2972_v49 = vpop.f32.mrf.mxu1 }
 0x282   : > { %v2872_v5 = vadd.f32 %v2871_v31, %v2823_v23  ;;  %3374 = vmatpush.bf16.msra.mxu2 %v6824_v6  ;;  %v6935_v6 = vld [vmem:[#allocation5 + $0x7c8] sm:$0xf] }
 0x283   : > { %3020 = vmatmul.bf16.gmra.mxu2 %v8694_v10  ;;  %3118 = vmatmul.bf16.gmra.mxu0 %v8344_v51 }
 0x284   : > { %v2921_v9 = vadd.f32 %v2920_v48, %v2872_v5  ;;  %3167 = vmatmul.bf16.gmra.mxu1 %v8348_v53 }
 0x286   : > { %3069 = vmatmul.bf16.gmra.mxu3 %v8696_v25  ;;  %v8908_v41 = vadd.f32 %v2969_v8, %v2921_v9  ;;  %v2825_v62 = vpop.f32.mrf.mxu2 }
 0x287   : > { %v2826_v4 = vadd.f32 %v2825_v62, %v8817_v42  ;;  %v9824_v42 = vld [vmem:[#allocation62_spill] sm:$0xff] }
 0x288   : > { %v2925_v60 = vpop.f32.mrf.mxu0 }
 0x289   : > { %v2874_v48 = vpop.f32.mrf.mxu3  ;;  %v2974_v38 = vpop.f32.mrf.mxu1 }
 0x28a   : > { %v2875_v11 = vadd.f32 %v2874_v48, %v2826_v4  ;;  %v6936_v48 = vor.u32 %v7615_v12, %v6935_v6 }
 0x28c   : > { %v2924_v40 = vadd.f32 %v2923_v0, %v2875_v11  ;;  %3424 = vmatpush.bf16.msra.mxu3 %v6936_v48 }
 0x28e   : > { %v8911_v23 = vadd.f32 %v2972_v49, %v2924_v40  ;;  %v2827_v31 = vpop.f32.mrf.mxu2  ;;  %v6807_v49 = vld [vmem:[#allocation5 + $0x6c8] sm:$0xf] }
 0x28f   : > { %v2828_v46 = vadd.f32 %v2827_v31, %v8827_v18  ;;  %v6808_v62 = vor.u32 %v7583_v37, %v6807_v49  ;;  %v7880_v31 = vld [vmem:[#allocation7] sm:$0xf] }
 0x290   : > { %v2928_v19 = vpop.f32.mrf.mxu0 }
 0x291   : > { %v2876_v56 = vpop.f32.mrf.mxu3  ;;  %v2977_v5 = vpop.f32.mrf.mxu1  ;;  %3375 = vmatpush.bf16.msra.mxu2 %v6808_v62  ;;  %v7611_v62 = vld [vmem:[#allocation5 + $0x7b4] sm:$0xf0] }
 0x292   : > { %v2877_v8 = vadd.f32 %v2876_v56, %v2828_v46  ;;  %v8921_v46 = vperm.slane %v7880_v31, 2 }
 0x293   : > { %3025 = vmatmul.bf16.gmra.mxu2 %v8712_v1  ;;  %3123 = vmatmul.bf16.gmra.mxu0 %v8364_v15 }
 0x294   : > { %v2926_v9 = vadd.f32 %v2925_v60, %v2877_v8  ;;  %3172 = vmatmul.bf16.gmra.mxu1 %v9825_v17 }
 0x296   : > { %3074 = vmatmul.bf16.gmra.mxu3 %v9824_v42  ;;  %v8918_v16 = vadd.f32 %v2974_v38, %v2926_v9  ;;  %v2830_v0 = vpop.f32.mrf.mxu2 }
 0x297   : > { %v2831_v18 = vadd.f32 %v2830_v0, %v8831_v29 }
 0x298   : > { %v2930_v4 = vpop.f32.mrf.mxu0 }
 0x299   : > { %v2879_v59 = vpop.f32.mrf.mxu3  ;;  %v2979_v11 = vpop.f32.mrf.mxu1 }
 0x29a   : > { %v2880_v60 = vadd.f32 %v2879_v59, %v2831_v18 }
 0x29c   : > { %v2929_v40 = vadd.f32 %v2928_v19, %v2880_v60  ;;  %v6791_v19 = vld [vmem:[#allocation5 + $0x6a8] sm:$0xf] }
 0x29e   : > { %v8923_v38 = vadd.f32 %v2977_v5, %v2929_v40  ;;  %v2832_v56 = vpop.f32.mrf.mxu2  ;;  %v7579_v5 = vld [vmem:[#allocation5 + $0x6b4] sm:$0xf0] }
 0x29f   : > { %v2833_v8 = vadd.f32 %v2832_v56, %v8841_v44  ;;  %v6919_v44 = vld [vmem:[#allocation5 + $0x7a8] sm:$0xf]  ;;  %v6792_v59 = vor.u32 %v7579_v5, %v6791_v19 }
 0x2a0   : > { %v3089_v29 = vpop.f32.mrf.mxu0  ;;  %v6920_v60 = vor.u32 %v7611_v62, %v6919_v44  ;;  %v9826_v62 = vld [vmem:[#allocation28_spill] sm:$0xff] }
 0x2a1   : > { %v2881_v9 = vpop.f32.mrf.mxu3  ;;  %v3090_v49 = vadd.f32 %v3089_v29, %v8921_v46  ;;  %v3138_v37 = vpop.f32.mrf.mxu1  ;;  %3376 = vmatpush.bf16.msra.mxu2 %v6792_v59 }
 0x2a2   : > { %v2882_v0 = vadd.f32 %v2881_v9, %v2833_v8  ;;  %3425 = vmatpush.bf16.msra.mxu3 %v6920_v60  ;;  %v7575_v60 = vld [vmem:[#allocation5 + $0x694] sm:$0xf0] }
 0x2a3   : > { %v8927_v18 = vadd.f32 %v3138_v37, %v3090_v49  ;;  %3186 = vmatmul.bf16.vlgmr.msrb.gmra.mxu2 %v8382_v32  ;;  %3284 = vmatmul.bf16.vlgmr.msrb.gmra.mxu0 %v8384_v33 }
 0x2a4   : > { %v2931_v6 = vadd.f32 %v2930_v4, %v2882_v0  ;;  %3333 = vmatmul.bf16.vlgmr.msrb.gmra.mxu1 %v8388_v35 }
 0x2a6   : > { %3235 = vmatmul.bf16.vlgmr.msrb.gmra.mxu3 %v8386_v34  ;;  %v8933_v12 = vadd.f32 %v2979_v11, %v2931_v6  ;;  %v2991_v48 = vpop.f32.mrf.mxu2 }
 0x2a7   : > { %v2992_v4 = vadd.f32 %v2991_v48, %v8851_v47  ;;  %v9827_v48 = vld [vmem:[#allocation29_spill] sm:$0xff] }
 0x2a8   : > { %v3091_v31 = vpop.f32.mrf.mxu0 }
 0x2a9   : > { %v3040_v40 = vpop.f32.mrf.mxu3  ;;  %v3092_v8 = vadd.f32 %v3091_v31, %v8921_v46  ;;  %v3140_v9 = vpop.f32.mrf.mxu1 }
 0x2aa   : > { %v3041_v56 = vadd.f32 %v3040_v40, %v2992_v4  ;;  %v6903_v4 = vld [vmem:[#allocation5 + $0x788] sm:$0xf] }
 0x2ab   : > { %v8937_v29 = vadd.f32 %v3140_v9, %v3092_v8  ;;  %v7607_v9 = vld [vmem:[#allocation5 + $0x794] sm:$0xf0] }
 0x2ac   : > { %v3929_v6 = vmul.f32 0.2, %v3041_v56  ;;  %vm3865_vm0 = vcmp.gt.f32.partialorder %v3041_v56, 0.0 }
 0x2ae   : > { %v2993_v0 = vpop.f32.mrf.mxu2  ;;  %v3993_v40 = vsel %vm3865_vm0, %v3041_v56, %v3929_v6 }
 0x2af   : > { %v2994_v49 = vadd.f32 %v2993_v0, %v8858_v36  ;;  %v6775_v36 = vld [vmem:[#allocation5 + $0x688] sm:$0xf] }
 0x2b0   : > { %v3094_v11 = vpop.f32.mrf.mxu0  ;;  %v6776_v8 = vor.u32 %v7575_v60, %v6775_v36 }
 0x2b1   : > { %v3042_v37 = vpop.f32.mrf.mxu3  ;;  %v3095_v5 = vadd.f32 %v3094_v11, %v8921_v46  ;;  %v3143_v47 = vpop.f32.mrf.mxu1 }
 0x2b2   : > { %v3043_v19 = vadd.f32 %v3042_v37, %v2994_v49  ;;  %v6904_v37 = vor.u32 %v7607_v9, %v6903_v4  ;;  %3377 = vmatpush.bf16.msra.mxu2 %v6776_v8  ;;  %v7571_v8 = vld [vmem:[#allocation5 + $0x674] sm:$0xf0]  ;;  %v6887_v9 = vld [vmem:[#allocation5 + $0x768] sm:$0xf] }
 0x2b3   : > { %v8941_v59 = vadd.f32 %v3143_v47, %v3095_v5  ;;  %3191 = vmatmul.bf16.gmra.mxu2 %v8402_v54  ;;  %3289 = vmatmul.bf16.gmra.mxu0 %v8404_v55 }
 0x2b4   : > { %vm3869_vm1 = vcmp.gt.f32.partialorder %v3043_v19, 0.0  ;;  %v3933_v44 = vmul.f32 0.2, %v3043_v19  ;;  %3338 = vmatmul.bf16.gmra.mxu1 %v9827_v48  ;;  %3426 = vmatpush.bf16.msra.mxu3 %v6904_v37  ;;  %v7603_v37 = vld [vmem:[#allocation5 + $0x774] sm:$0xf0] }
 0x2b6   : > { %3240 = vmatmul.bf16.gmra.mxu3 %v9826_v62  ;;  %v3997_v31 = vsel %vm3869_vm1, %v3043_v19, %v3933_v44  ;;  %v2996_v49 = vpop.f32.mrf.mxu2 }
 0x2b7   : > { %v8947_v0 = vpack.c.bf16 %v3997_v31, %v3993_v40  ;;  %v2997_v11 = vadd.f32 %v2996_v49, %v8861_v28 }
 0x2b8   : > { %v3096_v47 = vpop.f32.mrf.mxu0 }
 0x2b9   : > { %9828 = vst [vmem:[#allocation55_spill] sm:$0xff] %v8947_v0  ;;  %v3045_v5 = vpop.f32.mrf.mxu3  ;;  %v3097_v48 = vadd.f32 %v3096_v47, %v8921_v46  ;;  %v3145_v55 = vpop.f32.mrf.mxu1 }
 0x2ba   : > { %v3046_v62 = vadd.f32 %v3045_v5, %v2997_v11 }
 0x2bb   : > { %v8951_v54 = vadd.f32 %v3145_v55, %v3097_v48  ;;  %v9829_v55 = vld [vmem:[#allocation32_spill] sm:$0xff]  ;;  %v9830_v48 = vld [vmem:[#allocation33_spill] sm:$0xff] }
 0x2bc   : > { %v3937_v36 = vmul.f32 0.2, %v3046_v62  ;;  %vm3873_vm2 = vcmp.gt.f32.partialorder %v3046_v62, 0.0 }
 0x2be   : > { %v2998_v56 = vpop.f32.mrf.mxu2  ;;  %v4001_v11 = vsel %vm3873_vm2, %v3046_v62, %v3937_v36 }
 0x2bf   : > { %v2999_v6 = vadd.f32 %v2998_v56, %v8868_v22  ;;  %v6759_v22 = vld [vmem:[#allocation5 + $0x668] sm:$0xf]  ;;  %v6888_v56 = vor.u32 %v7603_v37, %v6887_v9 }
 0x2c0   : > { %v3099_v44 = vpop.f32.mrf.mxu0  ;;  %v6760_v49 = vor.u32 %v7571_v8, %v6759_v22 }
 0x2c1   : > { %v3047_v19 = vpop.f32.mrf.mxu3  ;;  %v3100_v4 = vadd.f32 %v3099_v44, %v8921_v46  ;;  %v3148_v28 = vpop.f32.mrf.mxu1  ;;  %3427 = vmatpush.bf16.msra.mxu3 %v6888_v56  ;;  %v6871_v56 = vld [vmem:[#allocation5 + $0x748] sm:$0xf] }
 0x2c2   : > { %v3048_v60 = vadd.f32 %v3047_v19, %v2999_v6  ;;  %3378 = vmatpush.bf16.msra.mxu2 %v6760_v49 }
 0x2c3   : > { %v8955_v31 = vadd.f32 %v3148_v28, %v3100_v4  ;;  %3196 = vmatmul.bf16.gmra.mxu2 %v8422_v20  ;;  %3294 = vmatmul.bf16.gmra.mxu0 %v8424_v21  ;;  %v7421_v21 = vld [vmem:[#allocation5 + $0x1cc] sm:$0xf] }
 0x2c4   : > { %vm3877_vm3 = vcmp.gt.f32.partialorder %v3048_v60, 0.0  ;;  %v3941_v40 = vmul.f32 0.2, %v3048_v60  ;;  %3343 = vmatmul.bf16.gmra.mxu1 %v9830_v48 }
 0x2c6   : > { %3245 = vmatmul.bf16.gmra.mxu3 %v9829_v55  ;;  %v4005_v5 = vsel %vm3877_vm3, %v3048_v60, %v3941_v40  ;;  %v3001_v47 = vpop.f32.mrf.mxu2 }
 0x2c7   : > { %v8961_v6 = vpack.c.bf16 %v4005_v5, %v4001_v11  ;;  %v3002_v19 = vadd.f32 %v3001_v47, %v8871_v52  ;;  %v9832_v11 = vld [vmem:[#allocation34_spill] sm:$0xff]  ;;  %v9833_v5 = vld [vmem:[#allocation35_spill] sm:$0xff] }
 0x2c8   : > { %v3101_v4 = vpop.f32.mrf.mxu0  ;;  %v7567_v47 = vld [vmem:[#allocation5 + $0x654] sm:$0xf0] }
 0x2c9   : > { %9831 = vst [vmem:[#allocation20_spill] sm:$0xff] %v8961_v6  ;;  %v3050_v44 = vpop.f32.mrf.mxu3  ;;  %v3102_v0 = vadd.f32 %v3101_v4, %v8921_v46  ;;  %v3150_v48 = vpop.f32.mrf.mxu1 }
 0x2ca   : > { %v3051_v28 = vadd.f32 %v3050_v44, %v3002_v19  ;;  %v7599_v44 = vld [vmem:[#allocation5 + $0x754] sm:$0xf0] }
 0x2cb   : > { %v8965_v55 = vadd.f32 %v3150_v48, %v3102_v0  ;;  %v9834_v0 = vld [vmem:[#allocation36_spill] sm:$0xff]  ;;  %v9835_v48 = vld [vmem:[#allocation37_spill] sm:$0xff] }
 0x2cc   : > { %v3945_v40 = vmul.f32 0.2, %v3051_v28  ;;  %vm3881_vm4 = vcmp.gt.f32.partialorder %v3051_v28, 0.0 }
 0x2ce   : > { %v3003_v22 = vpop.f32.mrf.mxu2  ;;  %v4009_v4 = vsel %vm3881_vm4, %v3051_v28, %v3945_v40 }
 0x2cf   : > { %v3004_v62 = vadd.f32 %v3003_v22, %v8878_v2  ;;  %v6743_v2 = vld [vmem:[#allocation5 + $0x648] sm:$0xf] }
 0x2d0   : > { %v3104_v60 = vpop.f32.mrf.mxu0  ;;  %v6744_v19 = vor.u32 %v7567_v47, %v6743_v2 }
 0x2d1   : > { %v3052_v36 = vpop.f32.mrf.mxu3  ;;  %v3105_v9 = vadd.f32 %v3104_v60, %v8921_v46  ;;  %v3153_v52 = vpop.f32.mrf.mxu1 }
 0x2d2   : > { %v3053_v8 = vadd.f32 %v3052_v36, %v3004_v62  ;;  %v6872_v36 = vor.u32 %v7599_v44, %v6871_v56  ;;  %3379 = vmatpush.bf16.msra.mxu2 %v6744_v19  ;;  %v7393_v19 = vld [vmem:[#allocation5 + $0xec] sm:$0xf]  ;;  %v6057_v44 = vld [vmem:[#allocation5 + $0xf8] sm:$0xf0] }
 0x2d3   : > { %v8969_v37 = vadd.f32 %v3153_v52, %v3105_v9  ;;  %3201 = vmatmul.bf16.gmra.mxu2 %v9832_v11  ;;  %3299 = vmatmul.bf16.gmra.mxu0 %v9833_v5 }
 0x2d4   : > { %vm3885_vm5 = vcmp.gt.f32.partialorder %v3053_v8, 0.0  ;;  %v3949_v49 = vmul.f32 0.2, %v3053_v8  ;;  %3348 = vmatmul.bf16.gmra.mxu1 %v9835_v48  ;;  %3428 = vmatpush.bf16.msra.mxu3 %v6872_v36  ;;  %v9839_v36 = vld [vmem:[#allocation40_spill] sm:$0xff] }
 0x2d6   : > { %3250 = vmatmul.bf16.gmra.mxu3 %v9834_v0  ;;  %v4013_v22 = vsel %vm3885_vm5, %v3053_v8, %v3949_v49  ;;  %v3006_v62 = vpop.f32.mrf.mxu2 }
 0x2d7   : > { %v8975_v60 = vpack.c.bf16 %v4013_v22, %v4009_v4  ;;  %v3007_v9 = vadd.f32 %v3006_v62, %v8881_v7  ;;  %v7425_v4 = vld [vmem:[#allocation5 + $0x1ec] sm:$0xf]  ;;  %v6185_v62 = vld [vmem:[#allocation5 + $0x1f8] sm:$0xf0] }
 0x2d8   : > { %v3106_v6 = vpop.f32.mrf.mxu0 }
 0x2d9   : > { %9836 = vst [vmem:[#allocation56_spill] sm:$0xff] %v8975_v60  ;;  %v3055_v52 = vpop.f32.mrf.mxu3  ;;  %v3107_v48 = vadd.f32 %v3106_v6, %v8921_v46  ;;  %v3155_v5 = vpop.f32.mrf.mxu1  ;;  %v7595_v60 = vld [vmem:[#allocation5 + $0x734] sm:$0xf0] }
 0x2da   : > { %v3056_v0 = vadd.f32 %v3055_v52, %v3007_v9  ;;  %v9840_v9 = vld [vmem:[#allocation41_spill] sm:$0xff]  ;;  %v6727_v52 = vld [vmem:[#allocation5 + $0x628] sm:$0xf] }
 0x2db   : > { %v8979_v11 = vadd.f32 %v3155_v5, %v3107_v48  ;;  %v9837_v5 = vld [vmem:[#allocation38_spill] sm:$0xff]  ;;  %v9838_v48 = vld [vmem:[#allocation39_spill] sm:$0xff] }
 0x2dc   : > { %vm3889_vm6 = vcmp.gt.f32.partialorder %v3056_v0, 0.0  ;;  %v3953_v49 = vmul.f32 0.2, %v3056_v0 }
 0x2de   : > { %v3008_v2 = vpop.f32.mrf.mxu2 }
 0x2df   : > { %v3009_v28 = vadd.f32 %v3008_v2, %v8888_v13  ;;  %v6060_v13 = vor.u32 %v7393_v19, %v6057_v44  ;;  %v7563_v2 = vld [vmem:[#allocation5 + $0x634] sm:$0xf0]  ;;  %v7389_v19 = vld [vmem:[#allocation5 + $0xcc] sm:$0xf]  ;;  %v6041_v44 = vld [vmem:[#allocation5 + $0xd8] sm:$0xf0] }
 0x2e0   : > { %v3109_v8 = vpop.f32.mrf.mxu0 }
 0x2e1   : > { %v3057_v40 = vpop.f32.mrf.mxu3  ;;  %v3110_v7 = vadd.f32 %v3109_v8, %v8921_v46  ;;  %v3158_v56 = vpop.f32.mrf.mxu1  ;;  %v6728_v8 = vor.u32 %v7563_v2, %v6727_v52  ;;  %3472 = vmatpush.bf16.msra.mxu0 %v6060_v13  ;;  %v7417_v2 = vld [vmem:[#allocation5 + $0x1ac] sm:$0xf] }
 0x2e2   : > { %v3058_v47 = vadd.f32 %v3057_v40, %v3009_v28  ;;  %v6188_v28 = vor.u32 %v7425_v4, %v6185_v62  ;;  %v6855_v40 = vld [vmem:[#allocation5 + $0x728] sm:$0xf]  ;;  %v6044_v4 = vor.u32 %v7389_v19, %v6041_v44  ;;  %v6169_v62 = vld [vmem:[#allocation5 + $0x1d8] sm:$0xf0] }
 0x2e3   : > { %v8983_v6 = vadd.f32 %v3158_v56, %v3110_v7  ;;  %3206 = vmatmul.bf16.gmra.mxu2 %v9837_v5  ;;  %3304 = vmatmul.bf16.gmra.mxu0 %v9838_v48  ;;  %v4017_v7 = vsel %vm3889_vm6, %v3056_v0, %v3953_v49  ;;  %v6856_v48 = vor.u32 %v7595_v60, %v6855_v40  ;;  %v7385_v60 = vld [vmem:[#allocation5 + $0xac] sm:$0xf]  ;;  %v6137_v19 = vld [vmem:[#allocation5 + $0x198] sm:$0xf0] }
 0x2e4   : > { %vm3893_vm7 = vcmp.gt.f32.partialorder %v3058_v47, 0.0  ;;  %v3957_v22 = vmul.f32 0.2, %v3058_v47  ;;  %3353 = vmatmul.bf16.gmra.mxu1 %v9840_v9  ;;  %3380 = vmatpush.bf16.msra.mxu2 %v6728_v8  ;;  %v6172_v52 = vor.u32 %v7421_v21, %v6169_v62  ;;  %v7413_v21 = vld [vmem:[#allocation5 + $0x18c] sm:$0xf] }
 0x2e5   : > { %3521 = vmatpush.bf16.msra.mxu1 %v6188_v28  ;;  %3429 = vmatpush.bf16.msra.mxu3 %v6856_v48  ;;  %v6009_v48 = vld [vmem:[#allocation5 + $0x98] sm:$0xf0] }
 0x2e6   : > { %3255 = vmatmul.bf16.gmra.mxu3 %v9839_v36  ;;  %v4021_v56 = vsel %vm3893_vm7, %v3058_v47, %v3957_v22  ;;  %v3011_v5 = vpop.f32.mrf.mxu2  ;;  %3473 = vmatpush.bf16.msra.mxu0 %v6044_v4  ;;  %v6025_v22 = vld [vmem:[#allocation5 + $0xb8] sm:$0xf0]  ;;  %v6140_v4 = vor.u32 %v7413_v21, %v6137_v19  ;;  %v6711_v21 = vld [vmem:[#allocation5 + $0x608] sm:$0xf] }
 0x2e7   : > { %v8991_v36 = vpack.c.bf16 %v4021_v56, %v4017_v7  ;;  %v3012_v9 = vadd.f32 %v3011_v5, %v8891_v43  ;;  %v6028_v40 = vor.u32 %v7385_v60, %v6025_v22  ;;  %v6153_v43 = vld [vmem:[#allocation5 + $0x1b8] sm:$0xf0]  ;;  %v7381_v7 = vld [vmem:[#allocation5 + $0x8c] sm:$0xf] }
 0x2e8   : > { %v3111_v13 = vpop.f32.mrf.mxu0  ;;  %v6156_v5 = vor.u32 %v7417_v2, %v6153_v43  ;;  %v6012_v56 = vor.u32 %v7381_v7, %v6009_v48  ;;  %v5993_v60 = vld [vmem:[#allocation5 + $0x78] sm:$0xf0]  ;;  %v7409_v22 = vld [vmem:[#allocation5 + $0x16c] sm:$0xf]  ;;  %v9844_v7 = vld [vmem:[#allocation44_spill] sm:$0xff] }
 0x2e9   : > { %9841 = vst [vmem:[#allocation62_spill] sm:$0xff] %v8991_v36  ;;  %v3060_v20 = vpop.f32.mrf.mxu3  ;;  %v3112_v49 = vadd.f32 %v3111_v13, %v8921_v46  ;;  %v3160_v47 = vpop.f32.mrf.mxu1  ;;  %3522 = vmatpush.bf16.msra.mxu1 %v6172_v52  ;;  %v9843_v43 = vld [vmem:[#allocation43_spill] sm:$0xff]  ;;  %v9845_v48 = vld [vmem:[#allocation45_spill] sm:$0xff] }
 0x2ea   : > { %v3061_v0 = vadd.f32 %v3060_v20, %v3012_v9  ;;  %3474 = vmatpush.bf16.msra.mxu0 %v6028_v40 }
 0x2eb   : > { %v8995_v28 = vadd.f32 %v3160_v47, %v3112_v49  ;;  %v7377_v47 = vld [vmem:[#allocation5 + $0x6c] sm:$0xf] }
 0x2ec   : > { %vm3897_vm8 = vcmp.gt.f32.partialorder %v3061_v0, 0.0  ;;  %v3961_v62 = vmul.f32 0.2, %v3061_v0 }
 0x2ed   : > { %3523 = vmatpush.bf16.msra.mxu1 %v6156_v5  ;;  %v5996_v5 = vor.u32 %v7377_v47, %v5993_v60  ;;  %v7373_v47 = vld [vmem:[#allocation5 + $0x4c] sm:$0xf]  ;;  %v5977_v60 = vld [vmem:[#allocation5 + $0x58] sm:$0xf0] }
 0x2ee   : > { %v3013_v8 = vpop.f32.mrf.mxu2  ;;  %3475 = vmatpush.bf16.msra.mxu0 %v6012_v56  ;;  %v6839_v56 = vld [vmem:[#allocation5 + $0x708] sm:$0xf] }
 0x2ef   : > { %v3014_v20 = vadd.f32 %v3013_v8, %v8898_v14  ;;  %v9842_v14 = vld [vmem:[#allocation42_spill] sm:$0xff]  ;;  %v6121_v8 = vld [vmem:[#allocation5 + $0x178] sm:$0xf0] }
 0x2f0   : > { %v3114_v44 = vpop.f32.mrf.mxu0 }
 0x2f1   : > { %v3062_v9 = vpop.f32.mrf.mxu3  ;;  %v3115_v52 = vadd.f32 %v3114_v44, %v8921_v46  ;;  %v3163_v49 = vpop.f32.mrf.mxu1  ;;  %3524 = vmatpush.bf16.msra.mxu1 %v6140_v4  ;;  %v7591_v44 = vld [vmem:[#allocation5 + $0x714] sm:$0xf0]  ;;  %v4025_v4 = vsel %vm3897_vm8, %v3061_v0, %v3961_v62 }
 0x2f2   : > { %v3063_v13 = vadd.f32 %v3062_v9, %v3014_v20  ;;  %v7559_v20 = vld [vmem:[#allocation5 + $0x614] sm:$0xf0]  ;;  %v6124_v9 = vor.u32 %v7409_v22, %v6121_v8  ;;  %3476 = vmatpush.bf16.msra.mxu0 %v5996_v5  ;;  %v6840_v36 = vor.u32 %v7591_v44, %v6839_v56  ;;  %v5980_v22 = vor.u32 %v7373_v47, %v5977_v60  ;;  %v6105_v8 = vld [vmem:[#allocation5 + $0x158] sm:$0xf0] }
 0x2f3   : > { %v8999_v40 = vadd.f32 %v3163_v49, %v3115_v52  ;;  %3211 = vmatmul.bf16.gmra.mxu2 %v9842_v14  ;;  %3309 = vmatmul.bf16.gmra.mxu0 %v9843_v43  ;;  %v6712_v19 = vor.u32 %v7559_v20, %v6711_v21  ;;  %v7405_v43 = vld [vmem:[#allocation5 + $0x14c] sm:$0xf]  ;;  %v5961_v20 = vld [vmem:[#allocation5 + $0x38] sm:$0xf0] }
 0x2f4   : > { %vm3901_vm9 = vcmp.gt.f32.partialorder %v3063_v13, 0.0  ;;  %v3965_v2 = vmul.f32 0.2, %v3063_v13  ;;  %3358 = vmatmul.bf16.gmra.mxu1 %v9845_v48  ;;  %3430 = vmatpush.bf16.msra.mxu3 %v6840_v36  ;;  %v6108_v21 = vor.u32 %v7405_v43, %v6105_v8  ;;  %v5945_v36 = vld [vmem:[#allocation5 + $0x18] sm:$0xf0] }
 0x2f5   : > { %3525 = vmatpush.bf16.msra.mxu1 %v6124_v9  ;;  %3381 = vmatpush.bf16.msra.mxu2 %v6712_v19  ;;  %v7401_v9 = vld [vmem:[#allocation5 + $0x12c] sm:$0xf]  ;;  %v6073_v47 = vld [vmem:[#allocation5 + $0x118] sm:$0xf0] }
 0x2f6   : > { %3260 = vmatmul.bf16.gmra.mxu3 %v9844_v7  ;;  %v4029_v52 = vsel %vm3901_vm9, %v3063_v13, %v3965_v2  ;;  %v3016_v49 = vpop.f32.mrf.mxu2  ;;  %3477 = vmatpush.bf16.msra.mxu0 %v5980_v22  ;;  %v7369_v2 = vld [vmem:[#allocation5 + $0x2c] sm:$0xf] }
 0x2f7   : > { %v9007_v7 = vpack.c.bf16 %v4029_v52, %v4025_v4  ;;  %v3017_v48 = vadd.f32 %v3016_v49, %v8901_v27  ;;  %v5964_v44 = vor.u32 %v7369_v2, %v5961_v20  ;;  %v6089_v27 = vld [vmem:[#allocation5 + $0x138] sm:$0xf0]  ;;  %v7365_v52 = vld [vmem:[#allocation5 + $0xc] sm:$0xf]  ;;  %v9848_v20 = vld [vmem:[#allocation48_spill] sm:$0xff] }
 0x2f8   : > { %v3116_v5 = vpop.f32.mrf.mxu0  ;;  %v6092_v4 = vor.u32 %v7401_v9, %v6089_v27  ;;  %v7397_v43 = vld [vmem:[#allocation5 + $0x10c] sm:$0xf]  ;;  %v5948_v49 = vor.u32 %v7365_v52, %v5945_v36 }
 0x2f9   : > { %9846 = vst [vmem:[#allocation25_spill] sm:$0xff] %v9007_v7  ;;  %v3065_v14 = vpop.f32.mrf.mxu3  ;;  %v3117_v62 = vadd.f32 %v3116_v5, %v8921_v46  ;;  %v3165_v13 = vpop.f32.mrf.mxu1  ;;  %3526 = vmatpush.bf16.msra.mxu1 %v6108_v21  ;;  %v6076_v22 = vor.u32 %v7397_v43, %v6073_v47  ;;  %v7457_v9 = vld [vmem:[#allocation5 + $0x2ec] sm:$0xf] }
 0x2fa   : > { %v3066_v0 = vadd.f32 %v3065_v14, %v3017_v48  ;;  %3478 = vmatpush.bf16.msra.mxu0 %v5964_v44  ;;  %v6313_v44 = vld [vmem:[#allocation5 + $0x2f8] sm:$0xf0]  ;;  %v7489_v27 = vld [vmem:[#allocation5 + $0x3ec] sm:$0xf] }
 0x2fb   : > { %v9011_v56 = vadd.f32 %v3165_v13, %v3117_v62 }
 0x2fc   : > { %v3969_v8 = vmul.f32 0.2, %v3066_v0  ;;  %vm3905_vm10 = vcmp.gt.f32.partialorder %v3066_v0, 0.0 }
 0x2fd   : > { %3527 = vmatpush.bf16.msra.mxu1 %v6092_v4  ;;  %v6316_v4 = vor.u32 %v7457_v9, %v6313_v44 }
 0x2fe   : > { %v3018_v19 = vpop.f32.mrf.mxu2  ;;  %3479 = vmatpush.bf16.msra.mxu0 %v5948_v49  ;;  %v4033_v52 = vsel %vm3905_vm10, %v3066_v0, %v3969_v8 }
 0x2ff   : > { %v3019_v14 = vadd.f32 %v3018_v19, %v8908_v41  ;;  %v9847_v41 = vld [vmem:[#allocation47_spill] sm:$0xff]  ;;  %3570 = vmatpush.bf16.msrb.mxu2 %v6316_v4 }
 0x300   : > { %v3119_v60 = vpop.f32.mrf.mxu0  ;;  %v6441_v19 = vld [vmem:[#allocation5 + $0x3f8] sm:$0xf0] }
 0x301   : > { %v3067_v48 = vpop.f32.mrf.mxu3  ;;  %v3120_v21 = vadd.f32 %v3119_v60, %v8921_v46  ;;  %v3168_v62 = vpop.f32.mrf.mxu1  ;;  %3528 = vmatpush.bf16.msra.mxu1 %v6076_v22 }
 0x302   : > { %v3068_v5 = vadd.f32 %v3067_v48, %v3019_v14  ;;  %v6444_v14 = vor.u32 %v7489_v27, %v6441_v19 }
 0x303   : > { %v9015_v2 = vadd.f32 %v3168_v62, %v3120_v21  ;;  %3216 = vmatmul.bf16.gmra.mxu2 %v8526_v24  ;;  %3314 = vmatmul.bf16.gmra.mxu0 %v9798_v61 }
 0x304   : > { %vm3909_vm11 = vcmp.gt.f32.partialorder %v3068_v5, 0.0  ;;  %v3973_v13 = vmul.f32 0.2, %v3068_v5  ;;  %3363 = vmatmul.bf16.gmra.mxu1 %v9848_v20  ;;  %3619 = vmatpush.bf16.msrb.mxu3 %v6444_v14  ;;  %v9853_v14 = vld [vmem:[#allocation52_spill] sm:$0xff] }
 0x306   : > { %3265 = vmatmul.bf16.gmra.mxu3 %v9847_v41  ;;  %v4037_v36 = vsel %vm3909_vm11, %v3068_v5, %v3973_v13  ;;  %v3021_v43 = vpop.f32.mrf.mxu2 }
 0x307   : > { %v9021_v48 = vpack.c.bf16 %v4037_v36, %v4033_v52  ;;  %v3022_v49 = vadd.f32 %v3021_v43, %v8911_v23  ;;  %v9850_v52 = vld [vmem:[#allocation49_spill] sm:$0xff]  ;;  %v9851_v36 = vld [vmem:[#allocation50_spill] sm:$0xff]  ;;  %v9852_v43 = vld [vmem:[#allocation51_spill] sm:$0xff] }
 0x308   : > { %v3121_v60 = vpop.f32.mrf.mxu0 }
 0x309   : > { %9849 = vst [vmem:[#allocation47_spill] sm:$0xff] %v9021_v48  ;;  %v3070_v47 = vpop.f32.mrf.mxu3  ;;  %v3122_v21 = vadd.f32 %v3121_v60, %v8921_v46  ;;  %v3170_v62 = vpop.f32.mrf.mxu1 }
 0x30a   : > { %v3071_v22 = vadd.f32 %v3070_v47, %v3022_v49  ;;  %v6297_v49 = vld [vmem:[#allocation5 + $0x2d8] sm:$0xf0]  ;;  %v7485_v47 = vld [vmem:[#allocation5 + $0x3cc] sm:$0xf] }
 0x30b   : > { %v9025_v7 = vadd.f32 %v3170_v62, %v3122_v21  ;;  %v6425_v21 = vld [vmem:[#allocation5 + $0x3d8] sm:$0xf0] }
 0x30c   : > { %v3977_v13 = vmul.f32 0.2, %v3071_v22  ;;  %vm3913_vm12 = vcmp.gt.f32.partialorder %v3071_v22, 0.0 }
 0x30e   : > { %v3023_v9 = vpop.f32.mrf.mxu2  ;;  %v4041_v62 = vsel %vm3913_vm12, %v3071_v22, %v3977_v13 }
 0x30f   : > { %v3024_v0 = vadd.f32 %v3023_v9, %v8918_v16  ;;  %v7453_v16 = vld [vmem:[#allocation5 + $0x2cc] sm:$0xf] }
 0x310   : > { %v3124_v5 = vpop.f32.mrf.mxu0  ;;  %v6300_v60 = vor.u32 %v7453_v16, %v6297_v49 }
 0x311   : > { %v3072_v8 = vpop.f32.mrf.mxu3  ;;  %v3125_v27 = vadd.f32 %v3124_v5, %v8921_v46  ;;  %v3173_v23 = vpop.f32.mrf.mxu1 }
 0x312   : > { %v3073_v44 = vadd.f32 %v3072_v8, %v3024_v0  ;;  %v6428_v8 = vor.u32 %v7485_v47, %v6425_v21  ;;  %3571 = vmatpush.bf16.msrb.mxu2 %v6300_v60  ;;  %v9855_v60 = vld [vmem:[#allocation53_spill] sm:$0xff]  ;;  %v9856_v21 = vld [vmem:[#allocation16_spill] sm:$0xff] }
 0x313   : > { %v9029_v19 = vadd.f32 %v3173_v23, %v3125_v27  ;;  %3221 = vmatmul.bf16.gmra.mxu2 %v9850_v52  ;;  %3319 = vmatmul.bf16.gmra.mxu0 %v9851_v36 }
 0x314   : > { %vm3917_vm13 = vcmp.gt.f32.partialorder %v3073_v44, 0.0  ;;  %v3981_v4 = vmul.f32 0.2, %v3073_v44  ;;  %3368 = vmatmul.bf16.gmra.mxu1 %v9853_v14  ;;  %3620 = vmatpush.bf16.msrb.mxu3 %v6428_v8 }
 0x316   : > { %3270 = vmatmul.bf16.gmra.mxu3 %v9852_v43  ;;  %v4045_v9 = vsel %vm3917_vm13, %v3073_v44, %v3981_v4  ;;  %v3026_v0 = vpop.f32.mrf.mxu2 }
 0x317   : > { %v9035_v5 = vpack.c.bf16 %v4045_v9, %v4041_v62  ;;  %v3027_v27 = vadd.f32 %v3026_v0, %v8923_v38  ;;  %v9857_v62 = vld [vmem:[#allocation54_spill] sm:$0xff]  ;;  %v6409_v9 = vld [vmem:[#allocation5 + $0x3b8] sm:$0xf0] }
 0x318   : > { %v3126_v48 = vpop.f32.mrf.mxu0 }
 0x319   : > { %9854 = vst [vmem:[#allocation70_spill] sm:$0xff] %v9035_v5  ;;  %v3075_v23 = vpop.f32.mrf.mxu3  ;;  %v3127_v14 = vadd.f32 %v3126_v48, %v8921_v46  ;;  %v3175_v36 = vpop.f32.mrf.mxu1  ;;  %v9858_v46 = vld [vmem:[#allocation18_spill] sm:$0xff]  ;;  %v7449_v48 = vld [vmem:[#allocation5 + $0x2ac] sm:$0xf] }
 0x31a   : > { %v3076_v43 = vadd.f32 %v3075_v23, %v3027_v27 }
 0x31b   : > { %v9039_v52 = vadd.f32 %v3175_v36, %v3127_v14  ;;  %v6281_v36 = vld [vmem:[#allocation5 + $0x2b8] sm:$0xf0]  ;;  %v7481_v14 = vld [vmem:[#allocation5 + $0x3ac] sm:$0xf] }
 0x31c   : > { %v3985_v4 = vmul.f32 0.2, %v3076_v43  ;;  %vm3921_vm14 = vcmp.gt.f32.partialorder %v3076_v43, 0.0  ;;  %v6412_v23 = vor.u32 %v7481_v14, %v6409_v9  ;;  %v6393_v14 = vld [vmem:[#allocation5 + $0x398] sm:$0xf0] }
 0x31e   : > { %v3028_v16 = vpop.f32.mrf.mxu2  ;;  %v4049_v0 = vsel %vm3921_vm14, %v3076_v43, %v3985_v4  ;;  %3621 = vmatpush.bf16.msrb.mxu3 %v6412_v23 }
 0x31f   : > { %v3029_v22 = vadd.f32 %v3028_v16, %v8933_v12  ;;  %v6284_v12 = vor.u32 %v7449_v48, %v6281_v36 }
 0x320   : > { %v3285_v44 = vpop.f32.mrf.mxu0 }
 0x321   : > { %v3077_v13 = vpop.f32.mrf.mxu3  ;;  %v3334_v47 = vpop.f32.mrf.mxu1  ;;  %3572 = vmatpush.bf16.msrb.mxu2 %v6284_v12 }
 0x322   : > { %v3078_v49 = vadd.f32 %v3077_v13, %v3029_v22 }
 0x323   : > { %3382 = vmatmul.bf16.vlgmr.msra.gmra.mxu2 %v9855_v60  ;;  %3480 = vmatmul.bf16.vlgmr.msra.gmra.mxu0 %v9856_v21 }
 0x324   : > { %vm3925_vm15 = vcmp.gt.f32.partialorder %v3078_v49, 0.0  ;;  %v3989_v38 = vmul.f32 0.2, %v3078_v49  ;;  %3529 = vmatmul.bf16.vlgmr.msra.gmra.mxu1 %v9858_v46 }
 0x326   : > { %3431 = vmatmul.bf16.vlgmr.msra.gmra.mxu3 %v9857_v62  ;;  %v4053_v8 = vsel %vm3925_vm15, %v3078_v49, %v3989_v38  ;;  %v3187_v27 = vpop.f32.mrf.mxu2 }
 0x327   : > { %v9046_v16 = vpack.c.bf16 %v4053_v8, %v4049_v0  ;;  %v3188_v22 = vadd.f32 %v3187_v27, %v8927_v18  ;;  %v7445_v18 = vld [vmem:[#allocation5 + $0x28c] sm:$0xf] }
 0x328   : > { %v3287_v21 = vpop.f32.mrf.mxu0 }
 0x329   : > { %9859 = vst [vmem:[#allocation16_spill] sm:$0xff] %v9046_v16  ;;  %v3236_v13 = vpop.f32.mrf.mxu3  ;;  %v3336_v62 = vpop.f32.mrf.mxu1 }
 0x32a   : > { %v3237_v5 = vadd.f32 %v3236_v13, %v3188_v22 }
 0x32c   : > { %v3286_v46 = vadd.f32 %v3285_v44, %v3237_v5  ;;  %v6265_v5 = vld [vmem:[#allocation5 + $0x298] sm:$0xf0]  ;;  %v7477_v44 = vld [vmem:[#allocation5 + $0x38c] sm:$0xf] }
 0x32e   : > { %v9049_v60 = vadd.f32 %v3334_v47, %v3286_v46  ;;  %v3189_v20 = vpop.f32.mrf.mxu2  ;;  %v6268_v47 = vor.u32 %v7445_v18, %v6265_v5  ;;  %v6377_v18 = vld [vmem:[#allocation5 + $0x378] sm:$0xf0] }
 0x32f   : > { %v3190_v48 = vadd.f32 %v3189_v20, %v8937_v29  ;;  %v6396_v20 = vor.u32 %v7477_v44, %v6393_v14 }
 0x330   : > { %v3290_v4 = vpop.f32.mrf.mxu0  ;;  %3573 = vmatpush.bf16.msrb.mxu2 %v6268_v47 }
 0x331   : > { %v3238_v43 = vpop.f32.mrf.mxu3  ;;  %v3339_v38 = vpop.f32.mrf.mxu1  ;;  %3622 = vmatpush.bf16.msrb.mxu3 %v6396_v20 }
 0x332   : > { %v3239_v49 = vadd.f32 %v3238_v43, %v3190_v48 }
 0x333   : > { %3387 = vmatmul.bf16.gmra.mxu2 %v8604_v45  ;;  %3485 = vmatmul.bf16.gmra.mxu0 %v8322_v57 }
 0x334   : > { %v3288_v36 = vadd.f32 %v3287_v21, %v3239_v49  ;;  %3534 = vmatmul.bf16.gmra.mxu1 %v9813_v3  ;;  %v7441_v49 = vld [vmem:[#allocation5 + $0x26c] sm:$0xf] }
 0x336   : > { %3436 = vmatmul.bf16.gmra.mxu3 %v9812_v30  ;;  %v9056_v12 = vadd.f32 %v3336_v62, %v3288_v36  ;;  %v3192_v29 = vpop.f32.mrf.mxu2 }
 0x337   : > { %v3193_v9 = vadd.f32 %v3192_v29, %v8941_v59  ;;  %v9860_v59 = vld [vmem:[#allocation22_spill] sm:$0xff] }
 0x338   : > { %v3292_v8 = vpop.f32.mrf.mxu0 }
 0x339   : > { %v3241_v0 = vpop.f32.mrf.mxu3  ;;  %v3341_v27 = vpop.f32.mrf.mxu1 }
 0x33a   : > { %v3242_v57 = vadd.f32 %v3241_v0, %v3193_v9 }
 0x33c   : > { %v3291_v23 = vadd.f32 %v3290_v4, %v3242_v57  ;;  %v6249_v4 = vld [vmem:[#allocation5 + $0x278] sm:$0xf0] }
 0x33d   : > { %v6252_v36 = vor.u32 %v7441_v49, %v6249_v4  ;;  %v7437_v49 = vld [vmem:[#allocation5 + $0x24c] sm:$0xf] }
 0x33e   : > { %v9059_v22 = vadd.f32 %v3339_v38, %v3291_v23  ;;  %v3194_v3 = vpop.f32.mrf.mxu2  ;;  %v7473_v38 = vld [vmem:[#allocation5 + $0x36c] sm:$0xf] }
 0x33f   : > { %v3195_v13 = vadd.f32 %v3194_v3, %v8951_v54  ;;  %v6380_v44 = vor.u32 %v7473_v38, %v6377_v18  ;;  %3574 = vmatpush.bf16.msrb.mxu2 %v6252_v36  ;;  %v6361_v38 = vld [vmem:[#allocation5 + $0x358] sm:$0xf0] }
 0x340   : > { %v3295_v46 = vpop.f32.mrf.mxu0 }
 0x341   : > { %v3243_v21 = vpop.f32.mrf.mxu3  ;;  %v3344_v48 = vpop.f32.mrf.mxu1  ;;  %3623 = vmatpush.bf16.msrb.mxu3 %v6380_v44 }
 0x342   : > { %v3244_v62 = vadd.f32 %v3243_v21, %v3195_v13 }
 0x343   : > { %3392 = vmatmul.bf16.gmra.mxu2 %v8622_v63  ;;  %3490 = vmatmul.bf16.gmra.mxu0 %v8342_v50 }
 0x344   : > { %v3293_v43 = vadd.f32 %v3292_v8, %v3244_v62  ;;  %3539 = vmatmul.bf16.gmra.mxu1 %v9860_v59  ;;  %v9861_v62 = vld [vmem:[#allocation57_spill] sm:$0xff]  ;;  %v9864_v59 = vld [vmem:[#allocation24_spill] sm:$0xff] }
 0x346   : > { %3441 = vmatmul.bf16.gmra.mxu3 %v9814_v39  ;;  %v9066_v5 = vadd.f32 %v3341_v27, %v3293_v43  ;;  %v3197_v54 = vpop.f32.mrf.mxu2  ;;  %v9863_v43 = vld [vmem:[#allocation58_spill] sm:$0xff] }
 0x347   : > { %v3198_v47 = vadd.f32 %v3197_v54, %v8955_v31  ;;  %v9862_v31 = vld [vmem:[#allocation23_spill] sm:$0xff] }
 0x348   : > { %v3297_v29 = vpop.f32.mrf.mxu0 }
 0x349   : > { %v3246_v14 = vpop.f32.mrf.mxu3  ;;  %v3346_v20 = vpop.f32.mrf.mxu1 }
 0x34a   : > { %v3247_v50 = vadd.f32 %v3246_v14, %v3198_v47 }
 0x34c   : > { %v3296_v9 = vadd.f32 %v3295_v46, %v3247_v50  ;;  %v6233_v46 = vld [vmem:[#allocation5 + $0x258] sm:$0xf0] }
 0x34d   : > { %v6236_v4 = vor.u32 %v7437_v49, %v6233_v46  ;;  %v7553_v49 = vld [vmem:[#allocation5 + $0x5ec] sm:$0xf]  ;;  %v9865_v46 = vld [vmem:[#allocation59_spill] sm:$0xff] }
 0x34e   : > { %v9069_v0 = vadd.f32 %v3344_v48, %v3296_v9  ;;  %v3199_v8 = vpop.f32.mrf.mxu2  ;;  %v7469_v48 = vld [vmem:[#allocation5 + $0x34c] sm:$0xf] }
 0x34f   : > { %v3200_v57 = vadd.f32 %v3199_v8, %v8965_v55  ;;  %v6364_v18 = vor.u32 %v7469_v48, %v6361_v38  ;;  %3575 = vmatpush.bf16.msrb.mxu2 %v6236_v4  ;;  %v9866_v48 = vld [vmem:[#allocation17_spill] sm:$0xff]  ;;  %v6697_v38 = vld [vmem:[#allocation5 + $0x5f8] sm:$0xf0] }
 0x350   : > { %v3300_v3 = vpop.f32.mrf.mxu0 }
 0x351   : > { %v3248_v23 = vpop.f32.mrf.mxu3  ;;  %v3349_v13 = vpop.f32.mrf.mxu1  ;;  %3624 = vmatpush.bf16.msrb.mxu3 %v6364_v18  ;;  %v6700_v18 = vor.u32 %v7553_v49, %v6697_v38 }
 0x352   : > { %v3249_v27 = vadd.f32 %v3248_v23, %v3200_v57 }
 0x353   : > { %3397 = vmatmul.bf16.gmra.mxu2 %v9861_v62  ;;  %3495 = vmatmul.bf16.gmra.mxu0 %v9862_v31  ;;  %v7521_v31 = vld [vmem:[#allocation5 + $0x4ec] sm:$0xf] }
 0x354   : > { %v3298_v21 = vadd.f32 %v3297_v29, %v3249_v27  ;;  %3544 = vmatmul.bf16.gmra.mxu1 %v9864_v59  ;;  %v6569_v59 = vld [vmem:[#allocation5 + $0x4f8] sm:$0xf0] }
 0x355   : > { %v6572_v4 = vor.u32 %v7521_v31, %v6569_v59  ;;  %3717 = vmatpush.bf16.msrb.mxu1 %v6700_v18 }
 0x356   : > { %3446 = vmatmul.bf16.gmra.mxu3 %v9863_v43  ;;  %v9076_v36 = vadd.f32 %v3346_v20, %v3298_v21  ;;  %v3202_v55 = vpop.f32.mrf.mxu2 }
 0x357   : > { %v3203_v54 = vadd.f32 %v3202_v55, %v8969_v37  ;;  %v7433_v55 = vld [vmem:[#allocation5 + $0x22c] sm:$0xf]  ;;  %3668 = vmatpush.bf16.msrb.mxu0 %v6572_v4 }
 0x358   : > { %v3302_v47 = vpop.f32.mrf.mxu0 }
 0x359   : > { %v3251_v44 = vpop.f32.mrf.mxu3  ;;  %v3351_v29 = vpop.f32.mrf.mxu1 }
 0x35a   : > { %v3252_v14 = vadd.f32 %v3251_v44, %v3203_v54  ;;  %v7465_v54 = vld [vmem:[#allocation5 + $0x32c] sm:$0xf] }
 0x35c   : > { %v3301_v50 = vadd.f32 %v3300_v3, %v3252_v14  ;;  %v9867_v3 = vld [vmem:[#allocation60_spill] sm:$0xff]  ;;  %v6345_v14 = vld [vmem:[#allocation5 + $0x338] sm:$0xf0] }
 0x35e   : > { %v9079_v9 = vadd.f32 %v3349_v13, %v3301_v50  ;;  %v3204_v8 = vpop.f32.mrf.mxu2  ;;  %v9868_v13 = vld [vmem:[#allocation19_spill] sm:$0xff] }
 0x35f   : > { %v3205_v57 = vadd.f32 %v3204_v8, %v8979_v11  ;;  %v6217_v11 = vld [vmem:[#allocation5 + $0x238] sm:$0xf0]  ;;  %v6348_v8 = vor.u32 %v7465_v54, %v6345_v14 }
 0x360   : > { %v3305_v27 = vpop.f32.mrf.mxu0  ;;  %v6220_v44 = vor.u32 %v7433_v55, %v6217_v11  ;;  %v7545_v55 = vld [vmem:[#allocation5 + $0x5ac] sm:$0xf]  ;;  %v6665_v54 = vld [vmem:[#allocation5 + $0x5b8] sm:$0xf0] }
 0x361   : > { %v3253_v23 = vpop.f32.mrf.mxu3  ;;  %v3354_v21 = vpop.f32.mrf.mxu1  ;;  %3625 = vmatpush.bf16.msrb.mxu3 %v6348_v8  ;;  %v6668_v14 = vor.u32 %v7545_v55, %v6665_v54  ;;  %v7541_v8 = vld [vmem:[#allocation5 + $0x58c] sm:$0xf] }
 0x362   : > { %v3254_v20 = vadd.f32 %v3253_v23, %v3205_v57  ;;  %v7517_v57 = vld [vmem:[#allocation5 + $0x4cc] sm:$0xf]  ;;  %v6553_v23 = vld [vmem:[#allocation5 + $0x4d8] sm:$0xf0]  ;;  %3576 = vmatpush.bf16.msrb.mxu2 %v6220_v44 }
 0x363   : > { %3402 = vmatmul.bf16.gmra.mxu2 %v9865_v46  ;;  %3500 = vmatmul.bf16.gmra.mxu0 %v9866_v48  ;;  %v6556_v48 = vor.u32 %v7517_v57, %v6553_v23  ;;  %v6521_v57 = vld [vmem:[#allocation5 + $0x498] sm:$0xf0]  ;;  %v7429_v54 = vld [vmem:[#allocation5 + $0x20c] sm:$0xf] }
 0x364   : > { %v3303_v37 = vadd.f32 %v3302_v47, %v3254_v20  ;;  %3549 = vmatmul.bf16.gmra.mxu1 %v9868_v13  ;;  %v7549_v20 = vld [vmem:[#allocation5 + $0x5cc] sm:$0xf]  ;;  %v6681_v13 = vld [vmem:[#allocation5 + $0x5d8] sm:$0xf0] }
 0x365   : > { %v6684_v49 = vor.u32 %v7549_v20, %v6681_v13  ;;  %3669 = vmatpush.bf16.msrb.mxu0 %v6556_v48 }
 0x366   : > { %3451 = vmatmul.bf16.gmra.mxu3 %v9867_v3  ;;  %v9086_v50 = vadd.f32 %v3351_v29, %v3303_v37  ;;  %v3207_v47 = vpop.f32.mrf.mxu2  ;;  %v7513_v29 = vld [vmem:[#allocation5 + $0x4ac] sm:$0xf]  ;;  %v6537_v37 = vld [vmem:[#allocation5 + $0x4b8] sm:$0xf0] }
 0x367   : > { %v3208_v31 = vadd.f32 %v3207_v47, %v8983_v6  ;;  %3718 = vmatpush.bf16.msrb.mxu1 %v6684_v49  ;;  %v6540_v18 = vor.u32 %v7513_v29, %v6537_v37  ;;  %v7509_v47 = vld [vmem:[#allocation5 + $0x48c] sm:$0xf]  ;;  %v6505_v29 = vld [vmem:[#allocation5 + $0x478] sm:$0xf0] }
 0x368   : > { %v3307_v16 = vpop.f32.mrf.mxu0 }
 0x369   : > { %v3256_v59 = vpop.f32.mrf.mxu3  ;;  %v3356_v4 = vpop.f32.mrf.mxu1  ;;  %3670 = vmatpush.bf16.msrb.mxu0 %v6540_v18  ;;  %v9870_v18 = vld [vmem:[#allocation21_spill] sm:$0xff] }
 0x36a   : > { %v3257_v38 = vadd.f32 %v3256_v59, %v3208_v31  ;;  %v6524_v31 = vor.u32 %v7509_v47, %v6521_v57  ;;  %v6649_v59 = vld [vmem:[#allocation5 + $0x598] sm:$0xf0]  ;;  %v7461_v47 = vld [vmem:[#allocation5 + $0x30c] sm:$0xf] }
 0x36b   : > { %3719 = vmatpush.bf16.msrb.mxu1 %v6668_v14  ;;  %v6652_v13 = vor.u32 %v7541_v8, %v6649_v59  ;;  %v6201_v14 = vld [vmem:[#allocation5 + $0x218] sm:$0xf0]  ;;  %v7533_v59 = vld [vmem:[#allocation5 + $0x54c] sm:$0xf] }
 0x36c   : > { %v3306_v11 = vadd.f32 %v3305_v27, %v3257_v38  ;;  %v7505_v38 = vld [vmem:[#allocation5 + $0x46c] sm:$0xf]  ;;  %v6204_v57 = vor.u32 %v7429_v54, %v6201_v14  ;;  %v6329_v8 = vld [vmem:[#allocation5 + $0x318] sm:$0xf0] }
 0x36d   : > { %3671 = vmatpush.bf16.msrb.mxu0 %v6524_v31  ;;  %v6508_v55 = vor.u32 %v7505_v38, %v6505_v29  ;;  %v7501_v31 = vld [vmem:[#allocation5 + $0x44c] sm:$0xf]  ;;  %v6617_v29 = vld [vmem:[#allocation5 + $0x558] sm:$0xf0] }
 0x36e   : > { %v9089_v6 = vadd.f32 %v3354_v21, %v3306_v11  ;;  %v3209_v44 = vpop.f32.mrf.mxu2  ;;  %v7537_v21 = vld [vmem:[#allocation5 + $0x56c] sm:$0xf]  ;;  %v6633_v11 = vld [vmem:[#allocation5 + $0x578] sm:$0xf0]  ;;  %3577 = vmatpush.bf16.msrb.mxu2 %v6204_v57 }
 0x36f   : > { %v3210_v23 = vadd.f32 %v3209_v44, %v8995_v28  ;;  %3720 = vmatpush.bf16.msrb.mxu1 %v6652_v13  ;;  %v9869_v28 = vld [vmem:[#allocation61_spill] sm:$0xff]  ;;  %v6636_v44 = vor.u32 %v7537_v21, %v6633_v11  ;;  %v6620_v21 = vor.u32 %v7533_v59, %v6617_v29 }
 0x370   : > { %v3310_v48 = vpop.f32.mrf.mxu0  ;;  %v7529_v54 = vld [vmem:[#allocation5 + $0x52c] sm:$0xf] }
 0x371   : > { %v3258_v20 = vpop.f32.mrf.mxu3  ;;  %v3359_v27 = vpop.f32.mrf.mxu1  ;;  %3672 = vmatpush.bf16.msrb.mxu0 %v6508_v55 }
 0x372   : > { %v3259_v49 = vadd.f32 %v3258_v20, %v3210_v23  ;;  %v6332_v20 = vor.u32 %v7461_v47, %v6329_v8  ;;  %v6601_v47 = vld [vmem:[#allocation5 + $0x538] sm:$0xf0] }
 0x373   : > { %3407 = vmatmul.bf16.gmra.mxu2 %v8676_v26  ;;  %3505 = vmatmul.bf16.gmra.mxu0 %v8324_v58  ;;  %v6489_v58 = vld [vmem:[#allocation5 + $0x458] sm:$0xf0]  ;;  %v6604_v8 = vor.u32 %v7529_v54, %v6601_v47 }
 0x374   : > { %v3308_v37 = vadd.f32 %v3307_v16, %v3259_v49  ;;  %3554 = vmatmul.bf16.gmra.mxu1 %v9870_v18  ;;  %v6492_v38 = vor.u32 %v7501_v31, %v6489_v58  ;;  %3626 = vmatpush.bf16.msrb.mxu3 %v6332_v20  ;;  %v6457_v31 = vld [vmem:[#allocation5 + $0x418] sm:$0xf0]  ;;  %v7525_v20 = vld [vmem:[#allocation5 + $0x50c] sm:$0xf] }
 0x375   : > { %3721 = vmatpush.bf16.msrb.mxu1 %v6636_v44  ;;  %v6953_v54 = vld [vmem:[#allocation5 + $0x7f8] sm:$0xf0] }
 0x376   : > { %3456 = vmatmul.bf16.gmra.mxu3 %v9869_v28  ;;  %v9096_v23 = vadd.f32 %v3356_v4, %v3308_v37  ;;  %v3212_v16 = vpop.f32.mrf.mxu2  ;;  %3673 = vmatpush.bf16.msrb.mxu0 %v6492_v38  ;;  %v7497_v4 = vld [vmem:[#allocation5 + $0x42c] sm:$0xf]  ;;  %v6473_v37 = vld [vmem:[#allocation5 + $0x438] sm:$0xf0] }
 0x377   : > { %v3213_v13 = vadd.f32 %v3212_v16, %v8999_v40  ;;  %v6476_v44 = vor.u32 %v7497_v4, %v6473_v37  ;;  %v7493_v16 = vld [vmem:[#allocation5 + $0x40c] sm:$0xf] }
 0x378   : > { %v3312_v18 = vpop.f32.mrf.mxu0  ;;  %v7617_v4 = vld [vmem:[#allocation5 + $0x7ec] sm:$0xf] }
 0x379   : > { %v3261_v49 = vpop.f32.mrf.mxu3  ;;  %v3361_v55 = vpop.f32.mrf.mxu1  ;;  %3722 = vmatpush.bf16.msrb.mxu1 %v6620_v21  ;;  %v6956_v47 = vor.u32 %v7617_v4, %v6953_v54  ;;  %v6937_v4 = vld [vmem:[#allocation5 + $0x7d8] sm:$0xf0] }
 0x37a   : > { %v3262_v11 = vadd.f32 %v3261_v49, %v3213_v13  ;;  %3674 = vmatpush.bf16.msrb.mxu0 %v6476_v44  ;;  %v6460_v13 = vor.u32 %v7493_v16, %v6457_v31  ;;  %v6585_v49 = vld [vmem:[#allocation5 + $0x518] sm:$0xf0] }
 0x37b   : > { %v6588_v29 = vor.u32 %v7525_v20, %v6585_v49  ;;  %3815 = vmatpush.bf16.msra.mxu3 %v6956_v47 }
 0x37c   : > { %v3311_v14 = vadd.f32 %v3310_v48, %v3262_v11 }
 0x37d   : > { %3723 = vmatpush.bf16.msrb.mxu1 %v6604_v8 }
 0x37e   : > { %v9099_v40 = vadd.f32 %v3359_v27, %v3311_v14  ;;  %v3214_v57 = vpop.f32.mrf.mxu2  ;;  %3675 = vmatpush.bf16.msrb.mxu0 %v6460_v13  ;;  %v7585_v27 = vld [vmem:[#allocation5 + $0x6ec] sm:$0xf] }
 0x37f   : > { %v3215_v58 = vadd.f32 %v3214_v57, %v9011_v56  ;;  %v6825_v56 = vld [vmem:[#allocation5 + $0x6f8] sm:$0xf0] }
 0x380   : > { %v3315_v38 = vpop.f32.mrf.mxu0  ;;  %v6828_v37 = vor.u32 %v7585_v27, %v6825_v56 }
 0x381   : > { %v3263_v59 = vpop.f32.mrf.mxu3  ;;  %v3364_v48 = vpop.f32.mrf.mxu1  ;;  %3724 = vmatpush.bf16.msrb.mxu1 %v6588_v29 }
 0x382   : > { %v3264_v21 = vadd.f32 %v3263_v59, %v3215_v58  ;;  %3766 = vmatpush.bf16.msra.mxu2 %v6828_v37 }
 0x383   : > { %3412 = vmatmul.bf16.gmra.mxu2 %v8694_v10  ;;  %3510 = vmatmul.bf16.gmra.mxu0 %v8344_v51 }
 0x384   : > { %v3313_v11 = vadd.f32 %v3312_v18, %v3264_v21  ;;  %3559 = vmatmul.bf16.gmra.mxu1 %v8348_v53  ;;  %v7581_v21 = vld [vmem:[#allocation5 + $0x6cc] sm:$0xf] }
 0x386   : > { %3461 = vmatmul.bf16.gmra.mxu3 %v8696_v25  ;;  %v9106_v14 = vadd.f32 %v3361_v55, %v3313_v11  ;;  %v3217_v44 = vpop.f32.mrf.mxu2  ;;  %v7613_v11 = vld [vmem:[#allocation5 + $0x7cc] sm:$0xf] }
 0x387   : > { %v3218_v8 = vadd.f32 %v3217_v44, %v9015_v2  ;;  %v6940_v54 = vor.u32 %v7613_v11, %v6937_v4 }
 0x388   : > { %v3317_v57 = vpop.f32.mrf.mxu0 }
 0x389   : > { %v3266_v18 = vpop.f32.mrf.mxu3  ;;  %v3366_v16 = vpop.f32.mrf.mxu1  ;;  %3816 = vmatpush.bf16.msra.mxu3 %v6940_v54 }
 0x38a   : > { %v3267_v51 = vadd.f32 %v3266_v18, %v3218_v8  ;;  %v7881_v8 = vld [vmem:[#allocation7] sm:$0xf] }
 0x38c   : > { %v3316_v31 = vadd.f32 %v3315_v38, %v3267_v51 }
 0x38e   : > { %v9109_v20 = vadd.f32 %v3364_v48, %v3316_v31  ;;  %v3219_v53 = vpop.f32.mrf.mxu2  ;;  %v6809_v48 = vld [vmem:[#allocation5 + $0x6d8] sm:$0xf0] }
 0x38f   : > { %v3220_v58 = vadd.f32 %v3219_v53, %v9025_v7  ;;  %v6812_v56 = vor.u32 %v7581_v21, %v6809_v48 }
 0x390   : > { %v3320_v13 = vpop.f32.mrf.mxu0 }
 0x391   : > { %v3268_v59 = vpop.f32.mrf.mxu3  ;;  %v3369_v49 = vpop.f32.mrf.mxu1  ;;  %3767 = vmatpush.bf16.msra.mxu2 %v6812_v56 }
 0x392   : > { %v3269_v55 = vadd.f32 %v3268_v59, %v3220_v58 }
 0x393   : > { %3417 = vmatmul.bf16.gmra.mxu2 %v8712_v1  ;;  %3515 = vmatmul.bf16.gmra.mxu0 %v8364_v15 }
 0x394   : > { %v3318_v29 = vadd.f32 %v3317_v57, %v3269_v55  ;;  %3564 = vmatmul.bf16.gmra.mxu1 %v9825_v17  ;;  %v9119_v17 = vperm.slane %v7881_v8, 3 }
 0x396   : > { %3466 = vmatmul.bf16.gmra.mxu3 %v9824_v42  ;;  %v9116_v2 = vadd.f32 %v3366_v16, %v3318_v29  ;;  %v3222_v38 = vpop.f32.mrf.mxu2 }
 0x397   : > { %v3223_v7 = vadd.f32 %v3222_v38, %v9029_v19  ;;  %v6921_v38 = vld [vmem:[#allocation5 + $0x7b8] sm:$0xf0] }
 0x398   : > { %v3322_v37 = vpop.f32.mrf.mxu0 }
 0x399   : > { %v3271_v27 = vpop.f32.mrf.mxu3  ;;  %v3371_v47 = vpop.f32.mrf.mxu1 }
 0x39a   : > { %v3272_v44 = vadd.f32 %v3271_v27, %v3223_v7 }
 0x39c   : > { %v3321_v15 = vadd.f32 %v3320_v13, %v3272_v44  ;;  %v7577_v13 = vld [vmem:[#allocation5 + $0x6ac] sm:$0xf] }
 0x39e   : > { %v9121_v18 = vadd.f32 %v3369_v49, %v3321_v15  ;;  %v3224_v57 = vpop.f32.mrf.mxu2  ;;  %v6793_v49 = vld [vmem:[#allocation5 + $0x6b8] sm:$0xf0] }
 0x39f   : > { %v3225_v51 = vadd.f32 %v3224_v57, %v9039_v52  ;;  %v7609_v52 = vld [vmem:[#allocation5 + $0x7ac] sm:$0xf]  ;;  %v6796_v29 = vor.u32 %v7577_v13, %v6793_v49 }
 0x3a0   : > { %v3481_v19 = vpop.f32.mrf.mxu0  ;;  %v6924_v11 = vor.u32 %v7609_v52, %v6921_v38 }
 0x3a1   : > { %v3273_v16 = vpop.f32.mrf.mxu3  ;;  %v3482_v53 = vadd.f32 %v3481_v19, %v9119_v17  ;;  %v3530_v58 = vpop.f32.mrf.mxu1  ;;  %3768 = vmatpush.bf16.msra.mxu2 %v6796_v29  ;;  %v9872_v19 = vld [vmem:[#allocation27_spill] sm:$0xff] }
 0x3a2   : > { %v3274_v31 = vadd.f32 %v3273_v16, %v3225_v51  ;;  %3817 = vmatpush.bf16.msra.mxu3 %v6924_v11  ;;  %v9871_v16 = vld [vmem:[#allocation26_spill] sm:$0xff]  ;;  %v6905_v29 = vld [vmem:[#allocation5 + $0x798] sm:$0xf0] }
 0x3a3   : > { %v9125_v55 = vadd.f32 %v3530_v58, %v3482_v53  ;;  %3578 = vmatmul.bf16.vlgmr.msrb.gmra.mxu2 %v8382_v32  ;;  %3676 = vmatmul.bf16.vlgmr.msrb.gmra.mxu0 %v8384_v33  ;;  %v9874_v53 = vld [vmem:[#allocation29_spill] sm:$0xff]  ;;  %v6777_v58 = vld [vmem:[#allocation5 + $0x698] sm:$0xf0] }
 0x3a4   : > { %v3323_v59 = vadd.f32 %v3322_v37, %v3274_v31  ;;  %3725 = vmatmul.bf16.vlgmr.msrb.gmra.mxu1 %v8388_v35  ;;  %v9873_v31 = vld [vmem:[#allocation28_spill] sm:$0xff] }
 0x3a6   : > { %3627 = vmatmul.bf16.vlgmr.msrb.gmra.mxu3 %v8386_v34  ;;  %v9131_v21 = vadd.f32 %v3371_v47, %v3323_v59  ;;  %v3383_v48 = vpop.f32.mrf.mxu2  ;;  %v7605_v59 = vld [vmem:[#allocation5 + $0x78c] sm:$0xf] }
 0x3a7   : > { %v3384_v7 = vadd.f32 %v3383_v48, %v9049_v60  ;;  %v6908_v11 = vor.u32 %v7605_v59, %v6905_v29  ;;  %v7601_v59 = vld [vmem:[#allocation5 + $0x76c] sm:$0xf] }
 0x3a8   : > { %v3483_v32 = vpop.f32.mrf.mxu0 }
 0x3a9   : > { %v3432_v27 = vpop.f32.mrf.mxu3  ;;  %v3484_v34 = vadd.f32 %v3483_v32, %v9119_v17  ;;  %v3532_v56 = vpop.f32.mrf.mxu1  ;;  %3818 = vmatpush.bf16.msra.mxu3 %v6908_v11 }
 0x3aa   : > { %v3433_v33 = vadd.f32 %v3432_v27, %v3384_v7 }
 0x3ab   : > { %v9135_v35 = vadd.f32 %v3532_v56, %v3484_v34 }
 0x3ac   : > { %v3930_v47 = vmul.f32 0.2, %v3433_v33  ;;  %vm3866_vm0 = vcmp.gt.f32.partialorder %v3433_v33, 0.0 }
 0x3ae   : > { %v3385_v4 = vpop.f32.mrf.mxu2  ;;  %v3994_v13 = vsel %vm3866_vm0, %v3433_v33, %v3930_v47 }
 0x3af   : > { %v3386_v37 = vadd.f32 %v3385_v4, %v9056_v12  ;;  %v7573_v12 = vld [vmem:[#allocation5 + $0x68c] sm:$0xf] }
 0x3b0   : > { %v3486_v44 = vpop.f32.mrf.mxu0  ;;  %v6780_v52 = vor.u32 %v7573_v12, %v6777_v58  ;;  %v9878_v12 = vld [vmem:[#allocation33_spill] sm:$0xff]  ;;  %v6761_v58 = vld [vmem:[#allocation5 + $0x678] sm:$0xf0] }
 0x3b1   : > { %v3434_v54 = vpop.f32.mrf.mxu3  ;;  %v3487_v8 = vadd.f32 %v3486_v44, %v9119_v17  ;;  %v3535_v60 = vpop.f32.mrf.mxu1 }
 0x3b2   : > { %v3435_v15 = vadd.f32 %v3434_v54, %v3386_v37  ;;  %3769 = vmatpush.bf16.msra.mxu2 %v6780_v52 }
 0x3b3   : > { %v9139_v51 = vadd.f32 %v3535_v60, %v3487_v8  ;;  %3583 = vmatmul.bf16.gmra.mxu2 %v9871_v16  ;;  %3681 = vmatmul.bf16.gmra.mxu0 %v9872_v19  ;;  %v9875_v19 = vld [vmem:[#allocation30_spill] sm:$0xff] }
 0x3b4   : > { %vm3870_vm1 = vcmp.gt.f32.partialorder %v3435_v15, 0.0  ;;  %v3934_v57 = vmul.f32 0.2, %v3435_v15  ;;  %3730 = vmatmul.bf16.gmra.mxu1 %v9874_v53  ;;  %v9877_v53 = vld [vmem:[#allocation32_spill] sm:$0xff] }
 0x3b6   : > { %3632 = vmatmul.bf16.gmra.mxu3 %v9873_v31  ;;  %v3998_v49 = vsel %vm3870_vm1, %v3435_v15, %v3934_v57  ;;  %v3388_v48 = vpop.f32.mrf.mxu2  ;;  %v9876_v31 = vld [vmem:[#allocation31_spill] sm:$0xff] }
 0x3b7   : > { %v9145_v38 = vpack.c.bf16 %v3998_v49, %v3994_v13  ;;  %v3389_v7 = vadd.f32 %v3388_v48, %v9059_v22  ;;  %v6889_v49 = vld [vmem:[#allocation5 + $0x778] sm:$0xf0] }
 0x3b8   : > { %v3488_v32 = vpop.f32.mrf.mxu0  ;;  %v6892_v11 = vor.u32 %v7601_v59, %v6889_v49  ;;  %v6745_v59 = vld [vmem:[#allocation5 + $0x658] sm:$0xf0] }
 0x3b9   : > { %v3437_v27 = vpop.f32.mrf.mxu3  ;;  %v3489_v56 = vadd.f32 %v3488_v32, %v9119_v17  ;;  %v3537_v4 = vpop.f32.mrf.mxu1 }
 0x3ba   : > { %v3438_v34 = vadd.f32 %v3437_v27, %v3389_v7  ;;  %3819 = vmatpush.bf16.msra.mxu3 %v6892_v11 }
 0x3bb   : > { %v9149_v37 = vadd.f32 %v3537_v4, %v3489_v56 }
 0x3bc   : > { %v3938_v15 = vmul.f32 0.2, %v3438_v34  ;;  %vm3874_vm2 = vcmp.gt.f32.partialorder %v3438_v34, 0.0 }
 0x3be   : > { %v3390_v33 = vpop.f32.mrf.mxu2  ;;  %v4002_v52 = vsel %vm3874_vm2, %v3438_v34, %v3938_v15 }
 0x3bf   : > { %v3391_v54 = vadd.f32 %v3390_v33, %v9066_v5  ;;  %v7569_v5 = vld [vmem:[#allocation5 + $0x66c] sm:$0xf] }
 0x3c0   : > { %v3491_v47 = vpop.f32.mrf.mxu0  ;;  %v6764_v13 = vor.u32 %v7569_v5, %v6761_v58  ;;  %v9881_v5 = vld [vmem:[#allocation36_spill] sm:$0xff]  ;;  %v9882_v58 = vld [vmem:[#allocation37_spill] sm:$0xff] }
 0x3c1   : > { %v3439_v44 = vpop.f32.mrf.mxu3  ;;  %v3492_v60 = vadd.f32 %v3491_v47, %v9119_v17  ;;  %v3540_v22 = vpop.f32.mrf.mxu1 }
 0x3c2   : > { %v3440_v8 = vadd.f32 %v3439_v44, %v3391_v54  ;;  %3770 = vmatpush.bf16.msra.mxu2 %v6764_v13  ;;  %v7597_v13 = vld [vmem:[#allocation5 + $0x74c] sm:$0xf] }
 0x3c3   : > { %v9153_v16 = vadd.f32 %v3540_v22, %v3492_v60  ;;  %3588 = vmatmul.bf16.gmra.mxu2 %v9875_v19  ;;  %3686 = vmatmul.bf16.gmra.mxu0 %v9876_v31 }
 0x3c4   : > { %vm3878_vm3 = vcmp.gt.f32.partialorder %v3440_v8, 0.0  ;;  %v3942_v57 = vmul.f32 0.2, %v3440_v8  ;;  %3735 = vmatmul.bf16.gmra.mxu1 %v9878_v12  ;;  %v9880_v12 = vld [vmem:[#allocation35_spill] sm:$0xff] }
 0x3c6   : > { %3637 = vmatmul.bf16.gmra.mxu3 %v9877_v53  ;;  %v4006_v29 = vsel %vm3878_vm3, %v3440_v8, %v3942_v57  ;;  %v3393_v48 = vpop.f32.mrf.mxu2  ;;  %v9879_v53 = vld [vmem:[#allocation34_spill] sm:$0xff] }
 0x3c7   : > { %v9159_v7 = vpack.c.bf16 %v4006_v29, %v4002_v52  ;;  %v3394_v27 = vadd.f32 %v3393_v48, %v9069_v0  ;;  %v6873_v52 = vld [vmem:[#allocation5 + $0x758] sm:$0xf0] }
 0x3c8   : > { %v3493_v56 = vpop.f32.mrf.mxu0 }
 0x3c9   : > { %v3442_v32 = vpop.f32.mrf.mxu3  ;;  %v3494_v33 = vadd.f32 %v3493_v56, %v9119_v17  ;;  %v3542_v54 = vpop.f32.mrf.mxu1 }
 0x3ca   : > { %v3443_v4 = vadd.f32 %v3442_v32, %v3394_v27  ;;  %v6876_v27 = vor.u32 %v7597_v13, %v6873_v52  ;;  %v9883_v13 = vld [vmem:[#allocation38_spill] sm:$0xff]  ;;  %v7651_v52 = vld [vmem:[#allocation8 + $0xf4] sm:$0xf0] }
 0x3cb   : > { %v9163_v44 = vadd.f32 %v3542_v54, %v3494_v33 }
 0x3cc   : > { %v3946_v60 = vmul.f32 0.2, %v3443_v4  ;;  %vm3882_vm4 = vcmp.gt.f32.partialorder %v3443_v4, 0.0  ;;  %3820 = vmatpush.bf16.msra.mxu3 %v6876_v27  ;;  %v6729_v27 = vld [vmem:[#allocation5 + $0x638] sm:$0xf0] }
 0x3ce   : > { %v3395_v47 = vpop.f32.mrf.mxu2  ;;  %v4010_v29 = vsel %vm3882_vm4, %v3443_v4, %v3946_v60 }
 0x3cf   : > { %v3396_v34 = vadd.f32 %v3395_v47, %v9076_v36  ;;  %v7565_v36 = vld [vmem:[#allocation5 + $0x64c] sm:$0xf] }
 0x3d0   : > { %v3496_v8 = vpop.f32.mrf.mxu0  ;;  %v6748_v49 = vor.u32 %v7565_v36, %v6745_v59 }
 0x3d1   : > { %v3444_v15 = vpop.f32.mrf.mxu3  ;;  %v3497_v57 = vadd.f32 %v3496_v8, %v9119_v17  ;;  %v3545_v0 = vpop.f32.mrf.mxu1 }
 0x3d2   : > { %v3445_v22 = vadd.f32 %v3444_v15, %v3396_v34  ;;  %3771 = vmatpush.bf16.msra.mxu2 %v6748_v49  ;;  %v9884_v49 = vld [vmem:[#allocation39_spill] sm:$0xff] }
 0x3d3   : > { %v9167_v31 = vadd.f32 %v3545_v0, %v3497_v57  ;;  %3593 = vmatmul.bf16.gmra.mxu2 %v9879_v53  ;;  %3691 = vmatmul.bf16.gmra.mxu0 %v9880_v12  ;;  %v7015_v12 = vld [vmem:[#allocation8 + $0x70] sm:$0xf] }
 0x3d4   : > { %vm3886_vm5 = vcmp.gt.f32.partialorder %v3445_v22, 0.0  ;;  %v3950_v19 = vmul.f32 0.2, %v3445_v22  ;;  %3740 = vmatmul.bf16.gmra.mxu1 %v9882_v58  ;;  %v7079_v58 = vld [vmem:[#allocation8 + $0xf0] sm:$0xf] }
 0x3d6   : > { %3642 = vmatmul.bf16.gmra.mxu3 %v9881_v5  ;;  %v4014_v48 = vsel %vm3886_vm5, %v3445_v22, %v3950_v19  ;;  %v3398_v11 = vpop.f32.mrf.mxu2  ;;  %v7635_v5 = vld [vmem:[#allocation8 + $0x74] sm:$0xf0] }
 0x3d7   : > { %v9173_v32 = vpack.c.bf16 %v4014_v48, %v4010_v29  ;;  %v3399_v56 = vadd.f32 %v3398_v11, %v9079_v9  ;;  %v9885_v29 = vld [vmem:[#allocation40_spill] sm:$0xff]  ;;  %v9886_v48 = vld [vmem:[#allocation41_spill] sm:$0xff] }
 0x3d8   : > { %v3498_v54 = vpop.f32.mrf.mxu0  ;;  %v7561_v11 = vld [vmem:[#allocation5 + $0x62c] sm:$0xf] }
 0x3d9   : > { %v3447_v33 = vpop.f32.mrf.mxu3  ;;  %v3499_v34 = vadd.f32 %v3498_v54, %v9119_v17  ;;  %v3547_v15 = vpop.f32.mrf.mxu1  ;;  %v6732_v54 = vor.u32 %v7561_v11, %v6729_v27 }
 0x3da   : > { %v3448_v47 = vadd.f32 %v3447_v33, %v3399_v56  ;;  %v7080_v56 = vor.u32 %v7651_v52, %v7079_v58  ;;  %v7593_v33 = vld [vmem:[#allocation5 + $0x72c] sm:$0xf] }
 0x3db   : > { %v9177_v8 = vadd.f32 %v3547_v15, %v3499_v34  ;;  %v6857_v34 = vld [vmem:[#allocation5 + $0x738] sm:$0xf0]  ;;  %3772 = vmatpush.bf16.msra.mxu2 %v6732_v54  ;;  %v6991_v54 = vld [vmem:[#allocation8 + $0x40] sm:$0xf] }
 0x3dc   : > { %vm3890_vm6 = vcmp.gt.f32.partialorder %v3448_v47, 0.0  ;;  %v3954_v0 = vmul.f32 0.2, %v3448_v47  ;;  %4527 = vmatpush.bf16.msra.mxu1 %v7080_v56 }
 0x3de   : > { %v3400_v57 = vpop.f32.mrf.mxu2  ;;  %v4018_v15 = vsel %vm3890_vm6, %v3448_v47, %v3954_v0 }
 0x3df   : > { %v3401_v4 = vadd.f32 %v3400_v57, %v9086_v50  ;;  %v7016_v50 = vor.u32 %v7635_v5, %v7015_v12 }
 0x3e0   : > { %v3501_v22 = vpop.f32.mrf.mxu0 }
 0x3e1   : > { %v3449_v60 = vpop.f32.mrf.mxu3  ;;  %v3502_v9 = vadd.f32 %v3501_v22, %v9119_v17  ;;  %v3550_v53 = vpop.f32.mrf.mxu1  ;;  %4478 = vmatpush.bf16.msra.mxu0 %v7016_v50  ;;  %v7007_v22 = vld [vmem:[#allocation8 + $0x60] sm:$0xf] }
 0x3e2   : > { %v3450_v19 = vadd.f32 %v3449_v60, %v3401_v4  ;;  %v6860_v60 = vor.u32 %v7593_v33, %v6857_v34  ;;  %v7629_v34 = vld [vmem:[#allocation8 + $0x44] sm:$0xf0] }
 0x3e3   : > { %v9181_v59 = vadd.f32 %v3550_v53, %v3502_v9  ;;  %3598 = vmatmul.bf16.gmra.mxu2 %v9883_v13  ;;  %3696 = vmatmul.bf16.gmra.mxu0 %v9884_v49  ;;  %v7633_v9 = vld [vmem:[#allocation8 + $0x64] sm:$0xf0]  ;;  %v7071_v53 = vld [vmem:[#allocation8 + $0xe0] sm:$0xf] }
 0x3e4   : > { %vm3894_vm7 = vcmp.gt.f32.partialorder %v3450_v19, 0.0  ;;  %v3958_v36 = vmul.f32 0.2, %v3450_v19  ;;  %3745 = vmatmul.bf16.gmra.mxu1 %v9886_v48  ;;  %v7008_v58 = vor.u32 %v7633_v9, %v7007_v22  ;;  %v7649_v49 = vld [vmem:[#allocation8 + $0xe4] sm:$0xf0]  ;;  %3821 = vmatpush.bf16.msra.mxu3 %v6860_v60  ;;  %v6992_v60 = vor.u32 %v7629_v34, %v6991_v54 }
 0x3e5   : > { %v7072_v52 = vor.u32 %v7649_v49, %v7071_v53  ;;  %v7063_v48 = vld [vmem:[#allocation8 + $0xd0] sm:$0xf]  ;;  %v7645_v22 = vld [vmem:[#allocation8 + $0xc4] sm:$0xf0]  ;;  %v6713_v54 = vld [vmem:[#allocation5 + $0x618] sm:$0xf0] }
 0x3e6   : > { %3647 = vmatmul.bf16.gmra.mxu3 %v9885_v29  ;;  %v4022_v57 = vsel %vm3894_vm7, %v3450_v19, %v3958_v36  ;;  %v3403_v4 = vpop.f32.mrf.mxu2  ;;  %4479 = vmatpush.bf16.msra.mxu0 %v7008_v58  ;;  %v6999_v36 = vld [vmem:[#allocation8 + $0x50] sm:$0xf]  ;;  %v7631_v29 = vld [vmem:[#allocation8 + $0x54] sm:$0xf0] }
 0x3e7   : > { %v9189_v12 = vpack.c.bf16 %v4022_v57, %v4018_v15  ;;  %v3404_v5 = vadd.f32 %v3403_v4, %v9089_v6  ;;  %4528 = vmatpush.bf16.msra.mxu1 %v7072_v52  ;;  %v7000_v27 = vor.u32 %v7631_v29, %v6999_v36  ;;  %v7647_v6 = vld [vmem:[#allocation8 + $0xd4] sm:$0xf0]  ;;  %v7055_v15 = vld [vmem:[#allocation8 + $0xc0] sm:$0xf] }
 0x3e8   : > { %v3503_v50 = vpop.f32.mrf.mxu0  ;;  %v7064_v56 = vor.u32 %v7647_v6, %v7063_v48  ;;  %v7056_v53 = vor.u32 %v7645_v22, %v7055_v15  ;;  %v7627_v52 = vld [vmem:[#allocation8 + $0x34] sm:$0xf0]  ;;  %v9889_v6 = vld [vmem:[#allocation44_spill] sm:$0xff]  ;;  %v7589_v15 = vld [vmem:[#allocation5 + $0x70c] sm:$0xf] }
 0x3e9   : > { %v3452_v13 = vpop.f32.mrf.mxu3  ;;  %v3504_v0 = vadd.f32 %v3503_v50, %v9119_v17  ;;  %v3552_v19 = vpop.f32.mrf.mxu1  ;;  %v6983_v50 = vld [vmem:[#allocation8 + $0x30] sm:$0xf]  ;;  %v9888_v29 = vld [vmem:[#allocation43_spill] sm:$0xff] }
 0x3ea   : > { %v3453_v47 = vadd.f32 %v3452_v13, %v3404_v5  ;;  %4480 = vmatpush.bf16.msra.mxu0 %v7000_v27  ;;  %v6984_v48 = vor.u32 %v7627_v52, %v6983_v50  ;;  %v7643_v27 = vld [vmem:[#allocation8 + $0xb4] sm:$0xf0]  ;;  %v7039_v50 = vld [vmem:[#allocation8 + $0xa0] sm:$0xf] }
 0x3eb   : > { %v9193_v11 = vadd.f32 %v3552_v19, %v3504_v0  ;;  %4529 = vmatpush.bf16.msra.mxu1 %v7064_v56  ;;  %v7047_v0 = vld [vmem:[#allocation8 + $0xb0] sm:$0xf]  ;;  %v9890_v56 = vld [vmem:[#allocation45_spill] sm:$0xff] }
 0x3ec   : > { %vm3898_vm8 = vcmp.gt.f32.partialorder %v3453_v47, 0.0  ;;  %v3962_v5 = vmul.f32 0.2, %v3453_v47  ;;  %v7048_v34 = vor.u32 %v7643_v27, %v7047_v0  ;;  %v7641_v27 = vld [vmem:[#allocation8 + $0xa4] sm:$0xf0] }
 0x3ee   : > { %v3405_v33 = vpop.f32.mrf.mxu2  ;;  %4481 = vmatpush.bf16.msra.mxu0 %v6992_v60  ;;  %v4026_v60 = vsel %vm3898_vm8, %v3453_v47, %v3962_v5 }
 0x3ef   : > { %v3406_v57 = vadd.f32 %v3405_v33, %v9096_v23  ;;  %4530 = vmatpush.bf16.msra.mxu1 %v7056_v53  ;;  %v9887_v23 = vld [vmem:[#allocation42_spill] sm:$0xff]  ;;  %v7557_v33 = vld [vmem:[#allocation5 + $0x60c] sm:$0xf] }
 0x3f0   : > { %v3506_v9 = vpop.f32.mrf.mxu0 }
 0x3f1   : > { %v3454_v4 = vpop.f32.mrf.mxu3  ;;  %v3507_v58 = vadd.f32 %v3506_v9, %v9119_v17  ;;  %v3555_v49 = vpop.f32.mrf.mxu1 }
 0x3f2   : > { %v3455_v13 = vadd.f32 %v3454_v4, %v3406_v57  ;;  %v6716_v57 = vor.u32 %v7557_v33, %v6713_v54  ;;  %4482 = vmatpush.bf16.msra.mxu0 %v6984_v48  ;;  %v6841_v4 = vld [vmem:[#allocation5 + $0x718] sm:$0xf0]  ;;  %v7031_v33 = vld [vmem:[#allocation8 + $0x90] sm:$0xf] }
 0x3f3   : > { %v9197_v36 = vadd.f32 %v3555_v49, %v3507_v58  ;;  %3603 = vmatmul.bf16.gmra.mxu2 %v9887_v23  ;;  %3701 = vmatmul.bf16.gmra.mxu0 %v9888_v29  ;;  %v6844_v53 = vor.u32 %v7589_v15, %v6841_v4  ;;  %v6975_v58 = vld [vmem:[#allocation8 + $0x20] sm:$0xf]  ;;  %v7625_v49 = vld [vmem:[#allocation8 + $0x24] sm:$0xf0] }
 0x3f4   : > { %vm3902_vm9 = vcmp.gt.f32.partialorder %v3455_v13, 0.0  ;;  %v3966_v19 = vmul.f32 0.2, %v3455_v13  ;;  %3750 = vmatmul.bf16.gmra.mxu1 %v9890_v56  ;;  %3773 = vmatpush.bf16.msra.mxu2 %v6716_v57  ;;  %v6976_v0 = vor.u32 %v7625_v49, %v6975_v58  ;;  %v7623_v56 = vld [vmem:[#allocation8 + $0x14] sm:$0xf0] }
 0x3f5   : > { %4531 = vmatpush.bf16.msra.mxu1 %v7048_v34  ;;  %3822 = vmatpush.bf16.msra.mxu3 %v6844_v53  ;;  %v6959_v4 = vld [vmem:[#allocation8] sm:$0xf]  ;;  %v7637_v49 = vld [vmem:[#allocation8 + $0x84] sm:$0xf0] }
 0x3f6   : > { %3652 = vmatmul.bf16.gmra.mxu3 %v9889_v6  ;;  %v4030_v22 = vsel %vm3902_vm9, %v3455_v13, %v3966_v19  ;;  %v3408_v9 = vpop.f32.mrf.mxu2  ;;  %v7040_v6 = vor.u32 %v7641_v27, %v7039_v50  ;;  %4483 = vmatpush.bf16.msra.mxu0 %v6976_v0  ;;  %v6967_v19 = vld [vmem:[#allocation8 + $0x10] sm:$0xf] }
 0x3f7   : > { %v9205_v52 = vpack.c.bf16 %v4030_v22, %v4026_v60  ;;  %v3409_v23 = vadd.f32 %v3408_v9, %v9099_v40  ;;  %v6968_v34 = vor.u32 %v7623_v56, %v6967_v19  ;;  %v7639_v40 = vld [vmem:[#allocation8 + $0x94] sm:$0xf0]  ;;  %v7621_v60 = vld [vmem:[#allocation8 + $0x4] sm:$0xf0]  ;;  %v7023_v22 = vld [vmem:[#allocation8 + $0x80] sm:$0xf] }
 0x3f8   : > { %v3508_v48 = vpop.f32.mrf.mxu0  ;;  %v7032_v15 = vor.u32 %v7639_v40, %v7031_v33  ;;  %v6960_v58 = vor.u32 %v7621_v60, %v6959_v4 }
 0x3f9   : > { %v3457_v29 = vpop.f32.mrf.mxu3  ;;  %v3509_v5 = vadd.f32 %v3508_v48, %v9119_v17  ;;  %v3557_v13 = vpop.f32.mrf.mxu1  ;;  %4532 = vmatpush.bf16.msra.mxu1 %v7040_v6 }
 0x3fa   : > { %v3458_v47 = vadd.f32 %v3457_v29, %v3409_v23  ;;  %4484 = vmatpush.bf16.msra.mxu0 %v6968_v34  ;;  %v7024_v23 = vor.u32 %v7637_v49, %v7023_v22 }
 0x3fb   : > { %v9209_v54 = vadd.f32 %v3557_v13, %v3509_v5 }
 0x3fc   : > { %v3970_v29 = vmul.f32 0.2, %v3458_v47  ;;  %vm3906_vm10 = vcmp.gt.f32.partialorder %v3458_v47, 0.0 }
 0x3fd   : > { %4533 = vmatpush.bf16.msra.mxu1 %v7032_v15 }
 0x3fe   : > { %v3410_v57 = vpop.f32.mrf.mxu2  ;;  %4485 = vmatpush.bf16.msra.mxu0 %v6960_v58  ;;  %v4034_v13 = vsel %vm3906_vm10, %v3458_v47, %v3970_v29  ;;  %v9893_v29 = vld [vmem:[#allocation50_spill] sm:$0xff] }
 0x3ff   : > { %v3411_v9 = vadd.f32 %v3410_v57, %v9106_v14  ;;  %v9891_v14 = vld [vmem:[#allocation48_spill] sm:$0xff] }
 0x400   : > { %v3511_v50 = vpop.f32.mrf.mxu0 }
 0x401   : > { %v3459_v53 = vpop.f32.mrf.mxu3  ;;  %v3512_v27 = vadd.f32 %v3511_v50, %v9119_v17  ;;  %v3560_v48 = vpop.f32.mrf.mxu1  ;;  %4534 = vmatpush.bf16.msra.mxu1 %v7024_v23  ;;  %v9892_v23 = vld [vmem:[#allocation49_spill] sm:$0xff] }
 0x402   : > { %v3460_v0 = vadd.f32 %v3459_v53, %v3411_v9 }
 0x403   : > { %v9213_v5 = vadd.f32 %v3560_v48, %v3512_v27  ;;  %3608 = vmatmul.bf16.gmra.mxu2 %v8526_v24  ;;  %3706 = vmatmul.bf16.gmra.mxu0 %v9798_v61  ;;  %v9895_v27 = vld [vmem:[#allocation52_spill] sm:$0xff] }
 0x404   : > { %vm3910_vm11 = vcmp.gt.f32.partialorder %v3460_v0, 0.0  ;;  %v3974_v6 = vmul.f32 0.2, %v3460_v0  ;;  %3755 = vmatmul.bf16.gmra.mxu1 %v9891_v14 }
 0x406   : > { %3657 = vmatmul.bf16.gmra.mxu3 %v9847_v41  ;;  %v4038_v19 = vsel %vm3910_vm11, %v3460_v0, %v3974_v6  ;;  %v3413_v56 = vpop.f32.mrf.mxu2  ;;  %v9894_v0 = vld [vmem:[#allocation51_spill] sm:$0xff] }
 0x407   : > { %v9219_v33 = vpack.c.bf16 %v4038_v19, %v4034_v13  ;;  %v3414_v34 = vadd.f32 %v3413_v56, %v9109_v20 }
 0x408   : > { %v3513_v15 = vpop.f32.mrf.mxu0 }
 0x409   : > { %v3462_v40 = vpop.f32.mrf.mxu3  ;;  %v3514_v4 = vadd.f32 %v3513_v15, %v9119_v17  ;;  %v3562_v60 = vpop.f32.mrf.mxu1 }
 0x40a   : > { %v3463_v57 = vadd.f32 %v3462_v40, %v3414_v34 }
 0x40b   : > { %v9223_v24 = vadd.f32 %v3562_v60, %v3514_v4  ;;  %v7143_v60 = vld [vmem:[#allocation8 + $0x170] sm:$0xf] }
 0x40c   : > { %v3978_v47 = vmul.f32 0.2, %v3463_v57  ;;  %vm3914_vm12 = vcmp.gt.f32.partialorder %v3463_v57, 0.0 }
 0x40e   : > { %v3415_v61 = vpop.f32.mrf.mxu2 }
 0x40f   : > { %v3416_v41 = vadd.f32 %v3415_v61, %v9116_v2  ;;  %v4042_v2 = vsel %vm3914_vm12, %v3463_v57, %v3978_v47  ;;  %v7667_v61 = vld [vmem:[#allocation8 + $0x174] sm:$0xf0] }
 0x410   : > { %v3516_v9 = vpop.f32.mrf.mxu0 }
 0x411   : > { %v3464_v22 = vpop.f32.mrf.mxu3  ;;  %v3517_v58 = vadd.f32 %v3516_v9, %v9119_v17  ;;  %v3565_v49 = vpop.f32.mrf.mxu1  ;;  %v7144_v9 = vor.u32 %v7667_v61, %v7143_v60 }
 0x412   : > { %v3465_v53 = vadd.f32 %v3464_v22, %v3416_v41  ;;  %v7207_v41 = vld [vmem:[#allocation8 + $0x1f0] sm:$0xf]  ;;  %v7683_v22 = vld [vmem:[#allocation8 + $0x1f4] sm:$0xf0] }
 0x413   : > { %v9227_v50 = vadd.f32 %v3565_v49, %v3517_v58  ;;  %3613 = vmatmul.bf16.gmra.mxu2 %v9892_v23  ;;  %3711 = vmatmul.bf16.gmra.mxu0 %v9893_v29  ;;  %v7208_v57 = vor.u32 %v7683_v22, %v7207_v41  ;;  %v9896_v29 = vld [vmem:[#allocation53_spill] sm:$0xff]  ;;  %v7135_v41 = vld [vmem:[#allocation8 + $0x160] sm:$0xf] }
 0x414   : > { %vm3918_vm13 = vcmp.gt.f32.partialorder %v3465_v53, 0.0  ;;  %v3982_v20 = vmul.f32 0.2, %v3465_v53  ;;  %3760 = vmatmul.bf16.gmra.mxu1 %v9895_v27  ;;  %4576 = vmatpush.bf16.msrb.mxu2 %v7144_v9  ;;  %v9898_v27 = vld [vmem:[#allocation54_spill] sm:$0xff]  ;;  %v7665_v22 = vld [vmem:[#allocation8 + $0x164] sm:$0xf0] }
 0x415   : > { %4625 = vmatpush.bf16.msrb.mxu3 %v7208_v57  ;;  %v7199_v9 = vld [vmem:[#allocation8 + $0x1e0] sm:$0xf]  ;;  %v7136_v57 = vor.u32 %v7665_v22, %v7135_v41  ;;  %v7127_v41 = vld [vmem:[#allocation8 + $0x150] sm:$0xf] }
 0x416   : > { %3662 = vmatmul.bf16.gmra.mxu3 %v9894_v0  ;;  %v4046_v48 = vsel %vm3918_vm13, %v3465_v53, %v3982_v20  ;;  %v3418_v6 = vpop.f32.mrf.mxu2  ;;  %v9897_v0 = vld [vmem:[#allocation63_spill] sm:$0xff]  ;;  %v7191_v22 = vld [vmem:[#allocation8 + $0x1d0] sm:$0xf] }
 0x417   : > { %v9233_v14 = vpack.c.bf16 %v4046_v48, %v4042_v2  ;;  %v3419_v13 = vadd.f32 %v3418_v6, %v9121_v18  ;;  %v9899_v2 = vld [vmem:[#allocation55_spill] sm:$0xff] }
 0x418   : > { %v3518_v56 = vpop.f32.mrf.mxu0  ;;  %4577 = vmatpush.bf16.msrb.mxu2 %v7136_v57 }
 0x419   : > { %v3467_v19 = vpop.f32.mrf.mxu3  ;;  %v3519_v40 = vadd.f32 %v3518_v56, %v9119_v17  ;;  %v3567_v15 = vpop.f32.mrf.mxu1 }
 0x41a   : > { %v3468_v34 = vadd.f32 %v3467_v19, %v3419_v13 }
 0x41b   : > { %v9237_v4 = vadd.f32 %v3567_v15, %v3519_v40 }
 0x41c   : > { %v3986_v49 = vmul.f32 0.2, %v3468_v34  ;;  %vm3922_vm14 = vcmp.gt.f32.partialorder %v3468_v34, 0.0 }
 0x41e   : > { %v3420_v47 = vpop.f32.mrf.mxu2  ;;  %v4050_v48 = vsel %vm3922_vm14, %v3468_v34, %v3986_v49 }
 0x41f   : > { %v3421_v53 = vadd.f32 %v3420_v47, %v9131_v21  ;;  %v7681_v47 = vld [vmem:[#allocation8 + $0x1e4] sm:$0xf0] }
 0x420   : > { %v3677_v18 = vpop.f32.mrf.mxu0 }
 0x421   : > { %v3469_v58 = vpop.f32.mrf.mxu3  ;;  %v3726_v23 = vpop.f32.mrf.mxu1 }
 0x422   : > { %v3470_v20 = vadd.f32 %v3469_v58, %v3421_v53  ;;  %v7200_v53 = vor.u32 %v7681_v47, %v7199_v9  ;;  %v7679_v9 = vld [vmem:[#allocation8 + $0x1d4] sm:$0xf0] }
 0x423   : > { %3774 = vmatmul.bf16.vlgmr.msra.gmra.mxu2 %v9896_v29  ;;  %4486 = vmatmul.bf16.vlgmr.msra.gmra.mxu0 %v9897_v0  ;;  %v7192_v57 = vor.u32 %v7679_v9, %v7191_v22  ;;  %v7677_v22 = vld [vmem:[#allocation8 + $0x1c4] sm:$0xf0] }
 0x424   : > { %vm3926_vm15 = vcmp.gt.f32.partialorder %v3470_v20, 0.0  ;;  %v3990_v17 = vmul.f32 0.2, %v3470_v20  ;;  %4535 = vmatmul.bf16.vlgmr.msra.gmra.mxu1 %v9899_v2  ;;  %4626 = vmatpush.bf16.msrb.mxu3 %v7200_v53 }
 0x426   : > { %3823 = vmatmul.bf16.vlgmr.msra.gmra.mxu3 %v9898_v27  ;;  %v4054_v21 = vsel %vm3926_vm15, %v3470_v20, %v3990_v17  ;;  %v3579_v6 = vpop.f32.mrf.mxu2 }
 0x427   : > { %v9244_v13 = vpack.c.bf16 %v4054_v21, %v4050_v48  ;;  %v3580_v19 = vadd.f32 %v3579_v6, %v9125_v55  ;;  %v9902_v48 = vld [vmem:[#allocation20_spill] sm:$0xff] }
 0x428   : > { %v3679_v40 = vpop.f32.mrf.mxu0  ;;  %4627 = vmatpush.bf16.msrb.mxu3 %v7192_v57 }
 0x429   : > { %9900 = vst [vmem:[#allocation18_spill] sm:$0xff] %v9244_v13  ;;  %v3628_v56 = vpop.f32.mrf.mxu3  ;;  %v3728_v60 = vpop.f32.mrf.mxu1 }
 0x42a   : > { %v3629_v15 = vadd.f32 %v3628_v56, %v3580_v19 }
 0x42c   : > { %v3678_v61 = vadd.f32 %v3677_v18, %v3629_v15  ;;  %v9901_v18 = vld [vmem:[#allocation64_spill] sm:$0xff] }
 0x42e   : > { %v9247_v58 = vadd.f32 %v3726_v23, %v3678_v61  ;;  %v3581_v34 = vpop.f32.mrf.mxu2 }
 0x42f   : > { %v3582_v49 = vadd.f32 %v3581_v34, %v9135_v35 }
 0x430   : > { %v3682_v55 = vpop.f32.mrf.mxu0 }
 0x431   : > { %v3630_v20 = vpop.f32.mrf.mxu3  ;;  %v3731_v29 = vpop.f32.mrf.mxu1 }
 0x432   : > { %v3631_v17 = vadd.f32 %v3630_v20, %v3582_v49 }
 0x433   : > { %3779 = vmatmul.bf16.gmra.mxu2 %v8604_v45  ;;  %4491 = vmatmul.bf16.gmra.mxu0 %v9901_v18 }
 0x434   : > { %v3680_v27 = vadd.f32 %v3679_v40, %v3631_v17  ;;  %4540 = vmatmul.bf16.gmra.mxu1 %v9902_v48  ;;  %v7663_v40 = vld [vmem:[#allocation8 + $0x154] sm:$0xf0]  ;;  %v9904_v17 = vld [vmem:[#allocation56_spill] sm:$0xff] }
 0x435   : > { %v7128_v45 = vor.u32 %v7663_v40, %v7127_v41  ;;  %v7119_v41 = vld [vmem:[#allocation8 + $0x140] sm:$0xf] }
 0x436   : > { %3828 = vmatmul.bf16.gmra.mxu3 %v9812_v30  ;;  %v9254_v23 = vadd.f32 %v3728_v60, %v3680_v27  ;;  %v3584_v21 = vpop.f32.mrf.mxu2  ;;  %v7183_v40 = vld [vmem:[#allocation8 + $0x1c0] sm:$0xf] }
 0x437   : > { %v3585_v6 = vadd.f32 %v3584_v21, %v9139_v51  ;;  %4578 = vmatpush.bf16.msrb.mxu2 %v7128_v45  ;;  %v7184_v45 = vor.u32 %v7677_v22, %v7183_v40  ;;  %v7675_v40 = vld [vmem:[#allocation8 + $0x1b4] sm:$0xf0] }
 0x438   : > { %v3684_v19 = vpop.f32.mrf.mxu0 }
 0x439   : > { %v3633_v35 = vpop.f32.mrf.mxu3  ;;  %v3733_v15 = vpop.f32.mrf.mxu1  ;;  %4628 = vmatpush.bf16.msrb.mxu3 %v7184_v45 }
 0x43a   : > { %v3634_v56 = vadd.f32 %v3633_v35, %v3585_v6 }
 0x43c   : > { %v3683_v61 = vadd.f32 %v3682_v55, %v3634_v56  ;;  %v9903_v55 = vld [vmem:[#allocation65_spill] sm:$0xff] }
 0x43e   : > { %v9257_v47 = vadd.f32 %v3731_v29, %v3683_v61  ;;  %v3586_v30 = vpop.f32.mrf.mxu2 }
 0x43f   : > { %v3587_v60 = vadd.f32 %v3586_v30, %v9149_v37 }
 0x440   : > { %v3687_v51 = vpop.f32.mrf.mxu0 }
 0x441   : > { %v3635_v53 = vpop.f32.mrf.mxu3  ;;  %v3736_v49 = vpop.f32.mrf.mxu1 }
 0x442   : > { %v3636_v34 = vadd.f32 %v3635_v53, %v3587_v60 }
 0x443   : > { %3784 = vmatmul.bf16.gmra.mxu2 %v8622_v63  ;;  %4496 = vmatmul.bf16.gmra.mxu0 %v9903_v55 }
 0x444   : > { %v3685_v20 = vadd.f32 %v3684_v19, %v3636_v34  ;;  %4545 = vmatmul.bf16.gmra.mxu1 %v9904_v17  ;;  %v7661_v19 = vld [vmem:[#allocation8 + $0x144] sm:$0xf0]  ;;  %v9906_v34 = vld [vmem:[#allocation62_spill] sm:$0xff] }
 0x445   : > { %v7120_v63 = vor.u32 %v7661_v19, %v7119_v41  ;;  %v7111_v41 = vld [vmem:[#allocation8 + $0x130] sm:$0xf] }
 0x446   : > { %3833 = vmatmul.bf16.gmra.mxu3 %v9814_v39  ;;  %v9264_v29 = vadd.f32 %v3733_v15, %v3685_v20  ;;  %v3589_v27 = vpop.f32.mrf.mxu2  ;;  %v7175_v19 = vld [vmem:[#allocation8 + $0x1b0] sm:$0xf] }
 0x447   : > { %v3590_v21 = vadd.f32 %v3589_v27, %v9153_v16  ;;  %4579 = vmatpush.bf16.msrb.mxu2 %v7120_v63  ;;  %v7176_v63 = vor.u32 %v7675_v40, %v7175_v19  ;;  %v7648_v19 = vld [vmem:[#allocation8 + $0xe4] sm:$0xf]  ;;  %v7073_v40 = vld [vmem:[#allocation8 + $0xe8] sm:$0xf0] }
 0x448   : > { %v3689_v6 = vpop.f32.mrf.mxu0 }
 0x449   : > { %v3638_v37 = vpop.f32.mrf.mxu3  ;;  %v3738_v56 = vpop.f32.mrf.mxu1  ;;  %4629 = vmatpush.bf16.msrb.mxu3 %v7176_v63 }
 0x44a   : > { %v3639_v35 = vadd.f32 %v3638_v37, %v3590_v21 }
 0x44c   : > { %v3688_v61 = vadd.f32 %v3687_v51, %v3639_v35  ;;  %v9905_v51 = vld [vmem:[#allocation66_spill] sm:$0xff] }
 0x44e   : > { %v9267_v9 = vadd.f32 %v3736_v49, %v3688_v61  ;;  %v3591_v39 = vpop.f32.mrf.mxu2 }
 0x44f   : > { %v3592_v15 = vadd.f32 %v3591_v39, %v9163_v44 }
 0x450   : > { %v3692_v16 = vpop.f32.mrf.mxu0 }
 0x451   : > { %v3640_v57 = vpop.f32.mrf.mxu3  ;;  %v3741_v60 = vpop.f32.mrf.mxu1 }
 0x452   : > { %v3641_v30 = vadd.f32 %v3640_v57, %v3592_v15  ;;  %v7634_v57 = vld [vmem:[#allocation8 + $0x74] sm:$0xf] }
 0x453   : > { %3789 = vmatmul.bf16.gmra.mxu2 %v9861_v62  ;;  %4501 = vmatmul.bf16.gmra.mxu0 %v9905_v51 }
 0x454   : > { %v3690_v53 = vadd.f32 %v3689_v6, %v3641_v30  ;;  %4550 = vmatmul.bf16.gmra.mxu1 %v9906_v34  ;;  %v7659_v6 = vld [vmem:[#allocation8 + $0x134] sm:$0xf0]  ;;  %v7017_v30 = vld [vmem:[#allocation8 + $0x78] sm:$0xf0] }
 0x455   : > { %v7112_v62 = vor.u32 %v7659_v6, %v7111_v41  ;;  %v7632_v41 = vld [vmem:[#allocation8 + $0x64] sm:$0xf]  ;;  %v7009_v6 = vld [vmem:[#allocation8 + $0x68] sm:$0xf0] }
 0x456   : > { %3838 = vmatmul.bf16.gmra.mxu3 %v9863_v43  ;;  %v9274_v49 = vadd.f32 %v3738_v56, %v3690_v53  ;;  %v3594_v20 = vpop.f32.mrf.mxu2 }
 0x457   : > { %v3595_v27 = vadd.f32 %v3594_v20, %v9167_v31  ;;  %4580 = vmatpush.bf16.msrb.mxu2 %v7112_v62  ;;  %v9907_v20 = vld [vmem:[#allocation67_spill] sm:$0xff]  ;;  %v7012_v62 = vor.u32 %v7632_v41, %v7009_v6 }
 0x458   : > { %v3694_v21 = vpop.f32.mrf.mxu0 }
 0x459   : > { %v3643_v44 = vpop.f32.mrf.mxu3  ;;  %v3743_v35 = vpop.f32.mrf.mxu1 }
 0x45a   : > { %v3644_v37 = vadd.f32 %v3643_v44, %v3595_v27  ;;  %v7020_v27 = vor.u32 %v7634_v57, %v7017_v30  ;;  %v9908_v44 = vld [vmem:[#allocation25_spill] sm:$0xff]  ;;  %v7103_v30 = vld [vmem:[#allocation8 + $0x120] sm:$0xf] }
 0x45c   : > { %v3693_v61 = vadd.f32 %v3692_v16, %v3644_v37  ;;  %v7650_v16 = vld [vmem:[#allocation8 + $0xf4] sm:$0xf]  ;;  %4674 = vmatpush.bf16.msrb.mxu0 %v7020_v27 }
 0x45e   : > { %v9277_v22 = vadd.f32 %v3741_v60, %v3693_v61  ;;  %v3596_v43 = vpop.f32.mrf.mxu2  ;;  %v7081_v60 = vld [vmem:[#allocation8 + $0xf8] sm:$0xf0] }
 0x45f   : > { %v3597_v56 = vadd.f32 %v3596_v43, %v9177_v8  ;;  %v7084_v8 = vor.u32 %v7650_v16, %v7081_v60  ;;  %v7076_v43 = vor.u32 %v7648_v19, %v7073_v40  ;;  %v7657_v16 = vld [vmem:[#allocation8 + $0x124] sm:$0xf0] }
 0x460   : > { %v3697_v31 = vpop.f32.mrf.mxu0  ;;  %4675 = vmatpush.bf16.msrb.mxu0 %v7012_v62  ;;  %v7104_v60 = vor.u32 %v7657_v16, %v7103_v30  ;;  %v7644_v62 = vld [vmem:[#allocation8 + $0xc4] sm:$0xf] }
 0x461   : > { %v3645_v45 = vpop.f32.mrf.mxu3  ;;  %v3746_v15 = vpop.f32.mrf.mxu1  ;;  %4723 = vmatpush.bf16.msrb.mxu1 %v7084_v8  ;;  %v7673_v8 = vld [vmem:[#allocation8 + $0x1a4] sm:$0xf0] }
 0x462   : > { %v3646_v39 = vadd.f32 %v3645_v45, %v3597_v56  ;;  %v7630_v45 = vld [vmem:[#allocation8 + $0x54] sm:$0xf]  ;;  %4581 = vmatpush.bf16.msrb.mxu2 %v7104_v60 }
 0x463   : > { %3794 = vmatmul.bf16.gmra.mxu2 %v9865_v46  ;;  %4506 = vmatmul.bf16.gmra.mxu0 %v9907_v20 }
 0x464   : > { %v3695_v53 = vadd.f32 %v3694_v21, %v3646_v39  ;;  %4555 = vmatmul.bf16.gmra.mxu1 %v9908_v44  ;;  %v7001_v39 = vld [vmem:[#allocation8 + $0x58] sm:$0xf0] }
 0x465   : > { %4724 = vmatpush.bf16.msrb.mxu1 %v7076_v43  ;;  %v7004_v27 = vor.u32 %v7630_v45, %v7001_v39 }
 0x466   : > { %3843 = vmatmul.bf16.gmra.mxu3 %v9867_v3  ;;  %v9284_v37 = vadd.f32 %v3743_v35, %v3695_v53  ;;  %v3599_v61 = vpop.f32.mrf.mxu2  ;;  %v7646_v35 = vld [vmem:[#allocation8 + $0xd4] sm:$0xf]  ;;  %v7167_v53 = vld [vmem:[#allocation8 + $0x1a0] sm:$0xf] }
 0x467   : > { %v3600_v21 = vadd.f32 %v3599_v61, %v9181_v59  ;;  %v7065_v59 = vld [vmem:[#allocation8 + $0xd8] sm:$0xf0]  ;;  %v7168_v61 = vor.u32 %v7673_v8, %v7167_v53  ;;  %4676 = vmatpush.bf16.msrb.mxu0 %v7004_v27  ;;  %v9909_v27 = vld [vmem:[#allocation46_spill] sm:$0xff] }
 0x468   : > { %v3699_v63 = vpop.f32.mrf.mxu0  ;;  %v7068_v41 = vor.u32 %v7646_v35, %v7065_v59  ;;  %v7626_v35 = vld [vmem:[#allocation8 + $0x34] sm:$0xf]  ;;  %v9910_v8 = vld [vmem:[#allocation47_spill] sm:$0xff] }
 0x469   : > { %v3648_v46 = vpop.f32.mrf.mxu3  ;;  %v3748_v3 = vpop.f32.mrf.mxu1  ;;  %4630 = vmatpush.bf16.msrb.mxu3 %v7168_v61 }
 0x46a   : > { %v3649_v56 = vadd.f32 %v3648_v46, %v3600_v21  ;;  %v7628_v21 = vld [vmem:[#allocation8 + $0x44] sm:$0xf]  ;;  %v6993_v46 = vld [vmem:[#allocation8 + $0x48] sm:$0xf0]  ;;  %4725 = vmatpush.bf16.msrb.mxu1 %v7068_v41 }
 0x46b   : > { %v6996_v43 = vor.u32 %v7628_v21, %v6993_v46  ;;  %v6977_v21 = vld [vmem:[#allocation8 + $0x28] sm:$0xf0]  ;;  %v7640_v46 = vld [vmem:[#allocation8 + $0xa4] sm:$0xf] }
 0x46c   : > { %v3698_v57 = vadd.f32 %v3697_v31, %v3649_v56  ;;  %v7057_v56 = vld [vmem:[#allocation8 + $0xc8] sm:$0xf0] }
 0x46d   : > { %4677 = vmatpush.bf16.msrb.mxu0 %v6996_v43  ;;  %v7060_v16 = vor.u32 %v7644_v62, %v7057_v56 }
 0x46e   : > { %v9287_v6 = vadd.f32 %v3746_v15, %v3698_v57  ;;  %v3601_v19 = vpop.f32.mrf.mxu2  ;;  %v6985_v15 = vld [vmem:[#allocation8 + $0x38] sm:$0xf0]  ;;  %v7642_v57 = vld [vmem:[#allocation8 + $0xb4] sm:$0xf] }
 0x46f   : > { %v3602_v40 = vadd.f32 %v3601_v19, %v9193_v11  ;;  %v6988_v60 = vor.u32 %v7626_v35, %v6985_v15  ;;  %v7049_v11 = vld [vmem:[#allocation8 + $0xb8] sm:$0xf0]  ;;  %4726 = vmatpush.bf16.msrb.mxu1 %v7060_v16  ;;  %v7624_v19 = vld [vmem:[#allocation8 + $0x24] sm:$0xf]  ;;  %v7655_v16 = vld [vmem:[#allocation8 + $0x114] sm:$0xf0] }
 0x470   : > { %v3702_v45 = vpop.f32.mrf.mxu0  ;;  %v7052_v59 = vor.u32 %v7642_v57, %v7049_v11  ;;  %v6980_v62 = vor.u32 %v7624_v19, %v6977_v21  ;;  %v7622_v35 = vld [vmem:[#allocation8 + $0x14] sm:$0xf]  ;;  %v7159_v57 = vld [vmem:[#allocation8 + $0x190] sm:$0xf] }
 0x471   : > { %v3650_v31 = vpop.f32.mrf.mxu3  ;;  %v3751_v30 = vpop.f32.mrf.mxu1  ;;  %4678 = vmatpush.bf16.msrb.mxu0 %v6988_v60  ;;  %v6969_v60 = vld [vmem:[#allocation8 + $0x18] sm:$0xf0] }
 0x472   : > { %v3651_v39 = vadd.f32 %v3650_v31, %v3602_v40  ;;  %v7041_v40 = vld [vmem:[#allocation8 + $0xa8] sm:$0xf0]  ;;  %v6972_v13 = vor.u32 %v7622_v35, %v6969_v60 }
 0x473   : > { %3799 = vmatmul.bf16.gmra.mxu2 %v8676_v26  ;;  %4511 = vmatmul.bf16.gmra.mxu0 %v9909_v27 }
 0x474   : > { %v3700_v53 = vadd.f32 %v3699_v63, %v3651_v39  ;;  %4560 = vmatmul.bf16.gmra.mxu1 %v9910_v8  ;;  %v7095_v39 = vld [vmem:[#allocation8 + $0x110] sm:$0xf] }
 0x475   : > { %4727 = vmatpush.bf16.msrb.mxu1 %v7052_v59  ;;  %4679 = vmatpush.bf16.msrb.mxu0 %v6980_v62  ;;  %v7096_v15 = vor.u32 %v7655_v16, %v7095_v39  ;;  %v7636_v39 = vld [vmem:[#allocation8 + $0x84] sm:$0xf] }
 0x476   : > { %3848 = vmatmul.bf16.gmra.mxu3 %v9869_v28  ;;  %v9294_v61 = vadd.f32 %v3748_v3, %v3700_v53  ;;  %v3604_v41 = vpop.f32.mrf.mxu2  ;;  %v7044_v28 = vor.u32 %v7640_v46, %v7041_v40  ;;  %v7671_v53 = vld [vmem:[#allocation8 + $0x194] sm:$0xf0]  ;;  %v7087_v46 = vld [vmem:[#allocation8 + $0x100] sm:$0xf] }
 0x477   : > { %v3605_v63 = vadd.f32 %v3604_v41, %v9197_v36  ;;  %v7160_v11 = vor.u32 %v7671_v53, %v7159_v57  ;;  %v7638_v36 = vld [vmem:[#allocation8 + $0x94] sm:$0xf]  ;;  %v7033_v41 = vld [vmem:[#allocation8 + $0x98] sm:$0xf0]  ;;  %4582 = vmatpush.bf16.msrb.mxu2 %v7096_v15  ;;  %v7025_v57 = vld [vmem:[#allocation8 + $0x88] sm:$0xf0] }
 0x478   : > { %v3704_v31 = vpop.f32.mrf.mxu0  ;;  %v7036_v19 = vor.u32 %v7638_v36, %v7033_v41 }
 0x479   : > { %v3653_v26 = vpop.f32.mrf.mxu3  ;;  %v3753_v56 = vpop.f32.mrf.mxu1  ;;  %4728 = vmatpush.bf16.msrb.mxu1 %v7044_v28  ;;  %4631 = vmatpush.bf16.msrb.mxu3 %v7160_v11 }
 0x47a   : > { %v3654_v43 = vadd.f32 %v3653_v26, %v3605_v63  ;;  %4680 = vmatpush.bf16.msrb.mxu0 %v6972_v13  ;;  %v7653_v63 = vld [vmem:[#allocation8 + $0x104] sm:$0xf0]  ;;  %v7620_v26 = vld [vmem:[#allocation8 + $0x4] sm:$0xf] }
 0x47b   : > { %v7088_v40 = vor.u32 %v7653_v63, %v7087_v46  ;;  %v9911_v13 = vld [vmem:[#allocation68_spill] sm:$0xff]  ;;  %v7669_v63 = vld [vmem:[#allocation8 + $0x184] sm:$0xf0] }
 0x47c   : > { %v3703_v3 = vadd.f32 %v3702_v45, %v3654_v43  ;;  %v6961_v43 = vld [vmem:[#allocation8 + $0x8] sm:$0xf0] }
 0x47d   : > { %v6964_v35 = vor.u32 %v7620_v26, %v6961_v43  ;;  %4729 = vmatpush.bf16.msrb.mxu1 %v7036_v19  ;;  %4583 = vmatpush.bf16.msrb.mxu2 %v7088_v40 }
 0x47e   : > { %v9297_v21 = vadd.f32 %v3751_v30, %v3703_v3  ;;  %v3606_v59 = vpop.f32.mrf.mxu2  ;;  %v7028_v30 = vor.u32 %v7636_v39, %v7025_v57 }
 0x47f   : > { %v3607_v45 = vadd.f32 %v3606_v59, %v9209_v54  ;;  %4681 = vmatpush.bf16.msrb.mxu0 %v6964_v35  ;;  %v9912_v54 = vld [vmem:[#allocation70_spill] sm:$0xff] }
 0x480   : > { %v3707_v16 = vpop.f32.mrf.mxu0 }
 0x481   : > { %v3655_v62 = vpop.f32.mrf.mxu3  ;;  %v3756_v28 = vpop.f32.mrf.mxu1  ;;  %4730 = vmatpush.bf16.msrb.mxu1 %v7028_v30 }
 0x482   : > { %v3656_v15 = vadd.f32 %v3655_v62, %v3607_v45 }
 0x483   : > { %3804 = vmatmul.bf16.gmra.mxu2 %v8694_v10  ;;  %4516 = vmatmul.bf16.gmra.mxu0 %v9911_v13 }
 0x484   : > { %v3705_v3 = vadd.f32 %v3704_v31, %v3656_v15  ;;  %4565 = vmatmul.bf16.gmra.mxu1 %v9912_v54  ;;  %v7151_v31 = vld [vmem:[#allocation8 + $0x180] sm:$0xf] }
 0x485   : > { %v7152_v45 = vor.u32 %v7669_v63, %v7151_v31 }
 0x486   : > { %3853 = vmatmul.bf16.gmra.mxu3 %v8696_v25  ;;  %v9304_v53 = vadd.f32 %v3753_v56, %v3705_v3  ;;  %v3609_v60 = vpop.f32.mrf.mxu2 }
 0x487   : > { %v3610_v11 = vadd.f32 %v3609_v60, %v9213_v5  ;;  %4632 = vmatpush.bf16.msrb.mxu3 %v7152_v45  ;;  %v9913_v5 = vld [vmem:[#allocation69_spill] sm:$0xff]  ;;  %v9320_v60 = vld [vmem:[%s9616_s4] sm:$0x3] }
 0x488   : > { %v3709_v41 = vpop.f32.mrf.mxu0 }
 0x489   : > { %v3658_v36 = vpop.f32.mrf.mxu3  ;;  %v3758_v59 = vpop.f32.mrf.mxu1 }
 0x48a   : > { %v3659_v19 = vadd.f32 %v3658_v36, %v3610_v11  ;;  %v7666_v11 = vld [vmem:[#allocation8 + $0x174] sm:$0xf]  ;;  %v7145_v36 = vld [vmem:[#allocation8 + $0x178] sm:$0xf0] }
 0x48c   : > { %v3708_v46 = vadd.f32 %v3707_v16, %v3659_v19  ;;  %v9914_v16 = vld [vmem:[#allocation16_spill] sm:$0xff]  ;;  %v7209_v19 = vld [vmem:[#allocation8 + $0x1f8] sm:$0xf0] }
 0x48e   : > { %v9307_v10 = vadd.f32 %v3756_v28, %v3708_v46  ;;  %v3611_v26 = vpop.f32.mrf.mxu2 }
 0x48f   : > { %v3612_v25 = vadd.f32 %v3611_v26, %v9223_v24 }
 0x490   : > { %v3712_v40 = vpop.f32.mrf.mxu0 }
 0x491   : > { %v3660_v62 = vpop.f32.mrf.mxu3  ;;  %v3761_v43 = vpop.f32.mrf.mxu1 }
 0x492   : > { %v3661_v56 = vadd.f32 %v3660_v62, %v3612_v25 }
 0x493   : > { %3809 = vmatmul.bf16.gmra.mxu2 %v8712_v1  ;;  %4521 = vmatmul.bf16.gmra.mxu0 %v9913_v5 }
 0x494   : > { %v3710_v39 = vadd.f32 %v3709_v41, %v3661_v56  ;;  %4570 = vmatmul.bf16.gmra.mxu1 %v9914_v16  ;;  %v7148_v41 = vor.u32 %v7666_v11, %v7145_v36  ;;  %v7137_v36 = vld [vmem:[#allocation8 + $0x168] sm:$0xf0] }
 0x496   : > { %3858 = vmatmul.bf16.gmra.mxu3 %v9824_v42  ;;  %v9314_v35 = vadd.f32 %v3758_v59, %v3710_v39  ;;  %v3614_v57 = vpop.f32.mrf.mxu2  ;;  %v7682_v42 = vld [vmem:[#allocation8 + $0x1f4] sm:$0xf]  ;;  %v9323_v59 = vperm.slane %v9320_v60, 0  ;;  %4772 = vmatpush.bf16.msra.mxu2 %v7148_v41  ;;  %v7201_v41 = vld [vmem:[#allocation8 + $0x1e8] sm:$0xf0] }
 0x497   : > { %v3615_v15 = vadd.f32 %v3614_v57, %v9227_v50  ;;  %v7212_v46 = vor.u32 %v7682_v42, %v7209_v19  ;;  %v7680_v42 = vld [vmem:[#allocation8 + $0x1e4] sm:$0xf] }
 0x498   : > { %v3714_v28 = vpop.f32.mrf.mxu0 }
 0x499   : > { %v3663_v24 = vpop.f32.mrf.mxu3  ;;  %v3763_v3 = vpop.f32.mrf.mxu1  ;;  %4821 = vmatpush.bf16.msra.mxu3 %v7212_v46  ;;  %v7204_v46 = vor.u32 %v7680_v42, %v7201_v41  ;;  %v7662_v42 = vld [vmem:[#allocation8 + $0x154] sm:$0xf] }
 0x49a   : > { %v3664_v30 = vadd.f32 %v3663_v24, %v3615_v15  ;;  %v7678_v41 = vld [vmem:[#allocation8 + $0x1d4] sm:$0xf] }
 0x49c   : > { %v3713_v1 = vadd.f32 %v3712_v40, %v3664_v30 }
 0x49d   : > { %4822 = vmatpush.bf16.msra.mxu3 %v7204_v46 }
 0x49e   : > { %v9325_v50 = vadd.f32 %v3761_v43, %v3713_v1  ;;  %v3616_v31 = vpop.f32.mrf.mxu2 }
 0x49f   : > { %v3617_v63 = vadd.f32 %v3616_v31, %v9237_v4 }
 0x4a0   : > { %v4487_v45 = vpop.f32.mrf.mxu0 }
 0x4a1   : > { %v3665_v26 = vpop.f32.mrf.mxu3  ;;  %v4488_v62 = vadd.f32 %v4487_v45, %v9323_v59  ;;  %v4536_v40 = vpop.f32.mrf.mxu1 }
 0x4a2   : > { %v3666_v25 = vadd.f32 %v3665_v26, %v3617_v63 }
 0x4a3   : > { %v9329_v39 = vadd.f32 %v4536_v40, %v4488_v62  ;;  %4584 = vmatmul.bf16.vlgmr.msrb.gmra.mxu2 %v9145_v38  ;;  %4682 = vmatmul.bf16.vlgmr.msrb.gmra.mxu0 %v9897_v0 }
 0x4a4   : > { %v3715_v56 = vadd.f32 %v3714_v28, %v3666_v25  ;;  %4731 = vmatmul.bf16.vlgmr.msrb.gmra.mxu1 %v9899_v2  ;;  %v7664_v28 = vld [vmem:[#allocation8 + $0x164] sm:$0xf] }
 0x4a5   : > { %v7140_v0 = vor.u32 %v7664_v28, %v7137_v36 }
 0x4a6   : > { %v9334_v43 = vadd.f32 %v3763_v3, %v3715_v56  ;;  %v3775_v57 = vpop.f32.mrf.mxu2 }
 0x4a7   : > { %v3776_v24 = vadd.f32 %v3775_v57, %v9247_v58  ;;  %4773 = vmatpush.bf16.msra.mxu2 %v7140_v0 }
 0x4a8   : > { %v4489_v15 = vpop.f32.mrf.mxu0 }
 0x4a9   : > { %v3824_v4 = vpop.f32.mrf.mxu3  ;;  %v4490_v30 = vadd.f32 %v4489_v15, %v9323_v59  ;;  %v4538_v1 = vpop.f32.mrf.mxu1 }
 0x4aa   : > { %v3825_v19 = vadd.f32 %v3824_v4, %v3776_v24 }
 0x4ab   : > { %v9338_v11 = vadd.f32 %v4538_v1, %v4490_v30 }
 0x4ac   : > { %v3931_v58 = vmul.f32 0.2, %v3825_v19  ;;  %vm3867_vm0 = vcmp.gt.f32.partialorder %v3825_v19, 0.0 }
 0x4ae   : > { %v3777_v2 = vpop.f32.mrf.mxu2 }
 0x4af   : > { %v3778_v3 = vadd.f32 %v3777_v2, %v9254_v23  ;;  %v3995_v23 = vsel %vm3867_vm0, %v3825_v19, %v3931_v58 }
 0x4b0   : > { %v4492_v63 = vpop.f32.mrf.mxu0 }
 0x4b1   : > { %v3826_v31 = vpop.f32.mrf.mxu3  ;;  %v4493_v45 = vadd.f32 %v4492_v63, %v9323_v59  ;;  %v4541_v25 = vpop.f32.mrf.mxu1 }
 0x4b2   : > { %v3827_v26 = vadd.f32 %v3826_v31, %v3778_v3 }
 0x4b3   : > { %v9342_v40 = vadd.f32 %v4541_v25, %v4493_v45  ;;  %4589 = vmatmul.bf16.gmra.mxu2 %v9159_v7  ;;  %4687 = vmatmul.bf16.gmra.mxu0 %v9901_v18  ;;  %v7129_v18 = vld [vmem:[#allocation8 + $0x158] sm:$0xf0] }
 0x4b4   : > { %vm3871_vm1 = vcmp.gt.f32.partialorder %v3827_v26, 0.0  ;;  %v3935_v62 = vmul.f32 0.2, %v3827_v26  ;;  %4736 = vmatmul.bf16.gmra.mxu1 %v9902_v48  ;;  %v7193_v48 = vld [vmem:[#allocation8 + $0x1d8] sm:$0xf0]  ;;  %v7132_v0 = vor.u32 %v7662_v42, %v7129_v18 }
 0x4b5   : > { %v7196_v46 = vor.u32 %v7678_v41, %v7193_v48  ;;  %v7660_v18 = vld [vmem:[#allocation8 + $0x144] sm:$0xf] }
 0x4b6   : > { %v3999_v56 = vsel %vm3871_vm1, %v3827_v26, %v3935_v62  ;;  %v3780_v4 = vpop.f32.mrf.mxu2  ;;  %4774 = vmatpush.bf16.msra.mxu2 %v7132_v0  ;;  %v7676_v41 = vld [vmem:[#allocation8 + $0x1c4] sm:$0xf] }
 0x4b7   : > { %v9347_v57 = vpack.c.bf16 %v3999_v56, %v3995_v23  ;;  %v3781_v30 = vadd.f32 %v3780_v4, %v9257_v47  ;;  %4823 = vmatpush.bf16.msra.mxu3 %v7196_v46 }
 0x4b8   : > { %v4494_v24 = vpop.f32.mrf.mxu0 }
 0x4b9   : > { %v3829_v15 = vpop.f32.mrf.mxu3  ;;  %4633 = vmatmul.bf16.vlgmr.msrb.gmra.mxu3 %v9347_v57  ;;  %v4495_v1 = vadd.f32 %v4494_v24, %v9323_v59  ;;  %v4543_v28 = vpop.f32.mrf.mxu1 }
 0x4ba   : > { %v3830_v19 = vadd.f32 %v3829_v15, %v3781_v30 }
 0x4bb   : > { %v9352_v36 = vadd.f32 %v4543_v28, %v4495_v1 }
 0x4bc   : > { %v3939_v47 = vmul.f32 0.2, %v3830_v19  ;;  %vm3875_vm2 = vcmp.gt.f32.partialorder %v3830_v19, 0.0 }
 0x4be   : > { %v3782_v2 = vpop.f32.mrf.mxu2 }
 0x4bf   : > { %v3783_v3 = vadd.f32 %v3782_v2, %v9264_v29  ;;  %v4003_v29 = vsel %vm3875_vm2, %v3830_v19, %v3939_v47 }
 0x4c0   : > { %v4497_v63 = vpop.f32.mrf.mxu0 }
 0x4c1   : > { %v3831_v31 = vpop.f32.mrf.mxu3  ;;  %v4498_v26 = vadd.f32 %v4497_v63, %v9323_v59  ;;  %v4546_v45 = vpop.f32.mrf.mxu1 }
 0x4c2   : > { %v3832_v58 = vadd.f32 %v3831_v31, %v3783_v3 }
 0x4c3   : > { %v9356_v62 = vadd.f32 %v4546_v45, %v4498_v26  ;;  %4594 = vmatmul.bf16.gmra.mxu2 %v9173_v32  ;;  %4692 = vmatmul.bf16.gmra.mxu0 %v9903_v55  ;;  %v7121_v55 = vld [vmem:[#allocation8 + $0x148] sm:$0xf0] }
 0x4c4   : > { %vm3879_vm3 = vcmp.gt.f32.partialorder %v3832_v58, 0.0  ;;  %v3943_v25 = vmul.f32 0.2, %v3832_v58  ;;  %4741 = vmatmul.bf16.gmra.mxu1 %v9904_v17  ;;  %v7185_v17 = vld [vmem:[#allocation8 + $0x1c8] sm:$0xf0]  ;;  %v7124_v19 = vor.u32 %v7660_v18, %v7121_v55 }
 0x4c5   : > { %v7188_v0 = vor.u32 %v7676_v41, %v7185_v17  ;;  %v7658_v18 = vld [vmem:[#allocation8 + $0x134] sm:$0xf] }
 0x4c6   : > { %v4007_v23 = vsel %vm3879_vm3, %v3832_v58, %v3943_v25  ;;  %v3785_v56 = vpop.f32.mrf.mxu2  ;;  %4775 = vmatpush.bf16.msra.mxu2 %v7124_v19  ;;  %v7674_v55 = vld [vmem:[#allocation8 + $0x1b4] sm:$0xf] }
 0x4c7   : > { %v9361_v4 = vpack.c.bf16 %v4007_v23, %v4003_v29  ;;  %v3786_v30 = vadd.f32 %v3785_v56, %v9267_v9  ;;  %4824 = vmatpush.bf16.msra.mxu3 %v7188_v0 }
 0x4c8   : > { %v4499_v24 = vpop.f32.mrf.mxu0 }
 0x4c9   : > { %v3834_v15 = vpop.f32.mrf.mxu3  ;;  %4638 = vmatmul.bf16.gmra.mxu3 %v9361_v4  ;;  %v4500_v1 = vadd.f32 %v4499_v24, %v9323_v59  ;;  %v4548_v28 = vpop.f32.mrf.mxu1 }
 0x4ca   : > { %v3835_v48 = vadd.f32 %v3834_v15, %v3786_v30 }
 0x4cb   : > { %v9366_v42 = vadd.f32 %v4548_v28, %v4500_v1 }
 0x4cc   : > { %v3947_v9 = vmul.f32 0.2, %v3835_v48  ;;  %vm3883_vm4 = vcmp.gt.f32.partialorder %v3835_v48, 0.0 }
 0x4ce   : > { %v3787_v46 = vpop.f32.mrf.mxu2 }
 0x4cf   : > { %v3788_v2 = vadd.f32 %v3787_v46, %v9274_v49  ;;  %v4011_v49 = vsel %vm3883_vm4, %v3835_v48, %v3947_v9 }
 0x4d0   : > { %v4502_v31 = vpop.f32.mrf.mxu0 }
 0x4d1   : > { %v3836_v3 = vpop.f32.mrf.mxu3  ;;  %v4503_v47 = vadd.f32 %v4502_v31, %v9323_v59  ;;  %v4551_v58 = vpop.f32.mrf.mxu1 }
 0x4d2   : > { %v3837_v63 = vadd.f32 %v3836_v3, %v3788_v2 }
 0x4d3   : > { %v9370_v45 = vadd.f32 %v4551_v58, %v4503_v47  ;;  %4599 = vmatmul.bf16.gmra.mxu2 %v9189_v12  ;;  %4697 = vmatmul.bf16.gmra.mxu0 %v9905_v51  ;;  %v7113_v51 = vld [vmem:[#allocation8 + $0x138] sm:$0xf0] }
 0x4d4   : > { %vm3887_vm5 = vcmp.gt.f32.partialorder %v3837_v63, 0.0  ;;  %v3951_v26 = vmul.f32 0.2, %v3837_v63  ;;  %4746 = vmatmul.bf16.gmra.mxu1 %v9906_v34  ;;  %v7177_v34 = vld [vmem:[#allocation8 + $0x1b8] sm:$0xf0]  ;;  %v7116_v17 = vor.u32 %v7658_v18, %v7113_v51 }
 0x4d5   : > { %v7180_v48 = vor.u32 %v7674_v55, %v7177_v34 }
 0x4d6   : > { %v4015_v25 = vsel %vm3887_vm5, %v3837_v63, %v3951_v26  ;;  %v3790_v29 = vpop.f32.mrf.mxu2  ;;  %4776 = vmatpush.bf16.msra.mxu2 %v7116_v17  ;;  %v7656_v26 = vld [vmem:[#allocation8 + $0x124] sm:$0xf] }
 0x4d7   : > { %v9375_v23 = vpack.c.bf16 %v4015_v25, %v4011_v49  ;;  %v3791_v24 = vadd.f32 %v3790_v29, %v9277_v22  ;;  %4825 = vmatpush.bf16.msra.mxu3 %v7180_v48  ;;  %v7105_v49 = vld [vmem:[#allocation8 + $0x128] sm:$0xf0]  ;;  %v7672_v25 = vld [vmem:[#allocation8 + $0x1a4] sm:$0xf]  ;;  %v7654_v48 = vld [vmem:[#allocation8 + $0x114] sm:$0xf] }
 0x4d8   : > { %v4504_v15 = vpop.f32.mrf.mxu0  ;;  %v7169_v29 = vld [vmem:[#allocation8 + $0x1a8] sm:$0xf0] }
 0x4d9   : > { %v3839_v56 = vpop.f32.mrf.mxu3  ;;  %4643 = vmatmul.bf16.gmra.mxu3 %v9375_v23  ;;  %v4505_v30 = vadd.f32 %v4504_v15, %v9323_v59  ;;  %v4553_v1 = vpop.f32.mrf.mxu1  ;;  %v7108_v15 = vor.u32 %v7656_v26, %v7105_v49 }
 0x4da   : > { %v3840_v41 = vadd.f32 %v3839_v56, %v3791_v24  ;;  %v7172_v24 = vor.u32 %v7672_v25, %v7169_v29 }
 0x4db   : > { %v9380_v28 = vadd.f32 %v4553_v1, %v4505_v30  ;;  %4777 = vmatpush.bf16.msra.mxu2 %v7108_v15 }
 0x4dc   : > { %v3955_v2 = vmul.f32 0.2, %v3840_v41  ;;  %vm3891_vm6 = vcmp.gt.f32.partialorder %v3840_v41, 0.0  ;;  %4826 = vmatpush.bf16.msra.mxu3 %v7172_v24  ;;  %v7668_v24 = vld [vmem:[#allocation8 + $0x184] sm:$0xf] }
 0x4de   : > { %v3792_v19 = vpop.f32.mrf.mxu2  ;;  %v4019_v31 = vsel %vm3891_vm6, %v3840_v41, %v3955_v2  ;;  %v7161_v2 = vld [vmem:[#allocation8 + $0x198] sm:$0xf0] }
 0x4df   : > { %v3793_v0 = vadd.f32 %v3792_v19, %v9284_v37  ;;  %v7097_v19 = vld [vmem:[#allocation8 + $0x118] sm:$0xf0] }
 0x4e1   : > { %v3841_v46 = vpop.f32.mrf.mxu3 }
 0x4e2   : > { %v3842_v22 = vadd.f32 %v3841_v46, %v3793_v0  ;;  %v7100_v0 = vor.u32 %v7654_v48, %v7097_v19  ;;  %v7670_v46 = vld [vmem:[#allocation8 + $0x194] sm:$0xf] }
 0x4e3   : > { %4604 = vmatmul.bf16.gmra.mxu2 %v9205_v52  ;;  %4702 = vmatmul.bf16.gmra.mxu0 %v9907_v20 }
 0x4e4   : > { %vm3895_vm7 = vcmp.gt.f32.partialorder %v3842_v22, 0.0  ;;  %v3959_v3 = vmul.f32 0.2, %v3842_v22  ;;  %4751 = vmatmul.bf16.gmra.mxu1 %v9908_v44  ;;  %4778 = vmatpush.bf16.msra.mxu2 %v7100_v0 }
 0x4e6   : > { %v4023_v9 = vsel %vm3895_vm7, %v3842_v22, %v3959_v3  ;;  %v3795_v63 = vpop.f32.mrf.mxu2 }
 0x4e7   : > { %v9386_v47 = vpack.c.bf16 %v4023_v9, %v4019_v31  ;;  %v3796_v58 = vadd.f32 %v3795_v63, %v9287_v6  ;;  %v7089_v31 = vld [vmem:[#allocation8 + $0x108] sm:$0xf0] }
 0x4e9   : > { %v3844_v37 = vpop.f32.mrf.mxu3  ;;  %4648 = vmatmul.bf16.gmra.mxu3 %v9386_v47 }
 0x4ea   : > { %v3845_v56 = vadd.f32 %v3844_v37, %v3796_v58 }
 0x4ec   : > { %v3963_v1 = vmul.f32 0.2, %v3845_v56  ;;  %vm3899_vm8 = vcmp.gt.f32.partialorder %v3845_v56, 0.0 }
 0x4ee   : > { %v3797_v20 = vpop.f32.mrf.mxu2  ;;  %v4027_v6 = vsel %vm3899_vm8, %v3845_v56, %v3963_v1 }
 0x4ef   : > { %v3798_v44 = vadd.f32 %v3797_v20, %v9294_v61  ;;  %v7691_v20 = vld [vmem:[#allocation10 + $0x38] sm:$0xff] }
 0x4f0   : > { %5114 = vmatpush.bf16.msra.mxu0 %v7691_v20 }
 0x4f1   : > { %v3846_v30 = vpop.f32.mrf.mxu3 }
 0x4f2   : > { %v3847_v18 = vadd.f32 %v3846_v30, %v3798_v44  ;;  %v7153_v44 = vld [vmem:[#allocation8 + $0x188] sm:$0xf0] }
 0x4f3   : > { %4609 = vmatmul.bf16.gmra.mxu2 %v9219_v33  ;;  %4707 = vmatmul.bf16.gmra.mxu0 %v9909_v27  ;;  %v7164_v27 = vor.u32 %v7670_v46, %v7161_v2  ;;  %v7156_v1 = vor.u32 %v7668_v24, %v7153_v44  ;;  %v7688_v46 = vld [vmem:[#allocation10 + $0x20] sm:$0xff] }
 0x4f4   : > { %vm3903_vm9 = vcmp.gt.f32.partialorder %v3847_v18, 0.0  ;;  %v3967_v51 = vmul.f32 0.2, %v3847_v18  ;;  %4756 = vmatmul.bf16.gmra.mxu1 %v9910_v8  ;;  %v7652_v8 = vld [vmem:[#allocation8 + $0x104] sm:$0xf] }
 0x4f5   : > { %4827 = vmatpush.bf16.msra.mxu3 %v7164_v27  ;;  %v7092_v37 = vor.u32 %v7652_v8, %v7089_v31 }
 0x4f6   : > { %v4031_v55 = vsel %vm3903_vm9, %v3847_v18, %v3967_v51  ;;  %v3800_v34 = vpop.f32.mrf.mxu2  ;;  %v7690_v51 = vld [vmem:[#allocation10 + $0x30] sm:$0xff] }
 0x4f7   : > { %v9394_v41 = vpack.c.bf16 %v4031_v55, %v4027_v6  ;;  %v3801_v17 = vadd.f32 %v3800_v34, %v9297_v21  ;;  %4779 = vmatpush.bf16.msra.mxu2 %v7092_v37  ;;  %5115 = vmatpush.bf16.msra.mxu0 %v7690_v51  ;;  %v7685_v37 = vld [vmem:[#allocation10 + $0x8] sm:$0xff] }
 0x4f9   : > { %v3849_v61 = vpop.f32.mrf.mxu3  ;;  %4653 = vmatmul.bf16.gmra.mxu3 %v9394_v41 }
 0x4fa   : > { %v3850_v22 = vadd.f32 %v3849_v61, %v3801_v17  ;;  %4828 = vmatpush.bf16.msra.mxu3 %v7156_v1  ;;  %v9915_v61 = vld [vmem:[#allocation18_spill] sm:$0xff] }
 0x4fc   : > { %v3971_v58 = vmul.f32 0.2, %v3850_v22  ;;  %vm3907_vm10 = vcmp.gt.f32.partialorder %v3850_v22, 0.0 }
 0x4fe   : > { %v3802_v3 = vpop.f32.mrf.mxu2  ;;  %v4035_v49 = vsel %vm3907_vm10, %v3850_v22, %v3971_v58  ;;  %v7687_v22 = vld [vmem:[#allocation10 + $0x18] sm:$0xff]  ;;  %v9416_v58 = vpop.f32.mrf.mxu0 }
 0x4ff   : > { %v3803_v9 = vadd.f32 %v3802_v3, %v9304_v53 }
 0x501   : > { %v3851_v63 = vpop.f32.mrf.mxu3 }
 0x502   : > { %v3852_v26 = vadd.f32 %v3851_v63, %v3803_v9 }
 0x503   : > { %4614 = vmatmul.bf16.gmra.mxu2 %v9233_v14  ;;  %4712 = vmatmul.bf16.gmra.mxu0 %v9911_v13 }
 0x504   : > { %vm3911_vm11 = vcmp.gt.f32.partialorder %v3852_v26, 0.0  ;;  %v3975_v21 = vmul.f32 0.2, %v3852_v26  ;;  %4761 = vmatmul.bf16.gmra.mxu1 %v9912_v54 }
 0x506   : > { %v4039_v25 = vsel %vm3911_vm11, %v3852_v26, %v3975_v21  ;;  %v3805_v29 = vpop.f32.mrf.mxu2 }
 0x507   : > { %v9402_v56 = vpack.c.bf16 %v4039_v25, %v4035_v49  ;;  %v3806_v15 = vadd.f32 %v3805_v29, %v9307_v10  ;;  %v7689_v10 = vld [vmem:[#allocation10 + $0x28] sm:$0xff]  ;;  %v7699_v29 = vld [vmem:[#allocation10 + $0x78] sm:$0xff] }
 0x508   : > { %5116 = vmatpush.bf16.msra.mxu0 %v7689_v10  ;;  %5163 = vmatpush.bf16.msra.mxu1 %v7699_v29 }
 0x509   : > { %v3854_v53 = vpop.f32.mrf.mxu3  ;;  %4658 = vmatmul.bf16.gmra.mxu3 %v9402_v56 }
 0x50a   : > { %v3855_v30 = vadd.f32 %v3854_v53, %v3806_v15  ;;  %v9421_v53 = vpop.f32.mrf.mxu0 }
 0x50c   : > { %v3979_v6 = vmul.f32 0.2, %v3855_v30  ;;  %vm3915_vm12 = vcmp.gt.f32.partialorder %v3855_v30, 0.0  ;;  %5117 = vmatpush.bf16.msra.mxu0 %v7688_v46 }
 0x50e   : > { %v3807_v18 = vpop.f32.mrf.mxu2  ;;  %v4043_v17 = vsel %vm3915_vm12, %v3855_v30, %v3979_v6  ;;  %v7698_v30 = vld [vmem:[#allocation10 + $0x70] sm:$0xff] }
 0x50f   : > { %v3808_v13 = vadd.f32 %v3807_v18, %v9314_v35  ;;  %5164 = vmatpush.bf16.msra.mxu1 %v7698_v30 }
 0x510   : > { %5118 = vmatpush.bf16.msra.mxu0 %v7687_v22 }
 0x511   : > { %v3856_v54 = vpop.f32.mrf.mxu3 }
 0x512   : > { %v3857_v55 = vadd.f32 %v3856_v54, %v3808_v13  ;;  %v9425_v15 = vpop.f32.mrf.mxu0 }
 0x513   : > { %4619 = vmatmul.bf16.gmra.mxu2 %v9915_v61  ;;  %4717 = vmatmul.bf16.gmra.mxu0 %v9913_v5 }
 0x514   : > { %vm3919_vm13 = vcmp.gt.f32.partialorder %v3857_v55, 0.0  ;;  %v3983_v34 = vmul.f32 0.2, %v3857_v55  ;;  %4766 = vmatmul.bf16.gmra.mxu1 %v9914_v16  ;;  %v7686_v16 = vld [vmem:[#allocation10 + $0x10] sm:$0xff] }
 0x515   : > { %5119 = vmatpush.bf16.msra.mxu0 %v7686_v16 }
 0x516   : > { %v4047_v48 = vsel %vm3919_vm13, %v3857_v55, %v3983_v34  ;;  %v3810_v35 = vpop.f32.mrf.mxu2  ;;  %v9432_v55 = vpop.f32.mrf.mxu1 }
 0x517   : > { %v9410_v19 = vpack.c.bf16 %v4047_v48, %v4043_v17  ;;  %v3811_v2 = vadd.f32 %v3810_v35, %v9325_v50  ;;  %v7697_v35 = vld [vmem:[#allocation10 + $0x68] sm:$0xff] }
 0x518   : > { %5165 = vmatpush.bf16.msra.mxu1 %v7697_v35 }
 0x519   : > { %v3859_v0 = vpop.f32.mrf.mxu3  ;;  %4663 = vmatmul.bf16.gmra.mxu3 %v9410_v19  ;;  %5120 = vmatpush.bf16.msra.mxu0 %v7685_v37  ;;  %v7696_v37 = vld [vmem:[#allocation10 + $0x60] sm:$0xff] }
 0x51a   : > { %v3860_v27 = vadd.f32 %v3859_v0, %v3811_v2  ;;  %v9429_v13 = vpop.f32.mrf.mxu0 }
 0x51c   : > { %v3987_v31 = vmul.f32 0.2, %v3860_v27  ;;  %vm3923_vm14 = vcmp.gt.f32.partialorder %v3860_v27, 0.0  ;;  %5166 = vmatpush.bf16.msra.mxu1 %v7696_v37 }
 0x51e   : > { %v3812_v5 = vpop.f32.mrf.mxu2  ;;  %v4051_v50 = vsel %vm3923_vm14, %v3860_v27, %v3987_v31  ;;  %v9438_v46 = vpop.f32.mrf.mxu1 }
 0x51f   : > { %v3813_v3 = vadd.f32 %v3812_v5, %v9334_v43  ;;  %v7684_v43 = vld [vmem:[#allocation10] sm:$0xff] }
 0x520   : > { %5121 = vmatpush.bf16.msra.mxu0 %v7684_v43 }
 0x521   : > { %v3861_v8 = vpop.f32.mrf.mxu3 }
 0x522   : > { %v3862_v9 = vadd.f32 %v3861_v8, %v3813_v3 }
 0x523   : > { %4780 = vmatmul.bf16.vlgmr.msra.gmra.mxu2 %v9145_v38 }
 0x524   : > { %vm3927_vm15 = vcmp.gt.f32.partialorder %v3862_v9, 0.0  ;;  %v3991_v63 = vmul.f32 0.2, %v3862_v9 }
 0x526   : > { %v4055_v26 = vsel %vm3927_vm15, %v3862_v9, %v3991_v63  ;;  %v4585_v21 = vpop.f32.mrf.mxu2  ;;  %v9445_v63 = vpop.f32.mrf.mxu1 }
 0x527   : > { %v9418_v49 = vpack.c.bf16 %v4055_v26, %v4051_v50  ;;  %v4586_v20 = vadd.f32 %v4585_v21, %v9329_v39 }
 0x529   : > { %4668 = vmatmul.bf16.gmra.mxu3 %v9418_v49 }
 0x52e   : > { %v4587_v25 = vpop.f32.mrf.mxu2  ;;  %v9452_v29 = vpop.f32.mrf.mxu1 }
 0x52f   : > { %v4588_v18 = vadd.f32 %v4587_v25, %v9338_v11  ;;  %v9435_v11 = vpop.f32.mrf.mxu0 }
 0x533   : > { %4785 = vmatmul.bf16.gmra.mxu2 %v9159_v7 }
 0x536   : > { %v4590_v38 = vpop.f32.mrf.mxu2 }
 0x537   : > { %v4591_v48 = vadd.f32 %v4590_v38, %v9342_v40  ;;  %v9442_v16 = vpop.f32.mrf.mxu0 }
 0x539   : > { %4829 = vmatmul.bf16.vlgmr.msra.gmra.mxu3 %v9347_v57 }
 0x53c   : > { %v4634_v24 = vpop.f32.mrf.mxu3 }
 0x53d   : > { %v4635_v1 = vadd.f32 %v4634_v24, %v4586_v20 }
 0x53e   : > { %v4592_v44 = vpop.f32.mrf.mxu2 }
 0x53f   : > { %v4902_v7 = vmul.f32 0.2, %v4635_v1  ;;  %vm4870_vm0 = vcmp.gt.f32.partialorder %v4635_v1, 0.0  ;;  %v4593_v2 = vadd.f32 %v4592_v44, %v9352_v36  ;;  %v9448_v26 = vpop.f32.mrf.mxu0 }
 0x541   : > { %v4934_v39 = vsel %vm4870_vm0, %v4635_v1, %v4902_v7 }
 0x543   : > { %4790 = vmatmul.bf16.gmra.mxu2 %v9173_v32 }
 0x544   : > { %v4636_v54 = vpop.f32.mrf.mxu3 }
 0x545   : > { %v4637_v51 = vadd.f32 %v4636_v54, %v4588_v18  ;;  %v7695_v18 = vld [vmem:[#allocation10 + $0x58] sm:$0xff]  ;;  %v9458_v54 = vpop.f32.mrf.mxu1 }
 0x546   : > { %v4595_v6 = vpop.f32.mrf.mxu2  ;;  %5167 = vmatpush.bf16.msra.mxu1 %v7695_v18 }
 0x547   : > { %vm4872_vm1 = vcmp.gt.f32.partialorder %v4637_v51, 0.0  ;;  %v4904_v57 = vmul.f32 0.2, %v4637_v51  ;;  %v4596_v36 = vadd.f32 %v4595_v6, %v9356_v62  ;;  %v9455_v30 = vpop.f32.mrf.mxu0 }
 0x549   : > { %v4936_v34 = vsel %vm4872_vm1, %v4637_v51, %v4904_v57  ;;  %4834 = vmatmul.bf16.gmra.mxu3 %v9361_v4 }
 0x54a   : > { %v4966_v10 = vpack.c.bf16 %v4936_v34, %v4934_v39 }
 0x54c   : > { %v4639_v17 = vpop.f32.mrf.mxu3  ;;  %5122 = vmatmul.bf16.vlgmr.msra.gmra.mxu0 %v4966_v10 }
 0x54d   : > { %v4640_v0 = vadd.f32 %v4639_v17, %v4591_v48 }
 0x54e   : > { %v4597_v32 = vpop.f32.mrf.mxu2 }
 0x54f   : > { %v4906_v27 = vmul.f32 0.2, %v4640_v0  ;;  %vm4874_vm2 = vcmp.gt.f32.partialorder %v4640_v0, 0.0  ;;  %v4598_v21 = vadd.f32 %v4597_v32, %v9366_v42  ;;  %v9462_v39 = vpop.f32.mrf.mxu0 }
 0x551   : > { %v4938_v40 = vsel %vm4874_vm2, %v4640_v0, %v4906_v27  ;;  %v4510_v0 = vadd.f32 %v9421_v53, %v9323_v59  ;;  %v7694_v27 = vld [vmem:[#allocation10 + $0x50] sm:$0xff] }
 0x552   : > { %5168 = vmatpush.bf16.msra.mxu1 %v7694_v27 }
 0x553   : > { %4795 = vmatmul.bf16.gmra.mxu2 %v9189_v12 }
 0x554   : > { %v4641_v22 = vpop.f32.mrf.mxu3 }
 0x555   : > { %v4642_v4 = vadd.f32 %v4641_v22, %v4593_v2 }
 0x556   : > { %v4600_v3 = vpop.f32.mrf.mxu2 }
 0x557   : > { %vm4876_vm3 = vcmp.gt.f32.partialorder %v4642_v4, 0.0  ;;  %v4908_v5 = vmul.f32 0.2, %v4642_v4  ;;  %v4601_v42 = vadd.f32 %v4600_v3, %v9370_v45  ;;  %v4508_v45 = vadd.f32 %v9416_v58, %v9323_v59 }
 0x558   : > { %v4559_v58 = vadd.f32 %v9438_v46, %v4510_v0 }
 0x559   : > { %4839 = vmatmul.bf16.gmra.mxu3 %v9375_v23  ;;  %v4940_v8 = vsel %vm4876_vm3, %v4642_v4, %v4908_v5  ;;  %v9470_v4 = vpop.f32.mrf.mxu0 }
 0x55a   : > { %v4968_v31 = vpack.c.bf16 %v4940_v8, %v4938_v40 }
 0x55c   : > { %v4644_v9 = vpop.f32.mrf.mxu3  ;;  %5127 = vmatmul.bf16.gmra.mxu0 %v4968_v31 }
 0x55d   : > { %v4645_v50 = vadd.f32 %v4644_v9, %v4596_v36  ;;  %v4513_v9 = vadd.f32 %v9425_v15, %v9323_v59 }
 0x55e   : > { %v4602_v12 = vpop.f32.mrf.mxu2 }
 0x55f   : > { %v4910_v23 = vmul.f32 0.2, %v4645_v50  ;;  %vm4878_vm4 = vcmp.gt.f32.partialorder %v4645_v50, 0.0  ;;  %v4603_v51 = vadd.f32 %v4602_v12, %v9380_v28  ;;  %v4568_v28 = vpop.f32.mrf.mxu1 }
 0x561   : > { %v4942_v62 = vsel %vm4878_vm4, %v4645_v50, %v4910_v23  ;;  %v9479_v12 = vpop.f32.mrf.mxu0 }
 0x563   : > { %4800 = vmatmul.bf16.gmra.mxu2 %v9205_v52 }
 0x564   : > { %v4646_v43 = vpop.f32.mrf.mxu3 }
 0x565   : > { %v4647_v25 = vadd.f32 %v4646_v43, %v4598_v21  ;;  %v4515_v21 = vadd.f32 %v9429_v13, %v9323_v59 }
 0x566   : > { %v4605_v24 = vpop.f32.mrf.mxu2 }
 0x567   : > { %vm4880_vm5 = vcmp.gt.f32.partialorder %v4647_v25, 0.0  ;;  %v4912_v38 = vmul.f32 0.2, %v4647_v25  ;;  %v9474_v40 = vpop.f32.mrf.mxu1  ;;  %v4564_v15 = vadd.f32 %v9452_v29, %v4515_v21 }
 0x569   : > { %4844 = vmatmul.bf16.gmra.mxu3 %v9386_v47  ;;  %v4944_v20 = vsel %vm4880_vm5, %v4647_v25, %v4912_v38  ;;  %v7693_v38 = vld [vmem:[#allocation10 + $0x48] sm:$0xff] }
 0x56a   : > { %v4970_v44 = vpack.c.bf16 %v4944_v20, %v4942_v62  ;;  %5169 = vmatpush.bf16.msra.mxu1 %v7693_v38  ;;  %v9485_v62 = vpop.f32.mrf.mxu0 }
 0x56c   : > { %v4649_v1 = vpop.f32.mrf.mxu3  ;;  %5132 = vmatmul.bf16.gmra.mxu0 %v4970_v44 }
 0x56d   : > { %v4650_v7 = vadd.f32 %v4649_v1, %v4601_v42  ;;  %v4518_v42 = vadd.f32 %v9435_v11, %v9323_v59  ;;  %v7692_v11 = vld [vmem:[#allocation10 + $0x40] sm:$0xff] }
 0x56e   : > { %v4607_v52 = vpop.f32.mrf.mxu2  ;;  %5170 = vmatpush.bf16.msra.mxu1 %v7692_v11 }
 0x56f   : > { %v4914_v47 = vmul.f32 0.2, %v4650_v7  ;;  %vm4882_vm6 = vcmp.gt.f32.partialorder %v4650_v7, 0.0  ;;  %v4573_v43 = vpop.f32.mrf.mxu1 }
 0x571   : > { %v4946_v17 = vsel %vm4882_vm6, %v4650_v7, %v4914_v47 }
 0x572   : > { %v9494_v47 = vpop.f32.mrf.mxu0 }
 0x573   : > { %4805 = vmatmul.bf16.gmra.mxu2 %v9219_v33  ;;  %v4557_v33 = vadd.f32 %v9432_v55, %v4508_v45 }
 0x574   : > { %v4651_v57 = vpop.f32.mrf.mxu3 }
 0x575   : > { %v4652_v6 = vadd.f32 %v4651_v57, %v4603_v51  ;;  %v4606_v2 = vadd.f32 %v4605_v24, %v4557_v33  ;;  %v4567_v57 = vadd.f32 %v9458_v54, %v4518_v42 }
 0x576   : > { %v4610_v10 = vpop.f32.mrf.mxu2 }
 0x577   : > { %vm4884_vm7 = vcmp.gt.f32.partialorder %v4652_v6, 0.0  ;;  %v4916_v34 = vmul.f32 0.2, %v4652_v6 }
 0x579   : > { %4849 = vmatmul.bf16.gmra.mxu3 %v9394_v41  ;;  %v4948_v48 = vsel %vm4884_vm7, %v4652_v6, %v4916_v34  ;;  %v4608_v41 = vadd.f32 %v4607_v52, %v4559_v58  ;;  %v4732_v52 = vpop.f32.mrf.mxu1 }
 0x57a   : > { %v4972_v32 = vpack.c.bf16 %v4948_v48, %v4946_v17  ;;  %v9496_v0 = vpop.f32.mrf.mxu0 }
 0x57c   : > { %v4654_v35 = vpop.f32.mrf.mxu3  ;;  %5137 = vmatmul.bf16.gmra.mxu0 %v4972_v32 }
 0x57d   : > { %v4655_v5 = vadd.f32 %v4654_v35, %v4606_v2 }
 0x57e   : > { %v4612_v22 = vpop.f32.mrf.mxu2 }
 0x57f   : > { %v4918_v8 = vmul.f32 0.2, %v4655_v5  ;;  %vm4886_vm8 = vcmp.gt.f32.partialorder %v4655_v5, 0.0 }
 0x581   : > { %v4950_v46 = vsel %vm4886_vm8, %v4655_v5, %v4918_v8  ;;  %v4734_v17 = vpop.f32.mrf.mxu1  ;;  %v4525_v5 = vadd.f32 %v9455_v30, %v9323_v59 }
 0x583   : > { %4810 = vmatmul.bf16.gmra.mxu2 %v9233_v14  ;;  %v4562_v14 = vadd.f32 %v9445_v63, %v4513_v9 }
 0x584   : > { %v4656_v3 = vpop.f32.mrf.mxu3 }
 0x585   : > { %v4657_v55 = vadd.f32 %v4656_v3, %v4608_v41  ;;  %v4611_v23 = vadd.f32 %v4610_v10, %v4562_v14 }
 0x586   : > { %v4615_v31 = vpop.f32.mrf.mxu2 }
 0x587   : > { %vm4888_vm9 = vcmp.gt.f32.partialorder %v4657_v55, 0.0  ;;  %v4920_v53 = vmul.f32 0.2, %v4657_v55  ;;  %v4616_v6 = vadd.f32 %v4615_v31, %v4567_v57  ;;  %v9504_v31 = vpop.f32.mrf.mxu0 }
 0x589   : > { %4854 = vmatmul.bf16.gmra.mxu3 %v9402_v56  ;;  %v4952_v36 = vsel %vm4888_vm9, %v4657_v55, %v4920_v53  ;;  %v4613_v56 = vadd.f32 %v4612_v22, %v4564_v15  ;;  %v4737_v41 = vpop.f32.mrf.mxu1  ;;  %v4574_v55 = vadd.f32 %v4573_v43, %v4525_v5 }
 0x58a   : > { %v4974_v37 = vpack.c.bf16 %v4952_v36, %v4950_v46 }
 0x58c   : > { %v4659_v50 = vpop.f32.mrf.mxu3  ;;  %5142 = vmatmul.bf16.gmra.mxu0 %v4974_v37 }
 0x58d   : > { %v4660_v24 = vadd.f32 %v4659_v50, %v4611_v23 }
 0x58e   : > { %v4617_v25 = vpop.f32.mrf.mxu2 }
 0x58f   : > { %v4922_v44 = vmul.f32 0.2, %v4660_v24  ;;  %vm4890_vm10 = vcmp.gt.f32.partialorder %v4660_v24, 0.0  ;;  %v9511_v43 = vpop.f32.mrf.mxu0 }
 0x591   : > { %v4954_v29 = vsel %vm4890_vm10, %v4660_v24, %v4922_v44  ;;  %v4739_v37 = vpop.f32.mrf.mxu1 }
 0x593   : > { %4815 = vmatmul.bf16.gmra.mxu2 %v9915_v61  ;;  %v4520_v61 = vadd.f32 %v9442_v16, %v9323_v59  ;;  %v4523_v16 = vadd.f32 %v9448_v26, %v9323_v59 }
 0x594   : > { %v4661_v20 = vpop.f32.mrf.mxu3 }
 0x595   : > { %v4662_v1 = vadd.f32 %v4661_v20, %v4613_v56  ;;  %v4569_v10 = vadd.f32 %v4568_v28, %v4520_v61  ;;  %v4572_v58 = vadd.f32 %v9474_v40, %v4523_v16 }
 0x596   : > { %v4620_v13 = vpop.f32.mrf.mxu2 }
 0x597   : > { %vm4892_vm11 = vcmp.gt.f32.partialorder %v4662_v1, 0.0  ;;  %v4924_v63 = vmul.f32 0.2, %v4662_v1  ;;  %v4618_v48 = vadd.f32 %v4617_v25, %v4569_v10  ;;  %v4621_v3 = vadd.f32 %v4620_v13, %v4572_v58 }
 0x599   : > { %4859 = vmatmul.bf16.gmra.mxu3 %v9410_v19  ;;  %v4956_v18 = vsel %vm4892_vm11, %v4662_v1, %v4924_v63  ;;  %v4742_v56 = vpop.f32.mrf.mxu1 }
 0x59a   : > { %v4976_v7 = vpack.c.bf16 %v4956_v18, %v4954_v29 }
 0x59c   : > { %v4664_v51 = vpop.f32.mrf.mxu3  ;;  %5147 = vmatmul.bf16.gmra.mxu0 %v4976_v7 }
 0x59d   : > { %v4665_v45 = vadd.f32 %v4664_v51, %v4616_v6 }
 0x59e   : > { %v4622_v34 = vpop.f32.mrf.mxu2 }
 0x59f   : > { %v4926_v32 = vmul.f32 0.2, %v4665_v45  ;;  %vm4894_vm12 = vcmp.gt.f32.partialorder %v4665_v45, 0.0  ;;  %v4623_v26 = vadd.f32 %v4622_v34, %v4574_v55 }
 0x5a1   : > { %v4958_v28 = vsel %vm4894_vm12, %v4665_v45, %v4926_v32 }
 0x5a4   : > { %v4666_v19 = vpop.f32.mrf.mxu3 }
 0x5a5   : > { %v4667_v35 = vadd.f32 %v4666_v19, %v4618_v48 }
 0x5a6   : > { %v4781_v54 = vpop.f32.mrf.mxu2 }
 0x5a7   : > { %vm4896_vm13 = vcmp.gt.f32.partialorder %v4667_v35, 0.0  ;;  %v4928_v33 = vmul.f32 0.2, %v4667_v35 }
 0x5a9   : > { %4864 = vmatmul.bf16.gmra.mxu3 %v9418_v49  ;;  %v4960_v2 = vsel %vm4896_vm13, %v4667_v35, %v4928_v33  ;;  %v9507_v49 = vperm.slane %v9320_v60, 1 }
 0x5aa   : > { %v4978_v22 = vpack.c.bf16 %v4960_v2, %v4958_v28 }
 0x5ab   : > { %v4684_v59 = vadd.f32 %v9462_v39, %v9507_v49  ;;  %v4686_v60 = vadd.f32 %v9470_v4, %v9507_v49  ;;  %v4689_v29 = vadd.f32 %v9479_v12, %v9507_v49  ;;  %v4744_v4 = vpop.f32.mrf.mxu1  ;;  %v4691_v61 = vadd.f32 %v9485_v62, %v9507_v49 }
 0x5ac   : > { %v4669_v27 = vpop.f32.mrf.mxu3  ;;  %5152 = vmatmul.bf16.gmra.mxu0 %v4978_v22  ;;  %v4694_v33 = vadd.f32 %v9494_v47, %v9507_v49 }
 0x5ad   : > { %v4670_v53 = vadd.f32 %v4669_v27, %v4621_v3  ;;  %v4733_v25 = vadd.f32 %v4732_v52, %v4684_v59  ;;  %v4735_v24 = vadd.f32 %v4734_v17, %v4686_v60  ;;  %v4738_v57 = vadd.f32 %v4737_v41, %v4689_v29 }
 0x5ae   : > { %v4783_v8 = vpop.f32.mrf.mxu2  ;;  %v4740_v10 = vadd.f32 %v4739_v37, %v4691_v61  ;;  %v4743_v22 = vadd.f32 %v4742_v56, %v4694_v33  ;;  %v4696_v27 = vadd.f32 %v9496_v0, %v9507_v49 }
 0x5af   : > { %v4930_v46 = vmul.f32 0.2, %v4670_v53  ;;  %vm4898_vm14 = vcmp.gt.f32.partialorder %v4670_v53, 0.0  ;;  %v4782_v38 = vadd.f32 %v4781_v54, %v4733_v25  ;;  %v4784_v44 = vadd.f32 %v4783_v8, %v4735_v24  ;;  %v4703_v54 = vpop.f32.mrf.mxu0 }
 0x5b0   : > { %v4745_v3 = vadd.f32 %v4744_v4, %v4696_v27 }
 0x5b1   : > { %v4962_v30 = vsel %vm4898_vm14, %v4670_v53, %v4930_v46 }
 0x5b3   : > { %v4747_v48 = vpop.f32.mrf.mxu1 }
 0x5b4   : > { %v4671_v9 = vpop.f32.mrf.mxu3 }
 0x5b5   : > { %v4672_v36 = vadd.f32 %v4671_v9, %v4623_v26 }
 0x5b6   : > { %v4786_v50 = vpop.f32.mrf.mxu2 }
 0x5b7   : > { %vm4900_vm15 = vcmp.gt.f32.partialorder %v4672_v36, 0.0  ;;  %v4932_v40 = vmul.f32 0.2, %v4672_v36  ;;  %v4787_v6 = vadd.f32 %v4786_v50, %v4738_v57  ;;  %v4705_v55 = vpop.f32.mrf.mxu0 }
 0x5b9   : > { %v4964_v14 = vsel %vm4900_vm15, %v4672_v36, %v4932_v40  ;;  %v4699_v36 = vadd.f32 %v9504_v31, %v9507_v49 }
 0x5ba   : > { %v4980_v21 = vpack.c.bf16 %v4964_v14, %v4962_v30 }
 0x5bb   : > { %v4749_v58 = vpop.f32.mrf.mxu1  ;;  %v4748_v14 = vadd.f32 %v4747_v48, %v4699_v36 }
 0x5bc   : > { %v4830_v23 = vpop.f32.mrf.mxu3  ;;  %5157 = vmatmul.bf16.gmra.mxu0 %v4980_v21  ;;  %v4701_v21 = vadd.f32 %v9511_v43, %v9507_v49 }
 0x5bd   : > { %v4831_v20 = vadd.f32 %v4830_v23, %v4782_v38 }
 0x5be   : > { %v4788_v15 = vpop.f32.mrf.mxu2  ;;  %v4750_v60 = vadd.f32 %v4749_v58, %v4701_v21 }
 0x5bf   : > { %v4903_v63 = vmul.f32 0.2, %v4831_v20  ;;  %vm4871_vm0 = vcmp.gt.f32.partialorder %v4831_v20, 0.0  ;;  %v4789_v11 = vadd.f32 %v4788_v15, %v4740_v10  ;;  %v4708_v23 = vpop.f32.mrf.mxu0 }
 0x5c1   : > { %v4935_v52 = vsel %vm4871_vm0, %v4831_v20, %v4903_v63 }
 0x5c3   : > { %v4752_v37 = vpop.f32.mrf.mxu1 }
 0x5c4   : > { %v4832_v1 = vpop.f32.mrf.mxu3 }
 0x5c5   : > { %v4833_v39 = vadd.f32 %v4832_v1, %v4784_v44 }
 0x5c6   : > { %v4791_v42 = vpop.f32.mrf.mxu2 }
 0x5c7   : > { %vm4873_vm1 = vcmp.gt.f32.partialorder %v4833_v39, 0.0  ;;  %v4905_v13 = vmul.f32 0.2, %v4833_v39  ;;  %v4792_v5 = vadd.f32 %v4791_v42, %v4743_v22  ;;  %v4710_v1 = vpop.f32.mrf.mxu0 }
 0x5c9   : > { %v4937_v18 = vsel %vm4873_vm1, %v4833_v39, %v4905_v13  ;;  %v4704_v39 = vadd.f32 %v4703_v54, %v9507_v49 }
 0x5ca   : > { %v4967_v7 = vpack.c.bf16 %v4937_v18, %v4935_v52  ;;  %v4706_v18 = vadd.f32 %v4705_v55, %v9507_v49 }
 0x5cb   : > { %v4754_v15 = vpop.f32.mrf.mxu1  ;;  %v4753_v52 = vadd.f32 %v4752_v37, %v4704_v39 }
 0x5cc   : > { %v4835_v51 = vpop.f32.mrf.mxu3  ;;  %5171 = vmatmul.bf16.vlgmr.msra.gmra.mxu1 %v4967_v7  ;;  %v4755_v57 = vadd.f32 %v4754_v15, %v4706_v18 }
 0x5cd   : > { %v4836_v45 = vadd.f32 %v4835_v51, %v4787_v6 }
 0x5ce   : > { %v4793_v34 = vpop.f32.mrf.mxu2 }
 0x5cf   : > { %v4907_v19 = vmul.f32 0.2, %v4836_v45  ;;  %vm4875_vm2 = vcmp.gt.f32.partialorder %v4836_v45, 0.0  ;;  %v4794_v53 = vadd.f32 %v4793_v34, %v4745_v3  ;;  %v4713_v61 = vpop.f32.mrf.mxu0 }
 0x5d1   : > { %v4939_v16 = vsel %vm4875_vm2, %v4836_v45, %v4907_v19 }
 0x5d3   : > { %v4757_v7 = vpop.f32.mrf.mxu1 }
 0x5d4   : > { %v4837_v17 = vpop.f32.mrf.mxu3 }
 0x5d5   : > { %v4838_v32 = vadd.f32 %v4837_v17, %v4789_v11 }
 0x5d6   : > { %v4796_v35 = vpop.f32.mrf.mxu2 }
 0x5d7   : > { %vm4877_vm3 = vcmp.gt.f32.partialorder %v4838_v32, 0.0  ;;  %v4909_v12 = vmul.f32 0.2, %v4838_v32  ;;  %v4797_v25 = vadd.f32 %v4796_v35, %v4748_v14  ;;  %v4715_v54 = vpop.f32.mrf.mxu0 }
 0x5d9   : > { %v4941_v28 = vsel %vm4877_vm3, %v4838_v32, %v4909_v12  ;;  %v4709_v32 = vadd.f32 %v4708_v23, %v9507_v49 }
 0x5da   : > { %v4969_v62 = vpack.c.bf16 %v4941_v28, %v4939_v16 }
 0x5db   : > { %v4759_v17 = vpop.f32.mrf.mxu1  ;;  %v4758_v28 = vadd.f32 %v4757_v7, %v4709_v32 }
 0x5dc   : > { %v4840_v2 = vpop.f32.mrf.mxu3  ;;  %5176 = vmatmul.bf16.gmra.mxu1 %v4969_v62  ;;  %v4711_v62 = vadd.f32 %v4710_v1, %v9507_v49 }
 0x5dd   : > { %v4841_v8 = vadd.f32 %v4840_v2, %v4792_v5 }
 0x5de   : > { %v4798_v41 = vpop.f32.mrf.mxu2  ;;  %v4760_v22 = vadd.f32 %v4759_v17, %v4711_v62 }
 0x5df   : > { %v4911_v9 = vmul.f32 0.2, %v4841_v8  ;;  %vm4879_vm4 = vcmp.gt.f32.partialorder %v4841_v8, 0.0  ;;  %v4799_v24 = vadd.f32 %v4798_v41, %v4750_v60 }
 0x5e1   : > { %v4943_v40 = vsel %vm4879_vm4, %v4841_v8, %v4911_v9  ;;  %v4718_v8 = vpop.f32.mrf.mxu0  ;;  %v4714_v9 = vadd.f32 %v4713_v61, %v9507_v49 }
 0x5e3   : > { %v4762_v27 = vpop.f32.mrf.mxu1 }
 0x5e4   : > { %v4842_v26 = vpop.f32.mrf.mxu3 }
 0x5e5   : > { %v4843_v47 = vadd.f32 %v4842_v26, %v4794_v53 }
 0x5e6   : > { %v4801_v0 = vpop.f32.mrf.mxu2 }
 0x5e7   : > { %vm4881_vm5 = vcmp.gt.f32.partialorder %v4843_v47, 0.0  ;;  %v4913_v46 = vmul.f32 0.2, %v4843_v47  ;;  %v4802_v51 = vadd.f32 %v4801_v0, %v4753_v52  ;;  %v4763_v0 = vadd.f32 %v4762_v27, %v4714_v9 }
 0x5e9   : > { %v4945_v50 = vsel %vm4881_vm5, %v4843_v47, %v4913_v46 }
 0x5ea   : > { %v4971_v59 = vpack.c.bf16 %v4945_v50, %v4943_v40 }
 0x5eb   : > { %v4764_v37 = vpop.f32.mrf.mxu1 }
 0x5ec   : > { %v4845_v30 = vpop.f32.mrf.mxu3  ;;  %5181 = vmatmul.bf16.gmra.mxu1 %v4971_v59  ;;  %v4716_v59 = vadd.f32 %v4715_v54, %v9507_v49 }
 0x5ed   : > { %v4846_v38 = vadd.f32 %v4845_v30, %v4797_v25  ;;  %v4720_v30 = vpop.f32.mrf.mxu0 }
 0x5ee   : > { %v4803_v56 = vpop.f32.mrf.mxu2  ;;  %v4765_v21 = vadd.f32 %v4764_v37, %v4716_v59 }
 0x5ef   : > { %v4915_v31 = vmul.f32 0.2, %v4846_v38  ;;  %vm4883_vm6 = vcmp.gt.f32.partialorder %v4846_v38, 0.0  ;;  %v4804_v34 = vadd.f32 %v4803_v56, %v4755_v57 }
 0x5f1   : > { %v4947_v13 = vsel %vm4883_vm6, %v4846_v38, %v4915_v31 }
 0x5f4   : > { %v4847_v20 = vpop.f32.mrf.mxu3 }
 0x5f5   : > { %v4848_v44 = vadd.f32 %v4847_v20, %v4799_v24  ;;  %v4767_v24 = vpop.f32.mrf.mxu1  ;;  %v5123_v20 = vpop.f32.mrf.mxu0 }
 0x5f6   : > { %v4806_v4 = vpop.f32.mrf.mxu2 }
 0x5f7   : > { %vm4885_vm7 = vcmp.gt.f32.partialorder %v4848_v44, 0.0  ;;  %v4917_v63 = vmul.f32 0.2, %v4848_v44  ;;  %v4807_v2 = vadd.f32 %v4806_v4, %v4758_v28 }
 0x5f9   : > { %v4949_v42 = vsel %vm4885_vm7, %v4848_v44, %v4917_v63  ;;  %v4719_v44 = vadd.f32 %v4718_v8, %v9507_v49 }
 0x5fa   : > { %v4973_v29 = vpack.c.bf16 %v4949_v42, %v4947_v13 }
 0x5fb   : > { %v4768_v42 = vadd.f32 %v4767_v24, %v4719_v44 }
 0x5fc   : > { %v4850_v43 = vpop.f32.mrf.mxu3  ;;  %5186 = vmatmul.bf16.gmra.mxu1 %v4973_v29  ;;  %v4721_v29 = vadd.f32 %v4720_v30, %v9507_v49  ;;  %v9538_v49 = vld [vmem:[%s9618_s6] ss:$0 sm:$0xff] }
 0x5fd   : > { %v4851_v6 = vadd.f32 %v4850_v43, %v4802_v51  ;;  %v4769_v52 = vpop.f32.mrf.mxu1  ;;  %v5125_v4 = vpop.f32.mrf.mxu0  ;;  %v5124_v32 = vadd.f32 %v9538_v49, %v5123_v20 }
 0x5fe   : > { %v4808_v19 = vpop.f32.mrf.mxu2  ;;  %v4770_v7 = vadd.f32 %v4769_v52, %v4721_v29 }
 0x5ff   : > { %v4919_v45 = vmul.f32 0.2, %v4851_v6  ;;  %vm4887_vm8 = vcmp.gt.f32.partialorder %v4851_v6, 0.0  ;;  %v4809_v41 = vadd.f32 %v4808_v19, %v4760_v22 }
 0x601   : > { %v4951_v12 = vsel %vm4887_vm8, %v4851_v6, %v4919_v45 }
 0x604   : > { %v4852_v10 = vpop.f32.mrf.mxu3 }
 0x605   : > { %v4853_v11 = vadd.f32 %v4852_v10, %v4804_v34 }
 0x606   : > { %v4811_v5 = vpop.f32.mrf.mxu2 }
 0x607   : > { %vm4889_vm9 = vcmp.gt.f32.partialorder %v4853_v11, 0.0  ;;  %v4921_v48 = vmul.f32 0.2, %v4853_v11  ;;  %v4812_v14 = vadd.f32 %v4811_v5, %v4763_v0 }
 0x609   : > { %v4953_v35 = vsel %vm4889_vm9, %v4853_v11, %v4921_v48  ;;  %v5128_v48 = vpop.f32.mrf.mxu0 }
 0x60a   : > { %v4975_v33 = vpack.c.bf16 %v4953_v35, %v4951_v12 }
 0x60c   : > { %v4855_v16 = vpop.f32.mrf.mxu3  ;;  %5191 = vmatmul.bf16.gmra.mxu1 %v4975_v33 }
 0x60d   : > { %v4856_v58 = vadd.f32 %v4855_v16, %v4807_v2  ;;  %v5126_v16 = vadd.f32 %v9538_v49, %v5125_v4 }
 0x60e   : > { %v4813_v40 = vpop.f32.mrf.mxu2 }
 0x60f   : > { %v4923_v55 = vmul.f32 0.2, %v4856_v58  ;;  %vm4891_vm10 = vcmp.gt.f32.partialorder %v4856_v58, 0.0  ;;  %v4814_v25 = vadd.f32 %v4813_v40, %v4765_v21 }
 0x611   : > { %v4955_v47 = vsel %vm4891_vm10, %v4856_v58, %v4923_v55  ;;  %v5130_v19 = vpop.f32.mrf.mxu0  ;;  %v5129_v58 = vadd.f32 %v9538_v49, %v5128_v48 }
 0x614   : > { %v4857_v3 = vpop.f32.mrf.mxu3 }
 0x615   : > { %v4858_v53 = vadd.f32 %v4857_v3, %v4809_v41 }
 0x616   : > { %v4816_v56 = vpop.f32.mrf.mxu2 }
 0x617   : > { %vm4893_vm11 = vcmp.gt.f32.partialorder %v4858_v53, 0.0  ;;  %v4925_v26 = vmul.f32 0.2, %v4858_v53  ;;  %v4817_v43 = vadd.f32 %v4816_v56, %v4768_v42 }
 0x619   : > { %v4957_v46 = vsel %vm4893_vm11, %v4858_v53, %v4925_v26  ;;  %v5133_v54 = vpop.f32.mrf.mxu0 }
 0x61a   : > { %v4977_v36 = vpack.c.bf16 %v4957_v46, %v4955_v47  ;;  %v5131_v47 = vadd.f32 %v9538_v49, %v5130_v19  ;;  %v5134_v56 = vadd.f32 %v9538_v49, %v5133_v54 }
 0x61c   : > { %v4860_v50 = vpop.f32.mrf.mxu3  ;;  %5196 = vmatmul.bf16.gmra.mxu1 %v4977_v36 }
 0x61d   : > { %v4861_v23 = vadd.f32 %v4860_v50, %v4812_v14 }
 0x61e   : > { %v4818_v18 = vpop.f32.mrf.mxu2 }
 0x61f   : > { %v4927_v38 = vmul.f32 0.2, %v4861_v23  ;;  %vm4895_vm12 = vcmp.gt.f32.partialorder %v4861_v23, 0.0  ;;  %v4819_v57 = vadd.f32 %v4818_v18, %v4770_v7 }
 0x621   : > { %v4959_v1 = vsel %vm4895_vm12, %v4861_v23, %v4927_v38  ;;  %v5135_v5 = vpop.f32.mrf.mxu0 }
 0x624   : > { %v4862_v60 = vpop.f32.mrf.mxu3 }
 0x625   : > { %v4863_v15 = vadd.f32 %v4862_v60, %v4814_v25 }
 0x627   : > { %vm4897_vm13 = vcmp.gt.f32.partialorder %v4863_v15, 0.0  ;;  %v4929_v31 = vmul.f32 0.2, %v4863_v15 }
 0x629   : > { %v4961_v63 = vsel %vm4897_vm13, %v4863_v15, %v4929_v31  ;;  %v9545_v59 = vpop.f32.mrf.mxu0 }
 0x62a   : > { %v4979_v39 = vpack.c.bf16 %v4961_v63, %v4959_v1 }
 0x62c   : > { %v4865_v13 = vpop.f32.mrf.mxu3  ;;  %5201 = vmatmul.bf16.gmra.mxu1 %v4979_v39 }
 0x62d   : > { %v4866_v51 = vadd.f32 %v4865_v13, %v4817_v43 }
 0x62f   : > { %v4931_v6 = vmul.f32 0.2, %v4866_v51  ;;  %vm4899_vm14 = vcmp.gt.f32.partialorder %v4866_v51, 0.0 }
 0x631   : > { %v4963_v45 = vsel %vm4899_vm14, %v4866_v51, %v4931_v6  ;;  %v5140_v52 = vpop.f32.mrf.mxu0 }
 0x634   : > { %v4867_v61 = vpop.f32.mrf.mxu3 }
 0x635   : > { %v4868_v34 = vadd.f32 %v4867_v61, %v4819_v57  ;;  %v5136_v61 = vadd.f32 %v9538_v49, %v5135_v5 }
 0x637   : > { %vm4901_vm15 = vcmp.gt.f32.partialorder %v4868_v34, 0.0  ;;  %v4933_v10 = vmul.f32 0.2, %v4868_v34 }
 0x639   : > { %v4965_v11 = vsel %vm4901_vm15, %v4868_v34, %v4933_v10 }
 0x63a   : > { %v4981_v17 = vpack.c.bf16 %v4965_v11, %v4963_v45 }
 0x63c   : > { %5206 = vmatmul.bf16.gmra.mxu1 %v4981_v17 }
 0x649   : > { %v5172_v12 = vpop.f32.mrf.mxu1 }
 0x64a   : > { %v5173_v35 = vadd.f32 %v5172_v12, %v5124_v32 }
 0x64c   : > { %v7277_v33 = vmul.f32 -1.442695, %v5173_v35 }
 0x64e   : > { %7815 = vpow2.f32 %v7277_v33 }
 0x651   : > { %v5174_v28 = vpop.f32.mrf.mxu1 }
 0x652   : > { %v5175_v62 = vadd.f32 %v5174_v28, %v5126_v16  ;;  %v5143_v28 = vpop.f32.mrf.mxu0 }
 0x654   : > { %v7816_v2 = vpop.eup %7815  ;;  %v7278_v22 = vmul.f32 -1.442695, %v5175_v62 }
 0x655   : > { %v5260_v27 = vadd.f32 1.0, %v7816_v2  ;;  %v5139_v2 = vadd.f32 %v9538_v49, %v9545_v59 }
 0x656   : > { %7817 = vpow2.f32 %v7278_v22 }
 0x657   : > { %7819 = vrcp.f32 %v5260_v27  ;;  %v5287_v36 = vand.u32 2147483648, %v5260_v27  ;;  %v5285_v50 = vand.u32 2147483647, %v5260_v27  ;;  %vm5281_vm1 = vweird.f32 %v5260_v27 }
 0x659   : > { %v5177_v41 = vpop.f32.mrf.mxu1  ;;  %v5288_v25 = vor.u32 1.1754944e-38, %v5287_v36  ;;  %vm5286_vm3 = vcmp.eq.f32.partialorder %v5285_v50, 8.507059e+37 }
 0x65a   : > { %v5178_v3 = vadd.f32 %v5177_v41, %v5129_v58 }
 0x65c   : > { %v7818_v8 = vpop.eup %7817  ;;  %v7279_v55 = vmul.f32 -1.442695, %v5178_v3 }
 0x65d   : > { %v7820_v53 = vpop.eup %7819  ;;  %v5261_v26 = vadd.f32 1.0, %v7818_v8 }
 0x65e   : > { %v5277_v9 = vmul.f32 %v7820_v53, %v5260_v27  ;;  %7821 = vpow2.f32 %v7279_v55  ;;  %vm5282_vm0 = vweird.f32 %v7820_v53 }
 0x65f   : > { %7823 = vrcp.f32 %v5261_v26  ;;  %vm5283_vm2 = vmor %vm5281_vm1, %vm5282_vm0  ;;  %v5302_v31 = vand.u32 2147483648, %v5261_v26  ;;  %v5300_v63 = vand.u32 2147483647, %v5261_v26  ;;  %vm5296_vm5 = vweird.f32 %v5261_v26 }
 0x660   : > { %v5278_v46 = vsub.f32 1.0, %v5277_v9 }
 0x661   : > { %v5179_v37 = vpop.f32.mrf.mxu1  ;;  %v5303_v18 = vor.u32 1.1754944e-38, %v5302_v31  ;;  %vm5301_vm7 = vcmp.eq.f32.partialorder %v5300_v63, 8.507059e+37 }
 0x662   : > { %v5279_v40 = vmul.f32 %v7820_v53, %v5278_v46  ;;  %v5180_v0 = vadd.f32 %v5179_v37, %v5131_v47 }
 0x664   : > { %v7822_v30 = vpop.eup %7821  ;;  %v5280_v14 = vadd.f32 %v7820_v53, %v5279_v40  ;;  %v7280_v21 = vmul.f32 -1.442695, %v5180_v0  ;;  %v5141_v40 = vadd.f32 %v9538_v49, %v5140_v52  ;;  %v5145_v0 = vpop.f32.mrf.mxu0 }
 0x665   : > { %v7824_v23 = vpop.eup %7823  ;;  %v5262_v60 = vadd.f32 1.0, %v7822_v30 }
 0x666   : > { %v5284_v38 = vsel %vm5283_vm2, %v7820_v53, %v5280_v14  ;;  %v5292_v15 = vmul.f32 %v7824_v23, %v5261_v26  ;;  %7825 = vpow2.f32 %v7280_v21  ;;  %vm5297_vm4 = vweird.f32 %v7824_v23 }
 0x667   : > { %v5289_v24 = vsel %vm5286_vm3, %v5288_v25, %v5284_v38  ;;  %7827 = vrcp.f32 %v5262_v60  ;;  %vm5298_vm6 = vmor %vm5296_vm5, %vm5297_vm4  ;;  %v5317_v34 = vand.u32 2147483648, %v5262_v60  ;;  %v5315_v11 = vand.u32 2147483647, %v5262_v60 }
 0x668   : > { %5516 = vst [vmem:[%s9548_s29] sm:$0xff] %v5289_v24  ;;  %v5293_v20 = vsub.f32 1.0, %v5292_v15  ;;  %vm5311_vm9 = vweird.f32 %v5262_v60 }
 0x669   : > { %v5182_v44 = vpop.f32.mrf.mxu1  ;;  %v5318_v35 = vor.u32 1.1754944e-38, %v5317_v34  ;;  %vm5316_vm11 = vcmp.eq.f32.partialorder %v5315_v11, 8.507059e+37 }
 0x66a   : > { %v5294_v1 = vmul.f32 %v7824_v23, %v5293_v20  ;;  %v5183_v39 = vadd.f32 %v5182_v44, %v5134_v56 }
 0x66c   : > { %v7826_v13 = vpop.eup %7825  ;;  %v5295_v42 = vadd.f32 %v7824_v23, %v5294_v1  ;;  %v7281_v29 = vmul.f32 -1.442695, %v5183_v39  ;;  %v5144_v1 = vadd.f32 %v9538_v49, %v5143_v28  ;;  %v5148_v52 = vpop.f32.mrf.mxu0 }
 0x66d   : > { %v7828_v43 = vpop.eup %7827  ;;  %v5263_v7 = vadd.f32 1.0, %v7826_v13 }
 0x66e   : > { %v5299_v4 = vsel %vm5298_vm6, %v7824_v23, %v5295_v42  ;;  %v5307_v51 = vmul.f32 %v7828_v43, %v5262_v60  ;;  %7829 = vpow2.f32 %v7281_v29  ;;  %vm5312_vm8 = vweird.f32 %v7828_v43 }
 0x66f   : > { %v5304_v57 = vsel %vm5301_vm7, %v5303_v18, %v5299_v4  ;;  %7831 = vrcp.f32 %v5263_v7  ;;  %vm5313_vm10 = vmor %vm5311_vm9, %vm5312_vm8  ;;  %v5332_v27 = vand.u32 2147483648, %v5263_v7  ;;  %v5330_v41 = vand.u32 2147483647, %v5263_v7 }
 0x670   : > { %5517 = vst [vmem:[%s9548_s29 + $0x8] sm:$0xff] %v5304_v57  ;;  %v5308_v6 = vsub.f32 1.0, %v5307_v51  ;;  %vm5326_vm13 = vweird.f32 %v5263_v7 }
 0x671   : > { %v5184_v10 = vpop.f32.mrf.mxu1  ;;  %v5333_v9 = vor.u32 1.1754944e-38, %v5332_v27  ;;  %vm5331_vm15 = vcmp.eq.f32.partialorder %v5330_v41, 8.507059e+37 }
 0x672   : > { %v5309_v45 = vmul.f32 %v7828_v43, %v5308_v6  ;;  %v5185_v17 = vadd.f32 %v5184_v10, %v5136_v61 }
 0x674   : > { %v7830_v48 = vpop.eup %7829  ;;  %v5310_v19 = vadd.f32 %v7828_v43, %v5309_v45  ;;  %v7282_v32 = vmul.f32 -1.442695, %v5185_v17  ;;  %v5146_v45 = vadd.f32 %v9538_v49, %v5145_v0  ;;  %v5150_v28 = vpop.f32.mrf.mxu0 }
 0x675   : > { %v7832_v12 = vpop.eup %7831  ;;  %v5264_v33 = vadd.f32 1.0, %v7830_v48 }
 0x676   : > { %v5314_v54 = vsel %vm5313_vm10, %v7828_v43, %v5310_v19  ;;  %v5322_v16 = vmul.f32 %v7832_v12, %v5263_v7  ;;  %7833 = vpow2.f32 %v7282_v32  ;;  %vm5327_vm12 = vweird.f32 %v7832_v12 }
 0x677   : > { %v5319_v62 = vsel %vm5316_vm11, %v5318_v35, %v5314_v54  ;;  %7835 = vrcp.f32 %v5264_v33  ;;  %vm5328_vm14 = vmor %vm5326_vm13, %vm5327_vm12  ;;  %v5347_v59 = vand.u32 2147483648, %v5264_v33  ;;  %v5345_v21 = vand.u32 2147483647, %v5264_v33 }
 0x678   : > { %5518 = vst [vmem:[%s9548_s29 + $0x10] sm:$0xff] %v5319_v62  ;;  %v5323_v22 = vsub.f32 1.0, %v5322_v16  ;;  %vm5341_vm1 = vweird.f32 %v5264_v33 }
 0x679   : > { %v5187_v58 = vpop.f32.mrf.mxu1  ;;  %v5348_v24 = vor.u32 1.1754944e-38, %v5347_v59  ;;  %vm5346_vm3 = vcmp.eq.f32.partialorder %v5345_v21, 8.507059e+37 }
 0x67a   : > { %v5324_v5 = vmul.f32 %v7832_v12, %v5323_v22  ;;  %v5188_v3 = vadd.f32 %v5187_v58, %v5139_v2 }
 0x67c   : > { %v7834_v8 = vpop.eup %7833  ;;  %v5325_v55 = vadd.f32 %v7832_v12, %v5324_v5  ;;  %v7283_v53 = vmul.f32 -1.442695, %v5188_v3  ;;  %v5149_v5 = vadd.f32 %v9538_v49, %v5148_v52  ;;  %v5153_v59 = vpop.f32.mrf.mxu0 }
 0x67d   : > { %v7836_v26 = vpop.eup %7835  ;;  %v5265_v47 = vadd.f32 1.0, %v7834_v8 }
 0x67e   : > { %v5329_v46 = vsel %vm5328_vm14, %v7832_v12, %v5325_v55  ;;  %v5337_v36 = vmul.f32 %v7836_v26, %v5264_v33  ;;  %7837 = vpow2.f32 %v7283_v53  ;;  %vm5342_vm0 = vweird.f32 %v7836_v26 }
 0x67f   : > { %v5334_v37 = vsel %vm5331_vm15, %v5333_v9, %v5329_v46  ;;  %7839 = vrcp.f32 %v5265_v47  ;;  %vm5343_vm2 = vmor %vm5341_vm1, %vm5342_vm0  ;;  %v5362_v39 = vand.u32 2147483648, %v5265_v47  ;;  %v5360_v29 = vand.u32 2147483647, %v5265_v47 }
 0x680   : > { %5519 = vst [vmem:[%s9548_s29 + $0x18] sm:$0xff] %v5334_v37  ;;  %v5338_v50 = vsub.f32 1.0, %v5337_v36  ;;  %vm5356_vm5 = vweird.f32 %v5265_v47 }
 0x681   : > { %v5189_v30 = vpop.f32.mrf.mxu1  ;;  %v5363_v57 = vor.u32 1.1754944e-38, %v5362_v39  ;;  %vm5361_vm7 = vcmp.eq.f32.partialorder %v5360_v29, 8.507059e+37 }
 0x682   : > { %v5339_v14 = vmul.f32 %v7836_v26, %v5338_v50  ;;  %v5190_v23 = vadd.f32 %v5189_v30, %v5141_v40 }
 0x684   : > { %v7838_v25 = vpop.eup %7837  ;;  %v5340_v60 = vadd.f32 %v7836_v26, %v5339_v14  ;;  %v7284_v38 = vmul.f32 -1.442695, %v5190_v23  ;;  %v5151_v14 = vadd.f32 %v9538_v49, %v5150_v28 }
 0x685   : > { %v7840_v15 = vpop.eup %7839  ;;  %v5266_v56 = vadd.f32 1.0, %v7838_v25 }
 0x686   : > { %v5344_v20 = vsel %vm5343_vm2, %v7836_v26, %v5340_v60  ;;  %v5352_v31 = vmul.f32 %v7840_v15, %v5265_v47  ;;  %7841 = vpow2.f32 %v7284_v38  ;;  %vm5357_vm4 = vweird.f32 %v7840_v15 }
 0x687   : > { %v5349_v44 = vsel %vm5346_vm3, %v5348_v24, %v5344_v20  ;;  %7843 = vrcp.f32 %v5266_v56  ;;  %vm5358_vm6 = vmor %vm5356_vm5, %vm5357_vm4  ;;  %v5377_v17 = vand.u32 2147483648, %v5266_v56  ;;  %v5375_v32 = vand.u32 2147483647, %v5266_v56 }
 0x688   : > { %5520 = vst [vmem:[%s9548_s29 + $0x20] sm:$0xff] %v5349_v44  ;;  %v5353_v63 = vsub.f32 1.0, %v5352_v31  ;;  %vm5371_vm9 = vweird.f32 %v5266_v56 }
 0x689   : > { %v5192_v13 = vpop.f32.mrf.mxu1  ;;  %v5378_v62 = vor.u32 1.1754944e-38, %v5377_v17  ;;  %vm5376_vm11 = vcmp.eq.f32.partialorder %v5375_v32, 8.507059e+37 }
 0x68a   : > { %v5354_v42 = vmul.f32 %v7840_v15, %v5353_v63  ;;  %v5193_v43 = vadd.f32 %v5192_v13, %v5144_v1 }
 0x68c   : > { %v7842_v18 = vpop.eup %7841  ;;  %v5355_v7 = vadd.f32 %v7840_v15, %v5354_v42  ;;  %v7285_v4 = vmul.f32 -1.442695, %v5193_v43  ;;  %v5154_v42 = vadd.f32 %v9538_v49, %v5153_v59  ;;  %v5155_v43 = vpop.f32.mrf.mxu0 }
 0x68d   : > { %v7844_v51 = vpop.eup %7843  ;;  %v5267_v61 = vadd.f32 1.0, %v7842_v18 }
 0x68e   : > { %v5359_v6 = vsel %vm5358_vm6, %v7840_v15, %v5355_v7  ;;  %v5367_v34 = vmul.f32 %v7844_v51, %v5266_v56  ;;  %7845 = vpow2.f32 %v7285_v4  ;;  %vm5372_vm8 = vweird.f32 %v7844_v51 }
 0x68f   : > { %v5364_v10 = vsel %vm5361_vm7, %v5363_v57, %v5359_v6  ;;  %7847 = vrcp.f32 %v5267_v61  ;;  %vm5373_vm10 = vmor %vm5371_vm9, %vm5372_vm8  ;;  %v5392_v3 = vand.u32 2147483648, %v5267_v61  ;;  %v5390_v53 = vand.u32 2147483647, %v5267_v61 }
 0x690   : > { %5521 = vst [vmem:[%s9548_s29 + $0x28] sm:$0xff] %v5364_v10  ;;  %v5368_v11 = vsub.f32 1.0, %v5367_v34  ;;  %vm5386_vm13 = vweird.f32 %v5267_v61 }
 0x691   : > { %v5194_v48 = vpop.f32.mrf.mxu1  ;;  %v5393_v37 = vor.u32 1.1754944e-38, %v5392_v3  ;;  %vm5391_vm15 = vcmp.eq.f32.partialorder %v5390_v53, 8.507059e+37 }
 0x692   : > { %v5369_v19 = vmul.f32 %v7844_v51, %v5368_v11  ;;  %v5195_v12 = vadd.f32 %v5194_v48, %v5146_v45 }
 0x694   : > { %v7846_v35 = vpop.eup %7845  ;;  %v5370_v33 = vadd.f32 %v7844_v51, %v5369_v19  ;;  %v7286_v54 = vmul.f32 -1.442695, %v5195_v12  ;;  %v5156_v19 = vadd.f32 %v9538_v49, %v5155_v43  ;;  %v5158_v28 = vpop.f32.mrf.mxu0 }
 0x695   : > { %v7848_v16 = vpop.eup %7847  ;;  %v5268_v2 = vadd.f32 1.0, %v7846_v35 }
 0x696   : > { %v5374_v22 = vsel %vm5373_vm10, %v7844_v51, %v5370_v33  ;;  %v5382_v27 = vmul.f32 %v7848_v16, %v5267_v61  ;;  %7849 = vpow2.f32 %v7286_v54  ;;  %vm5387_vm12 = vweird.f32 %v7848_v16 }
 0x697   : > { %v5379_v58 = vsel %vm5376_vm11, %v5378_v62, %v5374_v22  ;;  %7851 = vrcp.f32 %v5268_v2  ;;  %vm5388_vm14 = vmor %vm5386_vm13, %vm5387_vm12  ;;  %v5407_v23 = vand.u32 2147483648, %v5268_v2  ;;  %v5405_v38 = vand.u32 2147483647, %v5268_v2 }
 0x698   : > { %5522 = vst [vmem:[%s9548_s29 + $0x30] sm:$0xff] %v5379_v58  ;;  %v5383_v41 = vsub.f32 1.0, %v5382_v27  ;;  %vm5401_vm1 = vweird.f32 %v5268_v2 }
 0x699   : > { %v5197_v8 = vpop.f32.mrf.mxu1  ;;  %v5408_v44 = vor.u32 1.1754944e-38, %v5407_v23  ;;  %vm5406_vm3 = vcmp.eq.f32.partialorder %v5405_v38, 8.507059e+37 }
 0x69a   : > { %v5384_v55 = vmul.f32 %v7848_v16, %v5383_v41  ;;  %v5198_v26 = vadd.f32 %v5197_v8, %v5149_v5 }
 0x69c   : > { %v7850_v9 = vpop.eup %7849  ;;  %v5385_v47 = vadd.f32 %v7848_v16, %v5384_v55  ;;  %v7287_v46 = vmul.f32 -1.442695, %v5198_v26  ;;  %v5159_v55 = vadd.f32 %v9538_v49, %v5158_v28  ;;  %v5160_v59 = vpop.f32.mrf.mxu0 }
 0x69d   : > { %v7852_v36 = vpop.eup %7851  ;;  %v5269_v40 = vadd.f32 1.0, %v7850_v9 }
 0x69e   : > { %v5389_v50 = vsel %vm5388_vm14, %v7848_v16, %v5385_v47  ;;  %v5397_v0 = vmul.f32 %v7852_v36, %v5268_v2  ;;  %7853 = vpow2.f32 %v7287_v46  ;;  %vm5402_vm0 = vweird.f32 %v7852_v36 }
 0x69f   : > { %v5394_v30 = vsel %vm5391_vm15, %v5393_v37, %v5389_v50  ;;  %7855 = vrcp.f32 %v5269_v40  ;;  %vm5403_vm2 = vmor %vm5401_vm1, %vm5402_vm0  ;;  %v5422_v52 = vand.u32 2147483648, %v5269_v40  ;;  %v5420_v4 = vand.u32 2147483647, %v5269_v40 }
 0x6a0   : > { %5523 = vst [vmem:[%s9548_s29 + $0x38] sm:$0xff] %v5394_v30  ;;  %v5398_v21 = vsub.f32 1.0, %v5397_v0  ;;  %vm5416_vm5 = vweird.f32 %v5269_v40 }
 0x6a1   : > { %v5199_v25 = vpop.f32.mrf.mxu1  ;;  %v5423_v10 = vor.u32 1.1754944e-38, %v5422_v52  ;;  %vm5421_vm7 = vcmp.eq.f32.partialorder %v5420_v4, 8.507059e+37 }
 0x6a2   : > { %v5399_v60 = vmul.f32 %v7852_v36, %v5398_v21  ;;  %v5200_v15 = vadd.f32 %v5199_v25, %v5151_v14 }
 0x6a4   : > { %v7854_v24 = vpop.eup %7853  ;;  %v5400_v56 = vadd.f32 %v7852_v36, %v5399_v60  ;;  %v7288_v20 = vmul.f32 -1.442695, %v5200_v15  ;;  %v5161_v60 = vadd.f32 %v9538_v49, %v5160_v59 }
 0x6a5   : > { %v7856_v31 = vpop.eup %7855  ;;  %v5270_v1 = vadd.f32 1.0, %v7854_v24 }
 0x6a6   : > { %v5404_v63 = vsel %vm5403_vm2, %v7852_v36, %v5400_v56  ;;  %v5412_v39 = vmul.f32 %v7856_v31, %v5269_v40  ;;  %7857 = vpow2.f32 %v7288_v20  ;;  %vm5417_vm4 = vweird.f32 %v7856_v31 }
 0x6a7   : > { %v5409_v13 = vsel %vm5406_vm3, %v5408_v44, %v5404_v63  ;;  %7859 = vrcp.f32 %v5270_v1  ;;  %vm5418_vm6 = vmor %vm5416_vm5, %vm5417_vm4  ;;  %v5437_v12 = vand.u32 2147483648, %v5270_v1  ;;  %v5435_v54 = vand.u32 2147483647, %v5270_v1 }
 0x6a8   : > { %5524 = vst [vmem:[%s9548_s29 + $0x40] sm:$0xff] %v5409_v13  ;;  %v5413_v29 = vsub.f32 1.0, %v5412_v39  ;;  %vm5431_vm9 = vweird.f32 %v5270_v1 }
 0x6a9   : > { %v5202_v18 = vpop.f32.mrf.mxu1  ;;  %v5438_v58 = vor.u32 1.1754944e-38, %v5437_v12  ;;  %vm5436_vm11 = vcmp.eq.f32.partialorder %v5435_v54, 8.507059e+37 }
 0x6aa   : > { %v5414_v7 = vmul.f32 %v7856_v31, %v5413_v29  ;;  %v5203_v51 = vadd.f32 %v5202_v18, %v5154_v42 }
 0x6ac   : > { %v7858_v57 = vpop.eup %7857  ;;  %v5415_v61 = vadd.f32 %v7856_v31, %v5414_v7  ;;  %v7289_v6 = vmul.f32 -1.442695, %v5203_v51 }
 0x6ad   : > { %v7860_v34 = vpop.eup %7859  ;;  %v5271_v45 = vadd.f32 1.0, %v7858_v57 }
 0x6ae   : > { %v5419_v11 = vsel %vm5418_vm6, %v7856_v31, %v5415_v61  ;;  %v5427_v17 = vmul.f32 %v7860_v34, %v5270_v1  ;;  %7861 = vpow2.f32 %v7289_v6  ;;  %vm5432_vm8 = vweird.f32 %v7860_v34 }
 0x6af   : > { %v5424_v48 = vsel %vm5421_vm7, %v5423_v10, %v5419_v11  ;;  %7863 = vrcp.f32 %v5271_v45  ;;  %vm5433_vm10 = vmor %vm5431_vm9, %vm5432_vm8  ;;  %v5452_v26 = vand.u32 2147483648, %v5271_v45  ;;  %v5450_v46 = vand.u32 2147483647, %v5271_v45 }
 0x6b0   : > { %5525 = vst [vmem:[%s9548_s29 + $0x48] sm:$0xff] %v5424_v48  ;;  %v5428_v32 = vsub.f32 1.0, %v5427_v17  ;;  %vm5446_vm13 = vweird.f32 %v5271_v45 }
 0x6b1   : > { %v5204_v35 = vpop.f32.mrf.mxu1  ;;  %v5453_v30 = vor.u32 1.1754944e-38, %v5452_v26  ;;  %vm5451_vm15 = vcmp.eq.f32.partialorder %v5450_v46, 8.507059e+37 }
 0x6b2   : > { %v5429_v33 = vmul.f32 %v7860_v34, %v5428_v32  ;;  %v5205_v16 = vadd.f32 %v5204_v35, %v5156_v19 }
 0x6b4   : > { %v7862_v62 = vpop.eup %7861  ;;  %v5430_v2 = vadd.f32 %v7860_v34, %v5429_v33  ;;  %v7290_v22 = vmul.f32 -1.442695, %v5205_v16 }
 0x6b5   : > { %v7864_v27 = vpop.eup %7863  ;;  %v5272_v5 = vadd.f32 1.0, %v7862_v62 }
 0x6b6   : > { %v5434_v41 = vsel %vm5433_vm10, %v7860_v34, %v5430_v2  ;;  %v5442_v3 = vmul.f32 %v7864_v27, %v5271_v45  ;;  %7865 = vpow2.f32 %v7290_v22  ;;  %vm5447_vm12 = vweird.f32 %v7864_v27 }
 0x6b7   : > { %v5439_v8 = vsel %vm5436_vm11, %v5438_v58, %v5434_v41  ;;  %7867 = vrcp.f32 %v5272_v5  ;;  %vm5448_vm14 = vmor %vm5446_vm13, %vm5447_vm12  ;;  %v5467_v15 = vand.u32 2147483648, %v5272_v5  ;;  %v5465_v20 = vand.u32 2147483647, %v5272_v5 }
 0x6b8   : > { %5526 = vst [vmem:[%s9548_s29 + $0x50] sm:$0xff] %v5439_v8  ;;  %v5443_v53 = vsub.f32 1.0, %v5442_v3  ;;  %vm5461_vm1 = vweird.f32 %v5272_v5 }
 0x6b9   : > { %v5207_v9 = vpop.f32.mrf.mxu1  ;;  %v5468_v13 = vor.u32 1.1754944e-38, %v5467_v15  ;;  %vm5466_vm3 = vcmp.eq.f32.partialorder %v5465_v20, 8.507059e+37 }
 0x6ba   : > { %v5444_v47 = vmul.f32 %v7864_v27, %v5443_v53  ;;  %v5208_v36 = vadd.f32 %v5207_v9, %v5159_v55 }
 0x6bc   : > { %v7866_v37 = vpop.eup %7865  ;;  %v5445_v40 = vadd.f32 %v7864_v27, %v5444_v47  ;;  %v7291_v50 = vmul.f32 -1.442695, %v5208_v36 }
 0x6bd   : > { %v7868_v0 = vpop.eup %7867  ;;  %v5273_v14 = vadd.f32 1.0, %v7866_v37 }
 0x6be   : > { %v5449_v21 = vsel %vm5448_vm14, %v7864_v27, %v5445_v40  ;;  %v5457_v23 = vmul.f32 %v7868_v0, %v5272_v5  ;;  %7869 = vpow2.f32 %v7291_v50  ;;  %vm5462_vm0 = vweird.f32 %v7868_v0 }
 0x6bf   : > { %v5454_v25 = vsel %vm5451_vm15, %v5453_v30, %v5449_v21  ;;  %7871 = vrcp.f32 %v5273_v14  ;;  %vm5463_vm2 = vmor %vm5461_vm1, %vm5462_vm0  ;;  %v5482_v18 = vand.u32 2147483648, %v5273_v14  ;;  %v5480_v4 = vand.u32 2147483647, %v5273_v14 }
 0x6c0   : > { %5527 = vst [vmem:[%s9548_s29 + $0x58] sm:$0xff] %v5454_v25  ;;  %v5458_v38 = vsub.f32 1.0, %v5457_v23  ;;  %vm5476_vm5 = vweird.f32 %v5273_v14 }
 0x6c1   : > { %v5209_v24 = vpop.f32.mrf.mxu1  ;;  %v5483_v6 = vor.u32 1.1754944e-38, %v5482_v18  ;;  %vm5481_vm7 = vcmp.eq.f32.partialorder %v5480_v4, 8.507059e+37 }
 0x6c2   : > { %v5459_v56 = vmul.f32 %v7868_v0, %v5458_v38  ;;  %v5210_v31 = vadd.f32 %v5209_v24, %v5161_v60 }
 0x6c4   : > { %v7870_v44 = vpop.eup %7869  ;;  %v5460_v1 = vadd.f32 %v7868_v0, %v5459_v56  ;;  %v7292_v63 = vmul.f32 -1.442695, %v5210_v31 }
 0x6c5   : > { %v7872_v39 = vpop.eup %7871  ;;  %v5274_v42 = vadd.f32 1.0, %v7870_v44 }
 0x6c6   : > { %v5464_v29 = vsel %vm5463_vm2, %v7868_v0, %v5460_v1  ;;  %v5472_v49 = vmul.f32 %v7872_v39, %v5273_v14  ;;  %7873 = vpow2.f32 %v7292_v63  ;;  %vm5477_vm4 = vweird.f32 %v7872_v39 }
 0x6c7   : > { %v5469_v43 = vsel %vm5466_vm3, %v5468_v13, %v5464_v29  ;;  %7875 = vrcp.f32 %v5274_v42  ;;  %vm5478_vm6 = vmor %vm5476_vm5, %vm5477_vm4  ;;  %v5497_v48 = vand.u32 2147483648, %v5274_v42  ;;  %v5495_v32 = vand.u32 2147483647, %v5274_v42 }
 0x6c8   : > { %5528 = vst [vmem:[%s9548_s29 + $0x60] sm:$0xff] %v5469_v43  ;;  %v5473_v52 = vsub.f32 1.0, %v5472_v49  ;;  %vm5491_vm9 = vweird.f32 %v5274_v42 }
 0x6c9   : > { %v5498_v33 = vor.u32 1.1754944e-38, %v5497_v48  ;;  %vm5496_vm11 = vcmp.eq.f32.partialorder %v5495_v32, 8.507059e+37 }
 0x6ca   : > { %v5474_v7 = vmul.f32 %v7872_v39, %v5473_v52 }
 0x6cc   : > { %v7874_v51 = vpop.eup %7873  ;;  %v5475_v57 = vadd.f32 %v7872_v39, %v5474_v7 }
 0x6cd   : > { %v7876_v61 = vpop.eup %7875  ;;  %v5275_v34 = vadd.f32 1.0, %v7874_v51 }
 0x6ce   : > { %v5479_v10 = vsel %vm5478_vm6, %v7872_v39, %v5475_v57  ;;  %v5487_v45 = vmul.f32 %v7876_v61, %v5274_v42  ;;  %vm5492_vm8 = vweird.f32 %v7876_v61 }
 0x6cf   : > { %v5484_v11 = vsel %vm5481_vm7, %v5483_v6, %v5479_v10  ;;  %7877 = vrcp.f32 %v5275_v34  ;;  %vm5493_vm10 = vmor %vm5491_vm9, %vm5492_vm8  ;;  %v5512_v2 = vand.u32 2147483648, %v5275_v34  ;;  %v5510_v27 = vand.u32 2147483647, %v5275_v34 }
 0x6d0   : > { %5529 = vst [vmem:[%s9548_s29 + $0x68] sm:$0xff] %v5484_v11  ;;  %v5488_v17 = vsub.f32 1.0, %v5487_v45  ;;  %vm5506_vm13 = vweird.f32 %v5275_v34 }
 0x6d1   : > { %v5513_v5 = vor.u32 1.1754944e-38, %v5512_v2  ;;  %vm5511_vm15 = vcmp.eq.f32.partialorder %v5510_v27, 8.507059e+37 }
 0x6d2   : > { %v5489_v19 = vmul.f32 %v7876_v61, %v5488_v17 }
 0x6d4   : > { %v5490_v12 = vadd.f32 %v7876_v61, %v5489_v19 }
 0x6d5   : > { %v7878_v35 = vpop.eup %7877 }
 0x6d6   : > { %v5494_v54 = vsel %vm5493_vm10, %v7876_v61, %v5490_v12  ;;  %v5502_v16 = vmul.f32 %v7878_v35, %v5275_v34  ;;  %vm5507_vm12 = vweird.f32 %v7878_v35 }
 0x6d7   : > { %v5499_v28 = vsel %vm5496_vm11, %v5498_v33, %v5494_v54  ;;  %vm5508_vm14 = vmor %vm5506_vm13, %vm5507_vm12 }
 0x6d8   : > { %5530 = vst [vmem:[%s9548_s29 + $0x70] sm:$0xff] %v5499_v28  ;;  %v5503_v62 = vsub.f32 1.0, %v5502_v16 }
 0x6da   : > { %v5504_v22 = vmul.f32 %v7878_v35, %v5503_v62 }
 0x6dc   : > { %v5505_v58 = vadd.f32 %v7878_v35, %v5504_v22 }
 0x6de   : > { %v5509_v41 = vsel %vm5508_vm14, %v7878_v35, %v5505_v58 }
 0x6df   : > { %v5514_v3 = vsel %vm5511_vm15, %v5513_v5, %v5509_v41 }
 0x6e0   : > { %5531 = vst [vmem:[%s9548_s29 + $0x78] sm:$0xff] %v5514_v3 }
 0x6e1   : > { %8059 = shalt.err (!%p8056_p10)
}
 0x6e2   : > { %s8120_s11 = smov 128   ;;  %s8121_s29 = smov 8  }
 0x6e3   : > { %7735 = dma.vmem_to_hbm [thread:$0]  (%p8249_p5), %s5546_s28, 2048, %s5548_s18, %s5533_s15, %s8120_s11, %s8120_s11, %s8121_s29  }
 0x6e4 PF: > { %s5562_s14 = sand.u32 1, %s8094_s24   ;;  %p9916_p12 = scmp.ge.s32.totalorder %s8106_s27, 2 }
 0x6e5   : > { %s5563_s17 = scalar_lea.sflag [#allocation4], %s5562_s14 }
 0x6e6   : > { %p7755_p13 = pnand %p9916_p12, %p8197_p6 }
 0x6e8   : > { %p7756_p0 = pneg %p7755_p13 }
 0x6ea   : > { %8089 = dma.done.wait (%p7756_p0), %s5563_s17, 2048  }
 0x6eb   : > { %8091 = vsyncadd (%p7756_p0), %s5563_s17, 4294965248  ;;  %p22_p3 = scmp.ge.s32.totalorder %s8236_s23, 4   ;;  %s9917_s24 = smov %s8098_s25 }
 0x6ec   : > { %s9918_s25 = smov %s8102_s26  ;;  %s9919_s26 = smov %s8245_s10 }
 0x6ed   : > { %s9920_s27 = smov %s8236_s23  ;;  %24 = sbr.rel (!%p22_p3) target bundleno = 9 (0x9), region = 109 }
 0x6f2   :  { %5569 = vsyncpa [#allocation3], 1 }
 0x6f3   :  { %5571 = vsyncpa [#allocation3 + $0x1], 1 }
 0x6f4   :  { %5572 = vsyncpa [#allocation6], 1 }
 0x6f5   :  { %5573 = vsyncpa [#allocation9], 1 }
 0x6f6   :  { %5574 = vsyncpa [#allocation4], 1 }
 0x6f7   :  { %5576 = vsyncpa [#allocation4 + $0x1], 1 }

</bundles_post_ra>
